<compile_context>
chip_gen: v6e
topology: v6e:2x2x1
jax: 0.10.0
libtpu: 0.0.40
codegen_flags: <defaults>
</compile_context>

<pallas_src>
import functools

import jax
import jax.numpy as jnp
from jax.experimental import pallas as pl
from jax.experimental.pallas import tpu as pltpu


ACT_DTYPE = jnp.bfloat16            # dtype of intermediate activations in HBM
RGB_MEAN = jnp.array([0.4488, 0.4371, 0.4040], jnp.float32)


# ---------------------------- Pallas kernels ----------------------------

def _conv3x3_kernel(x_ref, w_ref, b_ref, *rest, relu, alpha, has_skip):
    """Fused 3x3 conv (banded-weight matmul) + bias (+ReLU) (+alpha) (+skip).

    x_ref: (1, H+2, (W+2)*Cin)   padded input, flattened W*Cin in lanes
    w_ref: (3, (W+2)*Cin, W*Cout) banded weights, one per dy tap
    b_ref: (1, W*Cout)            bias tiled over W (f32)
    s_ref: (1, H, W*Cout)         optional skip/residual (same flat layout)
    o_ref: (1, H, W*Cout)         output (lane-dense)
    """
    if has_skip:
        s_ref, o_ref = rest
    else:
        (o_ref,) = rest
    H = o_ref.shape[1]
    x = x_ref[0]                                           # (H+2, (W+2)*Cin)
    acc = jnp.zeros(o_ref.shape[1:], jnp.float32)          # (H, W*Cout) f32 acc
    for dy in range(3):                                    # fused im2col: 3 row-
        acc = acc + jnp.dot(x[dy:dy + H, :], w_ref[dy],    # shifted slabs x banded W
                            preferred_element_type=jnp.float32)
    acc = acc + b_ref[...]
    if relu:
        acc = jnp.maximum(acc, 0.0)
    if alpha != 1.0:
        acc = acc * jnp.float32(alpha)
    if has_skip:
        acc = acc + s_ref[0].astype(jnp.float32)
    o_ref[0] = acc.astype(o_ref.dtype)


def _maxpool_kernel(ev_ref, od_ref, *rest, has_bias):
    """2x2 max-pool (stride 2) with optional fused per-channel bias subtract.

    ev_ref/od_ref: (R, 2, L) even/odd column taps, row pairs in dim 1, L = Wo*C
    b_ref:         (1, L)    optional bias (MeanShift fold), f32
    out_ref:       (R, L)
    """
    if has_bias:
        b_ref, out_ref = rest
    else:
        (out_ref,) = rest
    e = ev_ref[...].astype(jnp.float32)
    o = od_ref[...].astype(jnp.float32)
    m = jnp.max(jnp.maximum(e, o), axis=1)                 # reduce the row pair
    if has_bias:
        m = m - b_ref[...]
    out_ref[...] = m.astype(out_ref.dtype)


# ---------------------------- wrappers ----------------------------

def _banded_weights(w, W, dtype):
    """(3,3,Cin,Cout) HWIO conv weights -> (3, (W+2)*Cin, W*Cout) banded matrices.

    band[dy][(x+dx)*Cin + ci, x*Cout + co] = w[dy, dx, ci, co]  (zero elsewhere),
    so that sum_dy  xpad[y+dy, :] @ band[dy]  ==  conv3x3(x)[y, :] in (W*Cout) flat
    layout.  Built once per layer in XLA (weights are tiny at these channel counts).
    """
    _, _, cin, cout = w.shape
    eye = jnp.eye(W, dtype=jnp.float32)
    mats = []
    for dy in range(3):
        m = jnp.zeros(((W + 2) * cin, W * cout), jnp.float32)
        for dx in range(3):
            blk = (eye[:, None, :, None] * w[dy, dx][None, :, None, :]
                   ).reshape(W * cin, W * cout)            # kron(eye(W), w[dy,dx])
            m = m + jnp.pad(blk, ((dx * cin, (2 - dx) * cin), (0, 0)))
        mats.append(m)
    return jnp.stack(mats, 0).astype(dtype)


def conv3x3(x, w, b, *, relu=False, skip=None, alpha=1.0, out_dtype=None):
    """3x3 conv, stride 1, pad 1, bias; optional fused ReLU / alpha / skip add.

    out = conv(x) + b  [-> relu] [* alpha] [+ skip]
    x: (N,H,W,Cin) NHWC.  skip (if given): (N,H,W,Cout).
    """
    N, H, W, Cin = x.shape
    Cout = w.shape[-1]
    Wc = W * Cout
    out_dtype = ACT_DTYPE if out_dtype is None else out_dtype

    xp = jnp.pad(x.astype(ACT_DTYPE), ((0, 0), (1, 1), (1, 1), (0, 0)))
    x2 = xp.reshape(N, H + 2, (W + 2) * Cin)               # free row-major reshape
    wb = _banded_weights(w, W, ACT_DTYPE)                  # (3, (W+2)*Cin, Wc)
    bb = jnp.tile(b.astype(jnp.float32), W).reshape(1, Wc)

    ins = [x2, wb, bb]
    in_specs = [
        pl.BlockSpec((1, H + 2, (W + 2) * Cin), lambda n: (n, 0, 0)),
        pl.BlockSpec((3, (W + 2) * Cin, Wc), lambda n: (0, 0, 0)),   # resident
        pl.BlockSpec((1, Wc), lambda n: (0, 0)),                     # resident
    ]
    has_skip = skip is not None
    if has_skip:
        ins.append(skip.reshape(N, H, Wc))                 # free reshape
        in_specs.append(pl.BlockSpec((1, H, Wc), lambda n: (n, 0, 0)))

    out = pl.pallas_call(
        functools.partial(_conv3x3_kernel, relu=relu, alpha=float(alpha),
                          has_skip=has_skip),
        out_shape=jax.ShapeDtypeStruct((N, H, Wc), out_dtype),
        grid=(N,),
        in_specs=in_specs,
        out_specs=pl.BlockSpec((1, H, Wc), lambda n: (n, 0, 0)),
        compiler_params=pltpu.CompilerParams(dimension_semantics=("parallel",)),
    )(*ins)
    return out.reshape(N, H, W, Cout)


def maxpool2x2(x, sub_bias=None, out_dtype=None):
    """nn.MaxPool2d(2, 2); optionally fused per-channel bias subtract (MeanShift)."""
    N, H, W, C = x.shape
    Ho, Wo = H // 2, W // 2
    L = Wo * C
    # even/odd column taps; row pairing is a free reshape (handled in-kernel)
    ev = x[:, :, 0::2, :].reshape(N * Ho, 2, L)
    od = x[:, :, 1::2, :].reshape(N * Ho, 2, L)
    out_dtype = x.dtype if out_dtype is None else out_dtype

    has_bias = sub_bias is not None
    ins = [ev, od]
    if has_bias:
        ins.append(jnp.tile(sub_bias.astype(jnp.float32), Wo).reshape(1, L))

    out = pl.pallas_call(
        functools.partial(_maxpool_kernel, has_bias=has_bias),
        out_shape=jax.ShapeDtypeStruct((N * Ho, L), out_dtype),
    )(*ins)
    return out.reshape(N, Ho, Wo, C)


def pixel_shuffle2(x):
    """PyTorch PixelShuffle(2) in NHWC: input channel k = c*4 + i*2 + j."""
    N, H, W, C4 = x.shape
    C = C4 // 4
    x = x.reshape(N, H, W, C, 2, 2)
    x = jnp.transpose(x, (0, 1, 4, 2, 5, 3))               # (N, H, i, W, j, C)
    return x.reshape(N, H * 2, W * 2, C)


# ---------------------------- model ----------------------------

def init_conv(key, cin, cout, scale=0.05):
    kw, kb = jax.random.split(key)
    return {"w": scale * jax.random.normal(kw, (3, 3, cin, cout), jnp.float32),
            "b": scale * jax.random.normal(kb, (cout,), jnp.float32)}


def init_params(key, n_colors=3, n_feats=8, n_resblocks=2, rgb_range=1.0):
    keys = jax.random.split(key, 10 + 2 * n_resblocks)
    ki = iter(keys)
    p = {
        "rgb_bias": rgb_range * RGB_MEAN,
        "head2": init_conv(next(ki), n_colors, n_feats),
        "head3_conv1": init_conv(next(ki), n_feats, n_feats),
        "head3_conv2": init_conv(next(ki), n_feats, n_feats),
        "body_blocks": [],
        "body_tail": init_conv(next(ki), n_feats, n_colors),
        "tail1_up": init_conv(next(ki), n_colors, 4 * n_colors),
        "tail1_conv": init_conv(next(ki), n_colors, n_colors),
        "tail2_up": init_conv(next(ki), n_colors, 4 * n_colors),
        "tail2_conv": init_conv(next(ki), n_colors, n_feats),
        "tail3_up": init_conv(next(ki), n_feats, 4 * n_feats),
        "tail3_conv": init_conv(next(ki), n_feats, n_colors),
    }
    for _ in range(n_resblocks):
        c1 = init_conv(next(ki), n_feats, n_feats)
        c2 = init_conv(next(ki), n_feats, n_feats)
        p["body_blocks"].append({"w1": c1["w"], "b1": c1["b"],
                                 "w2": c2["w"], "b2": c2["b"]})
    return p


def edsr_forward(x, p, res_scale=1.0):
    """x: (N, H, W, 3) NHWC float32, H and W divisible by 8."""
    rgb_bias = p["rgb_bias"]

    # sub_mean folded into head1: maxpool(x - b) == maxpool(x) - b
    x1 = maxpool2x2(x, sub_bias=rgb_bias, out_dtype=ACT_DTYPE)   # head1 o sub_mean
    x2 = conv3x3(x1, **p["head2"])                               # head2
    t = maxpool2x2(x2)                                           # head3
    t = conv3x3(t, **p["head3_conv1"])
    t = maxpool2x2(t)
    y = conv3x3(t, **p["head3_conv2"])
    x3 = maxpool2x2(x1)                                          # pool_1
    x4 = maxpool2x2(x3)                                          # pool_2

    res = y                                                      # body
    for blk in p["body_blocks"]:
        r = conv3x3(res, blk["w1"], blk["b1"], relu=True)
        res = conv3x3(r, blk["w2"], blk["b2"], skip=res, alpha=res_scale)
    res = conv3x3(res, **p["body_tail"], skip=x4)                # + x4 fused

    z = pixel_shuffle2(conv3x3(res, **p["tail1_up"]))            # tail_1
    z1 = conv3x3(z, **p["tail1_conv"], skip=x3)                  # + x3 fused
    z = pixel_shuffle2(conv3x3(z1, **p["tail2_up"]))             # tail_2
    z2 = conv3x3(z, **p["tail2_conv"], skip=x2)                  # + x2 fused
    z = pixel_shuffle2(conv3x3(z2, **p["tail3_up"]))             # tail_3
    # z3 = conv(z) + (x - b); add_mean adds b back -> the biases cancel exactly,
    # so the final result is simply conv(z) + raw x (fused skip), output in f32.
    out = conv3x3(z, **p["tail3_conv"], skip=x, out_dtype=jnp.float32)
    return out


if __name__ == "__main__":
    key = jax.random.PRNGKey(0)
    kx, kp = jax.random.split(key)
    # small config: n_resblocks=2, n_feats=8, n_colors=3, scale=2, rgb_range=1.0
    params = init_params(kp, n_colors=3, n_feats=8, n_resblocks=2, rgb_range=1.0)
    x = jax.random.normal(kx, (2, 32, 32, 3), jnp.float32)       # NHWC
    fwd = jax.jit(functools.partial(edsr_forward, res_scale=1.0))
    out = jax.block_until_ready(fwd(x, params))
    assert out.shape == (2, 32, 32, 3) and out.dtype == jnp.float32
    print("KERNEL_OK")
</pallas_src>

<mosaic_0001>
module attributes {stable_mosaic.version = 11 : i64} {
  func.func @_maxpool_kernel(%arg0: memref<32x2x48xf32, #tpu.memory_space<vmem>>, %arg1: memref<32x2x48xf32, #tpu.memory_space<vmem>>, %arg2: memref<1x48xf32, #tpu.memory_space<vmem>>, %arg3: memref<32x48xbf16, #tpu.memory_space<vmem>>) attributes {dimension_semantics = [], scalar_prefetch = 0 : i64, scratch_operands = 0 : i64, tpu.core_type = #tpu.core_type<tc>} {
    %c0 = arith.constant 0 : index
    %c0_0 = arith.constant 0 : index
    %c0_1 = arith.constant 0 : index
    %0 = vector.load %arg0[%c0, %c0_0, %c0_1] : memref<32x2x48xf32, #tpu.memory_space<vmem>>, vector<32x2x48xf32>
    %c0_2 = arith.constant 0 : index
    %c0_3 = arith.constant 0 : index
    %c0_4 = arith.constant 0 : index
    %1 = vector.load %arg1[%c0_2, %c0_3, %c0_4] : memref<32x2x48xf32, #tpu.memory_space<vmem>>, vector<32x2x48xf32>
    %2 = arith.maximumf %0, %1 : vector<32x2x48xf32>
    %cst = arith.constant dense<0xFF800000> : vector<32x48xf32>
    %3 = vector.multi_reduction <maximumf>, %2, %cst [1] : vector<32x2x48xf32> to vector<32x48xf32>
    %c0_5 = arith.constant 0 : index
    %c0_6 = arith.constant 0 : index
    %4 = vector.load %arg2[%c0_5, %c0_6] : memref<1x48xf32, #tpu.memory_space<vmem>>, vector<1x48xf32>
    %5 = vector.broadcast %4 : vector<1x48xf32> to vector<32x48xf32>
    %6 = arith.subf %3, %5 : vector<32x48xf32>
    %7 = arith.truncf %6 : vector<32x48xf32> to vector<32x48xbf16>
    %c0_7 = arith.constant 0 : index
    %c0_8 = arith.constant 0 : index
    %8 = vector.load %arg3[%c0_7, %c0_8] : memref<32x48xbf16, #tpu.memory_space<vmem>>, vector<32x48xbf16>
    tpu.vector_store %arg3[%c0_7, %c0_8], %7 {strides = array<i32>} : memref<32x48xbf16, #tpu.memory_space<vmem>>, vector<32x48xbf16>,
    return
  }
}

module attributes {stable_mosaic.version = 11 : i64} {
  func.func @_conv3x3_kernel(%arg0: i32, %arg1: memref<1x18x54xbf16, #tpu.memory_space<vmem>>, %arg2: memref<3x54x128xbf16, #tpu.memory_space<vmem>>, %arg3: memref<1x128xf32, #tpu.memory_space<vmem>>, %arg4: memref<1x16x128xbf16, #tpu.memory_space<vmem>>) attributes {dimension_semantics = [#tpu.dimension_semantics<parallel>], iteration_bounds = array<i64: 2>, scalar_prefetch = 0 : i64, scratch_operands = 0 : i64, tpu.core_type = #tpu.core_type<tc>, window_params = [{transform_indices = @transform_0, window_bounds = array<i64: 1, 18, 54>}, {pipeline_mode = #tpu.pipeline_mode<synchronous>, transform_indices = @transform_1, window_bounds = array<i64: 3, 54, 128>}, {pipeline_mode = #tpu.pipeline_mode<synchronous>, transform_indices = @transform_2, window_bounds = array<i64: 1, 128>}, {transform_indices = @transform_3, window_bounds = array<i64: 1, 16, 128>}]} {
    %c0 = arith.constant 0 : index
    %c0_0 = arith.constant 0 : index
    %c0_1 = arith.constant 0 : index
    %0 = vector.load %arg1[%c0, %c0_0, %c0_1] : memref<1x18x54xbf16, #tpu.memory_space<vmem>>, vector<1x18x54xbf16>
    %1 = vector.shape_cast %0 : vector<1x18x54xbf16> to vector<18x54xbf16>
    %cst = arith.constant 0.000000e+00 : f32
    %2 = vector.broadcast %cst : f32 to vector<16x128xf32>
    %3 = vector.extract_strided_slice %1 {offsets = [0, 0], sizes = [16, 54], strides = [1, 1]} : vector<18x54xbf16> to vector<16x54xbf16>
    %c0_2 = arith.constant 0 : index
    %c0_3 = arith.constant 0 : index
    %c0_4 = arith.constant 0 : index
    %4 = vector.load %arg2[%c0_2, %c0_3, %c0_4] : memref<3x54x128xbf16, #tpu.memory_space<vmem>>, vector<1x54x128xbf16>
    %5 = vector.shape_cast %4 : vector<1x54x128xbf16> to vector<54x128xbf16>
    %cst_5 = arith.constant dense<0.000000e+00> : vector<16x128xf32>
    %6 = tpu.matmul %3, %5, %cst_5 {dimension_numbers = #tpu.dot_dimension_numbers<[1], [0], [0], [1], [0, 0, 1, 1], [], []>} : vector<16x54xbf16>, vector<54x128xbf16>, vector<16x128xf32> -> vector<16x128xf32>
    %7 = arith.addf %2, %6 : vector<16x128xf32>
    %8 = vector.extract_strided_slice %1 {offsets = [1, 0], sizes = [16, 54], strides = [1, 1]} : vector<18x54xbf16> to vector<16x54xbf16>
    %c1 = arith.constant 1 : index
    %c0_6 = arith.constant 0 : index
    %c0_7 = arith.constant 0 : index
    %9 = vector.load %arg2[%c1, %c0_6, %c0_7] : memref<3x54x128xbf16, #tpu.memory_space<vmem>>, vector<1x54x128xbf16>
    %10 = vector.shape_cast %9 : vector<1x54x128xbf16> to vector<54x128xbf16>
    %cst_8 = arith.constant dense<0.000000e+00> : vector<16x128xf32>
    %11 = tpu.matmul %8, %10, %cst_8 {dimension_numbers = #tpu.dot_dimension_numbers<[1], [0], [0], [1], [0, 0, 1, 1], [], []>} : vector<16x54xbf16>, vector<54x128xbf16>, vector<16x128xf32> -> vector<16x128xf32>
    %12 = arith.addf %7, %11 : vector<16x128xf32>
    %13 = vector.extract_strided_slice %1 {offsets = [2, 0], sizes = [16, 54], strides = [1, 1]} : vector<18x54xbf16> to vector<16x54xbf16>
    %c2 = arith.constant 2 : index
    %c0_9 = arith.constant 0 : index
    %c0_10 = arith.constant 0 : index
    %14 = vector.load %arg2[%c2, %c0_9, %c0_10] : memref<3x54x128xbf16, #tpu.memory_space<vmem>>, vector<1x54x128xbf16>
    %15 = vector.shape_cast %14 : vector<1x54x128xbf16> to vector<54x128xbf16>
    %cst_11 = arith.constant dense<0.000000e+00> : vector<16x128xf32>
    %16 = tpu.matmul %13, %15, %cst_11 {dimension_numbers = #tpu.dot_dimension_numbers<[1], [0], [0], [1], [0, 0, 1, 1], [], []>} : vector<16x54xbf16>, vector<54x128xbf16>, vector<16x128xf32> -> vector<16x128xf32>
    %17 = arith.addf %12, %16 : vector<16x128xf32>
    %c0_12 = arith.constant 0 : index
    %c0_13 = arith.constant 0 : index
    %18 = vector.load %arg3[%c0_12, %c0_13] : memref<1x128xf32, #tpu.memory_space<vmem>>, vector<1x128xf32>
    %19 = vector.broadcast %18 : vector<1x128xf32> to vector<16x128xf32>
    %20 = arith.addf %17, %19 : vector<16x128xf32>
    %21 = arith.truncf %20 : vector<16x128xf32> to vector<16x128xbf16>
    %c0_14 = arith.constant 0 : index
    %c0_15 = arith.constant 0 : index
    %c0_16 = arith.constant 0 : index
    %22 = vector.load %arg4[%c0_14, %c0_15, %c0_16] : memref<1x16x128xbf16, #tpu.memory_space<vmem>>, vector<1x16x128xbf16>
    %23 = vector.shape_cast %22 : vector<1x16x128xbf16> to vector<16x128xbf16>
    %24 = vector.shape_cast %21 : vector<16x128xbf16> to vector<1x16x128xbf16>
    tpu.vector_store %arg4[%c0_14, %c0_15, %c0_16], %24 {strides = array<i32>} : memref<1x16x128xbf16, #tpu.memory_space<vmem>>, vector<1x16x128xbf16>,
    return
  }
  func.func @transform_0(%arg0: i32) -> (i32, i32, i32) {
    %c0_i32 = arith.constant 0 : i32
    %c0_i32_0 = arith.constant 0 : i32
    %c0_i32_1 = arith.constant 0 : i32
    return %arg0, %c0_i32, %c0_i32_0 : i32, i32, i32
  }
  func.func @transform_1(%arg0: i32) -> (i32, i32, i32) {
    %c0_i32 = arith.constant 0 : i32
    %c0_i32_0 = arith.constant 0 : i32
    %c0_i32_1 = arith.constant 0 : i32
    %c0_i32_2 = arith.constant 0 : i32
    return %c0_i32, %c0_i32_0, %c0_i32_1 : i32, i32, i32
  }
  func.func @transform_2(%arg0: i32) -> (i32, i32) {
    %c0_i32 = arith.constant 0 : i32
    %c0_i32_0 = arith.constant 0 : i32
    %c0_i32_1 = arith.constant 0 : i32
    return %c0_i32, %c0_i32_0 : i32, i32
  }
  func.func @transform_3(%arg0: i32) -> (i32, i32, i32) {
    %c0_i32 = arith.constant 0 : i32
    %c0_i32_0 = arith.constant 0 : i32
    %c0_i32_1 = arith.constant 0 : i32
    return %arg0, %c0_i32, %c0_i32_0 : i32, i32, i32
  }
}

module attributes {stable_mosaic.version = 11 : i64} {
  func.func @_maxpool_kernel(%arg0: memref<16x2x64xbf16, #tpu.memory_space<vmem>>, %arg1: memref<16x2x64xbf16, #tpu.memory_space<vmem>>, %arg2: memref<16x64xbf16, #tpu.memory_space<vmem>>) attributes {dimension_semantics = [], scalar_prefetch = 0 : i64, scratch_operands = 0 : i64, tpu.core_type = #tpu.core_type<tc>} {
    %c0 = arith.constant 0 : index
    %c0_0 = arith.constant 0 : index
    %c0_1 = arith.constant 0 : index
    %0 = vector.load %arg0[%c0, %c0_0, %c0_1] : memref<16x2x64xbf16, #tpu.memory_space<vmem>>, vector<16x2x64xbf16>
    %1 = arith.extf %0 : vector<16x2x64xbf16> to vector<16x2x64xf32>
    %c0_2 = arith.constant 0 : index
    %c0_3 = arith.constant 0 : index
    %c0_4 = arith.constant 0 : index
    %2 = vector.load %arg1[%c0_2, %c0_3, %c0_4] : memref<16x2x64xbf16, #tpu.memory_space<vmem>>, vector<16x2x64xbf16>
    %3 = arith.extf %2 : vector<16x2x64xbf16> to vector<16x2x64xf32>
    %4 = arith.maximumf %1, %3 : vector<16x2x64xf32>
    %cst = arith.constant dense<0xFF800000> : vector<16x64xf32>
    %5 = vector.multi_reduction <maximumf>, %4, %cst [1] : vector<16x2x64xf32> to vector<16x64xf32>
    %6 = arith.truncf %5 : vector<16x64xf32> to vector<16x64xbf16>
    %c0_5 = arith.constant 0 : index
    %c0_6 = arith.constant 0 : index
    %7 = vector.load %arg2[%c0_5, %c0_6] : memref<16x64xbf16, #tpu.memory_space<vmem>>, vector<16x64xbf16>
    tpu.vector_store %arg2[%c0_5, %c0_6], %6 {strides = array<i32>} : memref<16x64xbf16, #tpu.memory_space<vmem>>, vector<16x64xbf16>,
    return
  }
}

module attributes {stable_mosaic.version = 11 : i64} {
  func.func @_conv3x3_kernel(%arg0: i32, %arg1: memref<1x10x80xbf16, #tpu.memory_space<vmem>>, %arg2: memref<3x80x64xbf16, #tpu.memory_space<vmem>>, %arg3: memref<1x64xf32, #tpu.memory_space<vmem>>, %arg4: memref<1x8x64xbf16, #tpu.memory_space<vmem>>) attributes {dimension_semantics = [#tpu.dimension_semantics<parallel>], iteration_bounds = array<i64: 2>, scalar_prefetch = 0 : i64, scratch_operands = 0 : i64, tpu.core_type = #tpu.core_type<tc>, window_params = [{transform_indices = @transform_0, window_bounds = array<i64: 1, 10, 80>}, {pipeline_mode = #tpu.pipeline_mode<synchronous>, transform_indices = @transform_1, window_bounds = array<i64: 3, 80, 64>}, {pipeline_mode = #tpu.pipeline_mode<synchronous>, transform_indices = @transform_2, window_bounds = array<i64: 1, 64>}, {transform_indices = @transform_3, window_bounds = array<i64: 1, 8, 64>}]} {
    %c0 = arith.constant 0 : index
    %c0_0 = arith.constant 0 : index
    %c0_1 = arith.constant 0 : index
    %0 = vector.load %arg1[%c0, %c0_0, %c0_1] : memref<1x10x80xbf16, #tpu.memory_space<vmem>>, vector<1x10x80xbf16>
    %1 = vector.shape_cast %0 : vector<1x10x80xbf16> to vector<10x80xbf16>
    %cst = arith.constant 0.000000e+00 : f32
    %2 = vector.broadcast %cst : f32 to vector<8x64xf32>
    %3 = vector.extract_strided_slice %1 {offsets = [0, 0], sizes = [8, 80], strides = [1, 1]} : vector<10x80xbf16> to vector<8x80xbf16>
    %c0_2 = arith.constant 0 : index
    %c0_3 = arith.constant 0 : index
    %c0_4 = arith.constant 0 : index
    %4 = vector.load %arg2[%c0_2, %c0_3, %c0_4] : memref<3x80x64xbf16, #tpu.memory_space<vmem>>, vector<1x80x64xbf16>
    %5 = vector.shape_cast %4 : vector<1x80x64xbf16> to vector<80x64xbf16>
    %cst_5 = arith.constant dense<0.000000e+00> : vector<8x64xf32>
    %6 = tpu.matmul %3, %5, %cst_5 {dimension_numbers = #tpu.dot_dimension_numbers<[1], [0], [0], [1], [0, 0, 1, 1], [], []>} : vector<8x80xbf16>, vector<80x64xbf16>, vector<8x64xf32> -> vector<8x64xf32>
    %7 = arith.addf %2, %6 : vector<8x64xf32>
    %8 = vector.extract_strided_slice %1 {offsets = [1, 0], sizes = [8, 80], strides = [1, 1]} : vector<10x80xbf16> to vector<8x80xbf16>
    %c1 = arith.constant 1 : index
    %c0_6 = arith.constant 0 : index
    %c0_7 = arith.constant 0 : index
    %9 = vector.load %arg2[%c1, %c0_6, %c0_7] : memref<3x80x64xbf16, #tpu.memory_space<vmem>>, vector<1x80x64xbf16>
    %10 = vector.shape_cast %9 : vector<1x80x64xbf16> to vector<80x64xbf16>
    %cst_8 = arith.constant dense<0.000000e+00> : vector<8x64xf32>
    %11 = tpu.matmul %8, %10, %cst_8 {dimension_numbers = #tpu.dot_dimension_numbers<[1], [0], [0], [1], [0, 0, 1, 1], [], []>} : vector<8x80xbf16>, vector<80x64xbf16>, vector<8x64xf32> -> vector<8x64xf32>
    %12 = arith.addf %7, %11 : vector<8x64xf32>
    %13 = vector.extract_strided_slice %1 {offsets = [2, 0], sizes = [8, 80], strides = [1, 1]} : vector<10x80xbf16> to vector<8x80xbf16>
    %c2 = arith.constant 2 : index
    %c0_9 = arith.constant 0 : index
    %c0_10 = arith.constant 0 : index
    %14 = vector.load %arg2[%c2, %c0_9, %c0_10] : memref<3x80x64xbf16, #tpu.memory_space<vmem>>, vector<1x80x64xbf16>
    %15 = vector.shape_cast %14 : vector<1x80x64xbf16> to vector<80x64xbf16>
    %cst_11 = arith.constant dense<0.000000e+00> : vector<8x64xf32>
    %16 = tpu.matmul %13, %15, %cst_11 {dimension_numbers = #tpu.dot_dimension_numbers<[1], [0], [0], [1], [0, 0, 1, 1], [], []>} : vector<8x80xbf16>, vector<80x64xbf16>, vector<8x64xf32> -> vector<8x64xf32>
    %17 = arith.addf %12, %16 : vector<8x64xf32>
    %c0_12 = arith.constant 0 : index
    %c0_13 = arith.constant 0 : index
    %18 = vector.load %arg3[%c0_12, %c0_13] : memref<1x64xf32, #tpu.memory_space<vmem>>, vector<1x64xf32>
    %19 = vector.broadcast %18 : vector<1x64xf32> to vector<8x64xf32>
    %20 = arith.addf %17, %19 : vector<8x64xf32>
    %21 = arith.truncf %20 : vector<8x64xf32> to vector<8x64xbf16>
    %c0_14 = arith.constant 0 : index
    %c0_15 = arith.constant 0 : index
    %c0_16 = arith.constant 0 : index
    %22 = vector.load %arg4[%c0_14, %c0_15, %c0_16] : memref<1x8x64xbf16, #tpu.memory_space<vmem>>, vector<1x8x64xbf16>
    %23 = vector.shape_cast %22 : vector<1x8x64xbf16> to vector<8x64xbf16>
    %24 = vector.shape_cast %21 : vector<8x64xbf16> to vector<1x8x64xbf16>
    tpu.vector_store %arg4[%c0_14, %c0_15, %c0_16], %24 {strides = array<i32>} : memref<1x8x64xbf16, #tpu.memory_space<vmem>>, vector<1x8x64xbf16>,
    return
  }
  func.func @transform_0(%arg0: i32) -> (i32, i32, i32) {
    %c0_i32 = arith.constant 0 : i32
    %c0_i32_0 = arith.constant 0 : i32
    %c0_i32_1 = arith.constant 0 : i32
    return %arg0, %c0_i32, %c0_i32_0 : i32, i32, i32
  }
  func.func @transform_1(%arg0: i32) -> (i32, i32, i32) {
    %c0_i32 = arith.constant 0 : i32
    %c0_i32_0 = arith.constant 0 : i32
    %c0_i32_1 = arith.constant 0 : i32
    %c0_i32_2 = arith.constant 0 : i32
    return %c0_i32, %c0_i32_0, %c0_i32_1 : i32, i32, i32
  }
  func.func @transform_2(%arg0: i32) -> (i32, i32) {
    %c0_i32 = arith.constant 0 : i32
    %c0_i32_0 = arith.constant 0 : i32
    %c0_i32_1 = arith.constant 0 : i32
    return %c0_i32, %c0_i32_0 : i32, i32
  }
  func.func @transform_3(%arg0: i32) -> (i32, i32, i32) {
    %c0_i32 = arith.constant 0 : i32
    %c0_i32_0 = arith.constant 0 : i32
    %c0_i32_1 = arith.constant 0 : i32
    return %arg0, %c0_i32, %c0_i32_0 : i32, i32, i32
  }
}

module attributes {stable_mosaic.version = 11 : i64} {
  func.func @_maxpool_kernel(%arg0: memref<8x2x32xbf16, #tpu.memory_space<vmem>>, %arg1: memref<8x2x32xbf16, #tpu.memory_space<vmem>>, %arg2: memref<8x32xbf16, #tpu.memory_space<vmem>>) attributes {dimension_semantics = [], scalar_prefetch = 0 : i64, scratch_operands = 0 : i64, tpu.core_type = #tpu.core_type<tc>} {
    %c0 = arith.constant 0 : index
    %c0_0 = arith.constant 0 : index
    %c0_1 = arith.constant 0 : index
    %0 = vector.load %arg0[%c0, %c0_0, %c0_1] : memref<8x2x32xbf16, #tpu.memory_space<vmem>>, vector<8x2x32xbf16>
    %1 = arith.extf %0 : vector<8x2x32xbf16> to vector<8x2x32xf32>
    %c0_2 = arith.constant 0 : index
    %c0_3 = arith.constant 0 : index
    %c0_4 = arith.constant 0 : index
    %2 = vector.load %arg1[%c0_2, %c0_3, %c0_4] : memref<8x2x32xbf16, #tpu.memory_space<vmem>>, vector<8x2x32xbf16>
    %3 = arith.extf %2 : vector<8x2x32xbf16> to vector<8x2x32xf32>
    %4 = arith.maximumf %1, %3 : vector<8x2x32xf32>
    %cst = arith.constant dense<0xFF800000> : vector<8x32xf32>
    %5 = vector.multi_reduction <maximumf>, %4, %cst [1] : vector<8x2x32xf32> to vector<8x32xf32>
    %6 = arith.truncf %5 : vector<8x32xf32> to vector<8x32xbf16>
    %c0_5 = arith.constant 0 : index
    %c0_6 = arith.constant 0 : index
    %7 = vector.load %arg2[%c0_5, %c0_6] : memref<8x32xbf16, #tpu.memory_space<vmem>>, vector<8x32xbf16>
    tpu.vector_store %arg2[%c0_5, %c0_6], %6 {strides = array<i32>} : memref<8x32xbf16, #tpu.memory_space<vmem>>, vector<8x32xbf16>,
    return
  }
}

module attributes {stable_mosaic.version = 11 : i64} {
  func.func @_conv3x3_kernel(%arg0: i32, %arg1: memref<1x6x48xbf16, #tpu.memory_space<vmem>>, %arg2: memref<3x48x32xbf16, #tpu.memory_space<vmem>>, %arg3: memref<1x32xf32, #tpu.memory_space<vmem>>, %arg4: memref<1x4x32xbf16, #tpu.memory_space<vmem>>) attributes {dimension_semantics = [#tpu.dimension_semantics<parallel>], iteration_bounds = array<i64: 2>, scalar_prefetch = 0 : i64, scratch_operands = 0 : i64, tpu.core_type = #tpu.core_type<tc>, window_params = [{transform_indices = @transform_0, window_bounds = array<i64: 1, 6, 48>}, {pipeline_mode = #tpu.pipeline_mode<synchronous>, transform_indices = @transform_1, window_bounds = array<i64: 3, 48, 32>}, {pipeline_mode = #tpu.pipeline_mode<synchronous>, transform_indices = @transform_2, window_bounds = array<i64: 1, 32>}, {transform_indices = @transform_3, window_bounds = array<i64: 1, 4, 32>}]} {
    %c0 = arith.constant 0 : index
    %c0_0 = arith.constant 0 : index
    %c0_1 = arith.constant 0 : index
    %0 = vector.load %arg1[%c0, %c0_0, %c0_1] : memref<1x6x48xbf16, #tpu.memory_space<vmem>>, vector<1x6x48xbf16>
    %1 = vector.shape_cast %0 : vector<1x6x48xbf16> to vector<6x48xbf16>
    %cst = arith.constant 0.000000e+00 : f32
    %2 = vector.broadcast %cst : f32 to vector<4x32xf32>
    %3 = vector.extract_strided_slice %1 {offsets = [0, 0], sizes = [4, 48], strides = [1, 1]} : vector<6x48xbf16> to vector<4x48xbf16>
    %c0_2 = arith.constant 0 : index
    %c0_3 = arith.constant 0 : index
    %c0_4 = arith.constant 0 : index
    %4 = vector.load %arg2[%c0_2, %c0_3, %c0_4] : memref<3x48x32xbf16, #tpu.memory_space<vmem>>, vector<1x48x32xbf16>
    %5 = vector.shape_cast %4 : vector<1x48x32xbf16> to vector<48x32xbf16>
    %cst_5 = arith.constant dense<0.000000e+00> : vector<4x32xf32>
    %6 = tpu.matmul %3, %5, %cst_5 {dimension_numbers = #tpu.dot_dimension_numbers<[1], [0], [0], [1], [0, 0, 1, 1], [], []>} : vector<4x48xbf16>, vector<48x32xbf16>, vector<4x32xf32> -> vector<4x32xf32>
    %7 = arith.addf %2, %6 : vector<4x32xf32>
    %8 = vector.extract_strided_slice %1 {offsets = [1, 0], sizes = [4, 48], strides = [1, 1]} : vector<6x48xbf16> to vector<4x48xbf16>
    %c1 = arith.constant 1 : index
    %c0_6 = arith.constant 0 : index
    %c0_7 = arith.constant 0 : index
    %9 = vector.load %arg2[%c1, %c0_6, %c0_7] : memref<3x48x32xbf16, #tpu.memory_space<vmem>>, vector<1x48x32xbf16>
    %10 = vector.shape_cast %9 : vector<1x48x32xbf16> to vector<48x32xbf16>
    %cst_8 = arith.constant dense<0.000000e+00> : vector<4x32xf32>
    %11 = tpu.matmul %8, %10, %cst_8 {dimension_numbers = #tpu.dot_dimension_numbers<[1], [0], [0], [1], [0, 0, 1, 1], [], []>} : vector<4x48xbf16>, vector<48x32xbf16>, vector<4x32xf32> -> vector<4x32xf32>
    %12 = arith.addf %7, %11 : vector<4x32xf32>
    %13 = vector.extract_strided_slice %1 {offsets = [2, 0], sizes = [4, 48], strides = [1, 1]} : vector<6x48xbf16> to vector<4x48xbf16>
    %c2 = arith.constant 2 : index
    %c0_9 = arith.constant 0 : index
    %c0_10 = arith.constant 0 : index
    %14 = vector.load %arg2[%c2, %c0_9, %c0_10] : memref<3x48x32xbf16, #tpu.memory_space<vmem>>, vector<1x48x32xbf16>
    %15 = vector.shape_cast %14 : vector<1x48x32xbf16> to vector<48x32xbf16>
    %cst_11 = arith.constant dense<0.000000e+00> : vector<4x32xf32>
    %16 = tpu.matmul %13, %15, %cst_11 {dimension_numbers = #tpu.dot_dimension_numbers<[1], [0], [0], [1], [0, 0, 1, 1], [], []>} : vector<4x48xbf16>, vector<48x32xbf16>, vector<4x32xf32> -> vector<4x32xf32>
    %17 = arith.addf %12, %16 : vector<4x32xf32>
    %c0_12 = arith.constant 0 : index
    %c0_13 = arith.constant 0 : index
    %18 = vector.load %arg3[%c0_12, %c0_13] : memref<1x32xf32, #tpu.memory_space<vmem>>, vector<1x32xf32>
    %19 = vector.broadcast %18 : vector<1x32xf32> to vector<4x32xf32>
    %20 = arith.addf %17, %19 : vector<4x32xf32>
    %cst_14 = arith.constant 0.000000e+00 : f32
    %21 = vector.broadcast %cst_14 : f32 to vector<4x32xf32>
    %22 = arith.maximumf %20, %21 : vector<4x32xf32>
    %23 = arith.truncf %22 : vector<4x32xf32> to vector<4x32xbf16>
    %c0_15 = arith.constant 0 : index
    %c0_16 = arith.constant 0 : index
    %c0_17 = arith.constant 0 : index
    %24 = vector.load %arg4[%c0_15, %c0_16, %c0_17] : memref<1x4x32xbf16, #tpu.memory_space<vmem>>, vector<1x4x32xbf16>
    %25 = vector.shape_cast %24 : vector<1x4x32xbf16> to vector<4x32xbf16>
    %26 = vector.shape_cast %23 : vector<4x32xbf16> to vector<1x4x32xbf16>
    tpu.vector_store %arg4[%c0_15, %c0_16, %c0_17], %26 {strides = array<i32>} : memref<1x4x32xbf16, #tpu.memory_space<vmem>>, vector<1x4x32xbf16>,
    return
  }
  func.func @transform_0(%arg0: i32) -> (i32, i32, i32) {
    %c0_i32 = arith.constant 0 : i32
    %c0_i32_0 = arith.constant 0 : i32
    %c0_i32_1 = arith.constant 0 : i32
    return %arg0, %c0_i32, %c0_i32_0 : i32, i32, i32
  }
  func.func @transform_1(%arg0: i32) -> (i32, i32, i32) {
    %c0_i32 = arith.constant 0 : i32
    %c0_i32_0 = arith.constant 0 : i32
    %c0_i32_1 = arith.constant 0 : i32
    %c0_i32_2 = arith.constant 0 : i32
    return %c0_i32, %c0_i32_0, %c0_i32_1 : i32, i32, i32
  }
  func.func @transform_2(%arg0: i32) -> (i32, i32) {
    %c0_i32 = arith.constant 0 : i32
    %c0_i32_0 = arith.constant 0 : i32
    %c0_i32_1 = arith.constant 0 : i32
    return %c0_i32, %c0_i32_0 : i32, i32
  }
  func.func @transform_3(%arg0: i32) -> (i32, i32, i32) {
    %c0_i32 = arith.constant 0 : i32
    %c0_i32_0 = arith.constant 0 : i32
    %c0_i32_1 = arith.constant 0 : i32
    return %arg0, %c0_i32, %c0_i32_0 : i32, i32, i32
  }
}

module attributes {stable_mosaic.version = 11 : i64} {
  func.func @_conv3x3_kernel(%arg0: i32, %arg1: memref<1x6x48xbf16, #tpu.memory_space<vmem>>, %arg2: memref<3x48x32xbf16, #tpu.memory_space<vmem>>, %arg3: memref<1x32xf32, #tpu.memory_space<vmem>>, %arg4: memref<1x4x32xbf16, #tpu.memory_space<vmem>>) attributes {dimension_semantics = [#tpu.dimension_semantics<parallel>], iteration_bounds = array<i64: 2>, scalar_prefetch = 0 : i64, scratch_operands = 0 : i64, tpu.core_type = #tpu.core_type<tc>, window_params = [{transform_indices = @transform_0, window_bounds = array<i64: 1, 6, 48>}, {pipeline_mode = #tpu.pipeline_mode<synchronous>, transform_indices = @transform_1, window_bounds = array<i64: 3, 48, 32>}, {pipeline_mode = #tpu.pipeline_mode<synchronous>, transform_indices = @transform_2, window_bounds = array<i64: 1, 32>}, {transform_indices = @transform_3, window_bounds = array<i64: 1, 4, 32>}]} {
    %c0 = arith.constant 0 : index
    %c0_0 = arith.constant 0 : index
    %c0_1 = arith.constant 0 : index
    %0 = vector.load %arg1[%c0, %c0_0, %c0_1] : memref<1x6x48xbf16, #tpu.memory_space<vmem>>, vector<1x6x48xbf16>
    %1 = vector.shape_cast %0 : vector<1x6x48xbf16> to vector<6x48xbf16>
    %cst = arith.constant 0.000000e+00 : f32
    %2 = vector.broadcast %cst : f32 to vector<4x32xf32>
    %3 = vector.extract_strided_slice %1 {offsets = [0, 0], sizes = [4, 48], strides = [1, 1]} : vector<6x48xbf16> to vector<4x48xbf16>
    %c0_2 = arith.constant 0 : index
    %c0_3 = arith.constant 0 : index
    %c0_4 = arith.constant 0 : index
    %4 = vector.load %arg2[%c0_2, %c0_3, %c0_4] : memref<3x48x32xbf16, #tpu.memory_space<vmem>>, vector<1x48x32xbf16>
    %5 = vector.shape_cast %4 : vector<1x48x32xbf16> to vector<48x32xbf16>
    %cst_5 = arith.constant dense<0.000000e+00> : vector<4x32xf32>
    %6 = tpu.matmul %3, %5, %cst_5 {dimension_numbers = #tpu.dot_dimension_numbers<[1], [0], [0], [1], [0, 0, 1, 1], [], []>} : vector<4x48xbf16>, vector<48x32xbf16>, vector<4x32xf32> -> vector<4x32xf32>
    %7 = arith.addf %2, %6 : vector<4x32xf32>
    %8 = vector.extract_strided_slice %1 {offsets = [1, 0], sizes = [4, 48], strides = [1, 1]} : vector<6x48xbf16> to vector<4x48xbf16>
    %c1 = arith.constant 1 : index
    %c0_6 = arith.constant 0 : index
    %c0_7 = arith.constant 0 : index
    %9 = vector.load %arg2[%c1, %c0_6, %c0_7] : memref<3x48x32xbf16, #tpu.memory_space<vmem>>, vector<1x48x32xbf16>
    %10 = vector.shape_cast %9 : vector<1x48x32xbf16> to vector<48x32xbf16>
    %cst_8 = arith.constant dense<0.000000e+00> : vector<4x32xf32>
    %11 = tpu.matmul %8, %10, %cst_8 {dimension_numbers = #tpu.dot_dimension_numbers<[1], [0], [0], [1], [0, 0, 1, 1], [], []>} : vector<4x48xbf16>, vector<48x32xbf16>, vector<4x32xf32> -> vector<4x32xf32>
    %12 = arith.addf %7, %11 : vector<4x32xf32>
    %13 = vector.extract_strided_slice %1 {offsets = [2, 0], sizes = [4, 48], strides = [1, 1]} : vector<6x48xbf16> to vector<4x48xbf16>
    %c2 = arith.constant 2 : index
    %c0_9 = arith.constant 0 : index
    %c0_10 = arith.constant 0 : index
    %14 = vector.load %arg2[%c2, %c0_9, %c0_10] : memref<3x48x32xbf16, #tpu.memory_space<vmem>>, vector<1x48x32xbf16>
    %15 = vector.shape_cast %14 : vector<1x48x32xbf16> to vector<48x32xbf16>
    %cst_11 = arith.constant dense<0.000000e+00> : vector<4x32xf32>
    %16 = tpu.matmul %13, %15, %cst_11 {dimension_numbers = #tpu.dot_dimension_numbers<[1], [0], [0], [1], [0, 0, 1, 1], [], []>} : vector<4x48xbf16>, vector<48x32xbf16>, vector<4x32xf32> -> vector<4x32xf32>
    %17 = arith.addf %12, %16 : vector<4x32xf32>
    %c0_12 = arith.constant 0 : index
    %c0_13 = arith.constant 0 : index
    %18 = vector.load %arg3[%c0_12, %c0_13] : memref<1x32xf32, #tpu.memory_space<vmem>>, vector<1x32xf32>
    %19 = vector.broadcast %18 : vector<1x32xf32> to vector<4x32xf32>
    %20 = arith.addf %17, %19 : vector<4x32xf32>
    %21 = arith.truncf %20 : vector<4x32xf32> to vector<4x32xbf16>
    %c0_14 = arith.constant 0 : index
    %c0_15 = arith.constant 0 : index
    %c0_16 = arith.constant 0 : index
    %22 = vector.load %arg4[%c0_14, %c0_15, %c0_16] : memref<1x4x32xbf16, #tpu.memory_space<vmem>>, vector<1x4x32xbf16>
    %23 = vector.shape_cast %22 : vector<1x4x32xbf16> to vector<4x32xbf16>
    %24 = vector.shape_cast %21 : vector<4x32xbf16> to vector<1x4x32xbf16>
    tpu.vector_store %arg4[%c0_14, %c0_15, %c0_16], %24 {strides = array<i32>} : memref<1x4x32xbf16, #tpu.memory_space<vmem>>, vector<1x4x32xbf16>,
    return
  }
  func.func @transform_0(%arg0: i32) -> (i32, i32, i32) {
    %c0_i32 = arith.constant 0 : i32
    %c0_i32_0 = arith.constant 0 : i32
    %c0_i32_1 = arith.constant 0 : i32
    return %arg0, %c0_i32, %c0_i32_0 : i32, i32, i32
  }
  func.func @transform_1(%arg0: i32) -> (i32, i32, i32) {
    %c0_i32 = arith.constant 0 : i32
    %c0_i32_0 = arith.constant 0 : i32
    %c0_i32_1 = arith.constant 0 : i32
    %c0_i32_2 = arith.constant 0 : i32
    return %c0_i32, %c0_i32_0, %c0_i32_1 : i32, i32, i32
  }
  func.func @transform_2(%arg0: i32) -> (i32, i32) {
    %c0_i32 = arith.constant 0 : i32
    %c0_i32_0 = arith.constant 0 : i32
    %c0_i32_1 = arith.constant 0 : i32
    return %c0_i32, %c0_i32_0 : i32, i32
  }
  func.func @transform_3(%arg0: i32) -> (i32, i32, i32) {
    %c0_i32 = arith.constant 0 : i32
    %c0_i32_0 = arith.constant 0 : i32
    %c0_i32_1 = arith.constant 0 : i32
    return %arg0, %c0_i32, %c0_i32_0 : i32, i32, i32
  }
}

module attributes {stable_mosaic.version = 11 : i64} {
  func.func @_conv3x3_kernel(%arg0: i32, %arg1: memref<1x6x48xbf16, #tpu.memory_space<vmem>>, %arg2: memref<3x48x32xbf16, #tpu.memory_space<vmem>>, %arg3: memref<1x32xf32, #tpu.memory_space<vmem>>, %arg4: memref<1x4x32xbf16, #tpu.memory_space<vmem>>, %arg5: memref<1x4x32xbf16, #tpu.memory_space<vmem>>) attributes {dimension_semantics = [#tpu.dimension_semantics<parallel>], iteration_bounds = array<i64: 2>, scalar_prefetch = 0 : i64, scratch_operands = 0 : i64, tpu.core_type = #tpu.core_type<tc>, window_params = [{transform_indices = @transform_0, window_bounds = array<i64: 1, 6, 48>}, {pipeline_mode = #tpu.pipeline_mode<synchronous>, transform_indices = @transform_1, window_bounds = array<i64: 3, 48, 32>}, {pipeline_mode = #tpu.pipeline_mode<synchronous>, transform_indices = @transform_2, window_bounds = array<i64: 1, 32>}, {transform_indices = @transform_3, window_bounds = array<i64: 1, 4, 32>}, {transform_indices = @transform_4, window_bounds = array<i64: 1, 4, 32>}]} {
    %c0 = arith.constant 0 : index
    %c0_0 = arith.constant 0 : index
    %c0_1 = arith.constant 0 : index
    %0 = vector.load %arg1[%c0, %c0_0, %c0_1] : memref<1x6x48xbf16, #tpu.memory_space<vmem>>, vector<1x6x48xbf16>
    %1 = vector.shape_cast %0 : vector<1x6x48xbf16> to vector<6x48xbf16>
    %cst = arith.constant 0.000000e+00 : f32
    %2 = vector.broadcast %cst : f32 to vector<4x32xf32>
    %3 = vector.extract_strided_slice %1 {offsets = [0, 0], sizes = [4, 48], strides = [1, 1]} : vector<6x48xbf16> to vector<4x48xbf16>
    %c0_2 = arith.constant 0 : index
    %c0_3 = arith.constant 0 : index
    %c0_4 = arith.constant 0 : index
    %4 = vector.load %arg2[%c0_2, %c0_3, %c0_4] : memref<3x48x32xbf16, #tpu.memory_space<vmem>>, vector<1x48x32xbf16>
    %5 = vector.shape_cast %4 : vector<1x48x32xbf16> to vector<48x32xbf16>
    %cst_5 = arith.constant dense<0.000000e+00> : vector<4x32xf32>
    %6 = tpu.matmul %3, %5, %cst_5 {dimension_numbers = #tpu.dot_dimension_numbers<[1], [0], [0], [1], [0, 0, 1, 1], [], []>} : vector<4x48xbf16>, vector<48x32xbf16>, vector<4x32xf32> -> vector<4x32xf32>
    %7 = arith.addf %2, %6 : vector<4x32xf32>
    %8 = vector.extract_strided_slice %1 {offsets = [1, 0], sizes = [4, 48], strides = [1, 1]} : vector<6x48xbf16> to vector<4x48xbf16>
    %c1 = arith.constant 1 : index
    %c0_6 = arith.constant 0 : index
    %c0_7 = arith.constant 0 : index
    %9 = vector.load %arg2[%c1, %c0_6, %c0_7] : memref<3x48x32xbf16, #tpu.memory_space<vmem>>, vector<1x48x32xbf16>
    %10 = vector.shape_cast %9 : vector<1x48x32xbf16> to vector<48x32xbf16>
    %cst_8 = arith.constant dense<0.000000e+00> : vector<4x32xf32>
    %11 = tpu.matmul %8, %10, %cst_8 {dimension_numbers = #tpu.dot_dimension_numbers<[1], [0], [0], [1], [0, 0, 1, 1], [], []>} : vector<4x48xbf16>, vector<48x32xbf16>, vector<4x32xf32> -> vector<4x32xf32>
    %12 = arith.addf %7, %11 : vector<4x32xf32>
    %13 = vector.extract_strided_slice %1 {offsets = [2, 0], sizes = [4, 48], strides = [1, 1]} : vector<6x48xbf16> to vector<4x48xbf16>
    %c2 = arith.constant 2 : index
    %c0_9 = arith.constant 0 : index
    %c0_10 = arith.constant 0 : index
    %14 = vector.load %arg2[%c2, %c0_9, %c0_10] : memref<3x48x32xbf16, #tpu.memory_space<vmem>>, vector<1x48x32xbf16>
    %15 = vector.shape_cast %14 : vector<1x48x32xbf16> to vector<48x32xbf16>
    %cst_11 = arith.constant dense<0.000000e+00> : vector<4x32xf32>
    %16 = tpu.matmul %13, %15, %cst_11 {dimension_numbers = #tpu.dot_dimension_numbers<[1], [0], [0], [1], [0, 0, 1, 1], [], []>} : vector<4x48xbf16>, vector<48x32xbf16>, vector<4x32xf32> -> vector<4x32xf32>
    %17 = arith.addf %12, %16 : vector<4x32xf32>
    %c0_12 = arith.constant 0 : index
    %c0_13 = arith.constant 0 : index
    %18 = vector.load %arg3[%c0_12, %c0_13] : memref<1x32xf32, #tpu.memory_space<vmem>>, vector<1x32xf32>
    %19 = vector.broadcast %18 : vector<1x32xf32> to vector<4x32xf32>
    %20 = arith.addf %17, %19 : vector<4x32xf32>
    %c0_14 = arith.constant 0 : index
    %c0_15 = arith.constant 0 : index
    %c0_16 = arith.constant 0 : index
    %21 = vector.load %arg4[%c0_14, %c0_15, %c0_16] : memref<1x4x32xbf16, #tpu.memory_space<vmem>>, vector<1x4x32xbf16>
    %22 = vector.shape_cast %21 : vector<1x4x32xbf16> to vector<4x32xbf16>
    %23 = arith.extf %22 : vector<4x32xbf16> to vector<4x32xf32>
    %24 = arith.addf %20, %23 : vector<4x32xf32>
    %25 = arith.truncf %24 : vector<4x32xf32> to vector<4x32xbf16>
    %c0_17 = arith.constant 0 : index
    %c0_18 = arith.constant 0 : index
    %c0_19 = arith.constant 0 : index
    %26 = vector.load %arg5[%c0_17, %c0_18, %c0_19] : memref<1x4x32xbf16, #tpu.memory_space<vmem>>, vector<1x4x32xbf16>
    %27 = vector.shape_cast %26 : vector<1x4x32xbf16> to vector<4x32xbf16>
    %28 = vector.shape_cast %25 : vector<4x32xbf16> to vector<1x4x32xbf16>
    tpu.vector_store %arg5[%c0_17, %c0_18, %c0_19], %28 {strides = array<i32>} : memref<1x4x32xbf16, #tpu.memory_space<vmem>>, vector<1x4x32xbf16>,
    return
  }
  func.func @transform_0(%arg0: i32) -> (i32, i32, i32) {
    %c0_i32 = arith.constant 0 : i32
    %c0_i32_0 = arith.constant 0 : i32
    %c0_i32_1 = arith.constant 0 : i32
    return %arg0, %c0_i32, %c0_i32_0 : i32, i32, i32
  }
  func.func @transform_1(%arg0: i32) -> (i32, i32, i32) {
    %c0_i32 = arith.constant 0 : i32
    %c0_i32_0 = arith.constant 0 : i32
    %c0_i32_1 = arith.constant 0 : i32
    %c0_i32_2 = arith.constant 0 : i32
    return %c0_i32, %c0_i32_0, %c0_i32_1 : i32, i32, i32
  }
  func.func @transform_2(%arg0: i32) -> (i32, i32) {
    %c0_i32 = arith.constant 0 : i32
    %c0_i32_0 = arith.constant 0 : i32
    %c0_i32_1 = arith.constant 0 : i32
    return %c0_i32, %c0_i32_0 : i32, i32
  }
  func.func @transform_3(%arg0: i32) -> (i32, i32, i32) {
    %c0_i32 = arith.constant 0 : i32
    %c0_i32_0 = arith.constant 0 : i32
    %c0_i32_1 = arith.constant 0 : i32
    return %arg0, %c0_i32, %c0_i32_0 : i32, i32, i32
  }
  func.func @transform_4(%arg0: i32) -> (i32, i32, i32) {
    %c0_i32 = arith.constant 0 : i32
    %c0_i32_0 = arith.constant 0 : i32
    %c0_i32_1 = arith.constant 0 : i32
    return %arg0, %c0_i32, %c0_i32_0 : i32, i32, i32
  }
}

module attributes {stable_mosaic.version = 11 : i64} {
  func.func @_maxpool_kernel(%arg0: memref<16x2x24xbf16, #tpu.memory_space<vmem>>, %arg1: memref<16x2x24xbf16, #tpu.memory_space<vmem>>, %arg2: memref<16x24xbf16, #tpu.memory_space<vmem>>) attributes {dimension_semantics = [], scalar_prefetch = 0 : i64, scratch_operands = 0 : i64, tpu.core_type = #tpu.core_type<tc>} {
    %c0 = arith.constant 0 : index
    %c0_0 = arith.constant 0 : index
    %c0_1 = arith.constant 0 : index
    %0 = vector.load %arg0[%c0, %c0_0, %c0_1] : memref<16x2x24xbf16, #tpu.memory_space<vmem>>, vector<16x2x24xbf16>
    %1 = arith.extf %0 : vector<16x2x24xbf16> to vector<16x2x24xf32>
    %c0_2 = arith.constant 0 : index
    %c0_3 = arith.constant 0 : index
    %c0_4 = arith.constant 0 : index
    %2 = vector.load %arg1[%c0_2, %c0_3, %c0_4] : memref<16x2x24xbf16, #tpu.memory_space<vmem>>, vector<16x2x24xbf16>
    %3 = arith.extf %2 : vector<16x2x24xbf16> to vector<16x2x24xf32>
    %4 = arith.maximumf %1, %3 : vector<16x2x24xf32>
    %cst = arith.constant dense<0xFF800000> : vector<16x24xf32>
    %5 = vector.multi_reduction <maximumf>, %4, %cst [1] : vector<16x2x24xf32> to vector<16x24xf32>
    %6 = arith.truncf %5 : vector<16x24xf32> to vector<16x24xbf16>
    %c0_5 = arith.constant 0 : index
    %c0_6 = arith.constant 0 : index
    %7 = vector.load %arg2[%c0_5, %c0_6] : memref<16x24xbf16, #tpu.memory_space<vmem>>, vector<16x24xbf16>
    tpu.vector_store %arg2[%c0_5, %c0_6], %6 {strides = array<i32>} : memref<16x24xbf16, #tpu.memory_space<vmem>>, vector<16x24xbf16>,
    return
  }
}

module attributes {stable_mosaic.version = 11 : i64} {
  func.func @_maxpool_kernel(%arg0: memref<8x2x12xbf16, #tpu.memory_space<vmem>>, %arg1: memref<8x2x12xbf16, #tpu.memory_space<vmem>>, %arg2: memref<8x12xbf16, #tpu.memory_space<vmem>>) attributes {dimension_semantics = [], scalar_prefetch = 0 : i64, scratch_operands = 0 : i64, tpu.core_type = #tpu.core_type<tc>} {
    %c0 = arith.constant 0 : index
    %c0_0 = arith.constant 0 : index
    %c0_1 = arith.constant 0 : index
    %0 = vector.load %arg0[%c0, %c0_0, %c0_1] : memref<8x2x12xbf16, #tpu.memory_space<vmem>>, vector<8x2x12xbf16>
    %1 = arith.extf %0 : vector<8x2x12xbf16> to vector<8x2x12xf32>
    %c0_2 = arith.constant 0 : index
    %c0_3 = arith.constant 0 : index
    %c0_4 = arith.constant 0 : index
    %2 = vector.load %arg1[%c0_2, %c0_3, %c0_4] : memref<8x2x12xbf16, #tpu.memory_space<vmem>>, vector<8x2x12xbf16>
    %3 = arith.extf %2 : vector<8x2x12xbf16> to vector<8x2x12xf32>
    %4 = arith.maximumf %1, %3 : vector<8x2x12xf32>
    %cst = arith.constant dense<0xFF800000> : vector<8x12xf32>
    %5 = vector.multi_reduction <maximumf>, %4, %cst [1] : vector<8x2x12xf32> to vector<8x12xf32>
    %6 = arith.truncf %5 : vector<8x12xf32> to vector<8x12xbf16>
    %c0_5 = arith.constant 0 : index
    %c0_6 = arith.constant 0 : index
    %7 = vector.load %arg2[%c0_5, %c0_6] : memref<8x12xbf16, #tpu.memory_space<vmem>>, vector<8x12xbf16>
    tpu.vector_store %arg2[%c0_5, %c0_6], %6 {strides = array<i32>} : memref<8x12xbf16, #tpu.memory_space<vmem>>, vector<8x12xbf16>,
    return
  }
}

module attributes {stable_mosaic.version = 11 : i64} {
  func.func @_conv3x3_kernel(%arg0: i32, %arg1: memref<1x6x48xbf16, #tpu.memory_space<vmem>>, %arg2: memref<3x48x12xbf16, #tpu.memory_space<vmem>>, %arg3: memref<1x12xf32, #tpu.memory_space<vmem>>, %arg4: memref<1x4x12xbf16, #tpu.memory_space<vmem>>, %arg5: memref<1x4x12xbf16, #tpu.memory_space<vmem>>) attributes {dimension_semantics = [#tpu.dimension_semantics<parallel>], iteration_bounds = array<i64: 2>, scalar_prefetch = 0 : i64, scratch_operands = 0 : i64, tpu.core_type = #tpu.core_type<tc>, window_params = [{transform_indices = @transform_0, window_bounds = array<i64: 1, 6, 48>}, {pipeline_mode = #tpu.pipeline_mode<synchronous>, transform_indices = @transform_1, window_bounds = array<i64: 3, 48, 12>}, {pipeline_mode = #tpu.pipeline_mode<synchronous>, transform_indices = @transform_2, window_bounds = array<i64: 1, 12>}, {transform_indices = @transform_3, window_bounds = array<i64: 1, 4, 12>}, {transform_indices = @transform_4, window_bounds = array<i64: 1, 4, 12>}]} {
    %c0 = arith.constant 0 : index
    %c0_0 = arith.constant 0 : index
    %c0_1 = arith.constant 0 : index
    %0 = vector.load %arg1[%c0, %c0_0, %c0_1] : memref<1x6x48xbf16, #tpu.memory_space<vmem>>, vector<1x6x48xbf16>
    %1 = vector.shape_cast %0 : vector<1x6x48xbf16> to vector<6x48xbf16>
    %cst = arith.constant 0.000000e+00 : f32
    %2 = vector.broadcast %cst : f32 to vector<4x12xf32>
    %3 = vector.extract_strided_slice %1 {offsets = [0, 0], sizes = [4, 48], strides = [1, 1]} : vector<6x48xbf16> to vector<4x48xbf16>
    %c0_2 = arith.constant 0 : index
    %c0_3 = arith.constant 0 : index
    %c0_4 = arith.constant 0 : index
    %4 = vector.load %arg2[%c0_2, %c0_3, %c0_4] : memref<3x48x12xbf16, #tpu.memory_space<vmem>>, vector<1x48x12xbf16>
    %5 = vector.shape_cast %4 : vector<1x48x12xbf16> to vector<48x12xbf16>
    %cst_5 = arith.constant dense<0.000000e+00> : vector<4x12xf32>
    %6 = tpu.matmul %3, %5, %cst_5 {dimension_numbers = #tpu.dot_dimension_numbers<[1], [0], [0], [1], [0, 0, 1, 1], [], []>} : vector<4x48xbf16>, vector<48x12xbf16>, vector<4x12xf32> -> vector<4x12xf32>
    %7 = arith.addf %2, %6 : vector<4x12xf32>
    %8 = vector.extract_strided_slice %1 {offsets = [1, 0], sizes = [4, 48], strides = [1, 1]} : vector<6x48xbf16> to vector<4x48xbf16>
    %c1 = arith.constant 1 : index
    %c0_6 = arith.constant 0 : index
    %c0_7 = arith.constant 0 : index
    %9 = vector.load %arg2[%c1, %c0_6, %c0_7] : memref<3x48x12xbf16, #tpu.memory_space<vmem>>, vector<1x48x12xbf16>
    %10 = vector.shape_cast %9 : vector<1x48x12xbf16> to vector<48x12xbf16>
    %cst_8 = arith.constant dense<0.000000e+00> : vector<4x12xf32>
    %11 = tpu.matmul %8, %10, %cst_8 {dimension_numbers = #tpu.dot_dimension_numbers<[1], [0], [0], [1], [0, 0, 1, 1], [], []>} : vector<4x48xbf16>, vector<48x12xbf16>, vector<4x12xf32> -> vector<4x12xf32>
    %12 = arith.addf %7, %11 : vector<4x12xf32>
    %13 = vector.extract_strided_slice %1 {offsets = [2, 0], sizes = [4, 48], strides = [1, 1]} : vector<6x48xbf16> to vector<4x48xbf16>
    %c2 = arith.constant 2 : index
    %c0_9 = arith.constant 0 : index
    %c0_10 = arith.constant 0 : index
    %14 = vector.load %arg2[%c2, %c0_9, %c0_10] : memref<3x48x12xbf16, #tpu.memory_space<vmem>>, vector<1x48x12xbf16>
    %15 = vector.shape_cast %14 : vector<1x48x12xbf16> to vector<48x12xbf16>
    %cst_11 = arith.constant dense<0.000000e+00> : vector<4x12xf32>
    %16 = tpu.matmul %13, %15, %cst_11 {dimension_numbers = #tpu.dot_dimension_numbers<[1], [0], [0], [1], [0, 0, 1, 1], [], []>} : vector<4x48xbf16>, vector<48x12xbf16>, vector<4x12xf32> -> vector<4x12xf32>
    %17 = arith.addf %12, %16 : vector<4x12xf32>
    %c0_12 = arith.constant 0 : index
    %c0_13 = arith.constant 0 : index
    %18 = vector.load %arg3[%c0_12, %c0_13] : memref<1x12xf32, #tpu.memory_space<vmem>>, vector<1x12xf32>
    %19 = vector.broadcast %18 : vector<1x12xf32> to vector<4x12xf32>
    %20 = arith.addf %17, %19 : vector<4x12xf32>
    %c0_14 = arith.constant 0 : index
    %c0_15 = arith.constant 0 : index
    %c0_16 = arith.constant 0 : index
    %21 = vector.load %arg4[%c0_14, %c0_15, %c0_16] : memref<1x4x12xbf16, #tpu.memory_space<vmem>>, vector<1x4x12xbf16>
    %22 = vector.shape_cast %21 : vector<1x4x12xbf16> to vector<4x12xbf16>
    %23 = arith.extf %22 : vector<4x12xbf16> to vector<4x12xf32>
    %24 = arith.addf %20, %23 : vector<4x12xf32>
    %25 = arith.truncf %24 : vector<4x12xf32> to vector<4x12xbf16>
    %c0_17 = arith.constant 0 : index
    %c0_18 = arith.constant 0 : index
    %c0_19 = arith.constant 0 : index
    %26 = vector.load %arg5[%c0_17, %c0_18, %c0_19] : memref<1x4x12xbf16, #tpu.memory_space<vmem>>, vector<1x4x12xbf16>
    %27 = vector.shape_cast %26 : vector<1x4x12xbf16> to vector<4x12xbf16>
    %28 = vector.shape_cast %25 : vector<4x12xbf16> to vector<1x4x12xbf16>
    tpu.vector_store %arg5[%c0_17, %c0_18, %c0_19], %28 {strides = array<i32>} : memref<1x4x12xbf16, #tpu.memory_space<vmem>>, vector<1x4x12xbf16>,
    return
  }
  func.func @transform_0(%arg0: i32) -> (i32, i32, i32) {
    %c0_i32 = arith.constant 0 : i32
    %c0_i32_0 = arith.constant 0 : i32
    %c0_i32_1 = arith.constant 0 : i32
    return %arg0, %c0_i32, %c0_i32_0 : i32, i32, i32
  }
  func.func @transform_1(%arg0: i32) -> (i32, i32, i32) {
    %c0_i32 = arith.constant 0 : i32
    %c0_i32_0 = arith.constant 0 : i32
    %c0_i32_1 = arith.constant 0 : i32
    %c0_i32_2 = arith.constant 0 : i32
    return %c0_i32, %c0_i32_0, %c0_i32_1 : i32, i32, i32
  }
  func.func @transform_2(%arg0: i32) -> (i32, i32) {
    %c0_i32 = arith.constant 0 : i32
    %c0_i32_0 = arith.constant 0 : i32
    %c0_i32_1 = arith.constant 0 : i32
    return %c0_i32, %c0_i32_0 : i32, i32
  }
  func.func @transform_3(%arg0: i32) -> (i32, i32, i32) {
    %c0_i32 = arith.constant 0 : i32
    %c0_i32_0 = arith.constant 0 : i32
    %c0_i32_1 = arith.constant 0 : i32
    return %arg0, %c0_i32, %c0_i32_0 : i32, i32, i32
  }
  func.func @transform_4(%arg0: i32) -> (i32, i32, i32) {
    %c0_i32 = arith.constant 0 : i32
    %c0_i32_0 = arith.constant 0 : i32
    %c0_i32_1 = arith.constant 0 : i32
    return %arg0, %c0_i32, %c0_i32_0 : i32, i32, i32
  }
}

module attributes {stable_mosaic.version = 11 : i64} {
  func.func @_conv3x3_kernel(%arg0: i32, %arg1: memref<1x6x18xbf16, #tpu.memory_space<vmem>>, %arg2: memref<3x18x48xbf16, #tpu.memory_space<vmem>>, %arg3: memref<1x48xf32, #tpu.memory_space<vmem>>, %arg4: memref<1x4x48xbf16, #tpu.memory_space<vmem>>) attributes {dimension_semantics = [#tpu.dimension_semantics<parallel>], iteration_bounds = array<i64: 2>, scalar_prefetch = 0 : i64, scratch_operands = 0 : i64, tpu.core_type = #tpu.core_type<tc>, window_params = [{transform_indices = @transform_0, window_bounds = array<i64: 1, 6, 18>}, {pipeline_mode = #tpu.pipeline_mode<synchronous>, transform_indices = @transform_1, window_bounds = array<i64: 3, 18, 48>}, {pipeline_mode = #tpu.pipeline_mode<synchronous>, transform_indices = @transform_2, window_bounds = array<i64: 1, 48>}, {transform_indices = @transform_3, window_bounds = array<i64: 1, 4, 48>}]} {
    %c0 = arith.constant 0 : index
    %c0_0 = arith.constant 0 : index
    %c0_1 = arith.constant 0 : index
    %0 = vector.load %arg1[%c0, %c0_0, %c0_1] : memref<1x6x18xbf16, #tpu.memory_space<vmem>>, vector<1x6x18xbf16>
    %1 = vector.shape_cast %0 : vector<1x6x18xbf16> to vector<6x18xbf16>
    %cst = arith.constant 0.000000e+00 : f32
    %2 = vector.broadcast %cst : f32 to vector<4x48xf32>
    %3 = vector.extract_strided_slice %1 {offsets = [0, 0], sizes = [4, 18], strides = [1, 1]} : vector<6x18xbf16> to vector<4x18xbf16>
    %c0_2 = arith.constant 0 : index
    %c0_3 = arith.constant 0 : index
    %c0_4 = arith.constant 0 : index
    %4 = vector.load %arg2[%c0_2, %c0_3, %c0_4] : memref<3x18x48xbf16, #tpu.memory_space<vmem>>, vector<1x18x48xbf16>
    %5 = vector.shape_cast %4 : vector<1x18x48xbf16> to vector<18x48xbf16>
    %cst_5 = arith.constant dense<0.000000e+00> : vector<4x48xf32>
    %6 = tpu.matmul %3, %5, %cst_5 {dimension_numbers = #tpu.dot_dimension_numbers<[1], [0], [0], [1], [0, 0, 1, 1], [], []>} : vector<4x18xbf16>, vector<18x48xbf16>, vector<4x48xf32> -> vector<4x48xf32>
    %7 = arith.addf %2, %6 : vector<4x48xf32>
    %8 = vector.extract_strided_slice %1 {offsets = [1, 0], sizes = [4, 18], strides = [1, 1]} : vector<6x18xbf16> to vector<4x18xbf16>
    %c1 = arith.constant 1 : index
    %c0_6 = arith.constant 0 : index
    %c0_7 = arith.constant 0 : index
    %9 = vector.load %arg2[%c1, %c0_6, %c0_7] : memref<3x18x48xbf16, #tpu.memory_space<vmem>>, vector<1x18x48xbf16>
    %10 = vector.shape_cast %9 : vector<1x18x48xbf16> to vector<18x48xbf16>
    %cst_8 = arith.constant dense<0.000000e+00> : vector<4x48xf32>
    %11 = tpu.matmul %8, %10, %cst_8 {dimension_numbers = #tpu.dot_dimension_numbers<[1], [0], [0], [1], [0, 0, 1, 1], [], []>} : vector<4x18xbf16>, vector<18x48xbf16>, vector<4x48xf32> -> vector<4x48xf32>
    %12 = arith.addf %7, %11 : vector<4x48xf32>
    %13 = vector.extract_strided_slice %1 {offsets = [2, 0], sizes = [4, 18], strides = [1, 1]} : vector<6x18xbf16> to vector<4x18xbf16>
    %c2 = arith.constant 2 : index
    %c0_9 = arith.constant 0 : index
    %c0_10 = arith.constant 0 : index
    %14 = vector.load %arg2[%c2, %c0_9, %c0_10] : memref<3x18x48xbf16, #tpu.memory_space<vmem>>, vector<1x18x48xbf16>
    %15 = vector.shape_cast %14 : vector<1x18x48xbf16> to vector<18x48xbf16>
    %cst_11 = arith.constant dense<0.000000e+00> : vector<4x48xf32>
    %16 = tpu.matmul %13, %15, %cst_11 {dimension_numbers = #tpu.dot_dimension_numbers<[1], [0], [0], [1], [0, 0, 1, 1], [], []>} : vector<4x18xbf16>, vector<18x48xbf16>, vector<4x48xf32> -> vector<4x48xf32>
    %17 = arith.addf %12, %16 : vector<4x48xf32>
    %c0_12 = arith.constant 0 : index
    %c0_13 = arith.constant 0 : index
    %18 = vector.load %arg3[%c0_12, %c0_13] : memref<1x48xf32, #tpu.memory_space<vmem>>, vector<1x48xf32>
    %19 = vector.broadcast %18 : vector<1x48xf32> to vector<4x48xf32>
    %20 = arith.addf %17, %19 : vector<4x48xf32>
    %21 = arith.truncf %20 : vector<4x48xf32> to vector<4x48xbf16>
    %c0_14 = arith.constant 0 : index
    %c0_15 = arith.constant 0 : index
    %c0_16 = arith.constant 0 : index
    %22 = vector.load %arg4[%c0_14, %c0_15, %c0_16] : memref<1x4x48xbf16, #tpu.memory_space<vmem>>, vector<1x4x48xbf16>
    %23 = vector.shape_cast %22 : vector<1x4x48xbf16> to vector<4x48xbf16>
    %24 = vector.shape_cast %21 : vector<4x48xbf16> to vector<1x4x48xbf16>
    tpu.vector_store %arg4[%c0_14, %c0_15, %c0_16], %24 {strides = array<i32>} : memref<1x4x48xbf16, #tpu.memory_space<vmem>>, vector<1x4x48xbf16>,
    return
  }
  func.func @transform_0(%arg0: i32) -> (i32, i32, i32) {
    %c0_i32 = arith.constant 0 : i32
    %c0_i32_0 = arith.constant 0 : i32
    %c0_i32_1 = arith.constant 0 : i32
    return %arg0, %c0_i32, %c0_i32_0 : i32, i32, i32
  }
  func.func @transform_1(%arg0: i32) -> (i32, i32, i32) {
    %c0_i32 = arith.constant 0 : i32
    %c0_i32_0 = arith.constant 0 : i32
    %c0_i32_1 = arith.constant 0 : i32
    %c0_i32_2 = arith.constant 0 : i32
    return %c0_i32, %c0_i32_0, %c0_i32_1 : i32, i32, i32
  }
  func.func @transform_2(%arg0: i32) -> (i32, i32) {
    %c0_i32 = arith.constant 0 : i32
    %c0_i32_0 = arith.constant 0 : i32
    %c0_i32_1 = arith.constant 0 : i32
    return %c0_i32, %c0_i32_0 : i32, i32
  }
  func.func @transform_3(%arg0: i32) -> (i32, i32, i32) {
    %c0_i32 = arith.constant 0 : i32
    %c0_i32_0 = arith.constant 0 : i32
    %c0_i32_1 = arith.constant 0 : i32
    return %arg0, %c0_i32, %c0_i32_0 : i32, i32, i32
  }
}

module attributes {stable_mosaic.version = 11 : i64} {
  func.func @_conv3x3_kernel(%arg0: i32, %arg1: memref<1x10x30xbf16, #tpu.memory_space<vmem>>, %arg2: memref<3x30x24xbf16, #tpu.memory_space<vmem>>, %arg3: memref<1x24xf32, #tpu.memory_space<vmem>>, %arg4: memref<1x8x24xbf16, #tpu.memory_space<vmem>>, %arg5: memref<1x8x24xbf16, #tpu.memory_space<vmem>>) attributes {dimension_semantics = [#tpu.dimension_semantics<parallel>], iteration_bounds = array<i64: 2>, scalar_prefetch = 0 : i64, scratch_operands = 0 : i64, tpu.core_type = #tpu.core_type<tc>, window_params = [{transform_indices = @transform_0, window_bounds = array<i64: 1, 10, 30>}, {pipeline_mode = #tpu.pipeline_mode<synchronous>, transform_indices = @transform_1, window_bounds = array<i64: 3, 30, 24>}, {pipeline_mode = #tpu.pipeline_mode<synchronous>, transform_indices = @transform_2, window_bounds = array<i64: 1, 24>}, {transform_indices = @transform_3, window_bounds = array<i64: 1, 8, 24>}, {transform_indices = @transform_4, window_bounds = array<i64: 1, 8, 24>}]} {
    %c0 = arith.constant 0 : index
    %c0_0 = arith.constant 0 : index
    %c0_1 = arith.constant 0 : index
    %0 = vector.load %arg1[%c0, %c0_0, %c0_1] : memref<1x10x30xbf16, #tpu.memory_space<vmem>>, vector<1x10x30xbf16>
    %1 = vector.shape_cast %0 : vector<1x10x30xbf16> to vector<10x30xbf16>
    %cst = arith.constant 0.000000e+00 : f32
    %2 = vector.broadcast %cst : f32 to vector<8x24xf32>
    %3 = vector.extract_strided_slice %1 {offsets = [0, 0], sizes = [8, 30], strides = [1, 1]} : vector<10x30xbf16> to vector<8x30xbf16>
    %c0_2 = arith.constant 0 : index
    %c0_3 = arith.constant 0 : index
    %c0_4 = arith.constant 0 : index
    %4 = vector.load %arg2[%c0_2, %c0_3, %c0_4] : memref<3x30x24xbf16, #tpu.memory_space<vmem>>, vector<1x30x24xbf16>
    %5 = vector.shape_cast %4 : vector<1x30x24xbf16> to vector<30x24xbf16>
    %cst_5 = arith.constant dense<0.000000e+00> : vector<8x24xf32>
    %6 = tpu.matmul %3, %5, %cst_5 {dimension_numbers = #tpu.dot_dimension_numbers<[1], [0], [0], [1], [0, 0, 1, 1], [], []>} : vector<8x30xbf16>, vector<30x24xbf16>, vector<8x24xf32> -> vector<8x24xf32>
    %7 = arith.addf %2, %6 : vector<8x24xf32>
    %8 = vector.extract_strided_slice %1 {offsets = [1, 0], sizes = [8, 30], strides = [1, 1]} : vector<10x30xbf16> to vector<8x30xbf16>
    %c1 = arith.constant 1 : index
    %c0_6 = arith.constant 0 : index
    %c0_7 = arith.constant 0 : index
    %9 = vector.load %arg2[%c1, %c0_6, %c0_7] : memref<3x30x24xbf16, #tpu.memory_space<vmem>>, vector<1x30x24xbf16>
    %10 = vector.shape_cast %9 : vector<1x30x24xbf16> to vector<30x24xbf16>
    %cst_8 = arith.constant dense<0.000000e+00> : vector<8x24xf32>
    %11 = tpu.matmul %8, %10, %cst_8 {dimension_numbers = #tpu.dot_dimension_numbers<[1], [0], [0], [1], [0, 0, 1, 1], [], []>} : vector<8x30xbf16>, vector<30x24xbf16>, vector<8x24xf32> -> vector<8x24xf32>
    %12 = arith.addf %7, %11 : vector<8x24xf32>
    %13 = vector.extract_strided_slice %1 {offsets = [2, 0], sizes = [8, 30], strides = [1, 1]} : vector<10x30xbf16> to vector<8x30xbf16>
    %c2 = arith.constant 2 : index
    %c0_9 = arith.constant 0 : index
    %c0_10 = arith.constant 0 : index
    %14 = vector.load %arg2[%c2, %c0_9, %c0_10] : memref<3x30x24xbf16, #tpu.memory_space<vmem>>, vector<1x30x24xbf16>
    %15 = vector.shape_cast %14 : vector<1x30x24xbf16> to vector<30x24xbf16>
    %cst_11 = arith.constant dense<0.000000e+00> : vector<8x24xf32>
    %16 = tpu.matmul %13, %15, %cst_11 {dimension_numbers = #tpu.dot_dimension_numbers<[1], [0], [0], [1], [0, 0, 1, 1], [], []>} : vector<8x30xbf16>, vector<30x24xbf16>, vector<8x24xf32> -> vector<8x24xf32>
    %17 = arith.addf %12, %16 : vector<8x24xf32>
    %c0_12 = arith.constant 0 : index
    %c0_13 = arith.constant 0 : index
    %18 = vector.load %arg3[%c0_12, %c0_13] : memref<1x24xf32, #tpu.memory_space<vmem>>, vector<1x24xf32>
    %19 = vector.broadcast %18 : vector<1x24xf32> to vector<8x24xf32>
    %20 = arith.addf %17, %19 : vector<8x24xf32>
    %c0_14 = arith.constant 0 : index
    %c0_15 = arith.constant 0 : index
    %c0_16 = arith.constant 0 : index
    %21 = vector.load %arg4[%c0_14, %c0_15, %c0_16] : memref<1x8x24xbf16, #tpu.memory_space<vmem>>, vector<1x8x24xbf16>
    %22 = vector.shape_cast %21 : vector<1x8x24xbf16> to vector<8x24xbf16>
    %23 = arith.extf %22 : vector<8x24xbf16> to vector<8x24xf32>
    %24 = arith.addf %20, %23 : vector<8x24xf32>
    %25 = arith.truncf %24 : vector<8x24xf32> to vector<8x24xbf16>
    %c0_17 = arith.constant 0 : index
    %c0_18 = arith.constant 0 : index
    %c0_19 = arith.constant 0 : index
    %26 = vector.load %arg5[%c0_17, %c0_18, %c0_19] : memref<1x8x24xbf16, #tpu.memory_space<vmem>>, vector<1x8x24xbf16>
    %27 = vector.shape_cast %26 : vector<1x8x24xbf16> to vector<8x24xbf16>
    %28 = vector.shape_cast %25 : vector<8x24xbf16> to vector<1x8x24xbf16>
    tpu.vector_store %arg5[%c0_17, %c0_18, %c0_19], %28 {strides = array<i32>} : memref<1x8x24xbf16, #tpu.memory_space<vmem>>, vector<1x8x24xbf16>,
    return
  }
  func.func @transform_0(%arg0: i32) -> (i32, i32, i32) {
    %c0_i32 = arith.constant 0 : i32
    %c0_i32_0 = arith.constant 0 : i32
    %c0_i32_1 = arith.constant 0 : i32
    return %arg0, %c0_i32, %c0_i32_0 : i32, i32, i32
  }
  func.func @transform_1(%arg0: i32) -> (i32, i32, i32) {
    %c0_i32 = arith.constant 0 : i32
    %c0_i32_0 = arith.constant 0 : i32
    %c0_i32_1 = arith.constant 0 : i32
    %c0_i32_2 = arith.constant 0 : i32
    return %c0_i32, %c0_i32_0, %c0_i32_1 : i32, i32, i32
  }
  func.func @transform_2(%arg0: i32) -> (i32, i32) {
    %c0_i32 = arith.constant 0 : i32
    %c0_i32_0 = arith.constant 0 : i32
    %c0_i32_1 = arith.constant 0 : i32
    return %c0_i32, %c0_i32_0 : i32, i32
  }
  func.func @transform_3(%arg0: i32) -> (i32, i32, i32) {
    %c0_i32 = arith.constant 0 : i32
    %c0_i32_0 = arith.constant 0 : i32
    %c0_i32_1 = arith.constant 0 : i32
    return %arg0, %c0_i32, %c0_i32_0 : i32, i32, i32
  }
  func.func @transform_4(%arg0: i32) -> (i32, i32, i32) {
    %c0_i32 = arith.constant 0 : i32
    %c0_i32_0 = arith.constant 0 : i32
    %c0_i32_1 = arith.constant 0 : i32
    return %arg0, %c0_i32, %c0_i32_0 : i32, i32, i32
  }
}

module attributes {stable_mosaic.version = 11 : i64} {
  func.func @_conv3x3_kernel(%arg0: i32, %arg1: memref<1x10x30xbf16, #tpu.memory_space<vmem>>, %arg2: memref<3x30x96xbf16, #tpu.memory_space<vmem>>, %arg3: memref<1x96xf32, #tpu.memory_space<vmem>>, %arg4: memref<1x8x96xbf16, #tpu.memory_space<vmem>>) attributes {dimension_semantics = [#tpu.dimension_semantics<parallel>], iteration_bounds = array<i64: 2>, scalar_prefetch = 0 : i64, scratch_operands = 0 : i64, tpu.core_type = #tpu.core_type<tc>, window_params = [{transform_indices = @transform_0, window_bounds = array<i64: 1, 10, 30>}, {pipeline_mode = #tpu.pipeline_mode<synchronous>, transform_indices = @transform_1, window_bounds = array<i64: 3, 30, 96>}, {pipeline_mode = #tpu.pipeline_mode<synchronous>, transform_indices = @transform_2, window_bounds = array<i64: 1, 96>}, {transform_indices = @transform_3, window_bounds = array<i64: 1, 8, 96>}]} {
    %c0 = arith.constant 0 : index
    %c0_0 = arith.constant 0 : index
    %c0_1 = arith.constant 0 : index
    %0 = vector.load %arg1[%c0, %c0_0, %c0_1] : memref<1x10x30xbf16, #tpu.memory_space<vmem>>, vector<1x10x30xbf16>
    %1 = vector.shape_cast %0 : vector<1x10x30xbf16> to vector<10x30xbf16>
    %cst = arith.constant 0.000000e+00 : f32
    %2 = vector.broadcast %cst : f32 to vector<8x96xf32>
    %3 = vector.extract_strided_slice %1 {offsets = [0, 0], sizes = [8, 30], strides = [1, 1]} : vector<10x30xbf16> to vector<8x30xbf16>
    %c0_2 = arith.constant 0 : index
    %c0_3 = arith.constant 0 : index
    %c0_4 = arith.constant 0 : index
    %4 = vector.load %arg2[%c0_2, %c0_3, %c0_4] : memref<3x30x96xbf16, #tpu.memory_space<vmem>>, vector<1x30x96xbf16>
    %5 = vector.shape_cast %4 : vector<1x30x96xbf16> to vector<30x96xbf16>
    %cst_5 = arith.constant dense<0.000000e+00> : vector<8x96xf32>
    %6 = tpu.matmul %3, %5, %cst_5 {dimension_numbers = #tpu.dot_dimension_numbers<[1], [0], [0], [1], [0, 0, 1, 1], [], []>} : vector<8x30xbf16>, vector<30x96xbf16>, vector<8x96xf32> -> vector<8x96xf32>
    %7 = arith.addf %2, %6 : vector<8x96xf32>
    %8 = vector.extract_strided_slice %1 {offsets = [1, 0], sizes = [8, 30], strides = [1, 1]} : vector<10x30xbf16> to vector<8x30xbf16>
    %c1 = arith.constant 1 : index
    %c0_6 = arith.constant 0 : index
    %c0_7 = arith.constant 0 : index
    %9 = vector.load %arg2[%c1, %c0_6, %c0_7] : memref<3x30x96xbf16, #tpu.memory_space<vmem>>, vector<1x30x96xbf16>
    %10 = vector.shape_cast %9 : vector<1x30x96xbf16> to vector<30x96xbf16>
    %cst_8 = arith.constant dense<0.000000e+00> : vector<8x96xf32>
    %11 = tpu.matmul %8, %10, %cst_8 {dimension_numbers = #tpu.dot_dimension_numbers<[1], [0], [0], [1], [0, 0, 1, 1], [], []>} : vector<8x30xbf16>, vector<30x96xbf16>, vector<8x96xf32> -> vector<8x96xf32>
    %12 = arith.addf %7, %11 : vector<8x96xf32>
    %13 = vector.extract_strided_slice %1 {offsets = [2, 0], sizes = [8, 30], strides = [1, 1]} : vector<10x30xbf16> to vector<8x30xbf16>
    %c2 = arith.constant 2 : index
    %c0_9 = arith.constant 0 : index
    %c0_10 = arith.constant 0 : index
    %14 = vector.load %arg2[%c2, %c0_9, %c0_10] : memref<3x30x96xbf16, #tpu.memory_space<vmem>>, vector<1x30x96xbf16>
    %15 = vector.shape_cast %14 : vector<1x30x96xbf16> to vector<30x96xbf16>
    %cst_11 = arith.constant dense<0.000000e+00> : vector<8x96xf32>
    %16 = tpu.matmul %13, %15, %cst_11 {dimension_numbers = #tpu.dot_dimension_numbers<[1], [0], [0], [1], [0, 0, 1, 1], [], []>} : vector<8x30xbf16>, vector<30x96xbf16>, vector<8x96xf32> -> vector<8x96xf32>
    %17 = arith.addf %12, %16 : vector<8x96xf32>
    %c0_12 = arith.constant 0 : index
    %c0_13 = arith.constant 0 : index
    %18 = vector.load %arg3[%c0_12, %c0_13] : memref<1x96xf32, #tpu.memory_space<vmem>>, vector<1x96xf32>
    %19 = vector.broadcast %18 : vector<1x96xf32> to vector<8x96xf32>
    %20 = arith.addf %17, %19 : vector<8x96xf32>
    %21 = arith.truncf %20 : vector<8x96xf32> to vector<8x96xbf16>
    %c0_14 = arith.constant 0 : index
    %c0_15 = arith.constant 0 : index
    %c0_16 = arith.constant 0 : index
    %22 = vector.load %arg4[%c0_14, %c0_15, %c0_16] : memref<1x8x96xbf16, #tpu.memory_space<vmem>>, vector<1x8x96xbf16>
    %23 = vector.shape_cast %22 : vector<1x8x96xbf16> to vector<8x96xbf16>
    %24 = vector.shape_cast %21 : vector<8x96xbf16> to vector<1x8x96xbf16>
    tpu.vector_store %arg4[%c0_14, %c0_15, %c0_16], %24 {strides = array<i32>} : memref<1x8x96xbf16, #tpu.memory_space<vmem>>, vector<1x8x96xbf16>,
    return
  }
  func.func @transform_0(%arg0: i32) -> (i32, i32, i32) {
    %c0_i32 = arith.constant 0 : i32
    %c0_i32_0 = arith.constant 0 : i32
    %c0_i32_1 = arith.constant 0 : i32
    return %arg0, %c0_i32, %c0_i32_0 : i32, i32, i32
  }
  func.func @transform_1(%arg0: i32) -> (i32, i32, i32) {
    %c0_i32 = arith.constant 0 : i32
    %c0_i32_0 = arith.constant 0 : i32
    %c0_i32_1 = arith.constant 0 : i32
    %c0_i32_2 = arith.constant 0 : i32
    return %c0_i32, %c0_i32_0, %c0_i32_1 : i32, i32, i32
  }
  func.func @transform_2(%arg0: i32) -> (i32, i32) {
    %c0_i32 = arith.constant 0 : i32
    %c0_i32_0 = arith.constant 0 : i32
    %c0_i32_1 = arith.constant 0 : i32
    return %c0_i32, %c0_i32_0 : i32, i32
  }
  func.func @transform_3(%arg0: i32) -> (i32, i32, i32) {
    %c0_i32 = arith.constant 0 : i32
    %c0_i32_0 = arith.constant 0 : i32
    %c0_i32_1 = arith.constant 0 : i32
    return %arg0, %c0_i32, %c0_i32_0 : i32, i32, i32
  }
}

module attributes {stable_mosaic.version = 11 : i64} {
  func.func @_conv3x3_kernel(%arg0: i32, %arg1: memref<1x18x54xbf16, #tpu.memory_space<vmem>>, %arg2: memref<3x54x128xbf16, #tpu.memory_space<vmem>>, %arg3: memref<1x128xf32, #tpu.memory_space<vmem>>, %arg4: memref<1x16x128xbf16, #tpu.memory_space<vmem>>, %arg5: memref<1x16x128xbf16, #tpu.memory_space<vmem>>) attributes {dimension_semantics = [#tpu.dimension_semantics<parallel>], iteration_bounds = array<i64: 2>, scalar_prefetch = 0 : i64, scratch_operands = 0 : i64, tpu.core_type = #tpu.core_type<tc>, window_params = [{transform_indices = @transform_0, window_bounds = array<i64: 1, 18, 54>}, {pipeline_mode = #tpu.pipeline_mode<synchronous>, transform_indices = @transform_1, window_bounds = array<i64: 3, 54, 128>}, {pipeline_mode = #tpu.pipeline_mode<synchronous>, transform_indices = @transform_2, window_bounds = array<i64: 1, 128>}, {transform_indices = @transform_3, window_bounds = array<i64: 1, 16, 128>}, {transform_indices = @transform_4, window_bounds = array<i64: 1, 16, 128>}]} {
    %c0 = arith.constant 0 : index
    %c0_0 = arith.constant 0 : index
    %c0_1 = arith.constant 0 : index
    %0 = vector.load %arg1[%c0, %c0_0, %c0_1] : memref<1x18x54xbf16, #tpu.memory_space<vmem>>, vector<1x18x54xbf16>
    %1 = vector.shape_cast %0 : vector<1x18x54xbf16> to vector<18x54xbf16>
    %cst = arith.constant 0.000000e+00 : f32
    %2 = vector.broadcast %cst : f32 to vector<16x128xf32>
    %3 = vector.extract_strided_slice %1 {offsets = [0, 0], sizes = [16, 54], strides = [1, 1]} : vector<18x54xbf16> to vector<16x54xbf16>
    %c0_2 = arith.constant 0 : index
    %c0_3 = arith.constant 0 : index
    %c0_4 = arith.constant 0 : index
    %4 = vector.load %arg2[%c0_2, %c0_3, %c0_4] : memref<3x54x128xbf16, #tpu.memory_space<vmem>>, vector<1x54x128xbf16>
    %5 = vector.shape_cast %4 : vector<1x54x128xbf16> to vector<54x128xbf16>
    %cst_5 = arith.constant dense<0.000000e+00> : vector<16x128xf32>
    %6 = tpu.matmul %3, %5, %cst_5 {dimension_numbers = #tpu.dot_dimension_numbers<[1], [0], [0], [1], [0, 0, 1, 1], [], []>} : vector<16x54xbf16>, vector<54x128xbf16>, vector<16x128xf32> -> vector<16x128xf32>
    %7 = arith.addf %2, %6 : vector<16x128xf32>
    %8 = vector.extract_strided_slice %1 {offsets = [1, 0], sizes = [16, 54], strides = [1, 1]} : vector<18x54xbf16> to vector<16x54xbf16>
    %c1 = arith.constant 1 : index
    %c0_6 = arith.constant 0 : index
    %c0_7 = arith.constant 0 : index
    %9 = vector.load %arg2[%c1, %c0_6, %c0_7] : memref<3x54x128xbf16, #tpu.memory_space<vmem>>, vector<1x54x128xbf16>
    %10 = vector.shape_cast %9 : vector<1x54x128xbf16> to vector<54x128xbf16>
    %cst_8 = arith.constant dense<0.000000e+00> : vector<16x128xf32>
    %11 = tpu.matmul %8, %10, %cst_8 {dimension_numbers = #tpu.dot_dimension_numbers<[1], [0], [0], [1], [0, 0, 1, 1], [], []>} : vector<16x54xbf16>, vector<54x128xbf16>, vector<16x128xf32> -> vector<16x128xf32>
    %12 = arith.addf %7, %11 : vector<16x128xf32>
    %13 = vector.extract_strided_slice %1 {offsets = [2, 0], sizes = [16, 54], strides = [1, 1]} : vector<18x54xbf16> to vector<16x54xbf16>
    %c2 = arith.constant 2 : index
    %c0_9 = arith.constant 0 : index
    %c0_10 = arith.constant 0 : index
    %14 = vector.load %arg2[%c2, %c0_9, %c0_10] : memref<3x54x128xbf16, #tpu.memory_space<vmem>>, vector<1x54x128xbf16>
    %15 = vector.shape_cast %14 : vector<1x54x128xbf16> to vector<54x128xbf16>
    %cst_11 = arith.constant dense<0.000000e+00> : vector<16x128xf32>
    %16 = tpu.matmul %13, %15, %cst_11 {dimension_numbers = #tpu.dot_dimension_numbers<[1], [0], [0], [1], [0, 0, 1, 1], [], []>} : vector<16x54xbf16>, vector<54x128xbf16>, vector<16x128xf32> -> vector<16x128xf32>
    %17 = arith.addf %12, %16 : vector<16x128xf32>
    %c0_12 = arith.constant 0 : index
    %c0_13 = arith.constant 0 : index
    %18 = vector.load %arg3[%c0_12, %c0_13] : memref<1x128xf32, #tpu.memory_space<vmem>>, vector<1x128xf32>
    %19 = vector.broadcast %18 : vector<1x128xf32> to vector<16x128xf32>
    %20 = arith.addf %17, %19 : vector<16x128xf32>
    %c0_14 = arith.constant 0 : index
    %c0_15 = arith.constant 0 : index
    %c0_16 = arith.constant 0 : index
    %21 = vector.load %arg4[%c0_14, %c0_15, %c0_16] : memref<1x16x128xbf16, #tpu.memory_space<vmem>>, vector<1x16x128xbf16>
    %22 = vector.shape_cast %21 : vector<1x16x128xbf16> to vector<16x128xbf16>
    %23 = arith.extf %22 : vector<16x128xbf16> to vector<16x128xf32>
    %24 = arith.addf %20, %23 : vector<16x128xf32>
    %25 = arith.truncf %24 : vector<16x128xf32> to vector<16x128xbf16>
    %c0_17 = arith.constant 0 : index
    %c0_18 = arith.constant 0 : index
    %c0_19 = arith.constant 0 : index
    %26 = vector.load %arg5[%c0_17, %c0_18, %c0_19] : memref<1x16x128xbf16, #tpu.memory_space<vmem>>, vector<1x16x128xbf16>
    %27 = vector.shape_cast %26 : vector<1x16x128xbf16> to vector<16x128xbf16>
    %28 = vector.shape_cast %25 : vector<16x128xbf16> to vector<1x16x128xbf16>
    tpu.vector_store %arg5[%c0_17, %c0_18, %c0_19], %28 {strides = array<i32>} : memref<1x16x128xbf16, #tpu.memory_space<vmem>>, vector<1x16x128xbf16>,
    return
  }
  func.func @transform_0(%arg0: i32) -> (i32, i32, i32) {
    %c0_i32 = arith.constant 0 : i32
    %c0_i32_0 = arith.constant 0 : i32
    %c0_i32_1 = arith.constant 0 : i32
    return %arg0, %c0_i32, %c0_i32_0 : i32, i32, i32
  }
  func.func @transform_1(%arg0: i32) -> (i32, i32, i32) {
    %c0_i32 = arith.constant 0 : i32
    %c0_i32_0 = arith.constant 0 : i32
    %c0_i32_1 = arith.constant 0 : i32
    %c0_i32_2 = arith.constant 0 : i32
    return %c0_i32, %c0_i32_0, %c0_i32_1 : i32, i32, i32
  }
  func.func @transform_2(%arg0: i32) -> (i32, i32) {
    %c0_i32 = arith.constant 0 : i32
    %c0_i32_0 = arith.constant 0 : i32
    %c0_i32_1 = arith.constant 0 : i32
    return %c0_i32, %c0_i32_0 : i32, i32
  }
  func.func @transform_3(%arg0: i32) -> (i32, i32, i32) {
    %c0_i32 = arith.constant 0 : i32
    %c0_i32_0 = arith.constant 0 : i32
    %c0_i32_1 = arith.constant 0 : i32
    return %arg0, %c0_i32, %c0_i32_0 : i32, i32, i32
  }
  func.func @transform_4(%arg0: i32) -> (i32, i32, i32) {
    %c0_i32 = arith.constant 0 : i32
    %c0_i32_0 = arith.constant 0 : i32
    %c0_i32_1 = arith.constant 0 : i32
    return %arg0, %c0_i32, %c0_i32_0 : i32, i32, i32
  }
}

module attributes {stable_mosaic.version = 11 : i64} {
  func.func @_conv3x3_kernel(%arg0: i32, %arg1: memref<1x18x144xbf16, #tpu.memory_space<vmem>>, %arg2: memref<3x144x512xbf16, #tpu.memory_space<vmem>>, %arg3: memref<1x512xf32, #tpu.memory_space<vmem>>, %arg4: memref<1x16x512xbf16, #tpu.memory_space<vmem>>) attributes {dimension_semantics = [#tpu.dimension_semantics<parallel>], iteration_bounds = array<i64: 2>, scalar_prefetch = 0 : i64, scratch_operands = 0 : i64, tpu.core_type = #tpu.core_type<tc>, window_params = [{transform_indices = @transform_0, window_bounds = array<i64: 1, 18, 144>}, {pipeline_mode = #tpu.pipeline_mode<synchronous>, transform_indices = @transform_1, window_bounds = array<i64: 3, 144, 512>}, {pipeline_mode = #tpu.pipeline_mode<synchronous>, transform_indices = @transform_2, window_bounds = array<i64: 1, 512>}, {transform_indices = @transform_3, window_bounds = array<i64: 1, 16, 512>}]} {
    %c0 = arith.constant 0 : index
    %c0_0 = arith.constant 0 : index
    %c0_1 = arith.constant 0 : index
    %0 = vector.load %arg1[%c0, %c0_0, %c0_1] : memref<1x18x144xbf16, #tpu.memory_space<vmem>>, vector<1x18x144xbf16>
    %1 = vector.shape_cast %0 : vector<1x18x144xbf16> to vector<18x144xbf16>
    %cst = arith.constant 0.000000e+00 : f32
    %2 = vector.broadcast %cst : f32 to vector<16x512xf32>
    %3 = vector.extract_strided_slice %1 {offsets = [0, 0], sizes = [16, 144], strides = [1, 1]} : vector<18x144xbf16> to vector<16x144xbf16>
    %c0_2 = arith.constant 0 : index
    %c0_3 = arith.constant 0 : index
    %c0_4 = arith.constant 0 : index
    %4 = vector.load %arg2[%c0_2, %c0_3, %c0_4] : memref<3x144x512xbf16, #tpu.memory_space<vmem>>, vector<1x144x512xbf16>
    %5 = vector.shape_cast %4 : vector<1x144x512xbf16> to vector<144x512xbf16>
    %cst_5 = arith.constant dense<0.000000e+00> : vector<16x512xf32>
    %6 = tpu.matmul %3, %5, %cst_5 {dimension_numbers = #tpu.dot_dimension_numbers<[1], [0], [0], [1], [0, 0, 1, 1], [], []>} : vector<16x144xbf16>, vector<144x512xbf16>, vector<16x512xf32> -> vector<16x512xf32>
    %7 = arith.addf %2, %6 : vector<16x512xf32>
    %8 = vector.extract_strided_slice %1 {offsets = [1, 0], sizes = [16, 144], strides = [1, 1]} : vector<18x144xbf16> to vector<16x144xbf16>
    %c1 = arith.constant 1 : index
    %c0_6 = arith.constant 0 : index
    %c0_7 = arith.constant 0 : index
    %9 = vector.load %arg2[%c1, %c0_6, %c0_7] : memref<3x144x512xbf16, #tpu.memory_space<vmem>>, vector<1x144x512xbf16>
    %10 = vector.shape_cast %9 : vector<1x144x512xbf16> to vector<144x512xbf16>
    %cst_8 = arith.constant dense<0.000000e+00> : vector<16x512xf32>
    %11 = tpu.matmul %8, %10, %cst_8 {dimension_numbers = #tpu.dot_dimension_numbers<[1], [0], [0], [1], [0, 0, 1, 1], [], []>} : vector<16x144xbf16>, vector<144x512xbf16>, vector<16x512xf32> -> vector<16x512xf32>
    %12 = arith.addf %7, %11 : vector<16x512xf32>
    %13 = vector.extract_strided_slice %1 {offsets = [2, 0], sizes = [16, 144], strides = [1, 1]} : vector<18x144xbf16> to vector<16x144xbf16>
    %c2 = arith.constant 2 : index
    %c0_9 = arith.constant 0 : index
    %c0_10 = arith.constant 0 : index
    %14 = vector.load %arg2[%c2, %c0_9, %c0_10] : memref<3x144x512xbf16, #tpu.memory_space<vmem>>, vector<1x144x512xbf16>
    %15 = vector.shape_cast %14 : vector<1x144x512xbf16> to vector<144x512xbf16>
    %cst_11 = arith.constant dense<0.000000e+00> : vector<16x512xf32>
    %16 = tpu.matmul %13, %15, %cst_11 {dimension_numbers = #tpu.dot_dimension_numbers<[1], [0], [0], [1], [0, 0, 1, 1], [], []>} : vector<16x144xbf16>, vector<144x512xbf16>, vector<16x512xf32> -> vector<16x512xf32>
    %17 = arith.addf %12, %16 : vector<16x512xf32>
    %c0_12 = arith.constant 0 : index
    %c0_13 = arith.constant 0 : index
    %18 = vector.load %arg3[%c0_12, %c0_13] : memref<1x512xf32, #tpu.memory_space<vmem>>, vector<1x512xf32>
    %19 = vector.broadcast %18 : vector<1x512xf32> to vector<16x512xf32>
    %20 = arith.addf %17, %19 : vector<16x512xf32>
    %21 = arith.truncf %20 : vector<16x512xf32> to vector<16x512xbf16>
    %c0_14 = arith.constant 0 : index
    %c0_15 = arith.constant 0 : index
    %c0_16 = arith.constant 0 : index
    %22 = vector.load %arg4[%c0_14, %c0_15, %c0_16] : memref<1x16x512xbf16, #tpu.memory_space<vmem>>, vector<1x16x512xbf16>
    %23 = vector.shape_cast %22 : vector<1x16x512xbf16> to vector<16x512xbf16>
    %24 = vector.shape_cast %21 : vector<16x512xbf16> to vector<1x16x512xbf16>
    tpu.vector_store %arg4[%c0_14, %c0_15, %c0_16], %24 {strides = array<i32>} : memref<1x16x512xbf16, #tpu.memory_space<vmem>>, vector<1x16x512xbf16>,
    return
  }
  func.func @transform_0(%arg0: i32) -> (i32, i32, i32) {
    %c0_i32 = arith.constant 0 : i32
    %c0_i32_0 = arith.constant 0 : i32
    %c0_i32_1 = arith.constant 0 : i32
    return %arg0, %c0_i32, %c0_i32_0 : i32, i32, i32
  }
  func.func @transform_1(%arg0: i32) -> (i32, i32, i32) {
    %c0_i32 = arith.constant 0 : i32
    %c0_i32_0 = arith.constant 0 : i32
    %c0_i32_1 = arith.constant 0 : i32
    %c0_i32_2 = arith.constant 0 : i32
    return %c0_i32, %c0_i32_0, %c0_i32_1 : i32, i32, i32
  }
  func.func @transform_2(%arg0: i32) -> (i32, i32) {
    %c0_i32 = arith.constant 0 : i32
    %c0_i32_0 = arith.constant 0 : i32
    %c0_i32_1 = arith.constant 0 : i32
    return %c0_i32, %c0_i32_0 : i32, i32
  }
  func.func @transform_3(%arg0: i32) -> (i32, i32, i32) {
    %c0_i32 = arith.constant 0 : i32
    %c0_i32_0 = arith.constant 0 : i32
    %c0_i32_1 = arith.constant 0 : i32
    return %arg0, %c0_i32, %c0_i32_0 : i32, i32, i32
  }
}

module attributes {stable_mosaic.version = 11 : i64} {
  func.func @_conv3x3_kernel(%arg0: i32, %arg1: memref<1x34x272xbf16, #tpu.memory_space<vmem>>, %arg2: memref<3x272x96xbf16, #tpu.memory_space<vmem>>, %arg3: memref<1x96xf32, #tpu.memory_space<vmem>>, %arg4: memref<1x32x96xf32, #tpu.memory_space<vmem>>, %arg5: memref<1x32x96xf32, #tpu.memory_space<vmem>>) attributes {dimension_semantics = [#tpu.dimension_semantics<parallel>], iteration_bounds = array<i64: 2>, scalar_prefetch = 0 : i64, scratch_operands = 0 : i64, tpu.core_type = #tpu.core_type<tc>, window_params = [{transform_indices = @transform_0, window_bounds = array<i64: 1, 34, 272>}, {pipeline_mode = #tpu.pipeline_mode<synchronous>, transform_indices = @transform_1, window_bounds = array<i64: 3, 272, 96>}, {pipeline_mode = #tpu.pipeline_mode<synchronous>, transform_indices = @transform_2, window_bounds = array<i64: 1, 96>}, {transform_indices = @transform_3, window_bounds = array<i64: 1, 32, 96>}, {transform_indices = @transform_4, window_bounds = array<i64: 1, 32, 96>}]} {
    %c0 = arith.constant 0 : index
    %c0_0 = arith.constant 0 : index
    %c0_1 = arith.constant 0 : index
    %0 = vector.load %arg1[%c0, %c0_0, %c0_1] : memref<1x34x272xbf16, #tpu.memory_space<vmem>>, vector<1x34x272xbf16>
    %1 = vector.shape_cast %0 : vector<1x34x272xbf16> to vector<34x272xbf16>
    %cst = arith.constant 0.000000e+00 : f32
    %2 = vector.broadcast %cst : f32 to vector<32x96xf32>
    %3 = vector.extract_strided_slice %1 {offsets = [0, 0], sizes = [32, 272], strides = [1, 1]} : vector<34x272xbf16> to vector<32x272xbf16>
    %c0_2 = arith.constant 0 : index
    %c0_3 = arith.constant 0 : index
    %c0_4 = arith.constant 0 : index
    %4 = vector.load %arg2[%c0_2, %c0_3, %c0_4] : memref<3x272x96xbf16, #tpu.memory_space<vmem>>, vector<1x272x96xbf16>
    %5 = vector.shape_cast %4 : vector<1x272x96xbf16> to vector<272x96xbf16>
    %cst_5 = arith.constant dense<0.000000e+00> : vector<32x96xf32>
    %6 = tpu.matmul %3, %5, %cst_5 {dimension_numbers = #tpu.dot_dimension_numbers<[1], [0], [0], [1], [0, 0, 1, 1], [], []>} : vector<32x272xbf16>, vector<272x96xbf16>, vector<32x96xf32> -> vector<32x96xf32>
    %7 = arith.addf %2, %6 : vector<32x96xf32>
    %8 = vector.extract_strided_slice %1 {offsets = [1, 0], sizes = [32, 272], strides = [1, 1]} : vector<34x272xbf16> to vector<32x272xbf16>
    %c1 = arith.constant 1 : index
    %c0_6 = arith.constant 0 : index
    %c0_7 = arith.constant 0 : index
    %9 = vector.load %arg2[%c1, %c0_6, %c0_7] : memref<3x272x96xbf16, #tpu.memory_space<vmem>>, vector<1x272x96xbf16>
    %10 = vector.shape_cast %9 : vector<1x272x96xbf16> to vector<272x96xbf16>
    %cst_8 = arith.constant dense<0.000000e+00> : vector<32x96xf32>
    %11 = tpu.matmul %8, %10, %cst_8 {dimension_numbers = #tpu.dot_dimension_numbers<[1], [0], [0], [1], [0, 0, 1, 1], [], []>} : vector<32x272xbf16>, vector<272x96xbf16>, vector<32x96xf32> -> vector<32x96xf32>
    %12 = arith.addf %7, %11 : vector<32x96xf32>
    %13 = vector.extract_strided_slice %1 {offsets = [2, 0], sizes = [32, 272], strides = [1, 1]} : vector<34x272xbf16> to vector<32x272xbf16>
    %c2 = arith.constant 2 : index
    %c0_9 = arith.constant 0 : index
    %c0_10 = arith.constant 0 : index
    %14 = vector.load %arg2[%c2, %c0_9, %c0_10] : memref<3x272x96xbf16, #tpu.memory_space<vmem>>, vector<1x272x96xbf16>
    %15 = vector.shape_cast %14 : vector<1x272x96xbf16> to vector<272x96xbf16>
    %cst_11 = arith.constant dense<0.000000e+00> : vector<32x96xf32>
    %16 = tpu.matmul %13, %15, %cst_11 {dimension_numbers = #tpu.dot_dimension_numbers<[1], [0], [0], [1], [0, 0, 1, 1], [], []>} : vector<32x272xbf16>, vector<272x96xbf16>, vector<32x96xf32> -> vector<32x96xf32>
    %17 = arith.addf %12, %16 : vector<32x96xf32>
    %c0_12 = arith.constant 0 : index
    %c0_13 = arith.constant 0 : index
    %18 = vector.load %arg3[%c0_12, %c0_13] : memref<1x96xf32, #tpu.memory_space<vmem>>, vector<1x96xf32>
    %19 = vector.broadcast %18 : vector<1x96xf32> to vector<32x96xf32>
    %20 = arith.addf %17, %19 : vector<32x96xf32>
    %c0_14 = arith.constant 0 : index
    %c0_15 = arith.constant 0 : index
    %c0_16 = arith.constant 0 : index
    %21 = vector.load %arg4[%c0_14, %c0_15, %c0_16] : memref<1x32x96xf32, #tpu.memory_space<vmem>>, vector<1x32x96xf32>
    %22 = vector.shape_cast %21 : vector<1x32x96xf32> to vector<32x96xf32>
    %23 = arith.addf %20, %22 : vector<32x96xf32>
    %c0_17 = arith.constant 0 : index
    %c0_18 = arith.constant 0 : index
    %c0_19 = arith.constant 0 : index
    %24 = vector.load %arg5[%c0_17, %c0_18, %c0_19] : memref<1x32x96xf32, #tpu.memory_space<vmem>>, vector<1x32x96xf32>
    %25 = vector.shape_cast %24 : vector<1x32x96xf32> to vector<32x96xf32>
    %26 = vector.shape_cast %23 : vector<32x96xf32> to vector<1x32x96xf32>
    tpu.vector_store %arg5[%c0_17, %c0_18, %c0_19], %26 {strides = array<i32>} : memref<1x32x96xf32, #tpu.memory_space<vmem>>, vector<1x32x96xf32>,
    return
  }
  func.func @transform_0(%arg0: i32) -> (i32, i32, i32) {
    %c0_i32 = arith.constant 0 : i32
    %c0_i32_0 = arith.constant 0 : i32
    %c0_i32_1 = arith.constant 0 : i32
    return %arg0, %c0_i32, %c0_i32_0 : i32, i32, i32
  }
  func.func @transform_1(%arg0: i32) -> (i32, i32, i32) {
    %c0_i32 = arith.constant 0 : i32
    %c0_i32_0 = arith.constant 0 : i32
    %c0_i32_1 = arith.constant 0 : i32
    %c0_i32_2 = arith.constant 0 : i32
    return %c0_i32, %c0_i32_0, %c0_i32_1 : i32, i32, i32
  }
  func.func @transform_2(%arg0: i32) -> (i32, i32) {
    %c0_i32 = arith.constant 0 : i32
    %c0_i32_0 = arith.constant 0 : i32
    %c0_i32_1 = arith.constant 0 : i32
    return %c0_i32, %c0_i32_0 : i32, i32
  }
  func.func @transform_3(%arg0: i32) -> (i32, i32, i32) {
    %c0_i32 = arith.constant 0 : i32
    %c0_i32_0 = arith.constant 0 : i32
    %c0_i32_1 = arith.constant 0 : i32
    return %arg0, %c0_i32, %c0_i32_0 : i32, i32, i32
  }
  func.func @transform_4(%arg0: i32) -> (i32, i32, i32) {
    %c0_i32 = arith.constant 0 : i32
    %c0_i32_0 = arith.constant 0 : i32
    %c0_i32_1 = arith.constant 0 : i32
    return %arg0, %c0_i32, %c0_i32_0 : i32, i32, i32
  }
}

</mosaic_0001>

<bundles_post_ra>
// kernel: tile.78
= control target key start
LH: loop header
LB: loop body
LE: loop exit
PB: predicated region body
PF: predicated region fallthrough
CT: control target
= control target key end

     0   :  { %s28_s0 = inlined_call_operand.vmem [shape: f32[3], index: 0, kind: input, shape index: {}]   ;;  %s29_s1 = inlined_call_operand.vmem [shape: f32[16,3], index: 1, kind: output, shape index: {}]  }
   0x1   :  { %v4_v0 = vld [vmem:[%s28_s0] ss:$0 sm:$0xff] }
   0x2   :  { %5 = vst [vmem:[%s29_s1] sm:$0xff] %v4_v0  ;;  %8 = vst [vmem:[%s29_s1 + $0x8] sm:$0xff] %v4_v0 }

// kernel: tile.79
= control target key start
LH: loop header
LB: loop body
LE: loop exit
PB: predicated region body
PF: predicated region fallthrough
CT: control target
= control target key end

     0   :  { %s133_s10 = smov 45   ;;  %s134_s11 = smov 39   ;;  %vm3_vm0 = vcmask 23552   ;;  %vm9_vm1 = vcmask 392552   ;;  %vm15_vm2 = vcmask 367952   ;;  %vm21_vm3 = vcmask 343352   ;;  %s209_s0 = inlined_call_operand.vmem [shape: f32[16,3], index: 0, kind: input, shape index: {}]   ;;  %s210_s1 = inlined_call_operand.vmem [shape: f32[1,48], index: 1, kind: output, shape index: {}]  }
   0x1   :  { %v103_v0 = vld [vmem:[%s209_s0 + $0xf] sm:$0x1]   ;;  %v105_v1 = vld [vmem:[%s209_s0 + $0xd] sm:$0x1]   ;;  %v104_v2 = vld [vmem:[%s209_s0 + $0xe] sm:$0x1]  }
   0x2   :  { %7 = vrot.lane.b32.xlu0 %v103_v0, %s133_s10  ;;  %19 = vrot.lane.b32.xlu1 %v105_v1, %s134_s11  ;;  %v106_v3 = vld [vmem:[%s209_s0 + $0xc] sm:$0x1]   ;;  %s135_s16 = smov 42   ;;  %s136_s17 = smov 36   ;;  %v107_v4 = vld [vmem:[%s209_s0 + $0xb] sm:$0x1]  }
   0x3   :  { %v108_v5 = vld [vmem:[%s209_s0 + $0xa] sm:$0x1]   ;;  %v2_v6 = vld [vmem:[%s209_s0] sm:$0x1]   ;;  %s137_s24 = smov 33   ;;  %s138_s25 = smov 30  }
   0x4   :  { %4 = vst.msk [vmem:[#allocation0] sm:$0x1] %vm3_vm0, %v2_v6   ;;  %v109_v7 = vld [vmem:[%s209_s0 + $0x9] sm:$0x1]   ;;  %v110_v8 = vld [vmem:[%s209_s0 + $0x8] sm:$0x1]  }
   0x5   :  { %s139_s30 = smov 27   ;;  %s140_s2 = smov 24   ;;  %v111_v9 = vld [vmem:[%s209_s0 + $0x7] sm:$0x1]   ;;  %v112_v10 = vld [vmem:[%s209_s0 + $0x6] sm:$0x1]  }
   0x6   :  { %13 = vrot.lane.b32.xlu0 %v104_v2, %s135_s16  ;;  %25 = vrot.lane.b32.xlu1 %v106_v3, %s136_s17  ;;  %s141_s7 = smov 21   ;;  %s142_s8 = smov 18   ;;  %v113_v11 = vld [vmem:[%s209_s0 + $0x5] sm:$0x1]   ;;  %v114_v12 = vld [vmem:[%s209_s0 + $0x4] sm:$0x1]  }
   0x7   :  { %s143_s13 = smov 15   ;;  %s144_s14 = smov 12   ;;  %v115_v13 = vld [vmem:[%s209_s0 + $0x3] sm:$0x1]   ;;  %v116_v14 = vld [vmem:[%s209_s0 + $0x2] sm:$0x1]  }
   0x8   :  { %s145_s19 = smov 9   ;;  %s146_s20 = smov 6   ;;  %v117_v15 = vld [vmem:[%s209_s0 + $0x1] sm:$0x1]   ;;  %vm27_vm4 = vcmask 318752   ;;  %vm33_vm5 = vcmask 294152  }
   0x9   :  { %s147_s0 = smov 3   ;;  %vm39_vm6 = vcmask 269552   ;;  %vm45_vm7 = vcmask 244952   ;;  %vm51_vm8 = vcmask 220352   ;;  %vm57_vm9 = vcmask 195752  }
   0xa   :  { %31 = vrot.lane.b32.xlu0 %v107_v4, %s137_s24  ;;  %37 = vrot.lane.b32.xlu1 %v108_v5, %s138_s25  ;;  %vm63_vm10 = vcmask 171152   ;;  %vm69_vm11 = vcmask 146552   ;;  %vm75_vm12 = vcmask 121952   ;;  %vm81_vm13 = vcmask 97352  }
   0xb   :  { %vm87_vm14 = vcmask 72752   ;;  %vm93_vm15 = vcmask 48152  }
   0xe   :  { %43 = vrot.lane.b32.xlu0 %v109_v7, %s139_s30  ;;  %49 = vrot.lane.b32.xlu1 %v110_v8, %s140_s2 }
  0x12   :  { %55 = vrot.lane.b32.xlu0 %v111_v9, %s141_s7  ;;  %61 = vrot.lane.b32.xlu1 %v112_v10, %s142_s8 }
  0x16   :  { %67 = vrot.lane.b32.xlu0 %v113_v11, %s143_s13  ;;  %73 = vrot.lane.b32.xlu1 %v114_v12, %s144_s14 }
  0x1a   :  { %79 = vrot.lane.b32.xlu0 %v115_v13, %s145_s19  ;;  %85 = vrot.lane.b32.xlu1 %v116_v14, %s146_s20 }
  0x1e   :  { %91 = vrot.lane.b32.xlu0 %v117_v15, %s147_s0 }
  0x74   :  { %v8_v16 = vpop.permute.xlu0 %7   ;;  %v20_v17 = vpop.permute.xlu1 %19  }
  0x75   :  { %10 = vst.msk [vmem:[#allocation0] sm:$0x1] %vm9_vm1, %v8_v16  }
  0x78   :  { %v14_v18 = vpop.permute.xlu0 %13   ;;  %v26_v19 = vpop.permute.xlu1 %25  }
  0x79   :  { %16 = vst.msk [vmem:[#allocation0] sm:$0x1] %vm15_vm2, %v14_v18  }
  0x7a   :  { %22 = vst.msk [vmem:[#allocation0] sm:$0x1] %vm21_vm3, %v20_v17  }
  0x7b   :  { %28 = vst.msk [vmem:[#allocation0] sm:$0x1] %vm27_vm4, %v26_v19  }
  0x7c   :  { %v32_v20 = vpop.permute.xlu0 %31   ;;  %v38_v21 = vpop.permute.xlu1 %37  }
  0x7d   :  { %34 = vst.msk [vmem:[#allocation0] sm:$0x1] %vm33_vm5, %v32_v20  }
  0x7e   :  { %40 = vst.msk [vmem:[#allocation0] sm:$0x1] %vm39_vm6, %v38_v21  }
  0x80   :  { %v44_v22 = vpop.permute.xlu0 %43   ;;  %v50_v23 = vpop.permute.xlu1 %49  }
  0x81   :  { %46 = vst.msk [vmem:[#allocation0] sm:$0x1] %vm45_vm7, %v44_v22  }
  0x82   :  { %52 = vst.msk [vmem:[#allocation0] sm:$0x1] %vm51_vm8, %v50_v23  }
  0x84   :  { %v56_v24 = vpop.permute.xlu0 %55   ;;  %v62_v25 = vpop.permute.xlu1 %61  }
  0x85   :  { %58 = vst.msk [vmem:[#allocation0] sm:$0x1] %vm57_vm9, %v56_v24  }
  0x86   :  { %64 = vst.msk [vmem:[#allocation0] sm:$0x1] %vm63_vm10, %v62_v25  }
  0x88   :  { %v68_v26 = vpop.permute.xlu0 %67   ;;  %v74_v27 = vpop.permute.xlu1 %73  }
  0x89   :  { %70 = vst.msk [vmem:[#allocation0] sm:$0x1] %vm69_vm11, %v68_v26  }
  0x8a   :  { %76 = vst.msk [vmem:[#allocation0] sm:$0x1] %vm75_vm12, %v74_v27  }
  0x8c   :  { %v80_v28 = vpop.permute.xlu0 %79   ;;  %v86_v29 = vpop.permute.xlu1 %85  }
  0x8d   :  { %82 = vst.msk [vmem:[#allocation0] sm:$0x1] %vm81_vm13, %v80_v28  }
  0x8e   :  { %88 = vst.msk [vmem:[#allocation0] sm:$0x1] %vm87_vm14, %v86_v29  }
  0x90   :  { %v92_v30 = vpop.permute.xlu0 %91  }
  0x91   :  { %94 = vst.msk [vmem:[#allocation0] sm:$0x1] %vm93_vm15, %v92_v30  }
  0x98   :  { %v99_v31 = vld [vmem:[#allocation0] sm:$0x1] }
  0x99   :  { %102 = vst [vmem:[%s210_s1] sm:$0x1] %v99_v31 }

// kernel: tile.83
= control target key start
LH: loop header
LB: loop body
LE: loop exit
PB: predicated region body
PF: predicated region fallthrough
CT: control target
= control target key end

     0   :  { %s28_s0 = inlined_call_operand.vmem [shape: f32[8], index: 0, kind: input, shape index: {}]   ;;  %s29_s1 = inlined_call_operand.vmem [shape: f32[16,8], index: 1, kind: output, shape index: {}]  }
   0x1   :  { %v4_v0 = vld [vmem:[%s28_s0] ss:$0 sm:$0xff] }
   0x2   :  { %5 = vst [vmem:[%s29_s1] sm:$0xff] %v4_v0  ;;  %8 = vst [vmem:[%s29_s1 + $0x8] sm:$0xff] %v4_v0 }

// kernel: tile.84
= control target key start
LH: loop header
LB: loop body
LE: loop exit
PB: predicated region body
PF: predicated region fallthrough
CT: control target
= control target key end

     0   :  { %s133_s10 = smov 120   ;;  %s134_s11 = smov 104   ;;  %vm3_vm0 = vcmask 64512   ;;  %vm9_vm1 = vcmask 1048512   ;;  %vm15_vm2 = vcmask 982912   ;;  %vm21_vm3 = vcmask 917312   ;;  %s209_s0 = inlined_call_operand.vmem [shape: f32[16,8], index: 0, kind: input, shape index: {}]   ;;  %s210_s1 = inlined_call_operand.vmem [shape: f32[1,128], index: 1, kind: output, shape index: {}]  }
   0x1   :  { %v103_v0 = vld [vmem:[%s209_s0 + $0xf] sm:$0x1]   ;;  %v105_v1 = vld [vmem:[%s209_s0 + $0xd] sm:$0x1]   ;;  %v104_v2 = vld [vmem:[%s209_s0 + $0xe] sm:$0x1]  }
   0x2   :  { %7 = vrot.lane.b32.xlu0 %v103_v0, %s133_s10  ;;  %19 = vrot.lane.b32.xlu1 %v105_v1, %s134_s11  ;;  %v106_v3 = vld [vmem:[%s209_s0 + $0xc] sm:$0x1]   ;;  %s135_s16 = smov 112   ;;  %s136_s17 = smov 96   ;;  %v107_v4 = vld [vmem:[%s209_s0 + $0xb] sm:$0x1]  }
   0x3   :  { %v108_v5 = vld [vmem:[%s209_s0 + $0xa] sm:$0x1]   ;;  %v2_v6 = vld [vmem:[%s209_s0] sm:$0x1]   ;;  %s137_s24 = smov 88   ;;  %s138_s25 = smov 80  }
   0x4   :  { %4 = vst.msk [vmem:[#allocation0] sm:$0x1] %vm3_vm0, %v2_v6   ;;  %v109_v7 = vld [vmem:[%s209_s0 + $0x9] sm:$0x1]   ;;  %v110_v8 = vld [vmem:[%s209_s0 + $0x8] sm:$0x1]  }
   0x5   :  { %s139_s30 = smov 72   ;;  %s140_s2 = smov 64   ;;  %v111_v9 = vld [vmem:[%s209_s0 + $0x7] sm:$0x1]   ;;  %v112_v10 = vld [vmem:[%s209_s0 + $0x6] sm:$0x1]  }
   0x6   :  { %13 = vrot.lane.b32.xlu0 %v104_v2, %s135_s16  ;;  %25 = vrot.lane.b32.xlu1 %v106_v3, %s136_s17  ;;  %s141_s7 = smov 56   ;;  %s142_s8 = smov 48   ;;  %v113_v11 = vld [vmem:[%s209_s0 + $0x5] sm:$0x1]   ;;  %v114_v12 = vld [vmem:[%s209_s0 + $0x4] sm:$0x1]  }
   0x7   :  { %s143_s13 = smov 40   ;;  %s144_s14 = smov 32   ;;  %v115_v13 = vld [vmem:[%s209_s0 + $0x3] sm:$0x1]   ;;  %v116_v14 = vld [vmem:[%s209_s0 + $0x2] sm:$0x1]  }
   0x8   :  { %s145_s19 = smov 24   ;;  %s146_s20 = smov 16   ;;  %v117_v15 = vld [vmem:[%s209_s0 + $0x1] sm:$0x1]   ;;  %vm27_vm4 = vcmask 851712   ;;  %vm33_vm5 = vcmask 786112  }
   0x9   :  { %s147_s0 = smov 8   ;;  %vm39_vm6 = vcmask 720512   ;;  %vm45_vm7 = vcmask 654912   ;;  %vm51_vm8 = vcmask 589312   ;;  %vm57_vm9 = vcmask 523712  }
   0xa   :  { %31 = vrot.lane.b32.xlu0 %v107_v4, %s137_s24  ;;  %37 = vrot.lane.b32.xlu1 %v108_v5, %s138_s25  ;;  %vm63_vm10 = vcmask 458112   ;;  %vm69_vm11 = vcmask 392512   ;;  %vm75_vm12 = vcmask 326912   ;;  %vm81_vm13 = vcmask 261312  }
   0xb   :  { %vm87_vm14 = vcmask 195712   ;;  %vm93_vm15 = vcmask 130112  }
   0xe   :  { %43 = vrot.lane.b32.xlu0 %v109_v7, %s139_s30  ;;  %49 = vrot.lane.b32.xlu1 %v110_v8, %s140_s2 }
  0x12   :  { %55 = vrot.lane.b32.xlu0 %v111_v9, %s141_s7  ;;  %61 = vrot.lane.b32.xlu1 %v112_v10, %s142_s8 }
  0x16   :  { %67 = vrot.lane.b32.xlu0 %v113_v11, %s143_s13  ;;  %73 = vrot.lane.b32.xlu1 %v114_v12, %s144_s14 }
  0x1a   :  { %79 = vrot.lane.b32.xlu0 %v115_v13, %s145_s19  ;;  %85 = vrot.lane.b32.xlu1 %v116_v14, %s146_s20 }
  0x1e   :  { %91 = vrot.lane.b32.xlu0 %v117_v15, %s147_s0 }
  0x74   :  { %v8_v16 = vpop.permute.xlu0 %7   ;;  %v20_v17 = vpop.permute.xlu1 %19  }
  0x75   :  { %10 = vst.msk [vmem:[#allocation0] sm:$0x1] %vm9_vm1, %v8_v16  }
  0x78   :  { %v14_v18 = vpop.permute.xlu0 %13   ;;  %v26_v19 = vpop.permute.xlu1 %25  }
  0x79   :  { %16 = vst.msk [vmem:[#allocation0] sm:$0x1] %vm15_vm2, %v14_v18  }
  0x7a   :  { %22 = vst.msk [vmem:[#allocation0] sm:$0x1] %vm21_vm3, %v20_v17  }
  0x7b   :  { %28 = vst.msk [vmem:[#allocation0] sm:$0x1] %vm27_vm4, %v26_v19  }
  0x7c   :  { %v32_v20 = vpop.permute.xlu0 %31   ;;  %v38_v21 = vpop.permute.xlu1 %37  }
  0x7d   :  { %34 = vst.msk [vmem:[#allocation0] sm:$0x1] %vm33_vm5, %v32_v20  }
  0x7e   :  { %40 = vst.msk [vmem:[#allocation0] sm:$0x1] %vm39_vm6, %v38_v21  }
  0x80   :  { %v44_v22 = vpop.permute.xlu0 %43   ;;  %v50_v23 = vpop.permute.xlu1 %49  }
  0x81   :  { %46 = vst.msk [vmem:[#allocation0] sm:$0x1] %vm45_vm7, %v44_v22  }
  0x82   :  { %52 = vst.msk [vmem:[#allocation0] sm:$0x1] %vm51_vm8, %v50_v23  }
  0x84   :  { %v56_v24 = vpop.permute.xlu0 %55   ;;  %v62_v25 = vpop.permute.xlu1 %61  }
  0x85   :  { %58 = vst.msk [vmem:[#allocation0] sm:$0x1] %vm57_vm9, %v56_v24  }
  0x86   :  { %64 = vst.msk [vmem:[#allocation0] sm:$0x1] %vm63_vm10, %v62_v25  }
  0x88   :  { %v68_v26 = vpop.permute.xlu0 %67   ;;  %v74_v27 = vpop.permute.xlu1 %73  }
  0x89   :  { %70 = vst.msk [vmem:[#allocation0] sm:$0x1] %vm69_vm11, %v68_v26  }
  0x8a   :  { %76 = vst.msk [vmem:[#allocation0] sm:$0x1] %vm75_vm12, %v74_v27  }
  0x8c   :  { %v80_v28 = vpop.permute.xlu0 %79   ;;  %v86_v29 = vpop.permute.xlu1 %85  }
  0x8d   :  { %82 = vst.msk [vmem:[#allocation0] sm:$0x1] %vm81_vm13, %v80_v28  }
  0x8e   :  { %88 = vst.msk [vmem:[#allocation0] sm:$0x1] %vm87_vm14, %v86_v29  }
  0x90   :  { %v92_v30 = vpop.permute.xlu0 %91  }
  0x91   :  { %94 = vst.msk [vmem:[#allocation0] sm:$0x1] %vm93_vm15, %v92_v30  }
  0x98   :  { %v99_v31 = vld [vmem:[#allocation0] sm:$0x1] }
  0x99   :  { %102 = vst [vmem:[%s210_s1] sm:$0x1] %v99_v31 }

// kernel: edsr_forward.19
= control target key start
LH: loop header
LB: loop body
LE: loop exit
PB: predicated region body
PF: predicated region fallthrough
CT: control target
= control target key end

     0   :  { %vm110_vm0 = vcmask 386048   ;;  %vm535_vm1 = vcmask 1041409   ;;  %vm538_vm2 = vcmask 1042434   ;;  %vm541_vm3 = vcmask 1043459   ;;  %s1454_s0 = inlined_call_operand.vmem [shape: f32[32,2,48], index: 0, kind: input, shape index: {}]   ;;  %s1455_s1 = inlined_call_operand.vmem [shape: f32[32,2,48], index: 1, kind: input, shape index: {}]   ;;  %s1456_s2 = inlined_call_operand.vmem [shape: f32[1,48], index: 2, kind: input, shape index: {}]   ;;  %s1457_s3 = inlined_call_operand.vmem [shape: bf16[32,48], index: 3, kind: output, shape index: {}]  }
   0x1   :  { %v702_v0 = vld [vmem:[%s1454_s0] sm:$0x3]  ;;  %v707_v1 = vld [vmem:[%s1454_s0 + $0x2] sm:$0x3]  ;;  %v712_v2 = vld [vmem:[%s1454_s0 + $0x4] sm:$0x3] }
   0x2   :  { %v717_v3 = vld [vmem:[%s1454_s0 + $0x6] sm:$0x3]  ;;  %v722_v4 = vld [vmem:[%s1454_s0 + $0x8] sm:$0x3]  ;;  %v727_v5 = vld [vmem:[%s1454_s0 + $0xa] sm:$0x3] }
   0x3   :  { %v732_v6 = vld [vmem:[%s1454_s0 + $0xc] sm:$0x3]  ;;  %v737_v7 = vld [vmem:[%s1454_s0 + $0xe] sm:$0x3]  ;;  %v742_v8 = vld [vmem:[%s1455_s1] sm:$0x3] }
   0x4   :  { %v747_v9 = vld [vmem:[%s1454_s0 + $0x10] sm:$0x3]  ;;  %v752_v10 = vld [vmem:[%s1454_s0 + $0x12] sm:$0x3]  ;;  %v757_v11 = vld [vmem:[%s1454_s0 + $0x14] sm:$0x3]  ;;  %v78_v37 = vmax.f32 %v702_v0, %v742_v8 }
   0x5   :  { %v762_v12 = vld [vmem:[%s1454_s0 + $0x16] sm:$0x3]  ;;  %v767_v13 = vld [vmem:[%s1455_s1 + $0x2] sm:$0x3]  ;;  %v772_v14 = vld [vmem:[%s1455_s1 + $0x4] sm:$0x3] }
   0x6   :  { %v777_v15 = vld [vmem:[%s1455_s1 + $0x6] sm:$0x3]  ;;  %v782_v16 = vld [vmem:[%s1454_s0 + $0x18] sm:$0x3]  ;;  %v787_v17 = vld [vmem:[%s1454_s0 + $0x1a] sm:$0x3]  ;;  %v79_v38 = vmax.f32 %v707_v1, %v767_v13  ;;  %v80_v39 = vmax.f32 %v712_v2, %v772_v14 }
   0x7   :  { %v792_v18 = vld [vmem:[%s1454_s0 + $0x1c] sm:$0x3]  ;;  %v797_v19 = vld [vmem:[%s1454_s0 + $0x1e] sm:$0x3]  ;;  %v802_v20 = vld [vmem:[%s1455_s1 + $0x8] sm:$0x3]  ;;  %v81_v40 = vmax.f32 %v717_v3, %v777_v15 }
   0x8   :  { %v807_v21 = vld [vmem:[%s1455_s1 + $0xa] sm:$0x3]  ;;  %v812_v22 = vld [vmem:[%s1455_s1 + $0xc] sm:$0x3]  ;;  %v817_v23 = vld [vmem:[%s1454_s0 + $0x20] sm:$0x3]  ;;  %v82_v48 = vmax.f32 %v722_v4, %v802_v20 }
   0x9   :  { %v822_v24 = vld [vmem:[%s1454_s0 + $0x22] sm:$0x3]  ;;  %v827_v25 = vld [vmem:[%s1454_s0 + $0x24] sm:$0x3]  ;;  %v832_v26 = vld [vmem:[%s1454_s0 + $0x26] sm:$0x3]  ;;  %v83_v49 = vmax.f32 %v727_v5, %v807_v21  ;;  %v84_v50 = vmax.f32 %v732_v6, %v812_v22 }
   0xa   :  { %v837_v27 = vld [vmem:[%s1455_s1 + $0xe] sm:$0x3]  ;;  %v842_v28 = vld [vmem:[%s1455_s1 + $0x10] sm:$0x3]  ;;  %v847_v29 = vld [vmem:[%s1455_s1 + $0x12] sm:$0x3] }
   0xb   :  { %v852_v30 = vld [vmem:[%s1454_s0 + $0x28] sm:$0x3]  ;;  %v857_v31 = vld [vmem:[%s1454_s0 + $0x2a] sm:$0x3]  ;;  %v862_v32 = vld [vmem:[%s1454_s0 + $0x2c] sm:$0x3] }
   0xc   :  { %v867_v33 = vld [vmem:[%s1454_s0 + $0x2e] sm:$0x3]  ;;  %v872_v34 = vld [vmem:[%s1455_s1 + $0x14] sm:$0x3]  ;;  %v877_v35 = vld [vmem:[%s1455_s1 + $0x16] sm:$0x3] }
   0xd   :  { %v882_v36 = vld [vmem:[%s1455_s1 + $0x18] sm:$0x3]  ;;  %v895_v41 = vld [vmem:[%s1454_s0 + $0x30] sm:$0x3]  ;;  %v900_v42 = vld [vmem:[%s1454_s0 + $0x32] sm:$0x3] }
   0xe   :  { %1474 = vst [vmem:[#allocation2_spill] sm:$0xff] %v895_v41  ;;  %1475 = vst [vmem:[#allocation3_spill] sm:$0xff] %v900_v42  ;;  %v905_v43 = vld [vmem:[%s1454_s0 + $0x34] sm:$0x3]  ;;  %v910_v44 = vld [vmem:[%s1454_s0 + $0x36] sm:$0x3] }
   0xf   :  { %1476 = vst [vmem:[#allocation4_spill] sm:$0xff] %v905_v43  ;;  %1477 = vst [vmem:[#allocation5_spill] sm:$0xff] %v910_v44  ;;  %v915_v45 = vld [vmem:[%s1455_s1 + $0x1a] sm:$0x3]  ;;  %v920_v46 = vld [vmem:[%s1455_s1 + $0x1c] sm:$0x3] }
  0x10   :  { %v925_v47 = vld [vmem:[%s1455_s1 + $0x1e] sm:$0x3]  ;;  %v938_v52 = vld [vmem:[%s1454_s0 + $0x38] sm:$0x3]  ;;  %v943_v53 = vld [vmem:[%s1454_s0 + $0x3a] sm:$0x3] }
  0x11   :  { %1478 = vst [vmem:[#allocation6_spill] sm:$0xff] %v938_v52  ;;  %1479 = vst [vmem:[#allocation7_spill] sm:$0xff] %v943_v53  ;;  %v948_v54 = vld [vmem:[%s1454_s0 + $0x3c] sm:$0x3]  ;;  %v953_v55 = vld [vmem:[%s1455_s1 + $0x20] sm:$0x3] }
  0x12   :  { %1480 = vst [vmem:[#allocation8_spill] sm:$0xff] %v948_v54  ;;  %v958_v56 = vld [vmem:[%s1455_s1 + $0x22] sm:$0x3]  ;;  %v963_v57 = vld [vmem:[%s1455_s1 + $0x24] sm:$0x3]  ;;  %v111_v58 = vsel %vm110_vm0, %v78_v37, -inf }
  0x13   :  { %v976_v62 = vld [vmem:[%s1454_s0 + $0x3e] sm:$0x3]  ;;  %v981_v63 = vld [vmem:[%s1455_s1 + $0x26] sm:$0x3]  ;;  %v986_v0 = vld [vmem:[%s1455_s1 + $0x28] sm:$0x3] }
  0x14   :  { %1481 = vst [vmem:[#allocation9_spill] sm:$0xff] %v976_v62  ;;  %v991_v1 = vld [vmem:[%s1455_s1 + $0x2a] sm:$0x3]  ;;  %v1004_v6 = vld [vmem:[%s1455_s1 + $0x2c] sm:$0x3]  ;;  %v112_v61 = vrot.slane %v111_v58, 4 }
  0x15   :  { %v1009_v8 = vld [vmem:[%s1455_s1 + $0x2e] sm:$0x3]  ;;  %v1014_v13 = vld [vmem:[%s1455_s1 + $0x30] sm:$0x3]  ;;  %v1027_v22 = vld [vmem:[%s1455_s1 + $0x32] sm:$0x3] }
  0x16   :  { %1482 = vst [vmem:[#allocation10_spill] sm:$0xff] %v1014_v13  ;;  %1483 = vst [vmem:[#allocation11_spill] sm:$0xff] %v1027_v22  ;;  %v1032_v5 = vld [vmem:[%s1455_s1 + $0x34] sm:$0x3]  ;;  %v1037_v15 = vld [vmem:[%s1455_s1 + $0x36] sm:$0x3]  ;;  %v113_v14 = vmax.f32 %v111_v58, %v112_v61 }
  0x17   :  { %1484 = vst [vmem:[#allocation12_spill] sm:$0xff] %v1032_v5  ;;  %1485 = vst [vmem:[#allocation13_spill] sm:$0xff] %v1037_v15  ;;  %v1050_v3 = vld [vmem:[%s1455_s1 + $0x38] sm:$0x3]  ;;  %v1055_v2 = vld [vmem:[%s1455_s1 + $0x3a] sm:$0x3] }
  0x18   :  { %1486 = vst [vmem:[#allocation14_spill] sm:$0xff] %v1050_v3  ;;  %1487 = vst [vmem:[#allocation15_spill] sm:$0xff] %v1055_v2  ;;  %v1060_v21 = vld [vmem:[%s1455_s1 + $0x3c] sm:$0x3]  ;;  %v1073_v60 = vld [vmem:[%s1455_s1 + $0x3e] sm:$0x3] }
  0x19   :  { %1488 = vst [vmem:[#allocation16_spill] sm:$0xff] %v1060_v21  ;;  %1489 = vst [vmem:[#allocation17_spill] sm:$0xff] %v1073_v60  ;;  %v118_v51 = vsel %vm110_vm0, %v79_v38, -inf  ;;  %v125_v15 = vsel %vm110_vm0, %v80_v39, -inf  ;;  %v132_v59 = vsel %vm110_vm0, %v81_v40, -inf  ;;  %v139_v3 = vsel %vm110_vm0, %v82_v48, -inf }
  0x1a   :  { %v119_v44 = vrot.slane %v118_v51, 4  ;;  %v126_v5 = vrot.slane %v125_v15, 4  ;;  %v133_v2 = vrot.slane %v132_v59, 4  ;;  %v140_v53 = vrot.slane %v139_v3, 4 }
  0x1b   :  { %v146_v4 = vsel %vm110_vm0, %v83_v49, -inf  ;;  %v153_v20 = vsel %vm110_vm0, %v84_v50, -inf  ;;  %v114_v60 = vrot.slane %v113_v14, 2  ;;  %v1490_v40 = vmax.f32 %v737_v7, %v837_v27 }
  0x1c   :  { %v120_v37 = vmax.f32 %v118_v51, %v119_v44  ;;  %v127_v21 = vmax.f32 %v125_v15, %v126_v5  ;;  %v147_v54 = vrot.slane %v146_v4, 4  ;;  %v134_v38 = vmax.f32 %v132_v59, %v133_v2 }
  0x1d   :  { %v141_v62 = vmax.f32 %v139_v3, %v140_v53  ;;  %v154_v39 = vrot.slane %v153_v20, 4  ;;  %v160_v48 = vsel %vm110_vm0, %v1490_v40, -inf  ;;  %v115_v58 = vmax.f32 %v113_v14, %v114_v60 }
  0x1e   :  { %v121_v52 = vrot.slane %v120_v37, 2  ;;  %v128_v43 = vrot.slane %v127_v21, 2  ;;  %v148_v22 = vmax.f32 %v146_v4, %v147_v54  ;;  %v135_v61 = vrot.slane %v134_v38, 2 }
  0x1f   :  { %v142_v49 = vrot.slane %v141_v62, 2  ;;  %v155_v44 = vmax.f32 %v153_v20, %v154_v39  ;;  %v161_v50 = vrot.slane %v160_v48, 4  ;;  %v116_v42 = vrot.slane %v115_v58, 1 }
  0x20   :  { %v122_v51 = vmax.f32 %v120_v37, %v121_v52  ;;  %v129_v5 = vmax.f32 %v127_v21, %v128_v43  ;;  %v149_v15 = vrot.slane %v148_v22, 2  ;;  %v136_v59 = vmax.f32 %v134_v38, %v135_v61 }
  0x21   :  { %v143_v53 = vmax.f32 %v141_v62, %v142_v49  ;;  %v156_v2 = vrot.slane %v155_v44, 2  ;;  %v162_v4 = vmax.f32 %v160_v48, %v161_v50  ;;  %v1094_v41 = vmax.f32 %v115_v58, %v116_v42 }
  0x22   :  { %v123_v3 = vrot.slane %v122_v51, 1  ;;  %v130_v13 = vrot.slane %v129_v5, 1  ;;  %v150_v54 = vmax.f32 %v148_v22, %v149_v15  ;;  %v137_v7 = vrot.slane %v136_v59, 1 }
  0x23   :  { %v144_v27 = vrot.slane %v143_v53, 1  ;;  %v157_v60 = vmax.f32 %v155_v44, %v156_v2  ;;  %v163_v52 = vrot.slane %v162_v4, 2  ;;  %v1491_v22 = vmax.f32 %v747_v9, %v842_v28 }
  0x24   :  { %v1096_v14 = vmax.f32 %v122_v51, %v123_v3  ;;  %v1098_v20 = vmax.f32 %v129_v5, %v130_v13  ;;  %v151_v43 = vrot.slane %v150_v54, 1  ;;  %v1100_v21 = vmax.f32 %v136_v59, %v137_v7 }
  0x25   :  { %v1102_v37 = vmax.f32 %v143_v53, %v144_v27  ;;  %v158_v62 = vrot.slane %v157_v60, 1  ;;  %v167_v42 = vsel %vm110_vm0, %v1491_v22, -inf  ;;  %v164_v39 = vmax.f32 %v162_v4, %v163_v52 }
  0x26   :  { %v1108_v38 = vmax.f32 %v150_v54, %v151_v43  ;;  %v168_v40 = vrot.slane %v167_v42, 4  ;;  %v1492_v13 = vmax.f32 %v752_v10, %v847_v29  ;;  %v1493_v49 = vmax.f32 %v757_v11, %v872_v34 }
  0x27   :  { %v1114_v58 = vmax.f32 %v157_v60, %v158_v62  ;;  %v1494_v9 = vmax.f32 %v762_v12, %v877_v35  ;;  %v165_v51 = vrot.slane %v164_v39, 1  ;;  %v1495_v29 = vmax.f32 %v782_v16, %v882_v36 }
  0x28   :  { %v174_v48 = vsel %vm110_vm0, %v1492_v13, -inf  ;;  %v181_v44 = vsel %vm110_vm0, %v1493_v49, -inf  ;;  %v169_v5 = vmax.f32 %v167_v42, %v168_v40  ;;  %v1496_v11 = vmax.f32 %v787_v17, %v915_v45 }
  0x29   :  { %v175_v61 = vrot.slane %v174_v48, 4  ;;  %v188_v28 = vsel %vm110_vm0, %v1494_v9, -inf  ;;  %v182_v15 = vrot.slane %v181_v44, 4  ;;  %v195_v59 = vsel %vm110_vm0, %v1495_v29, -inf }
  0x2a   :  { %v189_v50 = vrot.slane %v188_v28, 4  ;;  %v202_v34 = vsel %vm110_vm0, %v1496_v11, -inf  ;;  %v1497_v12 = vmax.f32 %v792_v18, %v920_v46  ;;  %v1136_v53 = vmax.f32 %v164_v39, %v165_v51 }
  0x2b   :  { %v176_v10 = vmax.f32 %v174_v48, %v175_v61  ;;  %v170_v2 = vrot.slane %v169_v5, 2  ;;  %v183_v3 = vmax.f32 %v181_v44, %v182_v15  ;;  %v196_v7 = vrot.slane %v195_v59, 4 }
  0x2c   :  { %v209_v35 = vsel %vm110_vm0, %v1497_v12, -inf  ;;  %v190_v54 = vmax.f32 %v188_v28, %v189_v50  ;;  %v203_v16 = vrot.slane %v202_v34, 4  ;;  %v1498_v17 = vmax.f32 %v797_v19, %v925_v47 }
  0x2d   :  { %v177_v4 = vrot.slane %v176_v10, 2  ;;  %v210_v36 = vrot.slane %v209_v35, 4  ;;  %v171_v27 = vmax.f32 %v169_v5, %v170_v2  ;;  %v184_v60 = vrot.slane %v183_v3, 2 }
  0x2e   :  { %v191_v43 = vrot.slane %v190_v54, 2  ;;  %v216_v45 = vsel %vm110_vm0, %v1498_v17, -inf  ;;  %v197_v46 = vmax.f32 %v195_v59, %v196_v7  ;;  %v204_v52 = vmax.f32 %v202_v34, %v203_v16 }
  0x2f   :  { %v178_v18 = vmax.f32 %v176_v10, %v177_v4  ;;  %v211_v62 = vmax.f32 %v209_v35, %v210_v36  ;;  %v172_v22 = vrot.slane %v171_v27, 1  ;;  %v185_v42 = vmax.f32 %v183_v3, %v184_v60 }
  0x30   :  { %v192_v39 = vmax.f32 %v190_v54, %v191_v43  ;;  %v217_v40 = vrot.slane %v216_v45, 4  ;;  %v198_v48 = vrot.slane %v197_v46, 2  ;;  %v205_v61 = vrot.slane %v204_v52, 2 }
  0x31   :  { %v179_v13 = vrot.slane %v178_v18, 1  ;;  %v212_v49 = vrot.slane %v211_v62, 2  ;;  %v1142_v44 = vmax.f32 %v171_v27, %v172_v22  ;;  %v186_v9 = vrot.slane %v185_v42, 1 }
  0x32   :  { %v193_v28 = vrot.slane %v192_v39, 1  ;;  %v218_v51 = vmax.f32 %v216_v45, %v217_v40  ;;  %v199_v47 = vmax.f32 %v197_v46, %v198_v48  ;;  %v206_v5 = vmax.f32 %v204_v52, %v205_v61 }
  0x33   :  { %v1144_v19 = vmax.f32 %v178_v18, %v179_v13  ;;  %v213_v15 = vmax.f32 %v211_v62, %v212_v49  ;;  %v1146_v50 = vmax.f32 %v185_v42, %v186_v9  ;;  %v1499_v59 = vmax.f32 %v817_v23, %v953_v55 }
  0x34   :  { %v1148_v10 = vmax.f32 %v192_v39, %v193_v28  ;;  %v219_v29 = vrot.slane %v218_v51, 2  ;;  %v200_v34 = vrot.slane %v199_v47, 1  ;;  %v207_v12 = vrot.slane %v206_v5, 1 }
  0x35   :  { %v223_v11 = vsel %vm110_vm0, %v1499_v59, -inf  ;;  %v214_v35 = vrot.slane %v213_v15, 1  ;;  %v1500_v54 = vmax.f32 %v822_v24, %v958_v56  ;;  %v1501_v7 = vmax.f32 %v827_v25, %v963_v57 }
  0x36   :  { %v224_v2 = vrot.slane %v223_v11, 4  ;;  %v220_v3 = vmax.f32 %v218_v51, %v219_v29  ;;  %v1502_v23 = vmax.f32 %v832_v26, %v981_v63  ;;  %v1166_v36 = vmax.f32 %v199_v47, %v200_v34 }
  0x37   :  { %v230_v4 = vsel %vm110_vm0, %v1500_v54, -inf  ;;  %v237_v16 = vsel %vm110_vm0, %v1501_v7, -inf  ;;  %v1168_v27 = vmax.f32 %v206_v5, %v207_v12  ;;  %v1170_v60 = vmax.f32 %v213_v15, %v214_v35  ;;  %v1508_v7 = vld [vmem:[#allocation10_spill] sm:$0xff] }
  0x38   :  { %v244_v55 = vsel %vm110_vm0, %v1502_v23, -inf  ;;  %v225_v43 = vmax.f32 %v223_v11, %v224_v2  ;;  %v221_v24 = vrot.slane %v220_v3, 1  ;;  %v231_v56 = vrot.slane %v230_v4, 4 }
  0x39   :  { %v238_v17 = vrot.slane %v237_v16, 4  ;;  %v245_v45 = vrot.slane %v244_v55, 4  ;;  %v1503_v25 = vmax.f32 %v852_v30, %v986_v0  ;;  %v1504_v26 = vmax.f32 %v857_v31, %v991_v1 }
  0x3a   :  { %v226_v18 = vrot.slane %v225_v43, 2  ;;  %v1505_v46 = vmax.f32 %v862_v32, %v1004_v6  ;;  %v1184_v62 = vmax.f32 %v220_v3, %v221_v24  ;;  %v232_v22 = vmax.f32 %v230_v4, %v231_v56  ;;  %v1507_v4 = vld [vmem:[#allocation2_spill] sm:$0xff] }
  0x3b   :  { %v251_v57 = vsel %vm110_vm0, %v1503_v25, -inf  ;;  %v258_v63 = vsel %vm110_vm0, %v1504_v26, -inf  ;;  %v239_v42 = vmax.f32 %v237_v16, %v238_v17  ;;  %v246_v39 = vmax.f32 %v244_v55, %v245_v45  ;;  %v1510_v26 = vld [vmem:[#allocation3_spill] sm:$0xff] }
  0x3c   :  { %v265_v52 = vsel %vm110_vm0, %v1505_v46, -inf  ;;  %v227_v40 = vmax.f32 %v225_v43, %v226_v18  ;;  %v252_v13 = vrot.slane %v251_v57, 4  ;;  %v259_v30 = vrot.slane %v258_v63, 4 }
  0x3d   :  { %v266_v0 = vrot.slane %v265_v52, 4  ;;  %v233_v48 = vrot.slane %v232_v22, 2  ;;  %v240_v61 = vrot.slane %v239_v42, 2  ;;  %v247_v49 = vrot.slane %v246_v39, 2 }
  0x3e   :  { %v1506_v31 = vmax.f32 %v867_v33, %v1009_v8  ;;  %v228_v32 = vrot.slane %v227_v40, 1  ;;  %v253_v6 = vmax.f32 %v251_v57, %v252_v13  ;;  %v260_v9 = vmax.f32 %v258_v63, %v259_v30  ;;  %v1511_v63 = vld [vmem:[#allocation11_spill] sm:$0xff]  ;;  %v1516_v13 = vld [vmem:[#allocation5_spill] sm:$0xff] }
  0x3f   :  { %v267_v28 = vmax.f32 %v265_v52, %v266_v0  ;;  %v234_v51 = vmax.f32 %v232_v22, %v233_v48  ;;  %v241_v47 = vmax.f32 %v239_v42, %v240_v61  ;;  %v248_v5 = vmax.f32 %v246_v39, %v247_v49  ;;  %v1513_v22 = vld [vmem:[#allocation4_spill] sm:$0xff]  ;;  %v1517_v30 = vld [vmem:[#allocation13_spill] sm:$0xff] }
  0x40   :  { %v272_v1 = vsel %vm110_vm0, %v1506_v31, -inf  ;;  %v1190_v29 = vmax.f32 %v227_v40, %v228_v32  ;;  %v254_v59 = vrot.slane %v253_v6, 2  ;;  %v261_v11 = vrot.slane %v260_v9, 2  ;;  %v1514_v42 = vld [vmem:[#allocation12_spill] sm:$0xff] }
  0x41   :  { %v273_v15 = vrot.slane %v272_v1, 4  ;;  %v268_v34 = vrot.slane %v267_v28, 2  ;;  %v235_v12 = vrot.slane %v234_v51, 1  ;;  %v242_v35 = vrot.slane %v241_v47, 1 }
  0x42   :  { %v249_v2 = vrot.slane %v248_v5, 1  ;;  %v255_v33 = vmax.f32 %v253_v6, %v254_v59  ;;  %v262_v8 = vmax.f32 %v260_v9, %v261_v11  ;;  %v1509_v16 = vmax.f32 %v1507_v4, %v1508_v7  ;;  %v1522_v11 = vld [vmem:[#allocation7_spill] sm:$0xff] }
  0x43   :  { %v274_v3 = vmax.f32 %v272_v1, %v273_v15  ;;  %v269_v54 = vmax.f32 %v267_v28, %v268_v34  ;;  %v1196_v55 = vmax.f32 %v234_v51, %v235_v12  ;;  %v1198_v43 = vmax.f32 %v241_v47, %v242_v35  ;;  %v1519_v47 = vld [vmem:[#allocation6_spill] sm:$0xff]  ;;  %v1523_v34 = vld [vmem:[#allocation15_spill] sm:$0xff] }
  0x44   :  { %v279_v23 = vsel %vm110_vm0, %v1509_v16, -inf  ;;  %v1200_v24 = vmax.f32 %v248_v5, %v249_v2  ;;  %v256_v17 = vrot.slane %v255_v33, 1  ;;  %v263_v45 = vrot.slane %v262_v8, 1  ;;  %v1520_v5 = vld [vmem:[#allocation14_spill] sm:$0xff]  ;;  %v1525_v2 = vld [vmem:[#allocation8_spill] sm:$0xff] }
  0x45   :  { %v275_v56 = vrot.slane %v274_v3, 2  ;;  %v270_v18 = vrot.slane %v269_v54, 1  ;;  %v280_v25 = vrot.slane %v279_v23, 4  ;;  %v1512_v46 = vmax.f32 %v1510_v26, %v1511_v63  ;;  %v1528_v63 = vld [vmem:[#allocation9_spill] sm:$0xff] }
  0x46   :  { %v1515_v39 = vmax.f32 %v1513_v22, %v1514_v42  ;;  %v1518_v0 = vmax.f32 %v1516_v13, %v1517_v30  ;;  %v1214_v61 = vmax.f32 %v255_v33, %v256_v17  ;;  %v1216_v49 = vmax.f32 %v262_v8, %v263_v45 }
  0x47   :  { %v276_v57 = vmax.f32 %v274_v3, %v275_v56  ;;  %v286_v52 = vsel %vm110_vm0, %v1512_v46, -inf  ;;  %v1218_v31 = vmax.f32 %v269_v54, %v270_v18  ;;  %v281_v1 = vmax.f32 %v279_v23, %v280_v25  ;;  %v1526_v3 = vld [vmem:[#allocation16_spill] sm:$0xff]  ;;  %v1529_v46 = vld [vmem:[#allocation17_spill] sm:$0xff] }
  0x48   :  { %v293_v40 = vsel %vm110_vm0, %v1515_v39, -inf  ;;  %v300_v48 = vsel %vm110_vm0, %v1518_v0, -inf  ;;  %v287_v6 = vrot.slane %v286_v52, 4  ;;  %v1521_v15 = vmax.f32 %v1519_v47, %v1520_v5 }
  0x49   :  { %v277_v32 = vrot.slane %v276_v57, 1  ;;  %v294_v9 = vrot.slane %v293_v40, 4  ;;  %v301_v28 = vrot.slane %v300_v48, 4  ;;  %v282_v51 = vrot.slane %v281_v1, 2 }
  0x4a   :  { %v307_v59 = vsel %vm110_vm0, %v1521_v15, -inf  ;;  %v1524_v12 = vmax.f32 %v1522_v11, %v1523_v34  ;;  %v1527_v33 = vmax.f32 %v1525_v2, %v1526_v3  ;;  %v288_v4 = vmax.f32 %v286_v52, %v287_v6  ;;  %v614_v15 = vld [vmem:[%s1456_s2] ss:$0 sm:$0xff] }
  0x4b   :  { %v1232_v54 = vmax.f32 %v276_v57, %v277_v32  ;;  %v295_v7 = vmax.f32 %v293_v40, %v294_v9  ;;  %v302_v16 = vmax.f32 %v300_v48, %v301_v28  ;;  %v283_v23 = vmax.f32 %v281_v1, %v282_v51 }
  0x4c   :  { %v314_v35 = vsel %vm110_vm0, %v1524_v12, -inf  ;;  %v321_v8 = vsel %vm110_vm0, %v1527_v33, -inf  ;;  %v308_v56 = vrot.slane %v307_v59, 4  ;;  %v289_v18 = vrot.slane %v288_v4, 2 }
  0x4d   :  { %v315_v17 = vrot.slane %v314_v35, 4  ;;  %v322_v45 = vrot.slane %v321_v8, 4  ;;  %v296_v25 = vrot.slane %v295_v7, 2  ;;  %v303_v26 = vrot.slane %v302_v16, 2 }
  0x4e   :  { %v1530_v22 = vmax.f32 %v1528_v63, %v1529_v46  ;;  %v284_v39 = vrot.slane %v283_v23, 1  ;;  %v309_v13 = vmax.f32 %v307_v59, %v308_v56  ;;  %v290_v0 = vmax.f32 %v288_v4, %v289_v18 }
  0x4f   :  { %v316_v30 = vmax.f32 %v314_v35, %v315_v17  ;;  %v323_v57 = vmax.f32 %v321_v8, %v322_v45  ;;  %v297_v52 = vmax.f32 %v295_v7, %v296_v25  ;;  %v304_v40 = vmax.f32 %v302_v16, %v303_v26 }
  0x50   :  { %v328_v42 = vsel %vm110_vm0, %v1530_v22, -inf  ;;  %v285_v1 = vmax.f32 %v283_v23, %v284_v39  ;;  %v310_v32 = vrot.slane %v309_v13, 2  ;;  %v291_v28 = vrot.slane %v290_v0, 1 }
  0x51   :  { %v329_v48 = vrot.slane %v328_v42, 4  ;;  %v317_v6 = vrot.slane %v316_v30, 2  ;;  %v324_v9 = vrot.slane %v323_v57, 2  ;;  %v298_v51 = vrot.slane %v297_v52, 1 }
  0x52   :  { %v305_v47 = vrot.slane %v304_v40, 1  ;;  %v311_v11 = vmax.f32 %v309_v13, %v310_v32  ;;  %v1242_v12 = vsub.f32 %v1094_v41, %v614_v15  ;;  %v292_v35 = vmax.f32 %v290_v0, %v291_v28 }
  0x53   :  { %v330_v5 = vmax.f32 %v328_v42, %v329_v48  ;;  %v318_v59 = vmax.f32 %v316_v30, %v317_v6  ;;  %v325_v34 = vmax.f32 %v323_v57, %v324_v9  ;;  %v299_v2 = vmax.f32 %v297_v52, %v298_v51 }
  0x54   :  { %v306_v3 = vmax.f32 %v304_v40, %v305_v47  ;;  %v312_v8 = vrot.slane %v311_v11, 1  ;;  %v1245_v16 = vsub.f32 %v1096_v14, %v614_v15  ;;  %v1248_v56 = vsub.f32 %v1098_v20, %v614_v15 }
  0x55   :  { %v331_v33 = vrot.slane %v330_v5, 2  ;;  %v319_v4 = vrot.slane %v318_v59, 1  ;;  %v326_v7 = vrot.slane %v325_v34, 1  ;;  %v1251_v17 = vsub.f32 %v1100_v21, %v614_v15 }
  0x56   :  { %v1254_v41 = vsub.f32 %v1102_v37, %v614_v15  ;;  %v313_v45 = vmax.f32 %v311_v11, %v312_v8  ;;  %v1257_v26 = vsub.f32 %v1108_v38, %v614_v15  ;;  %v1260_v14 = vsub.f32 %v1114_v58, %v614_v15 }
  0x57   :  { %v332_v23 = vmax.f32 %v330_v5, %v331_v33  ;;  %v320_v18 = vmax.f32 %v318_v59, %v319_v4  ;;  %v327_v25 = vmax.f32 %v325_v34, %v326_v7  ;;  %v1263_v46 = vsub.f32 %v1136_v53, %v614_v15 }
  0x58   :  { %v1266_v20 = vsub.f32 %v1142_v44, %v614_v15  ;;  %v1269_v21 = vsub.f32 %v1144_v19, %v614_v15  ;;  %v1272_v37 = vsub.f32 %v1146_v50, %v614_v15  ;;  %v1275_v22 = vsub.f32 %v1148_v10, %v614_v15 }
  0x59   :  { %v333_v63 = vrot.slane %v332_v23, 1  ;;  %v1278_v38 = vsub.f32 %v1166_v36, %v614_v15  ;;  %v1281_v42 = vsub.f32 %v1168_v27, %v614_v15  ;;  %v1284_v53 = vsub.f32 %v1170_v60, %v614_v15 }
  0x5a   :  { %v1287_v44 = vsub.f32 %v1184_v62, %v614_v15  ;;  %v1290_v19 = vsub.f32 %v1190_v29, %v614_v15  ;;  %v1293_v50 = vsub.f32 %v1196_v55, %v614_v15  ;;  %v1296_v10 = vsub.f32 %v1198_v43, %v614_v15 }
  0x5b   :  { %v334_v58 = vmax.f32 %v332_v23, %v333_v63  ;;  %v1299_v36 = vsub.f32 %v1200_v24, %v614_v15  ;;  %v1302_v27 = vsub.f32 %v1214_v61, %v614_v15  ;;  %v1305_v60 = vsub.f32 %v1216_v49, %v614_v15 }
  0x5c   :  { %v1308_v62 = vsub.f32 %v1218_v31, %v614_v15  ;;  %v1311_v29 = vsub.f32 %v1232_v54, %v614_v15  ;;  %v1313_v55 = vsub.f32 %v285_v1, %v614_v15  ;;  %v1315_v39 = vsub.f32 %v292_v35, %v614_v15 }
  0x5d   :  { %v1317_v43 = vsub.f32 %v299_v2, %v614_v15  ;;  %v1319_v24 = vsub.f32 %v306_v3, %v614_v15  ;;  %v1321_v13 = vsub.f32 %v313_v45, %v614_v15  ;;  %v1323_v61 = vsub.f32 %v320_v18, %v614_v15 }
  0x5e   :  { %v1325_v49 = vsub.f32 %v327_v25, %v614_v15  ;;  %v1327_v30 = vsub.f32 %v334_v58, %v614_v15  ;;  %v647_v31 = vpack.c.bf16 %v1242_v12, %v1242_v12  ;;  %v648_v54 = vpack.c.bf16 %v1245_v16, %v1245_v16 }
  0x5f   :  { %v649_v57 = vpack.c.bf16 %v1248_v56, %v1248_v56  ;;  %v650_v0 = vpack.c.bf16 %v1251_v17, %v1251_v17  ;;  %v651_v52 = vpack.c.bf16 %v1254_v41, %v1254_v41  ;;  %v652_v40 = vpack.c.bf16 %v1257_v26, %v1257_v26 }
  0x60   :  { %v653_v48 = vpack.c.bf16 %v1260_v14, %v1260_v14  ;;  %v654_v1 = vpack.c.bf16 %v1263_v46, %v1263_v46  ;;  %v655_v32 = vpack.c.bf16 %v1266_v20, %v1266_v20  ;;  %v656_v6 = vpack.c.bf16 %v1269_v21, %v1269_v21 }
  0x61   :  { %v657_v9 = vpack.c.bf16 %v1272_v37, %v1272_v37  ;;  %v658_v28 = vpack.c.bf16 %v1275_v22, %v1275_v22  ;;  %v659_v51 = vpack.c.bf16 %v1278_v38, %v1278_v38  ;;  %v660_v47 = vpack.c.bf16 %v1281_v42, %v1281_v42 }
  0x62   :  { %v661_v5 = vpack.c.bf16 %v1284_v53, %v1284_v53  ;;  %v662_v15 = vpack.c.bf16 %v1287_v44, %v1287_v44  ;;  %v663_v11 = vpack.c.bf16 %v1290_v19, %v1290_v19  ;;  %v664_v59 = vpack.c.bf16 %v1293_v50, %v1293_v50 }
  0x63   :  { %v665_v34 = vpack.c.bf16 %v1296_v10, %v1296_v10  ;;  %v666_v12 = vpack.c.bf16 %v1299_v36, %v1299_v36  ;;  %v667_v35 = vpack.c.bf16 %v1302_v27, %v1302_v27  ;;  %v668_v2 = vpack.c.bf16 %v1305_v60, %v1305_v60 }
  0x64   :  { %v669_v3 = vpack.c.bf16 %v1308_v62, %v1308_v62  ;;  %v670_v33 = vpack.c.bf16 %v1311_v29, %v1311_v29  ;;  %v671_v8 = vpack.c.bf16 %v1313_v55, %v1313_v55  ;;  %v672_v4 = vpack.c.bf16 %v1315_v39, %v1315_v39 }
  0x65   :  { %v673_v7 = vpack.c.bf16 %v1317_v43, %v1317_v43  ;;  %v674_v16 = vpack.c.bf16 %v1319_v24, %v1319_v24  ;;  %v675_v23 = vpack.c.bf16 %v1321_v13, %v1321_v13  ;;  %v676_v56 = vpack.c.bf16 %v1323_v61, %v1323_v61 }
  0x66   :  { %v677_v17 = vpack.c.bf16 %v1325_v49, %v1325_v49  ;;  %v678_v41 = vpack.c.bf16 %v1327_v30, %v1327_v30  ;;  %v502_v45 = vunpack.c.l.b16 %v647_v31  ;;  %v503_v18 = vunpack.c.l.b16 %v648_v54 }
  0x67   :  { %v504_v25 = vunpack.c.l.b16 %v649_v57  ;;  %v505_v26 = vunpack.c.l.b16 %v650_v0  ;;  %v506_v63 = vunpack.c.l.b16 %v651_v52  ;;  %v507_v14 = vunpack.c.l.b16 %v652_v40 }
  0x68   :  { %v508_v46 = vunpack.c.l.b16 %v653_v48  ;;  %v509_v20 = vunpack.c.l.b16 %v654_v1  ;;  %v510_v21 = vunpack.c.l.b16 %v655_v32  ;;  %v511_v37 = vunpack.c.l.b16 %v656_v6 }
  0x69   :  { %v512_v22 = vunpack.c.l.b16 %v657_v9  ;;  %v513_v38 = vunpack.c.l.b16 %v658_v28  ;;  %v514_v58 = vunpack.c.l.b16 %v659_v51  ;;  %v515_v42 = vunpack.c.l.b16 %v660_v47 }
  0x6a   :  { %v516_v53 = vunpack.c.l.b16 %v661_v5  ;;  %v1393_v44 = vunpack.c.l.b16 %v662_v15  ;;  %v518_v19 = vunpack.c.l.b16 %v663_v11  ;;  %v519_v50 = vunpack.c.l.b16 %v664_v59 }
  0x6b   :  { %v520_v10 = vunpack.c.l.b16 %v665_v34  ;;  %v521_v36 = vunpack.c.l.b16 %v666_v12  ;;  %v522_v27 = vunpack.c.l.b16 %v667_v35  ;;  %v523_v60 = vunpack.c.l.b16 %v668_v2 }
  0x6c   :  { %v524_v62 = vunpack.c.l.b16 %v669_v3  ;;  %v1395_v29 = vunpack.c.l.b16 %v670_v33  ;;  %v526_v55 = vunpack.c.l.b16 %v671_v8  ;;  %v527_v39 = vunpack.c.l.b16 %v672_v4 }
  0x6d   :  { %v528_v43 = vunpack.c.l.b16 %v673_v7  ;;  %v1397_v24 = vunpack.c.l.b16 %v674_v16  ;;  %v1399_v13 = vunpack.c.l.b16 %v675_v23  ;;  %v1401_v61 = vunpack.c.l.b16 %v676_v56 }
  0x6e   :  { %v1403_v49 = vunpack.c.l.b16 %v677_v17  ;;  %v1405_v30 = vunpack.c.l.b16 %v678_v41  ;;  %v534_v31 = vrot.slane %v503_v18, 7  ;;  %v537_v54 = vrot.slane %v504_v25, 6 }
  0x6f   :  { %v540_v57 = vrot.slane %v505_v26, 5  ;;  %v543_v0 = vrot.slane %v506_v63, 4  ;;  %vm544_vm4 = vcmask 1044484   ;;  %v546_v52 = vrot.slane %v507_v14, 3 }
  0x70   :  { %vm547_vm5 = vcmask 1045509   ;;  %v549_v40 = vrot.slane %v508_v46, 2  ;;  %v536_v48 = vsel %vm535_vm1, %v534_v31, %v502_v45  ;;  %vm550_vm6 = vcmask 1046534  }
  0x71   :  { %v552_v1 = vrot.slane %v509_v20, 1  ;;  %vm553_vm7 = vcmask 1047559   ;;  %v539_v32 = vsel %vm538_vm2, %v537_v54, %v536_v48  ;;  %v555_v6 = vrot.slane %v511_v37, 7 }
  0x72   :  { %v557_v9 = vrot.slane %v512_v22, 6  ;;  %v559_v28 = vrot.slane %v513_v38, 5  ;;  %v542_v51 = vsel %vm541_vm3, %v540_v57, %v539_v32  ;;  %v561_v47 = vrot.slane %v514_v58, 4 }
  0x73   :  { %v563_v5 = vrot.slane %v515_v42, 3  ;;  %v565_v15 = vrot.slane %v516_v53, 2  ;;  %v545_v11 = vsel %vm544_vm4, %v543_v0, %v542_v51  ;;  %v556_v59 = vsel %vm535_vm1, %v555_v6, %v510_v21 }
  0x74   :  { %v567_v34 = vrot.slane %v1393_v44, 1  ;;  %v569_v12 = vrot.slane %v519_v50, 7  ;;  %v548_v35 = vsel %vm547_vm5, %v546_v52, %v545_v11  ;;  %v558_v2 = vsel %vm538_vm2, %v557_v9, %v556_v59 }
  0x75   :  { %v571_v3 = vrot.slane %v520_v10, 6  ;;  %v573_v33 = vrot.slane %v521_v36, 5  ;;  %v551_v8 = vsel %vm550_vm6, %v549_v40, %v548_v35  ;;  %v560_v4 = vsel %vm541_vm3, %v559_v28, %v558_v2 }
  0x76   :  { %v570_v7 = vsel %vm535_vm1, %v569_v12, %v518_v19  ;;  %v575_v16 = vrot.slane %v522_v27, 4  ;;  %v554_v23 = vsel %vm553_vm7, %v552_v1, %v551_v8  ;;  %v562_v56 = vsel %vm544_vm4, %v561_v47, %v560_v4 }
  0x77   :  { %v572_v17 = vsel %vm538_vm2, %v571_v3, %v570_v7  ;;  %v577_v41 = vrot.slane %v523_v60, 3  ;;  %v564_v45 = vsel %vm547_vm5, %v563_v5, %v562_v56  ;;  %v579_v25 = vrot.slane %v524_v62, 2 }
  0x78   :  { %v574_v18 = vsel %vm541_vm3, %v573_v33, %v572_v17  ;;  %v581_v26 = vrot.slane %v1395_v29, 1  ;;  %v566_v63 = vsel %vm550_vm6, %v565_v15, %v564_v45  ;;  %v583_v46 = vrot.slane %v527_v39, 7 }
  0x79   :  { %v576_v14 = vsel %vm544_vm4, %v575_v16, %v574_v18  ;;  %v585_v20 = vrot.slane %v528_v43, 6  ;;  %v568_v21 = vsel %vm553_vm7, %v567_v34, %v566_v63  ;;  %v587_v22 = vrot.slane %v1397_v24, 5 }
  0x7a   :  { %v578_v37 = vsel %vm547_vm5, %v577_v41, %v576_v14  ;;  %v589_v38 = vrot.slane %v1399_v13, 4  ;;  %v584_v42 = vsel %vm535_vm1, %v583_v46, %v526_v55  ;;  %v591_v53 = vrot.slane %v1401_v61, 3 }
  0x7b   :  { %v580_v58 = vsel %vm550_vm6, %v579_v25, %v578_v37  ;;  %v593_v44 = vrot.slane %v1403_v49, 2  ;;  %v586_v50 = vsel %vm538_vm2, %v585_v20, %v584_v42  ;;  %v595_v10 = vrot.slane %v1405_v30, 1 }
  0x7c   :  { %v582_v19 = vsel %vm553_vm7, %v581_v26, %v580_v58  ;;  %v597_v36 = vpack.c.b16 %v554_v23, %v554_v23  ;;  %v588_v27 = vsel %vm541_vm3, %v587_v22, %v586_v50  ;;  %v598_v60 = vpack.c.b16 %v568_v21, %v568_v21 }
  0x7d   :  { %v599_v62 = vpack.c.b16 %v582_v19, %v582_v19  ;;  %vm605_vm8 = vcmask 388096   ;;  %v590_v29 = vsel %vm544_vm4, %v589_v38, %v588_v27 }
  0x7e   :  { %606 = vst.msk [vmem:[%s1457_s3] sm:$0xf] %vm605_vm8, %v597_v36  ;;  %v592_v55 = vsel %vm547_vm5, %v591_v53, %v590_v29  ;;  %607 = vst.msk [vmem:[%s1457_s3 + $0x4] sm:$0xf] %vm605_vm8, %v598_v60 }
  0x7f   :  { %608 = vst.msk [vmem:[%s1457_s3 + $0x8] sm:$0xf] %vm605_vm8, %v599_v62  ;;  %v594_v39 = vsel %vm550_vm6, %v593_v44, %v592_v55 }
  0x80   :  { %v596_v43 = vsel %vm553_vm7, %v595_v10, %v594_v39 }
  0x81   :  { %v600_v24 = vpack.c.b16 %v596_v43, %v596_v43 }
  0x83   :  { %609 = vst.msk [vmem:[%s1457_s3 + $0xc] sm:$0xf] %vm605_vm8, %v600_v24 }

// kernel: edsr_forward.20
= control target key start
LH: loop header
LB: loop body
LE: loop exit
PB: predicated region body
PF: predicated region fallthrough
CT: control target
= control target key end

     0   :  { %s662_s12 = smov 0   ;;  %s731_s0 = inlined_call_operand.vmem [shape: bf16[2,18,54], index: 0, kind: input, shape index: {}]   ;;  %s732_s1 = inlined_call_operand.vmem [shape: bf16[3,54,128], index: 1, kind: input, shape index: {}]   ;;  %s733_s2 = inlined_call_operand.vmem [shape: f32[1,128], index: 2, kind: input, shape index: {}]   ;;  %s734_s3 = inlined_call_operand.vmem [shape: bf16[2,16,128], index: 3, kind: output, shape index: {}]  }
   0x1 LB: > { %s504_s13 = sadd.s32 4294967295, %s638_s12   ;;  %p508_p0 = scmp.ge.s32.totalorder %s638_s12, 1  ;;  %s638_s12 = sphi %s662_s12, %s13_s12  }
   0x2   : > { %p137_p1 = scmp.lt.s32.totalorder %s638_s12, 3 }
   0x4   : > { %p138_p2 = pnand %p508_p0, %p137_p1 }
   0x5   : > { %p161_p3 = scmp.lt.s32.totalorder (!%p138_p2), %s504_s13, 1 }
   0x6   : > { %141 = sbr.rel (%p138_p2) target bundleno = 248 (0xf8), region = 32 }
   0xb   : > { %v618_v0 = vld [vmem:[%s732_s1 + $0x34] ss:$0 sps:$4 sm:$0x77]   ;;  %v640_v1 = vmov 0.0   ;;  %vm236_vm0 = vcmask 1042432   ;;  %v620_v5 = vld [vmem:[%s732_s1 + $0x2c] sm:$0xff]  }
   0xc   : > { %571 = vmatprep.subr.bf16.mxu0 %v640_v1  ;;  %583 = vmatprep.subr.bf16.mxu1 %v640_v1  ;;  %v619_v2 = vld [vmem:[%s732_s1 + $0x18] ss:$0 sps:$4 sm:$0x77]   ;;  %v238_v3 = vsel %vm236_vm0, %v618_v0, 0  ;;  %v621_v6 = vld [vmem:[%s732_s1 + $0x10] sm:$0xff]   ;;  %vm641_vm1 = vmmov 0  }
   0xd   : > { %572 = vmatpush3.bf16.msra.mxu0 %v238_v3  ;;  %v305_v4 = vsel %vm236_vm0, %v619_v2, 0  ;;  %579 = vmatprep.mubr.msk.bf16.mxu0 %vm641_vm1, %v640_v1  ;;  %v622_v7 = vld [vmem:[%s732_s1 + $0x24] sm:$0xff]   ;;  %s736_s13 = smov (!%p161_p3, %s504_s13), 1  ;;  %v624_v9 = vld [vmem:[%s732_s1 + $0x1c] sm:$0xff]   ;;  %vm232_vm2 = vcmask 441344   ;;  %vm356_vm4 = vcmask 1046528  }
   0xe   : > { %584 = vmatpush3.bf16.msra.mxu1 %v305_v4  ;;  %573 = vmatprep.subr.bf16.mxu0 %v640_v1  ;;  %v623_v8 = vld [vmem:[%s732_s1 + $0x8] sm:$0xff]   ;;  %s607_s26 = smul.u32 12, %s736_s13  ;;  %v625_v10 = vld [vmem:[%s732_s1] sm:$0xff]   ;;  %v628_v16 = vld [vmem:[%s732_s1 + $0x50] ss:$0 sps:$4 sm:$0x77]  }
   0xf   : > { %585 = vmatprep.subr.bf16.mxu1 %v640_v1  ;;  %591 = vmatprep.mubr.msk.bf16.mxu1 %vm641_vm1, %v640_v1  ;;  %vm198_vm3 = vsmask.f32 7424  ;;  %v385_v20 = vsel %vm236_vm0, %v628_v16, 0  ;;  %v629_v22 = vld [vmem:[%s732_s1 + $0x48] sm:$0xff]   ;;  %v630_v23 = vld [vmem:[%s732_s1 + $0x40] sm:$0xff]   ;;  %v631_v24 = vld [vmem:[%s732_s1 + $0x38] sm:$0xff]  }
  0x10   : > { %s165_s6 = scalar_lea.vmem %s731_s0, %s607_s26  ;;  %v543_v41 = vld [vmem:[%s733_s2] ss:$0 sm:$0xff]  ;;  %s548_s19 = sshll.u32 %s736_s13, 3 }
  0x11   : > { %574 = vmatpush3.bf16.msra.mxu0 %v620_v5  ;;  %v626_v11 = vld [vmem:[%s165_s6] sm:$0xff]   ;;  %v627_v12 = vld [vmem:[%s165_s6 + $0x8] ss:$0 sps:$4 sm:$0x11]   ;;  %s170_s22 = scalar_lea.vmem %s734_s3, %s548_s19 }
  0x12   : > { %586 = vmatpush3.bf16.msra.mxu1 %v621_v6  ;;  %575 = vmatprep.subr.bf16.mxu0 %v640_v1  ;;  %v200_v13 = vshrl.u32 %v626_v11, 16  ;;  %v202_v14 = vshll.u32 %v626_v11, 16  ;;  %v207_v15 = vshll.u32 %v627_v12, 16  ;;  %v357_v25 = vrot.slane %v626_v11, 1 }
  0x13   : > { %587 = vmatprep.subr.bf16.mxu1 %v640_v1  ;;  %v358_v26 = vrot.slane %v627_v12, 1 }
  0x14   : > { %v204_v17 = vrot.slane %v202_v14, 1  ;;  %v209_v18 = vrot.slane %v207_v15, 1 }
  0x15   : > { %576 = vmatpush3.bf16.msra.mxu0 %v622_v7  ;;  %v359_v27 = vsel %vm356_vm4, %v357_v25, %v358_v26 }
  0x16   : > { %588 = vmatpush3.bf16.msra.mxu1 %v623_v8  ;;  %577 = vmatprep.subr.bf16.mxu0 %v640_v1  ;;  %v205_v19 = vor.u32 %v204_v17, %v200_v13 }
  0x17   : > { %589 = vmatprep.subr.bf16.mxu1 %v640_v1 }
  0x18   : > { %v210_v21 = vsel %vm198_vm3, %v205_v19, %v209_v18 }
  0x19   : > { %578 = vmatpush3.bf16.msra.mxu0 %v624_v9 }
  0x1a   : > { %590 = vmatpush3.bf16.msra.mxu1 %v625_v10  ;;  %595 = vmatprep.subr.bf16.mxu0 %v640_v1 }
  0x1c   : > { %580 = vmatmul.mubr.msk.bf16.vlgmr.msra.gmra.mxu0 %vm232_vm2, %v210_v21 }
  0x1d   : > { %592 = vmatmul.mubr.msk.bf16.vlgmr.msra.gmra.mxu1 %vm232_vm2, %v626_v11  ;;  %596 = vmatpush3.bf16.msra.mxu0 %v385_v20 }
  0x1e   : > { %603 = vmatprep.mubr.msk.bf16.mxu0 %vm641_vm1, %v640_v1  ;;  %597 = vmatprep.subr.bf16.mxu0 %v640_v1 }
  0x21   : > { %598 = vmatpush3.bf16.msra.mxu0 %v629_v22 }
  0x22   : > { %599 = vmatprep.subr.bf16.mxu0 %v640_v1 }
  0x25   : > { %600 = vmatpush3.bf16.msra.mxu0 %v630_v23 }
  0x26   : > { %601 = vmatprep.subr.bf16.mxu0 %v640_v1 }
  0x29   : > { %602 = vmatpush3.bf16.msra.mxu0 %v631_v24 }
  0x2c   : > { %604 = vmatmul.mubr.msk.bf16.vlgmr.msra.gmra.mxu0 %vm232_vm2, %v359_v27 }
  0xdc   : > { %v274_v30 = vpop.f32.mrf.mxu0 }
  0xdd   : > { %v341_v28 = vpop.f32.mrf.mxu1 }
  0xde   : > { %v581_v32 = vpop.f32.mrf.mxu0  ;;  %v342_v37 = vadd.f32 %v341_v28, %v274_v30 }
  0xdf   : > { %v593_v29 = vpop.f32.mrf.mxu1 }
  0xe0   : > { %v277_v34 = vpop.f32.mrf.mxu0 }
  0xe1   : > { %v344_v31 = vpop.f32.mrf.mxu1 }
  0xe2   : > { %v582_v35 = vpop.f32.mrf.mxu0  ;;  %v345_v39 = vadd.f32 %v344_v31, %v277_v34 }
  0xe3   : > { %v594_v33 = vpop.f32.mrf.mxu1 }
  0xec   : > { %v421_v36 = vpop.f32.mrf.mxu0 }
  0xed   : > { %v428_v40 = vadd.f32 %v421_v36, %v342_v37 }
  0xee   : > { %v605_v38 = vpop.f32.mrf.mxu0 }
  0xef   : > { %v437_v45 = vadd.f32 %v543_v41, %v428_v40 }
  0xf0   : > { %v424_v42 = vpop.f32.mrf.mxu0 }
  0xf1   : > { %v429_v43 = vadd.f32 %v424_v42, %v345_v39 }
  0xf2   : > { %v606_v44 = vpop.f32.mrf.mxu0 }
  0xf3   : > { %v438_v46 = vadd.f32 %v543_v41, %v429_v43 }
  0xf5   : > { %v554_v47 = vpack.c.bf16 %v438_v46, %v437_v45 }
  0xf7   : > { %555 = vst [vmem:[%s170_s22] sm:$0xff] %v554_v47  }
  0xf8 PF: > { %s13_s12 = sadd.s32 1, %s638_s12  }
  0xf9   : > { %p10_p4 = scmp.ge.s32.totalorder %s13_s12, 4  }
  0xfb   :  { %12 = sbr.rel (!%p10_p4) target bundleno = 1 (0x1), region = 64 }

// kernel: edsr_forward.21
= control target key start
LH: loop header
LB: loop body
LE: loop exit
PB: predicated region body
PF: predicated region fallthrough
CT: control target
= control target key end

     0   :  { %vm91_vm0 = vcmask 517120   ;;  %vm284_vm1 = vcmask 1041409   ;;  %vm286_vm2 = vcmask 1042434   ;;  %vm288_vm3 = vcmask 1043459   ;;  %s578_s0 = inlined_call_operand.vmem [shape: bf16[16,2,64], index: 0, kind: input, shape index: {}]   ;;  %s579_s1 = inlined_call_operand.vmem [shape: bf16[16,2,64], index: 1, kind: input, shape index: {}]   ;;  %s580_s2 = inlined_call_operand.vmem [shape: bf16[16,64], index: 2, kind: output, shape index: {}]  }
   0x1   :  { %v366_v0 = vld [vmem:[%s578_s0] sm:$0x1]  ;;  %v371_v1 = vld [vmem:[%s578_s0 + $0x1] sm:$0x1]  ;;  %v376_v2 = vld [vmem:[%s578_s0 + $0x2] sm:$0x1] }
   0x2   :  { %v381_v3 = vld [vmem:[%s578_s0 + $0x3] sm:$0x1]  ;;  %v386_v4 = vld [vmem:[%s578_s0 + $0x4] sm:$0x1]  ;;  %v391_v5 = vld [vmem:[%s578_s0 + $0x5] sm:$0x1]  ;;  %v27_v12 = vunpack.c.l.bf16 %v366_v0  ;;  %v28_v13 = vunpack.c.l.bf16 %v371_v1  ;;  %v29_v17 = vunpack.c.l.bf16 %v376_v2 }
   0x3   :  { %v396_v6 = vld [vmem:[%s578_s0 + $0x6] sm:$0x1]  ;;  %v401_v7 = vld [vmem:[%s578_s0 + $0x7] sm:$0x1]  ;;  %v406_v8 = vld [vmem:[%s578_s0 + $0x8] sm:$0x1]  ;;  %v30_v18 = vunpack.c.l.bf16 %v381_v3  ;;  %v31_v19 = vunpack.c.l.bf16 %v386_v4  ;;  %v32_v20 = vunpack.c.l.bf16 %v391_v5 }
   0x4   :  { %v411_v9 = vld [vmem:[%s578_s0 + $0x9] sm:$0x1]  ;;  %v416_v10 = vld [vmem:[%s578_s0 + $0xa] sm:$0x1]  ;;  %v421_v11 = vld [vmem:[%s578_s0 + $0xb] sm:$0x1]  ;;  %v33_v22 = vunpack.c.l.bf16 %v396_v6  ;;  %v34_v23 = vunpack.c.l.bf16 %v401_v7  ;;  %v35_v24 = vunpack.c.l.bf16 %v406_v8 }
   0x5   :  { %v428_v14 = vld [vmem:[%s578_s0 + $0xc] sm:$0x1]  ;;  %v433_v15 = vld [vmem:[%s578_s0 + $0xd] sm:$0x1]  ;;  %v438_v16 = vld [vmem:[%s578_s0 + $0xe] sm:$0x1]  ;;  %v36_v25 = vunpack.c.l.bf16 %v411_v9  ;;  %v37_v28 = vunpack.c.l.bf16 %v416_v10  ;;  %v38_v29 = vunpack.c.l.bf16 %v421_v11 }
   0x6   :  { %v447_v21 = vld [vmem:[%s578_s0 + $0xf] sm:$0x1]  ;;  %v43_v26 = vld [vmem:[%s579_s1] sm:$0x1]  ;;  %v44_v27 = vld [vmem:[%s579_s1 + $0x1] sm:$0x1]  ;;  %v39_v30 = vunpack.c.l.bf16 %v428_v14  ;;  %v40_v35 = vunpack.c.l.bf16 %v433_v15  ;;  %v41_v42 = vunpack.c.l.bf16 %v438_v16 }
   0x7   :  { %v45_v31 = vld [vmem:[%s579_s1 + $0x2] sm:$0x1]  ;;  %v46_v32 = vld [vmem:[%s579_s1 + $0x3] sm:$0x1]  ;;  %v47_v33 = vld [vmem:[%s579_s1 + $0x4] sm:$0x1]  ;;  %v59_v34 = vunpack.c.l.bf16 %v43_v26  ;;  %v60_v39 = vunpack.c.l.bf16 %v44_v27  ;;  %v42_v43 = vunpack.c.l.bf16 %v447_v21 }
   0x8   :  { %v48_v36 = vld [vmem:[%s579_s1 + $0x5] sm:$0x1]  ;;  %v49_v37 = vld [vmem:[%s579_s1 + $0x6] sm:$0x1]  ;;  %v50_v38 = vld [vmem:[%s579_s1 + $0x7] sm:$0x1]  ;;  %v61_v40 = vunpack.c.l.bf16 %v45_v31  ;;  %v62_v41 = vunpack.c.l.bf16 %v46_v32  ;;  %v63_v47 = vunpack.c.l.bf16 %v47_v33 }
   0x9   :  { %v51_v44 = vld [vmem:[%s579_s1 + $0x8] sm:$0x1]  ;;  %v52_v45 = vld [vmem:[%s579_s1 + $0x9] sm:$0x1]  ;;  %v53_v46 = vld [vmem:[%s579_s1 + $0xa] sm:$0x1]  ;;  %v64_v48 = vunpack.c.l.bf16 %v48_v36  ;;  %v65_v52 = vunpack.c.l.bf16 %v49_v37  ;;  %v66_v53 = vunpack.c.l.bf16 %v50_v38  ;;  %v75_v61 = vmax.f32 %v27_v12, %v59_v34 }
   0xa   :  { %v54_v49 = vld [vmem:[%s579_s1 + $0xb] sm:$0x1]  ;;  %v55_v50 = vld [vmem:[%s579_s1 + $0xc] sm:$0x1]  ;;  %v501_v51 = vld [vmem:[%s579_s1 + $0xd] sm:$0x1]  ;;  %v67_v54 = vunpack.c.l.bf16 %v51_v44  ;;  %v68_v55 = vunpack.c.l.bf16 %v52_v45  ;;  %v69_v58 = vunpack.c.l.bf16 %v53_v46  ;;  %v76_v63 = vmax.f32 %v28_v13, %v60_v39 }
   0xb   :  { %v506_v56 = vld [vmem:[%s579_s1 + $0xe] sm:$0x1]  ;;  %v511_v57 = vld [vmem:[%s579_s1 + $0xf] sm:$0x1]  ;;  %v70_v59 = vunpack.c.l.bf16 %v54_v49  ;;  %v71_v60 = vunpack.c.l.bf16 %v55_v50  ;;  %v72_v62 = vunpack.c.l.bf16 %v501_v51  ;;  %v77_v0 = vmax.f32 %v29_v17, %v61_v40 }
   0xc   :  { %v78_v1 = vmax.f32 %v30_v18, %v62_v41  ;;  %v73_v2 = vunpack.c.l.bf16 %v506_v56  ;;  %v74_v3 = vunpack.c.l.bf16 %v511_v57  ;;  %v79_v4 = vmax.f32 %v31_v19, %v63_v47 }
   0xd   :  { %v80_v5 = vmax.f32 %v32_v20, %v64_v48  ;;  %v81_v6 = vmax.f32 %v33_v22, %v65_v52  ;;  %v82_v7 = vmax.f32 %v34_v23, %v66_v53  ;;  %v83_v8 = vmax.f32 %v35_v24, %v67_v54 }
   0xe   :  { %v84_v9 = vmax.f32 %v36_v25, %v68_v55  ;;  %v85_v10 = vmax.f32 %v37_v28, %v69_v58  ;;  %v516_v11 = vmax.f32 %v38_v29, %v70_v59  ;;  %v518_v14 = vmax.f32 %v39_v30, %v71_v60 }
   0xf   :  { %v92_v12 = vsel %vm91_vm0, %v75_v61, -inf  ;;  %v99_v17 = vsel %vm91_vm0, %v76_v63, -inf  ;;  %v106_v18 = vsel %vm91_vm0, %v77_v0, -inf  ;;  %v113_v26 = vsel %vm91_vm0, %v78_v1, -inf }
  0x10   :  { %v93_v13 = vrot.slane %v92_v12, 4  ;;  %v100_v19 = vrot.slane %v99_v17, 4  ;;  %v107_v20 = vrot.slane %v106_v18, 4  ;;  %v114_v22 = vrot.slane %v113_v26, 4 }
  0x11   :  { %v120_v23 = vsel %vm91_vm0, %v79_v4, -inf  ;;  %v127_v27 = vsel %vm91_vm0, %v80_v5, -inf  ;;  %v134_v28 = vsel %vm91_vm0, %v81_v6, -inf  ;;  %v141_v37 = vsel %vm91_vm0, %v82_v7, -inf }
  0x12   :  { %v94_v24 = vmax.f32 %v92_v12, %v93_v13  ;;  %v121_v25 = vrot.slane %v120_v23, 4  ;;  %v101_v29 = vmax.f32 %v99_v17, %v100_v19  ;;  %v108_v30 = vmax.f32 %v106_v18, %v107_v20 }
  0x13   :  { %v115_v31 = vmax.f32 %v113_v26, %v114_v22  ;;  %v128_v32 = vrot.slane %v127_v27, 4  ;;  %v135_v36 = vrot.slane %v134_v28, 4  ;;  %v142_v47 = vrot.slane %v141_v37, 4 }
  0x14   :  { %v95_v33 = vrot.slane %v94_v24, 2  ;;  %v122_v34 = vmax.f32 %v120_v23, %v121_v25  ;;  %v102_v38 = vrot.slane %v101_v29, 2  ;;  %v109_v39 = vrot.slane %v108_v30, 2 }
  0x15   :  { %v116_v40 = vrot.slane %v115_v31, 2  ;;  %v129_v41 = vmax.f32 %v127_v27, %v128_v32  ;;  %v136_v46 = vmax.f32 %v134_v28, %v135_v36  ;;  %v143_v55 = vmax.f32 %v141_v37, %v142_v47 }
  0x16   :  { %v96_v44 = vmax.f32 %v94_v24, %v95_v33  ;;  %v123_v45 = vrot.slane %v122_v34, 2  ;;  %v103_v48 = vmax.f32 %v101_v29, %v102_v38  ;;  %v110_v49 = vmax.f32 %v108_v30, %v109_v39 }
  0x17   :  { %v117_v50 = vmax.f32 %v115_v31, %v116_v40  ;;  %v130_v51 = vrot.slane %v129_v41, 2  ;;  %v137_v54 = vrot.slane %v136_v46, 2  ;;  %v88_v60 = vmax.f32 %v40_v35, %v72_v62 }
  0x18   :  { %v97_v52 = vrot.slane %v96_v44, 1  ;;  %v124_v53 = vmax.f32 %v122_v34, %v123_v45  ;;  %v104_v56 = vrot.slane %v103_v48, 1  ;;  %v111_v57 = vrot.slane %v110_v49, 1 }
  0x19   :  { %v118_v58 = vrot.slane %v117_v50, 1  ;;  %v131_v59 = vmax.f32 %v129_v41, %v130_v51  ;;  %v138_v63 = vmax.f32 %v136_v46, %v137_v54  ;;  %v144_v0 = vrot.slane %v143_v55, 2 }
  0x1a   :  { %v125_v61 = vrot.slane %v124_v53, 1  ;;  %v89_v1 = vmax.f32 %v41_v42, %v73_v2  ;;  %v90_v4 = vmax.f32 %v42_v43, %v74_v3  ;;  %v534_v5 = vmax.f32 %v96_v44, %v97_v52 }
  0x1b   :  { %v536_v6 = vmax.f32 %v103_v48, %v104_v56  ;;  %v538_v7 = vmax.f32 %v110_v49, %v111_v57  ;;  %v540_v12 = vmax.f32 %v117_v50, %v118_v58  ;;  %v145_v13 = vmax.f32 %v143_v55, %v144_v0 }
  0x1c   :  { %v148_v15 = vsel %vm91_vm0, %v83_v8, -inf  ;;  %v132_v35 = vrot.slane %v131_v59, 1  ;;  %v155_v17 = vsel %vm91_vm0, %v84_v9, -inf  ;;  %v162_v16 = vsel %vm91_vm0, %v85_v10, -inf }
  0x1d   :  { %v149_v62 = vrot.slane %v148_v15, 4  ;;  %v545_v42 = vmax.f32 %v124_v53, %v125_v61  ;;  %v139_v21 = vrot.slane %v138_v63, 1  ;;  %v156_v43 = vrot.slane %v155_v17, 4 }
  0x1e   :  { %v163_v2 = vrot.slane %v162_v16, 4  ;;  %v169_v18 = vsel %vm91_vm0, %v516_v11, -inf  ;;  %v176_v26 = vsel %vm91_vm0, %v518_v14, -inf  ;;  %v183_v8 = vsel %vm91_vm0, %v88_v60, -inf }
  0x1f   :  { %v150_v3 = vmax.f32 %v148_v15, %v149_v62  ;;  %v146_v19 = vrot.slane %v145_v13, 1  ;;  %v157_v20 = vmax.f32 %v155_v17, %v156_v43  ;;  %v170_v9 = vrot.slane %v169_v18, 4 }
  0x20   :  { %v164_v22 = vmax.f32 %v162_v16, %v163_v2  ;;  %v177_v10 = vrot.slane %v176_v26, 4  ;;  %v184_v24 = vrot.slane %v183_v8, 4  ;;  %v190_v25 = vsel %vm91_vm0, %v89_v1, -inf }
  0x21   :  { %v151_v23 = vrot.slane %v150_v3, 2  ;;  %v158_v27 = vrot.slane %v157_v20, 2  ;;  %v171_v29 = vmax.f32 %v169_v18, %v170_v9  ;;  %v191_v30 = vrot.slane %v190_v25, 4 }
  0x22   :  { %v165_v28 = vrot.slane %v164_v22, 2  ;;  %v178_v11 = vmax.f32 %v176_v26, %v177_v10  ;;  %v185_v32 = vmax.f32 %v183_v8, %v184_v24  ;;  %v197_v14 = vsel %vm91_vm0, %v90_v4, -inf }
  0x23   :  { %v152_v31 = vmax.f32 %v150_v3, %v151_v23  ;;  %v159_v33 = vmax.f32 %v157_v20, %v158_v27  ;;  %v172_v36 = vrot.slane %v171_v29, 2  ;;  %v192_v37 = vmax.f32 %v190_v25, %v191_v30 }
  0x24   :  { %v166_v34 = vmax.f32 %v164_v22, %v165_v28  ;;  %v179_v39 = vrot.slane %v178_v11, 2  ;;  %v186_v40 = vrot.slane %v185_v32, 2  ;;  %v198_v41 = vrot.slane %v197_v14, 4 }
  0x25   :  { %v153_v38 = vrot.slane %v152_v31, 1  ;;  %v160_v44 = vrot.slane %v159_v33, 1  ;;  %v173_v46 = vmax.f32 %v171_v29, %v172_v36  ;;  %v193_v47 = vrot.slane %v192_v37, 2 }
  0x26   :  { %v167_v45 = vrot.slane %v166_v34, 1  ;;  %v133_v48 = vmax.f32 %v131_v59, %v132_v35  ;;  %v180_v49 = vmax.f32 %v178_v11, %v179_v39  ;;  %v187_v50 = vmax.f32 %v185_v32, %v186_v40 }
  0x27   :  { %v199_v51 = vmax.f32 %v197_v14, %v198_v41  ;;  %v140_v52 = vmax.f32 %v138_v63, %v139_v21  ;;  %v147_v53 = vmax.f32 %v145_v13, %v146_v19  ;;  %v174_v54 = vrot.slane %v173_v46, 1 }
  0x28   :  { %v194_v55 = vmax.f32 %v192_v37, %v193_v47  ;;  %v154_v56 = vmax.f32 %v152_v31, %v153_v38  ;;  %v181_v57 = vrot.slane %v180_v49, 1  ;;  %v188_v58 = vrot.slane %v187_v50, 1 }
  0x29   :  { %v200_v60 = vrot.slane %v199_v51, 2  ;;  %v161_v61 = vmax.f32 %v159_v33, %v160_v44  ;;  %v168_v0 = vmax.f32 %v166_v34, %v167_v45  ;;  %v332_v4 = vpack.c.bf16 %v534_v5, %v534_v5 }
  0x2a   :  { %v195_v1 = vrot.slane %v194_v55, 1  ;;  %v175_v59 = vmax.f32 %v173_v46, %v174_v54  ;;  %v333_v63 = vpack.c.bf16 %v536_v6, %v536_v6  ;;  %v334_v13 = vpack.c.bf16 %v538_v7, %v538_v7 }
  0x2b   :  { %v201_v15 = vmax.f32 %v199_v51, %v200_v60  ;;  %v182_v35 = vmax.f32 %v180_v49, %v181_v57  ;;  %v189_v62 = vmax.f32 %v187_v50, %v188_v58  ;;  %v335_v16 = vpack.c.bf16 %v540_v12, %v540_v12 }
  0x2c   :  { %v196_v17 = vmax.f32 %v194_v55, %v195_v1  ;;  %v336_v43 = vpack.c.bf16 %v545_v42, %v545_v42  ;;  %v337_v2 = vpack.c.bf16 %v133_v48, %v133_v48  ;;  %v340_v5 = vpack.c.bf16 %v154_v56, %v154_v56 }
  0x2d   :  { %v202_v21 = vrot.slane %v201_v15, 1  ;;  %v338_v3 = vpack.c.bf16 %v140_v52, %v140_v52  ;;  %v339_v18 = vpack.c.bf16 %v147_v53, %v147_v53  ;;  %v341_v26 = vpack.c.bf16 %v161_v61, %v161_v61 }
  0x2e   :  { %v342_v8 = vpack.c.bf16 %v168_v0, %v168_v0  ;;  %v343_v19 = vpack.c.bf16 %v175_v59, %v175_v59  ;;  %v268_v20 = vunpack.c.l.b16 %v332_v4  ;;  %v269_v7 = vunpack.c.l.b16 %v333_v63 }
  0x2f   :  { %v203_v6 = vmax.f32 %v201_v15, %v202_v21  ;;  %v344_v22 = vpack.c.bf16 %v182_v35, %v182_v35  ;;  %v345_v9 = vpack.c.bf16 %v189_v62, %v189_v62  ;;  %v270_v23 = vunpack.c.l.b16 %v334_v13 }
  0x30   :  { %v346_v10 = vpack.c.bf16 %v196_v17, %v196_v17  ;;  %v271_v12 = vunpack.c.l.b16 %v335_v16  ;;  %v272_v24 = vunpack.c.l.b16 %v336_v43  ;;  %v276_v25 = vunpack.c.l.b16 %v340_v5 }
  0x31   :  { %v347_v27 = vpack.c.bf16 %v203_v6, %v203_v6  ;;  %v273_v42 = vunpack.c.l.b16 %v337_v2  ;;  %v277_v28 = vunpack.c.l.b16 %v341_v26  ;;  %v278_v29 = vunpack.c.l.b16 %v342_v8 }
  0x32   :  { %v274_v30 = vunpack.c.l.b16 %v338_v3  ;;  %v275_v31 = vunpack.c.l.b16 %v339_v18  ;;  %v279_v11 = vunpack.c.l.b16 %v343_v19  ;;  %v285_v32 = vsel %vm284_vm1, %v269_v7, %v268_v20 }
  0x33   :  { %v280_v14 = vunpack.c.l.b16 %v344_v22  ;;  %v287_v33 = vsel %vm286_vm2, %v270_v23, %v285_v32  ;;  %vm290_vm4 = vcmask 1044484   ;;  %vm292_vm5 = vcmask 1045509  }
  0x34   :  { %v281_v34 = vunpack.c.l.b16 %v345_v9  ;;  %v289_v36 = vsel %vm288_vm3, %v271_v12, %v287_v33  ;;  %vm294_vm6 = vcmask 1046534   ;;  %v298_v37 = vsel %vm284_vm1, %v277_v28, %v276_v25 }
  0x35   :  { %v282_v38 = vunpack.c.l.b16 %v346_v10  ;;  %v291_v39 = vsel %vm290_vm4, %v272_v24, %v289_v36  ;;  %vm296_vm7 = vcmask 1047559   ;;  %v299_v40 = vsel %vm286_vm2, %v278_v29, %v298_v37 }
  0x36   :  { %v283_v41 = vunpack.c.l.b16 %v347_v27  ;;  %v293_v44 = vsel %vm292_vm5, %v273_v42, %v291_v39  ;;  %v300_v45 = vsel %vm288_vm3, %v279_v11, %v299_v40  ;;  %vm309_vm8 = vcmask 519168  }
  0x37   :  { %v295_v46 = vsel %vm294_vm6, %v274_v30, %v293_v44  ;;  %v301_v47 = vsel %vm290_vm4, %v280_v14, %v300_v45 }
  0x38   :  { %v297_v48 = vsel %vm296_vm7, %v275_v31, %v295_v46  ;;  %v302_v49 = vsel %vm292_vm5, %v281_v34, %v301_v47 }
  0x39   :  { %v303_v50 = vsel %vm294_vm6, %v282_v38, %v302_v49  ;;  %v305_v51 = vpack.c.b16 %v297_v48, %v297_v48 }
  0x3a   :  { %v304_v52 = vsel %vm296_vm7, %v283_v41, %v303_v50 }
  0x3b   :  { %v306_v53 = vpack.c.b16 %v304_v52, %v304_v52  ;;  %310 = vst.msk [vmem:[%s580_s2] sm:$0xf] %vm309_vm8, %v305_v51 }
  0x3d   :  { %311 = vst.msk [vmem:[%s580_s2 + $0x4] sm:$0xf] %vm309_vm8, %v306_v53 }

// kernel: tile.88
= control target key start
LH: loop header
LB: loop body
LE: loop exit
PB: predicated region body
PF: predicated region fallthrough
CT: control target
= control target key end

     0   :  { %s22_s0 = inlined_call_operand.vmem [shape: f32[8], index: 0, kind: input, shape index: {}]   ;;  %s23_s1 = inlined_call_operand.vmem [shape: f32[8,8], index: 1, kind: output, shape index: {}]  }
   0x1   :  { %v4_v0 = vld [vmem:[%s22_s0] ss:$0 sm:$0xff] }
   0x2   :  { %5 = vst [vmem:[%s23_s1] sm:$0xff] %v4_v0 }

// kernel: tile.89
= control target key start
LH: loop header
LB: loop body
LE: loop exit
PB: predicated region body
PF: predicated region fallthrough
CT: control target
= control target key end

     0   :  { %s69_s10 = smov 56   ;;  %s70_s11 = smov 40   ;;  %vm3_vm0 = vcmask 64512   ;;  %vm9_vm1 = vcmask 523712   ;;  %vm15_vm2 = vcmask 458112   ;;  %vm21_vm3 = vcmask 392512   ;;  %s113_s0 = inlined_call_operand.vmem [shape: f32[8,8], index: 0, kind: input, shape index: {}]   ;;  %s114_s1 = inlined_call_operand.vmem [shape: f32[1,64], index: 1, kind: output, shape index: {}]  }
   0x1   :  { %v55_v0 = vld [vmem:[%s113_s0 + $0x7] sm:$0x1]   ;;  %v57_v1 = vld [vmem:[%s113_s0 + $0x5] sm:$0x1]   ;;  %v56_v2 = vld [vmem:[%s113_s0 + $0x6] sm:$0x1]  }
   0x2   :  { %7 = vrot.lane.b32.xlu0 %v55_v0, %s69_s10  ;;  %19 = vrot.lane.b32.xlu1 %v57_v1, %s70_s11  ;;  %v58_v3 = vld [vmem:[%s113_s0 + $0x4] sm:$0x1]   ;;  %v2_v4 = vld [vmem:[%s113_s0] sm:$0x1]   ;;  %s71_s18 = smov 48   ;;  %s72_s19 = smov 32  }
   0x3   :  { %4 = vst.msk [vmem:[#allocation0] sm:$0x1] %vm3_vm0, %v2_v4   ;;  %v59_v5 = vld [vmem:[%s113_s0 + $0x3] sm:$0x1]   ;;  %v60_v6 = vld [vmem:[%s113_s0 + $0x2] sm:$0x1]  }
   0x4   :  { %s73_s24 = smov 24   ;;  %s74_s25 = smov 16   ;;  %v61_v7 = vld [vmem:[%s113_s0 + $0x1] sm:$0x1]   ;;  %vm27_vm4 = vcmask 326912   ;;  %vm33_vm5 = vcmask 261312  }
   0x5   :  { %s75_s0 = smov 8   ;;  %vm39_vm6 = vcmask 195712   ;;  %vm45_vm7 = vcmask 130112  }
   0x6   :  { %13 = vrot.lane.b32.xlu0 %v56_v2, %s71_s18  ;;  %25 = vrot.lane.b32.xlu1 %v58_v3, %s72_s19 }
   0xa   :  { %31 = vrot.lane.b32.xlu0 %v59_v5, %s73_s24  ;;  %37 = vrot.lane.b32.xlu1 %v60_v6, %s74_s25 }
   0xe   :  { %43 = vrot.lane.b32.xlu0 %v61_v7, %s75_s0 }
  0x74   :  { %v8_v8 = vpop.permute.xlu0 %7   ;;  %v20_v9 = vpop.permute.xlu1 %19  }
  0x75   :  { %10 = vst.msk [vmem:[#allocation0] sm:$0x1] %vm9_vm1, %v8_v8  }
  0x78   :  { %v14_v10 = vpop.permute.xlu0 %13   ;;  %v26_v11 = vpop.permute.xlu1 %25  }
  0x79   :  { %16 = vst.msk [vmem:[#allocation0] sm:$0x1] %vm15_vm2, %v14_v10  }
  0x7a   :  { %22 = vst.msk [vmem:[#allocation0] sm:$0x1] %vm21_vm3, %v20_v9  }
  0x7b   :  { %28 = vst.msk [vmem:[#allocation0] sm:$0x1] %vm27_vm4, %v26_v11  }
  0x7c   :  { %v32_v12 = vpop.permute.xlu0 %31   ;;  %v38_v13 = vpop.permute.xlu1 %37  }
  0x7d   :  { %34 = vst.msk [vmem:[#allocation0] sm:$0x1] %vm33_vm5, %v32_v12  }
  0x7e   :  { %40 = vst.msk [vmem:[#allocation0] sm:$0x1] %vm39_vm6, %v38_v13  }
  0x80   :  { %v44_v14 = vpop.permute.xlu0 %43  }
  0x81   :  { %46 = vst.msk [vmem:[#allocation0] sm:$0x1] %vm45_vm7, %v44_v14  }
  0x88   :  { %v51_v15 = vld [vmem:[#allocation0] sm:$0x1] }
  0x89   :  { %54 = vst [vmem:[%s114_s1] sm:$0x1] %v51_v15 }

// kernel: tile.93
= control target key start
LH: loop header
LB: loop body
LE: loop exit
PB: predicated region body
PF: predicated region fallthrough
CT: control target
= control target key end

     0   :  { %s22_s0 = inlined_call_operand.vmem [shape: f32[8], index: 0, kind: input, shape index: {}]   ;;  %s23_s1 = inlined_call_operand.vmem [shape: f32[4,8], index: 1, kind: output, shape index: {}]  }
   0x1   :  { %v4_v0 = vld [vmem:[%s22_s0] ss:$0 sm:$0xff] }
   0x2   :  { %5 = vst [vmem:[%s23_s1] sm:$0xf] %v4_v0 }

// kernel: tile.94
= control target key start
LH: loop header
LB: loop body
LE: loop exit
PB: predicated region body
PF: predicated region fallthrough
CT: control target
= control target key end

     0   :  { %vm8_vm0 = vcmask 64512   ;;  %s40_s8 = smov 8   ;;  %s41_s9 = smov 16   ;;  %vm14_vm1 = vcmask 261312   ;;  %vm20_vm2 = vcmask 195712   ;;  %vm26_vm3 = vcmask 130112   ;;  %s58_s0 = inlined_call_operand.vmem [shape: f32[4,8], index: 0, kind: input, shape index: {}]   ;;  %s59_s1 = inlined_call_operand.vmem [shape: f32[1,32], index: 1, kind: output, shape index: {}]  }
   0x1   :  { %v5_v0 = vld [vmem:[%s58_s0] sm:$0xf]  ;;  %s39_s0 = smov 24  }
   0x2   :  { %6 = vst [vmem:[#allocation1] sm:$0xf] %v5_v0 }
   0x9   :  { %v11_v1 = vld [vmem:[#allocation1 + $0x3] sm:$0x1]   ;;  %v23_v2 = vld [vmem:[#allocation1 + $0x1] sm:$0x1]   ;;  %v7_v3 = vld [vmem:[#allocation1] sm:$0x1]  }
   0xa   :  { %12 = vrot.lane.b32.xlu0 %v11_v1, %s39_s0  ;;  %24 = vrot.lane.b32.xlu1 %v23_v2, %s40_s8  ;;  %v17_v4 = vld [vmem:[#allocation1 + $0x2] sm:$0x1]   ;;  %9 = vst.msk [vmem:[#allocation0] sm:$0x1] %vm8_vm0, %v7_v3  }
   0xe   :  { %18 = vrot.lane.b32.xlu0 %v17_v4, %s41_s9 }
  0x7c   :  { %v13_v5 = vpop.permute.xlu0 %12   ;;  %v25_v6 = vpop.permute.xlu1 %24  }
  0x7d   :  { %15 = vst.msk [vmem:[#allocation0] sm:$0x1] %vm14_vm1, %v13_v5  }
  0x80   :  { %v19_v7 = vpop.permute.xlu0 %18  }
  0x81   :  { %21 = vst.msk [vmem:[#allocation0] sm:$0x1] %vm20_vm2, %v19_v7  }
  0x82   :  { %27 = vst.msk [vmem:[#allocation0] sm:$0x1] %vm26_vm3, %v25_v6  }
  0x89   :  { %v32_v8 = vld [vmem:[#allocation0] sm:$0x1] }
  0x8a   :  { %35 = vst [vmem:[%s59_s1] sm:$0x1] %v32_v8 }

// kernel: edsr_forward.22
= control target key start
LH: loop header
LB: loop body
LE: loop exit
PB: predicated region body
PF: predicated region fallthrough
CT: control target
= control target key end

     0   :  { %s669_s12 = smov 0   ;;  %s744_s0 = inlined_call_operand.vmem [shape: bf16[2,10,80], index: 0, kind: input, shape index: {}]   ;;  %s745_s1 = inlined_call_operand.vmem [shape: bf16[3,80,64], index: 1, kind: input, shape index: {}]   ;;  %s746_s2 = inlined_call_operand.vmem [shape: f32[1,64], index: 2, kind: input, shape index: {}]   ;;  %s747_s3 = inlined_call_operand.vmem [shape: bf16[2,8,64], index: 3, kind: output, shape index: {}]  }
   0x1 LB: > { %s502_s13 = sadd.s32 4294967295, %s645_s12   ;;  %p506_p0 = scmp.ge.s32.totalorder %s645_s12, 1  ;;  %s645_s12 = sphi %s669_s12, %s13_s12  }
   0x2   : > { %p137_p1 = scmp.lt.s32.totalorder %s645_s12, 3 }
   0x4   : > { %p138_p2 = pnand %p506_p0, %p137_p1 }
   0x5   : > { %p160_p3 = scmp.lt.s32.totalorder (!%p138_p2), %s502_s13, 1 }
   0x6   : > { %141 = sbr.rel (%p138_p2) target bundleno = 252 (0xfc), region = 32 }
   0xb   : > { %v623_v0 = vld [vmem:[%s745_s1 + $0x48] sm:$0xff]   ;;  %v647_v1 = vmov 0.0   ;;  %v624_v2 = vld [vmem:[%s745_s1 + $0x20] sm:$0xff]   ;;  %vm648_vm0 = vmmov 0   ;;  %v626_v4 = vld [vmem:[%s745_s1 + $0x18] sm:$0xff]   ;;  %s749_s13 = smov (!%p160_p3, %s502_s13), 1 }
   0xc   : > { %571 = vmatprep.subr.bf16.mxu0 %v647_v1  ;;  %585 = vmatprep.subr.bf16.mxu1 %v647_v1  ;;  %v625_v3 = vld [vmem:[%s745_s1 + $0x40] sm:$0xff]   ;;  %v627_v5 = vld [vmem:[%s745_s1 + $0x38] sm:$0xff]   ;;  %s552_s24 = sshll.u32 %s749_s13, 3  ;;  %v628_v6 = vld [vmem:[%s745_s1 + $0x10] sm:$0xff]   ;;  %vm235_vm1 = vcmask 654336   ;;  %s509_s25 = sshll.u32 %s749_s13, 2 }
   0xd   : > { %572 = vmatpush3.bf16.msra.mxu0 %v623_v0  ;;  %581 = vmatprep.mubr.msk.bf16.mxu0 %vm648_vm0, %v647_v1  ;;  %s164_s29 = scalar_lea.vmem %s744_s0, %s552_s24  ;;  %v629_v7 = vld [vmem:[%s745_s1 + $0x30] sm:$0xff]   ;;  %v630_v10 = vld [vmem:[%s745_s1 + $0x8] sm:$0xff]   ;;  %v632_v15 = vld [vmem:[%s745_s1] sm:$0xff]   ;;  %s168_s28 = scalar_lea.vmem %s747_s3, %s509_s25  ;;  %vm447_vm2 = vcmask 519168  }
   0xe   : > { %586 = vmatpush3.bf16.msra.mxu1 %v624_v2  ;;  %573 = vmatprep.subr.bf16.mxu0 %v647_v1  ;;  %v170_v8 = vld [vmem:[%s164_s29] sm:$0xf]  ;;  %v171_v9 = vld [vmem:[%s164_s29 + $0x4] sm:$0x1]  ;;  %v631_v12 = vld [vmem:[%s745_s1 + $0x28] sm:$0xff]  }
   0xf   : > { %587 = vmatprep.subr.bf16.mxu1 %v647_v1  ;;  %595 = vmatprep.mubr.msk.bf16.mxu1 %vm648_vm0, %v647_v1  ;;  %v520_v11 = vcombine.low %v170_v8, %v171_v9  ;;  %v634_v18 = vld [vmem:[%s745_s1 + $0x70] sm:$0xff]   ;;  %v635_v19 = vld [vmem:[%s745_s1 + $0x68] sm:$0xff]   ;;  %v636_v20 = vld [vmem:[%s745_s1 + $0x60] sm:$0xff]  }
  0x10   : > { %v637_v21 = vld [vmem:[%s745_s1 + $0x58] sm:$0xff]   ;;  %v638_v22 = vld [vmem:[%s745_s1 + $0x50] sm:$0xff]   ;;  %v549_v34 = vld [vmem:[%s746_s2] ss:$0 sm:$0xff] }
  0x11   : > { %574 = vmatpush3.bf16.msra.mxu0 %v625_v3  ;;  %v199_v13 = vshrl.u32 %v520_v11, 16  ;;  %v201_v14 = vshll.u32 %v520_v11, 16  ;;  %v363_v23 = vrot.slane %v520_v11, 1 }
  0x12   : > { %588 = vmatpush3.bf16.msra.mxu1 %v626_v4  ;;  %575 = vmatprep.subr.bf16.mxu0 %v647_v1 }
  0x13   : > { %589 = vmatprep.subr.bf16.mxu1 %v647_v1  ;;  %v203_v16 = vrot.slane %v201_v14, 1 }
  0x15   : > { %576 = vmatpush3.bf16.msra.mxu0 %v627_v5  ;;  %v204_v17 = vor.u32 %v203_v16, %v199_v13 }
  0x16   : > { %590 = vmatpush3.bf16.msra.mxu1 %v628_v6  ;;  %577 = vmatprep.subr.bf16.mxu0 %v647_v1 }
  0x17   : > { %591 = vmatprep.subr.bf16.mxu1 %v647_v1 }
  0x19   : > { %578 = vmatpush3.bf16.msra.mxu0 %v629_v7 }
  0x1a   : > { %592 = vmatpush3.bf16.msra.mxu1 %v630_v10  ;;  %579 = vmatprep.subr.bf16.mxu0 %v647_v1 }
  0x1b   : > { %593 = vmatprep.subr.bf16.mxu1 %v647_v1 }
  0x1d   : > { %580 = vmatpush3.bf16.msra.mxu0 %v631_v12 }
  0x1e   : > { %594 = vmatpush3.bf16.msra.mxu1 %v632_v15  ;;  %599 = vmatprep.subr.bf16.mxu0 %v647_v1 }
  0x20   : > { %582 = vmatmul.mubr.msk.bf16.vlgmr.msra.gmra.mxu0 %vm235_vm1, %v204_v17 }
  0x21   : > { %596 = vmatmul.mubr.msk.bf16.vlgmr.msra.gmra.mxu1 %vm235_vm1, %v170_v8  ;;  %600 = vmatpush3.bf16.msra.mxu0 %v634_v18 }
  0x22   : > { %601 = vmatprep.subr.bf16.mxu0 %v647_v1  ;;  %609 = vmatprep.mubr.msk.bf16.mxu0 %vm648_vm0, %v647_v1 }
  0x25   : > { %602 = vmatpush3.bf16.msra.mxu0 %v635_v19 }
  0x26   : > { %603 = vmatprep.subr.bf16.mxu0 %v647_v1 }
  0x29   : > { %604 = vmatpush3.bf16.msra.mxu0 %v636_v20 }
  0x2a   : > { %605 = vmatprep.subr.bf16.mxu0 %v647_v1 }
  0x2d   : > { %606 = vmatpush3.bf16.msra.mxu0 %v637_v21 }
  0x2e   : > { %607 = vmatprep.subr.bf16.mxu0 %v647_v1 }
  0x31   : > { %608 = vmatpush3.bf16.msra.mxu0 %v638_v22 }
  0x34   : > { %610 = vmatmul.mubr.msk.bf16.vlgmr.msra.gmra.mxu0 %vm235_vm1, %v363_v23 }
  0xe0   : > { %v273_v24 = vpop.f32.mrf.mxu0 }
  0xe1   : > { %v346_v25 = vpop.f32.mrf.mxu1 }
  0xe2   : > { %v583_v26 = vpop.f32.mrf.mxu0  ;;  %v347_v32 = vadd.f32 %v346_v25, %v273_v24 }
  0xe3   : > { %v597_v27 = vpop.f32.mrf.mxu1 }
  0xe4   : > { %v276_v28 = vpop.f32.mrf.mxu0 }
  0xe5   : > { %v349_v29 = vpop.f32.mrf.mxu1 }
  0xe6   : > { %v584_v30 = vpop.f32.mrf.mxu0 }
  0xe7   : > { %v598_v31 = vpop.f32.mrf.mxu1 }
  0xf4   : > { %v431_v33 = vpop.f32.mrf.mxu0 }
  0xf5   : > { %v437_v35 = vadd.f32 %v431_v33, %v347_v32 }
  0xf6   : > { %v611_v36 = vpop.f32.mrf.mxu0 }
  0xf7   : > { %v445_v37 = vadd.f32 %v549_v34, %v437_v35 }
  0xf8   : > { %v434_v38 = vpop.f32.mrf.mxu0 }
  0xf9   : > { %v446_v39 = vpack.c.bf16 %v445_v37, %v445_v37 }
  0xfa   : > { %v612_v40 = vpop.f32.mrf.mxu0 }
  0xfb   : > { %448 = vst.msk [vmem:[%s168_s28] sm:$0xf] %vm447_vm2, %v446_v39 }
  0xfc PF: > { %s13_s12 = sadd.s32 1, %s645_s12  }
  0xfd   : > { %p10_p4 = scmp.ge.s32.totalorder %s13_s12, 4  }
  0xff   :  { %12 = sbr.rel (!%p10_p4) target bundleno = 1 (0x1), region = 64 }

// kernel: edsr_forward.23
= control target key start
LH: loop header
LB: loop body
LE: loop exit
PB: predicated region body
PF: predicated region fallthrough
CT: control target
= control target key end

     0   :  { %vm51_vm0 = vcmask 254976   ;;  %vm148_vm1 = vcmask 1041409   ;;  %vm150_vm2 = vcmask 1042434   ;;  %vm152_vm3 = vcmask 1043459   ;;  %s262_s0 = inlined_call_operand.vmem [shape: bf16[8,2,32], index: 0, kind: input, shape index: {}]   ;;  %s263_s1 = inlined_call_operand.vmem [shape: bf16[8,2,32], index: 1, kind: input, shape index: {}]   ;;  %s264_s2 = inlined_call_operand.vmem [shape: bf16[8,32], index: 2, kind: output, shape index: {}]  }
   0x1   :  { %v11_v0 = vld [vmem:[%s262_s0] sm:$0x1]  ;;  %v12_v1 = vld [vmem:[%s262_s0 + $0x1] sm:$0x1]  ;;  %v13_v2 = vld [vmem:[%s262_s0 + $0x2] sm:$0x1] }
   0x2   :  { %v14_v3 = vld [vmem:[%s262_s0 + $0x3] sm:$0x1]  ;;  %v15_v4 = vld [vmem:[%s262_s0 + $0x4] sm:$0x1]  ;;  %v16_v5 = vld [vmem:[%s262_s0 + $0x5] sm:$0x1]  ;;  %v19_v6 = vunpack.c.l.bf16 %v11_v0  ;;  %v20_v9 = vunpack.c.l.bf16 %v12_v1  ;;  %v21_v10 = vunpack.c.l.bf16 %v13_v2 }
   0x3   :  { %v17_v7 = vld [vmem:[%s262_s0 + $0x6] sm:$0x1]  ;;  %v18_v8 = vld [vmem:[%s262_s0 + $0x7] sm:$0x1]  ;;  %v22_v11 = vunpack.c.l.bf16 %v14_v3  ;;  %v27_v12 = vld [vmem:[%s263_s1] sm:$0x1]  ;;  %v23_v13 = vunpack.c.l.bf16 %v15_v4  ;;  %v24_v14 = vunpack.c.l.bf16 %v16_v5 }
   0x4   :  { %v25_v15 = vunpack.c.l.bf16 %v17_v7  ;;  %v28_v16 = vld [vmem:[%s263_s1 + $0x1] sm:$0x1]  ;;  %v29_v17 = vld [vmem:[%s263_s1 + $0x2] sm:$0x1]  ;;  %v30_v18 = vld [vmem:[%s263_s1 + $0x3] sm:$0x1]  ;;  %v35_v19 = vunpack.c.l.bf16 %v27_v12  ;;  %v26_v20 = vunpack.c.l.bf16 %v18_v8 }
   0x5   :  { %v31_v21 = vld [vmem:[%s263_s1 + $0x4] sm:$0x1]  ;;  %v32_v22 = vld [vmem:[%s263_s1 + $0x5] sm:$0x1]  ;;  %v33_v23 = vld [vmem:[%s263_s1 + $0x6] sm:$0x1]  ;;  %v36_v24 = vunpack.c.l.bf16 %v28_v16  ;;  %v37_v25 = vunpack.c.l.bf16 %v29_v17  ;;  %v38_v26 = vunpack.c.l.bf16 %v30_v18 }
   0x6   :  { %v34_v27 = vld [vmem:[%s263_s1 + $0x7] sm:$0x1]  ;;  %v39_v28 = vunpack.c.l.bf16 %v31_v21  ;;  %v40_v29 = vunpack.c.l.bf16 %v32_v22  ;;  %v41_v30 = vunpack.c.l.bf16 %v33_v23  ;;  %v43_v31 = vmax.f32 %v19_v6, %v35_v19 }
   0x7   :  { %v42_v32 = vunpack.c.l.bf16 %v34_v27  ;;  %v44_v33 = vmax.f32 %v20_v9, %v36_v24  ;;  %v45_v34 = vmax.f32 %v21_v10, %v37_v25  ;;  %v46_v35 = vmax.f32 %v22_v11, %v38_v26 }
   0x8   :  { %v47_v36 = vmax.f32 %v23_v13, %v39_v28  ;;  %v48_v37 = vmax.f32 %v24_v14, %v40_v29  ;;  %v49_v38 = vmax.f32 %v25_v15, %v41_v30  ;;  %v52_v39 = vsel %vm51_vm0, %v43_v31, -inf }
   0x9   :  { %v50_v40 = vmax.f32 %v26_v20, %v42_v32  ;;  %v53_v41 = vrot.slane %v52_v39, 4  ;;  %v59_v42 = vsel %vm51_vm0, %v44_v33, -inf  ;;  %v66_v43 = vsel %vm51_vm0, %v45_v34, -inf }
   0xa   :  { %v60_v44 = vrot.slane %v59_v42, 4  ;;  %v67_v45 = vrot.slane %v66_v43, 4  ;;  %v73_v46 = vsel %vm51_vm0, %v46_v35, -inf  ;;  %v80_v47 = vsel %vm51_vm0, %v47_v36, -inf }
   0xb   :  { %v54_v48 = vmax.f32 %v52_v39, %v53_v41  ;;  %v74_v49 = vrot.slane %v73_v46, 4  ;;  %v81_v50 = vrot.slane %v80_v47, 4  ;;  %v87_v51 = vsel %vm51_vm0, %v48_v37, -inf }
   0xc   :  { %v61_v52 = vmax.f32 %v59_v42, %v60_v44  ;;  %v68_v53 = vmax.f32 %v66_v43, %v67_v45  ;;  %v88_v54 = vrot.slane %v87_v51, 4  ;;  %v94_v55 = vsel %vm51_vm0, %v49_v38, -inf }
   0xd   :  { %v55_v56 = vrot.slane %v54_v48, 2  ;;  %v75_v57 = vmax.f32 %v73_v46, %v74_v49  ;;  %v82_v58 = vmax.f32 %v80_v47, %v81_v50  ;;  %v95_v59 = vrot.slane %v94_v55, 4 }
   0xe   :  { %v62_v60 = vrot.slane %v61_v52, 2  ;;  %v69_v61 = vrot.slane %v68_v53, 2  ;;  %v89_v62 = vmax.f32 %v87_v51, %v88_v54  ;;  %v101_v63 = vsel %vm51_vm0, %v50_v40, -inf }
   0xf   :  { %v56_v0 = vmax.f32 %v54_v48, %v55_v56  ;;  %v76_v1 = vrot.slane %v75_v57, 2  ;;  %v83_v2 = vrot.slane %v82_v58, 2  ;;  %v96_v3 = vmax.f32 %v94_v55, %v95_v59 }
  0x10   :  { %v63_v4 = vmax.f32 %v61_v52, %v62_v60  ;;  %v70_v5 = vmax.f32 %v68_v53, %v69_v61  ;;  %v90_v6 = vrot.slane %v89_v62, 2  ;;  %v102_v7 = vrot.slane %v101_v63, 4 }
  0x11   :  { %v57_v8 = vrot.slane %v56_v0, 1  ;;  %v77_v9 = vmax.f32 %v75_v57, %v76_v1  ;;  %v84_v10 = vmax.f32 %v82_v58, %v83_v2  ;;  %v97_v11 = vrot.slane %v96_v3, 2 }
  0x12   :  { %v64_v12 = vrot.slane %v63_v4, 1  ;;  %v71_v13 = vrot.slane %v70_v5, 1  ;;  %v91_v14 = vmax.f32 %v89_v62, %v90_v6  ;;  %v103_v15 = vmax.f32 %v101_v63, %v102_v7 }
  0x13   :  { %v58_v16 = vmax.f32 %v56_v0, %v57_v8  ;;  %v78_v17 = vrot.slane %v77_v9, 1  ;;  %v85_v18 = vrot.slane %v84_v10, 1  ;;  %v98_v19 = vmax.f32 %v96_v3, %v97_v11 }
  0x14   :  { %v65_v20 = vmax.f32 %v63_v4, %v64_v12  ;;  %v72_v21 = vmax.f32 %v70_v5, %v71_v13  ;;  %v92_v22 = vrot.slane %v91_v14, 1  ;;  %v104_v23 = vrot.slane %v103_v15, 2 }
  0x15   :  { %v79_v24 = vmax.f32 %v77_v9, %v78_v17  ;;  %v86_v25 = vmax.f32 %v84_v10, %v85_v18  ;;  %v99_v26 = vrot.slane %v98_v19, 1  ;;  %v178_v27 = vpack.c.bf16 %v58_v16, %v58_v16 }
  0x16   :  { %v93_v28 = vmax.f32 %v91_v14, %v92_v22  ;;  %v105_v29 = vmax.f32 %v103_v15, %v104_v23  ;;  %v179_v30 = vpack.c.bf16 %v65_v20, %v65_v20  ;;  %v180_v31 = vpack.c.bf16 %v72_v21, %v72_v21 }
  0x17   :  { %v100_v32 = vmax.f32 %v98_v19, %v99_v26  ;;  %v181_v33 = vpack.c.bf16 %v79_v24, %v79_v24  ;;  %v182_v34 = vpack.c.bf16 %v86_v25, %v86_v25  ;;  %v140_v35 = vunpack.c.l.b16 %v178_v27 }
  0x18   :  { %v106_v36 = vrot.slane %v105_v29, 1  ;;  %v183_v37 = vpack.c.bf16 %v93_v28, %v93_v28  ;;  %v141_v38 = vunpack.c.l.b16 %v179_v30  ;;  %v142_v39 = vunpack.c.l.b16 %v180_v31 }
  0x19   :  { %v184_v40 = vpack.c.bf16 %v100_v32, %v100_v32  ;;  %v143_v41 = vunpack.c.l.b16 %v181_v33  ;;  %v144_v42 = vunpack.c.l.b16 %v182_v34  ;;  %vm154_vm4 = vcmask 1044484  }
  0x1a   :  { %v107_v43 = vmax.f32 %v105_v29, %v106_v36  ;;  %v145_v44 = vunpack.c.l.b16 %v183_v37  ;;  %v149_v45 = vsel %vm148_vm1, %v141_v38, %v140_v35  ;;  %vm156_vm5 = vcmask 1045509  }
  0x1b   :  { %v146_v46 = vunpack.c.l.b16 %v184_v40  ;;  %v151_v47 = vsel %vm150_vm2, %v142_v39, %v149_v45  ;;  %vm158_vm6 = vcmask 1046534   ;;  %vm160_vm7 = vcmask 1047559  }
  0x1c   :  { %v185_v48 = vpack.c.bf16 %v107_v43, %v107_v43  ;;  %v153_v49 = vsel %vm152_vm3, %v143_v41, %v151_v47  ;;  %vm164_vm8 = vcmask 257024  }
  0x1d   :  { %v155_v50 = vsel %vm154_vm4, %v144_v42, %v153_v49 }
  0x1e   :  { %v147_v51 = vunpack.c.l.b16 %v185_v48  ;;  %v157_v52 = vsel %vm156_vm5, %v145_v44, %v155_v50 }
  0x1f   :  { %v159_v53 = vsel %vm158_vm6, %v146_v46, %v157_v52 }
  0x20   :  { %v161_v54 = vsel %vm160_vm7, %v147_v51, %v159_v53 }
  0x21   :  { %v162_v55 = vpack.c.b16 %v161_v54, %v161_v54 }
  0x23   :  { %165 = vst.msk [vmem:[%s264_s2] sm:$0xf] %vm164_vm8, %v162_v55 }

// kernel: edsr_forward.27
= control target key start
LH: loop header
LB: loop body
LE: loop exit
PB: predicated region body
PF: predicated region fallthrough
CT: control target
= control target key end

     0   :  { %s576_s12 = smov 0   ;;  %s630_s0 = inlined_call_operand.vmem [shape: bf16[2,6,48], index: 0, kind: input, shape index: {}]   ;;  %s631_s1 = inlined_call_operand.vmem [shape: bf16[3,48,32], index: 1, kind: input, shape index: {}]   ;;  %s632_s2 = inlined_call_operand.vmem [shape: f32[1,32], index: 2, kind: input, shape index: {}]   ;;  %s633_s3 = inlined_call_operand.vmem [shape: bf16[2,4,32], index: 3, kind: output, shape index: {}]  }
   0x1 LB: > { %s449_s13 = sadd.s32 4294967295, %s552_s12   ;;  %p453_p0 = scmp.ge.s32.totalorder %s552_s12, 1  ;;  %s552_s12 = sphi %s576_s12, %s13_s12  }
   0x2   : > { %p136_p1 = scmp.lt.s32.totalorder %s552_s12, 3 }
   0x4   : > { %p137_p2 = pnand %p453_p0, %p136_p1 }
   0x5   : > { %p158_p3 = scmp.lt.s32.totalorder (!%p137_p2), %s449_s13, 1 }
   0x6   : > { %140 = sbr.rel (%p137_p2) target bundleno = 238 (0xee), region = 32 }
   0xb   : > { %v536_v0 = vld [vmem:[%s631_s1 + $0x28] sm:$0xff]   ;;  %v554_v1 = vmov 0.0   ;;  %v537_v2 = vld [vmem:[%s631_s1 + $0x10] sm:$0xff]   ;;  %v538_v3 = vld [vmem:[%s631_s1 + $0x20] sm:$0xff]   ;;  %vm555_vm0 = vmmov 0   ;;  %s635_s13 = smov (!%p158_p3, %s449_s13), 1 }
   0xc   : > { %496 = vmatprep.subr.bf16.mxu0 %v554_v1  ;;  %506 = vmatprep.subr.bf16.mxu1 %v554_v1  ;;  %v539_v4 = vld [vmem:[%s631_s1 + $0x8] sm:$0xff]   ;;  %v540_v5 = vld [vmem:[%s631_s1 + $0x18] sm:$0xff]   ;;  %s454_s24 = sshll.u32 %s635_s13, 2  ;;  %v541_v6 = vld [vmem:[%s631_s1] sm:$0xff]   ;;  %vm209_vm1 = vcmask 392192   ;;  %s455_s11 = sshll.u32 %s635_s13, 1 }
   0xd   : > { %497 = vmatpush3.bf16.msra.mxu0 %v536_v0  ;;  %502 = vmatprep.mubr.msk.bf16.mxu0 %vm555_vm0, %v554_v1  ;;  %s161_s29 = scalar_lea.vmem %s630_s0, %s454_s24  ;;  %v543_v12 = vld [vmem:[%s631_s1 + $0x40] sm:$0xff]   ;;  %v544_v14 = vld [vmem:[%s631_s1 + $0x38] sm:$0xff]   ;;  %v545_v15 = vld [vmem:[%s631_s1 + $0x30] sm:$0xff]   ;;  %s165_s16 = scalar_lea.vmem %s633_s3, %s455_s11  ;;  %vm394_vm2 = vcmask 254976  }
   0xe   : > { %507 = vmatpush3.bf16.msra.mxu1 %v537_v2  ;;  %498 = vmatprep.subr.bf16.mxu0 %v554_v1  ;;  %v167_v7 = vld [vmem:[%s161_s29] sm:$0x7] }
   0xf   : > { %508 = vmatprep.subr.bf16.mxu1 %v554_v1  ;;  %512 = vmatprep.mubr.msk.bf16.mxu1 %vm555_vm0, %v554_v1  ;;  %v462_v8 = vcombine.low %v167_v7, %v167_v7  ;;  %v481_v27 = vld [vmem:[%s632_s2] ss:$0 sm:$0xff] }
  0x11   : > { %499 = vmatpush3.bf16.msra.mxu0 %v538_v3  ;;  %v185_v9 = vshrl.u32 %v462_v8, 16  ;;  %v187_v10 = vshll.u32 %v462_v8, 16  ;;  %v321_v16 = vrot.slane %v462_v8, 1 }
  0x12   : > { %509 = vmatpush3.bf16.msra.mxu1 %v539_v4  ;;  %500 = vmatprep.subr.bf16.mxu0 %v554_v1 }
  0x13   : > { %510 = vmatprep.subr.bf16.mxu1 %v554_v1  ;;  %v189_v11 = vrot.slane %v187_v10, 1 }
  0x15   : > { %501 = vmatpush3.bf16.msra.mxu0 %v540_v5  ;;  %v190_v13 = vor.u32 %v189_v11, %v185_v9 }
  0x16   : > { %511 = vmatpush3.bf16.msra.mxu1 %v541_v6  ;;  %516 = vmatprep.subr.bf16.mxu0 %v554_v1 }
  0x18   : > { %503 = vmatmul.mubr.msk.bf16.vlgmr.msra.gmra.mxu0 %vm209_vm1, %v190_v13 }
  0x19   : > { %513 = vmatmul.mubr.msk.bf16.vlgmr.msra.gmra.mxu1 %vm209_vm1, %v167_v7  ;;  %517 = vmatpush3.bf16.msra.mxu0 %v543_v12 }
  0x1a   : > { %522 = vmatprep.mubr.msk.bf16.mxu0 %vm555_vm0, %v554_v1  ;;  %518 = vmatprep.subr.bf16.mxu0 %v554_v1 }
  0x1d   : > { %519 = vmatpush3.bf16.msra.mxu0 %v544_v14 }
  0x1e   : > { %520 = vmatprep.subr.bf16.mxu0 %v554_v1 }
  0x21   : > { %521 = vmatpush3.bf16.msra.mxu0 %v545_v15 }
  0x24   : > { %523 = vmatmul.mubr.msk.bf16.vlgmr.msra.gmra.mxu0 %vm209_vm1, %v321_v16 }
  0xd8   : > { %v247_v19 = vpop.f32.mrf.mxu0 }
  0xd9   : > { %v308_v17 = vpop.f32.mrf.mxu1 }
  0xda   : > { %v504_v21 = vpop.f32.mrf.mxu0  ;;  %v309_v25 = vadd.f32 %v308_v17, %v247_v19 }
  0xdb   : > { %v514_v18 = vpop.f32.mrf.mxu1 }
  0xdc   : > { %v250_v23 = vpop.f32.mrf.mxu0 }
  0xdd   : > { %v311_v20 = vpop.f32.mrf.mxu1 }
  0xde   : > { %v505_v24 = vpop.f32.mrf.mxu0 }
  0xdf   : > { %v515_v22 = vpop.f32.mrf.mxu1 }
  0xe4   : > { %v377_v26 = vpop.f32.mrf.mxu0 }
  0xe5   : > { %v383_v28 = vadd.f32 %v377_v26, %v309_v25 }
  0xe6   : > { %v524_v29 = vpop.f32.mrf.mxu0 }
  0xe7   : > { %v391_v30 = vadd.f32 %v481_v27, %v383_v28 }
  0xe8   : > { %v380_v31 = vpop.f32.mrf.mxu0 }
  0xe9   : > { %v392_v32 = vmax.f32 %v391_v30, 0.0 }
  0xea   : > { %v525_v33 = vpop.f32.mrf.mxu0 }
  0xeb   : > { %v393_v34 = vpack.c.bf16 %v392_v32, %v392_v32 }
  0xed   : > { %395 = vst.msk [vmem:[%s165_s16] sm:$0x3] %vm394_vm2, %v393_v34 }
  0xee PF: > { %s13_s12 = sadd.s32 1, %s552_s12  }
  0xef   : > { %p10_p4 = scmp.ge.s32.totalorder %s13_s12, 4  }
  0xf1   :  { %12 = sbr.rel (!%p10_p4) target bundleno = 1 (0x1), region = 64 }

// kernel: edsr_forward.24
= control target key start
LH: loop header
LB: loop body
LE: loop exit
PB: predicated region body
PF: predicated region fallthrough
CT: control target
= control target key end

     0   :  { %s575_s12 = smov 0   ;;  %s629_s0 = inlined_call_operand.vmem [shape: bf16[2,6,48], index: 0, kind: input, shape index: {}]   ;;  %s630_s1 = inlined_call_operand.vmem [shape: bf16[3,48,32], index: 1, kind: input, shape index: {}]   ;;  %s631_s2 = inlined_call_operand.vmem [shape: f32[1,32], index: 2, kind: input, shape index: {}]   ;;  %s632_s3 = inlined_call_operand.vmem [shape: bf16[2,4,32], index: 3, kind: output, shape index: {}]  }
   0x1 LB: > { %s448_s13 = sadd.s32 4294967295, %s551_s12   ;;  %p452_p0 = scmp.ge.s32.totalorder %s551_s12, 1  ;;  %s551_s12 = sphi %s575_s12, %s13_s12  }
   0x2   : > { %p136_p1 = scmp.lt.s32.totalorder %s551_s12, 3 }
   0x4   : > { %p137_p2 = pnand %p452_p0, %p136_p1 }
   0x5   : > { %p158_p3 = scmp.lt.s32.totalorder (!%p137_p2), %s448_s13, 1 }
   0x6   : > { %140 = sbr.rel (%p137_p2) target bundleno = 236 (0xec), region = 32 }
   0xb   : > { %v535_v0 = vld [vmem:[%s630_s1 + $0x28] sm:$0xff]   ;;  %v553_v1 = vmov 0.0   ;;  %v536_v2 = vld [vmem:[%s630_s1 + $0x10] sm:$0xff]   ;;  %v537_v3 = vld [vmem:[%s630_s1 + $0x20] sm:$0xff]   ;;  %vm554_vm0 = vmmov 0   ;;  %s634_s13 = smov (!%p158_p3, %s448_s13), 1 }
   0xc   : > { %495 = vmatprep.subr.bf16.mxu0 %v553_v1  ;;  %505 = vmatprep.subr.bf16.mxu1 %v553_v1  ;;  %v538_v4 = vld [vmem:[%s630_s1 + $0x8] sm:$0xff]   ;;  %v539_v5 = vld [vmem:[%s630_s1 + $0x18] sm:$0xff]   ;;  %s453_s24 = sshll.u32 %s634_s13, 2  ;;  %v540_v6 = vld [vmem:[%s630_s1] sm:$0xff]   ;;  %vm209_vm1 = vcmask 392192   ;;  %s454_s11 = sshll.u32 %s634_s13, 1 }
   0xd   : > { %496 = vmatpush3.bf16.msra.mxu0 %v535_v0  ;;  %501 = vmatprep.mubr.msk.bf16.mxu0 %vm554_vm0, %v553_v1  ;;  %s161_s29 = scalar_lea.vmem %s629_s0, %s453_s24  ;;  %v542_v12 = vld [vmem:[%s630_s1 + $0x40] sm:$0xff]   ;;  %v543_v14 = vld [vmem:[%s630_s1 + $0x38] sm:$0xff]   ;;  %v544_v15 = vld [vmem:[%s630_s1 + $0x30] sm:$0xff]   ;;  %s165_s16 = scalar_lea.vmem %s632_s3, %s454_s11  ;;  %vm393_vm2 = vcmask 254976  }
   0xe   : > { %506 = vmatpush3.bf16.msra.mxu1 %v536_v2  ;;  %497 = vmatprep.subr.bf16.mxu0 %v553_v1  ;;  %v167_v7 = vld [vmem:[%s161_s29] sm:$0x7] }
   0xf   : > { %507 = vmatprep.subr.bf16.mxu1 %v553_v1  ;;  %511 = vmatprep.mubr.msk.bf16.mxu1 %vm554_vm0, %v553_v1  ;;  %v461_v8 = vcombine.low %v167_v7, %v167_v7  ;;  %v480_v27 = vld [vmem:[%s631_s2] ss:$0 sm:$0xff] }
  0x11   : > { %498 = vmatpush3.bf16.msra.mxu0 %v537_v3  ;;  %v185_v9 = vshrl.u32 %v461_v8, 16  ;;  %v187_v10 = vshll.u32 %v461_v8, 16  ;;  %v321_v16 = vrot.slane %v461_v8, 1 }
  0x12   : > { %508 = vmatpush3.bf16.msra.mxu1 %v538_v4  ;;  %499 = vmatprep.subr.bf16.mxu0 %v553_v1 }
  0x13   : > { %509 = vmatprep.subr.bf16.mxu1 %v553_v1  ;;  %v189_v11 = vrot.slane %v187_v10, 1 }
  0x15   : > { %500 = vmatpush3.bf16.msra.mxu0 %v539_v5  ;;  %v190_v13 = vor.u32 %v189_v11, %v185_v9 }
  0x16   : > { %510 = vmatpush3.bf16.msra.mxu1 %v540_v6  ;;  %515 = vmatprep.subr.bf16.mxu0 %v553_v1 }
  0x18   : > { %502 = vmatmul.mubr.msk.bf16.vlgmr.msra.gmra.mxu0 %vm209_vm1, %v190_v13 }
  0x19   : > { %512 = vmatmul.mubr.msk.bf16.vlgmr.msra.gmra.mxu1 %vm209_vm1, %v167_v7  ;;  %516 = vmatpush3.bf16.msra.mxu0 %v542_v12 }
  0x1a   : > { %521 = vmatprep.mubr.msk.bf16.mxu0 %vm554_vm0, %v553_v1  ;;  %517 = vmatprep.subr.bf16.mxu0 %v553_v1 }
  0x1d   : > { %518 = vmatpush3.bf16.msra.mxu0 %v543_v14 }
  0x1e   : > { %519 = vmatprep.subr.bf16.mxu0 %v553_v1 }
  0x21   : > { %520 = vmatpush3.bf16.msra.mxu0 %v544_v15 }
  0x24   : > { %522 = vmatmul.mubr.msk.bf16.vlgmr.msra.gmra.mxu0 %vm209_vm1, %v321_v16 }
  0xd8   : > { %v247_v19 = vpop.f32.mrf.mxu0 }
  0xd9   : > { %v308_v17 = vpop.f32.mrf.mxu1 }
  0xda   : > { %v503_v21 = vpop.f32.mrf.mxu0  ;;  %v309_v25 = vadd.f32 %v308_v17, %v247_v19 }
  0xdb   : > { %v513_v18 = vpop.f32.mrf.mxu1 }
  0xdc   : > { %v250_v23 = vpop.f32.mrf.mxu0 }
  0xdd   : > { %v311_v20 = vpop.f32.mrf.mxu1 }
  0xde   : > { %v504_v24 = vpop.f32.mrf.mxu0 }
  0xdf   : > { %v514_v22 = vpop.f32.mrf.mxu1 }
  0xe4   : > { %v377_v26 = vpop.f32.mrf.mxu0 }
  0xe5   : > { %v383_v28 = vadd.f32 %v377_v26, %v309_v25 }
  0xe6   : > { %v523_v29 = vpop.f32.mrf.mxu0 }
  0xe7   : > { %v391_v30 = vadd.f32 %v480_v27, %v383_v28 }
  0xe8   : > { %v380_v31 = vpop.f32.mrf.mxu0 }
  0xe9   : > { %v392_v32 = vpack.c.bf16 %v391_v30, %v391_v30 }
  0xea   : > { %v524_v33 = vpop.f32.mrf.mxu0 }
  0xeb   : > { %394 = vst.msk [vmem:[%s165_s16] sm:$0x3] %vm393_vm2, %v392_v32 }
  0xec PF: > { %s13_s12 = sadd.s32 1, %s551_s12  }
  0xed   : > { %p10_p4 = scmp.ge.s32.totalorder %s13_s12, 4  }
  0xef   :  { %12 = sbr.rel (!%p10_p4) target bundleno = 1 (0x1), region = 64 }

// kernel: edsr_forward.28
= control target key start
LH: loop header
LB: loop body
LE: loop exit
PB: predicated region body
PF: predicated region fallthrough
CT: control target
= control target key end

     0   :  { %s640_s15 = smov 0   ;;  %s697_s0 = inlined_call_operand.vmem [shape: bf16[2,6,48], index: 0, kind: input, shape index: {}]   ;;  %s698_s1 = inlined_call_operand.vmem [shape: bf16[3,48,32], index: 1, kind: input, shape index: {}]   ;;  %s699_s2 = inlined_call_operand.vmem [shape: f32[1,32], index: 2, kind: input, shape index: {}]   ;;  %s700_s3 = inlined_call_operand.vmem [shape: bf16[2,4,32], index: 3, kind: input, shape index: {}]   ;;  %s701_s4 = inlined_call_operand.vmem [shape: bf16[2,4,32], index: 4, kind: output, shape index: {}]  }
   0x1 LB: > { %s507_s16 = sadd.s32 4294967295, %s611_s15   ;;  %p511_p0 = scmp.ge.s32.totalorder %s611_s15, 1  ;;  %s611_s15 = sphi %s640_s15, %s14_s15  }
   0x2   : > { %p170_p1 = scmp.lt.s32.totalorder %s611_s15, 3 }
   0x4   : > { %p171_p2 = pnand %p511_p0, %p170_p1 }
   0x5   : > { %p198_p3 = scmp.lt.s32.totalorder (!%p171_p2), %s507_s16, 1 }
   0x6   : > { %174 = sbr.rel (%p171_p2) target bundleno = 238 (0xee), region = 36 }
   0xb   : > { %v595_v0 = vld [vmem:[%s698_s1 + $0x28] sm:$0xff]   ;;  %v613_v1 = vmov 0.0   ;;  %v596_v2 = vld [vmem:[%s698_s1 + $0x10] sm:$0xff]   ;;  %v597_v3 = vld [vmem:[%s698_s1 + $0x20] sm:$0xff]   ;;  %vm614_vm0 = vmmov 0   ;;  %s703_s16 = smov (!%p198_p3, %s507_s16), 1 }
   0xc   : > { %555 = vmatprep.subr.bf16.mxu0 %v613_v1  ;;  %565 = vmatprep.subr.bf16.mxu1 %v613_v1  ;;  %v598_v4 = vld [vmem:[%s698_s1 + $0x8] sm:$0xff]   ;;  %v599_v5 = vld [vmem:[%s698_s1 + $0x18] sm:$0xff]   ;;  %s512_s27 = sshll.u32 %s703_s16, 2  ;;  %v600_v6 = vld [vmem:[%s698_s1] sm:$0xff]   ;;  %vm253_vm1 = vcmask 392192   ;;  %s513_s13 = sshll.u32 %s703_s16, 1 }
   0xd   : > { %556 = vmatpush3.bf16.msra.mxu0 %v595_v0  ;;  %561 = vmatprep.mubr.msk.bf16.mxu0 %vm614_vm0, %v613_v1  ;;  %s201_s6 = scalar_lea.vmem %s697_s0, %s512_s27  ;;  %v602_v12 = vld [vmem:[%s698_s1 + $0x40] sm:$0xff]   ;;  %v603_v14 = vld [vmem:[%s698_s1 + $0x38] sm:$0xff]   ;;  %v604_v15 = vld [vmem:[%s698_s1 + $0x30] sm:$0xff]   ;;  %s205_s18 = scalar_lea.vmem %s700_s3, %s513_s13  ;;  %vm440_vm2 = vcmask 254976  }
   0xe   : > { %566 = vmatpush3.bf16.msra.mxu1 %v596_v2  ;;  %557 = vmatprep.subr.bf16.mxu0 %v613_v1  ;;  %v211_v7 = vld [vmem:[%s201_s6] sm:$0x7]  ;;  %s209_s22 = scalar_lea.vmem %s701_s4, %s513_s13 }
   0xf   : > { %567 = vmatprep.subr.bf16.mxu1 %v613_v1  ;;  %571 = vmatprep.mubr.msk.bf16.mxu1 %vm614_vm0, %v613_v1  ;;  %v521_v8 = vcombine.low %v211_v7, %v211_v7  ;;  %v436_v25 = vld [vmem:[%s205_s18] sm:$0x3] }
  0x10   : > { %v540_v28 = vld [vmem:[%s699_s2] ss:$0 sm:$0xff]  ;;  %v437_v30 = vunpack.c.l.bf16 %v436_v25 }
  0x11   : > { %558 = vmatpush3.bf16.msra.mxu0 %v597_v3  ;;  %v229_v9 = vshrl.u32 %v521_v8, 16  ;;  %v231_v10 = vshll.u32 %v521_v8, 16  ;;  %v365_v16 = vrot.slane %v521_v8, 1 }
  0x12   : > { %568 = vmatpush3.bf16.msra.mxu1 %v598_v4  ;;  %559 = vmatprep.subr.bf16.mxu0 %v613_v1 }
  0x13   : > { %569 = vmatprep.subr.bf16.mxu1 %v613_v1  ;;  %v233_v11 = vrot.slane %v231_v10, 1 }
  0x15   : > { %560 = vmatpush3.bf16.msra.mxu0 %v599_v5  ;;  %v234_v13 = vor.u32 %v233_v11, %v229_v9 }
  0x16   : > { %570 = vmatpush3.bf16.msra.mxu1 %v600_v6  ;;  %575 = vmatprep.subr.bf16.mxu0 %v613_v1 }
  0x18   : > { %562 = vmatmul.mubr.msk.bf16.vlgmr.msra.gmra.mxu0 %vm253_vm1, %v234_v13 }
  0x19   : > { %572 = vmatmul.mubr.msk.bf16.vlgmr.msra.gmra.mxu1 %vm253_vm1, %v211_v7  ;;  %576 = vmatpush3.bf16.msra.mxu0 %v602_v12 }
  0x1a   : > { %581 = vmatprep.mubr.msk.bf16.mxu0 %vm614_vm0, %v613_v1  ;;  %577 = vmatprep.subr.bf16.mxu0 %v613_v1 }
  0x1d   : > { %578 = vmatpush3.bf16.msra.mxu0 %v603_v14 }
  0x1e   : > { %579 = vmatprep.subr.bf16.mxu0 %v613_v1 }
  0x21   : > { %580 = vmatpush3.bf16.msra.mxu0 %v604_v15 }
  0x24   : > { %582 = vmatmul.mubr.msk.bf16.vlgmr.msra.gmra.mxu0 %vm253_vm1, %v365_v16 }
  0xd8   : > { %v291_v19 = vpop.f32.mrf.mxu0 }
  0xd9   : > { %v352_v17 = vpop.f32.mrf.mxu1 }
  0xda   : > { %v563_v21 = vpop.f32.mrf.mxu0  ;;  %v353_v26 = vadd.f32 %v352_v17, %v291_v19 }
  0xdb   : > { %v573_v18 = vpop.f32.mrf.mxu1 }
  0xdc   : > { %v294_v23 = vpop.f32.mrf.mxu0 }
  0xdd   : > { %v355_v20 = vpop.f32.mrf.mxu1 }
  0xde   : > { %v564_v24 = vpop.f32.mrf.mxu0 }
  0xdf   : > { %v574_v22 = vpop.f32.mrf.mxu1 }
  0xe4   : > { %v421_v27 = vpop.f32.mrf.mxu0 }
  0xe5   : > { %v427_v29 = vadd.f32 %v421_v27, %v353_v26 }
  0xe6   : > { %v583_v31 = vpop.f32.mrf.mxu0 }
  0xe7   : > { %v435_v32 = vadd.f32 %v540_v28, %v427_v29 }
  0xe8   : > { %v424_v33 = vpop.f32.mrf.mxu0 }
  0xe9   : > { %v438_v34 = vadd.f32 %v437_v30, %v435_v32 }
  0xea   : > { %v584_v35 = vpop.f32.mrf.mxu0 }
  0xeb   : > { %v439_v36 = vpack.c.bf16 %v438_v34, %v438_v34 }
  0xed   : > { %441 = vst.msk [vmem:[%s209_s22] sm:$0x3] %vm440_vm2, %v439_v36 }
  0xee PF: > { %s14_s15 = sadd.s32 1, %s611_s15  }
  0xef   : > { %p11_p4 = scmp.ge.s32.totalorder %s14_s15, 4  }
  0xf1   :  { %13 = sbr.rel (!%p11_p4) target bundleno = 1 (0x1), region = 71 }

// kernel: tile.118
= control target key start
LH: loop header
LB: loop body
LE: loop exit
PB: predicated region body
PF: predicated region fallthrough
CT: control target
= control target key end

     0   :  { %s22_s0 = inlined_call_operand.vmem [shape: f32[3], index: 0, kind: input, shape index: {}]   ;;  %s23_s1 = inlined_call_operand.vmem [shape: f32[4,3], index: 1, kind: output, shape index: {}]  }
   0x1   :  { %v4_v0 = vld [vmem:[%s22_s0] ss:$0 sm:$0xff] }
   0x2   :  { %5 = vst [vmem:[%s23_s1] sm:$0xf] %v4_v0 }

// kernel: tile.119
= control target key start
LH: loop header
LB: loop body
LE: loop exit
PB: predicated region body
PF: predicated region fallthrough
CT: control target
= control target key end

     0   :  { %vm8_vm0 = vcmask 23552   ;;  %s40_s8 = smov 3   ;;  %s41_s9 = smov 6   ;;  %vm14_vm1 = vcmask 97352   ;;  %vm20_vm2 = vcmask 72752   ;;  %vm26_vm3 = vcmask 48152   ;;  %s58_s0 = inlined_call_operand.vmem [shape: f32[4,3], index: 0, kind: input, shape index: {}]   ;;  %s59_s1 = inlined_call_operand.vmem [shape: f32[1,12], index: 1, kind: output, shape index: {}]  }
   0x1   :  { %v5_v0 = vld [vmem:[%s58_s0] sm:$0xf]  ;;  %s39_s0 = smov 9  }
   0x2   :  { %6 = vst [vmem:[#allocation1] sm:$0xf] %v5_v0 }
   0x9   :  { %v11_v1 = vld [vmem:[#allocation1 + $0x3] sm:$0x1]   ;;  %v23_v2 = vld [vmem:[#allocation1 + $0x1] sm:$0x1]   ;;  %v7_v3 = vld [vmem:[#allocation1] sm:$0x1]  }
   0xa   :  { %12 = vrot.lane.b32.xlu0 %v11_v1, %s39_s0  ;;  %24 = vrot.lane.b32.xlu1 %v23_v2, %s40_s8  ;;  %v17_v4 = vld [vmem:[#allocation1 + $0x2] sm:$0x1]   ;;  %9 = vst.msk [vmem:[#allocation0] sm:$0x1] %vm8_vm0, %v7_v3  }
   0xe   :  { %18 = vrot.lane.b32.xlu0 %v17_v4, %s41_s9 }
  0x7c   :  { %v13_v5 = vpop.permute.xlu0 %12   ;;  %v25_v6 = vpop.permute.xlu1 %24  }
  0x7d   :  { %15 = vst.msk [vmem:[#allocation0] sm:$0x1] %vm14_vm1, %v13_v5  }
  0x80   :  { %v19_v7 = vpop.permute.xlu0 %18  }
  0x81   :  { %21 = vst.msk [vmem:[#allocation0] sm:$0x1] %vm20_vm2, %v19_v7  }
  0x82   :  { %27 = vst.msk [vmem:[#allocation0] sm:$0x1] %vm26_vm3, %v25_v6  }
  0x89   :  { %v32_v8 = vld [vmem:[#allocation0] sm:$0x1] }
  0x8a   :  { %35 = vst [vmem:[%s59_s1] sm:$0x1] %v32_v8 }

// kernel: edsr_forward.25
= control target key start
LH: loop header
LB: loop body
LE: loop exit
PB: predicated region body
PF: predicated region fallthrough
CT: control target
= control target key end

     0   :  { %vm91_vm0 = vcmask 189440   ;;  %vm284_vm1 = vcmask 1041409   ;;  %vm286_vm2 = vcmask 1042434   ;;  %vm288_vm3 = vcmask 1043459   ;;  %s578_s0 = inlined_call_operand.vmem [shape: bf16[16,2,24], index: 0, kind: input, shape index: {}]   ;;  %s579_s1 = inlined_call_operand.vmem [shape: bf16[16,2,24], index: 1, kind: input, shape index: {}]   ;;  %s580_s2 = inlined_call_operand.vmem [shape: bf16[16,24], index: 2, kind: output, shape index: {}]  }
   0x1   :  { %v366_v0 = vld [vmem:[%s578_s0] sm:$0x1]  ;;  %v371_v1 = vld [vmem:[%s578_s0 + $0x1] sm:$0x1]  ;;  %v376_v2 = vld [vmem:[%s578_s0 + $0x2] sm:$0x1] }
   0x2   :  { %v381_v3 = vld [vmem:[%s578_s0 + $0x3] sm:$0x1]  ;;  %v386_v4 = vld [vmem:[%s578_s0 + $0x4] sm:$0x1]  ;;  %v391_v5 = vld [vmem:[%s578_s0 + $0x5] sm:$0x1]  ;;  %v27_v12 = vunpack.c.l.bf16 %v366_v0  ;;  %v28_v13 = vunpack.c.l.bf16 %v371_v1  ;;  %v29_v17 = vunpack.c.l.bf16 %v376_v2 }
   0x3   :  { %v396_v6 = vld [vmem:[%s578_s0 + $0x6] sm:$0x1]  ;;  %v401_v7 = vld [vmem:[%s578_s0 + $0x7] sm:$0x1]  ;;  %v406_v8 = vld [vmem:[%s578_s0 + $0x8] sm:$0x1]  ;;  %v30_v18 = vunpack.c.l.bf16 %v381_v3  ;;  %v31_v19 = vunpack.c.l.bf16 %v386_v4  ;;  %v32_v20 = vunpack.c.l.bf16 %v391_v5 }
   0x4   :  { %v411_v9 = vld [vmem:[%s578_s0 + $0x9] sm:$0x1]  ;;  %v416_v10 = vld [vmem:[%s578_s0 + $0xa] sm:$0x1]  ;;  %v421_v11 = vld [vmem:[%s578_s0 + $0xb] sm:$0x1]  ;;  %v33_v22 = vunpack.c.l.bf16 %v396_v6  ;;  %v34_v23 = vunpack.c.l.bf16 %v401_v7  ;;  %v35_v24 = vunpack.c.l.bf16 %v406_v8 }
   0x5   :  { %v428_v14 = vld [vmem:[%s578_s0 + $0xc] sm:$0x1]  ;;  %v433_v15 = vld [vmem:[%s578_s0 + $0xd] sm:$0x1]  ;;  %v438_v16 = vld [vmem:[%s578_s0 + $0xe] sm:$0x1]  ;;  %v36_v25 = vunpack.c.l.bf16 %v411_v9  ;;  %v37_v28 = vunpack.c.l.bf16 %v416_v10  ;;  %v38_v29 = vunpack.c.l.bf16 %v421_v11 }
   0x6   :  { %v447_v21 = vld [vmem:[%s578_s0 + $0xf] sm:$0x1]  ;;  %v43_v26 = vld [vmem:[%s579_s1] sm:$0x1]  ;;  %v44_v27 = vld [vmem:[%s579_s1 + $0x1] sm:$0x1]  ;;  %v39_v30 = vunpack.c.l.bf16 %v428_v14  ;;  %v40_v35 = vunpack.c.l.bf16 %v433_v15  ;;  %v41_v42 = vunpack.c.l.bf16 %v438_v16 }
   0x7   :  { %v45_v31 = vld [vmem:[%s579_s1 + $0x2] sm:$0x1]  ;;  %v46_v32 = vld [vmem:[%s579_s1 + $0x3] sm:$0x1]  ;;  %v47_v33 = vld [vmem:[%s579_s1 + $0x4] sm:$0x1]  ;;  %v59_v34 = vunpack.c.l.bf16 %v43_v26  ;;  %v60_v39 = vunpack.c.l.bf16 %v44_v27  ;;  %v42_v43 = vunpack.c.l.bf16 %v447_v21 }
   0x8   :  { %v48_v36 = vld [vmem:[%s579_s1 + $0x5] sm:$0x1]  ;;  %v49_v37 = vld [vmem:[%s579_s1 + $0x6] sm:$0x1]  ;;  %v50_v38 = vld [vmem:[%s579_s1 + $0x7] sm:$0x1]  ;;  %v61_v40 = vunpack.c.l.bf16 %v45_v31  ;;  %v62_v41 = vunpack.c.l.bf16 %v46_v32  ;;  %v63_v47 = vunpack.c.l.bf16 %v47_v33 }
   0x9   :  { %v51_v44 = vld [vmem:[%s579_s1 + $0x8] sm:$0x1]  ;;  %v52_v45 = vld [vmem:[%s579_s1 + $0x9] sm:$0x1]  ;;  %v53_v46 = vld [vmem:[%s579_s1 + $0xa] sm:$0x1]  ;;  %v64_v48 = vunpack.c.l.bf16 %v48_v36  ;;  %v65_v52 = vunpack.c.l.bf16 %v49_v37  ;;  %v66_v53 = vunpack.c.l.bf16 %v50_v38  ;;  %v75_v61 = vmax.f32 %v27_v12, %v59_v34 }
   0xa   :  { %v54_v49 = vld [vmem:[%s579_s1 + $0xb] sm:$0x1]  ;;  %v55_v50 = vld [vmem:[%s579_s1 + $0xc] sm:$0x1]  ;;  %v501_v51 = vld [vmem:[%s579_s1 + $0xd] sm:$0x1]  ;;  %v67_v54 = vunpack.c.l.bf16 %v51_v44  ;;  %v68_v55 = vunpack.c.l.bf16 %v52_v45  ;;  %v69_v58 = vunpack.c.l.bf16 %v53_v46  ;;  %v76_v63 = vmax.f32 %v28_v13, %v60_v39 }
   0xb   :  { %v506_v56 = vld [vmem:[%s579_s1 + $0xe] sm:$0x1]  ;;  %v511_v57 = vld [vmem:[%s579_s1 + $0xf] sm:$0x1]  ;;  %v70_v59 = vunpack.c.l.bf16 %v54_v49  ;;  %v71_v60 = vunpack.c.l.bf16 %v55_v50  ;;  %v72_v62 = vunpack.c.l.bf16 %v501_v51  ;;  %v77_v0 = vmax.f32 %v29_v17, %v61_v40 }
   0xc   :  { %v78_v1 = vmax.f32 %v30_v18, %v62_v41  ;;  %v73_v2 = vunpack.c.l.bf16 %v506_v56  ;;  %v74_v3 = vunpack.c.l.bf16 %v511_v57  ;;  %v79_v4 = vmax.f32 %v31_v19, %v63_v47 }
   0xd   :  { %v80_v5 = vmax.f32 %v32_v20, %v64_v48  ;;  %v81_v6 = vmax.f32 %v33_v22, %v65_v52  ;;  %v82_v7 = vmax.f32 %v34_v23, %v66_v53  ;;  %v83_v8 = vmax.f32 %v35_v24, %v67_v54 }
   0xe   :  { %v84_v9 = vmax.f32 %v36_v25, %v68_v55  ;;  %v85_v10 = vmax.f32 %v37_v28, %v69_v58  ;;  %v516_v11 = vmax.f32 %v38_v29, %v70_v59  ;;  %v518_v14 = vmax.f32 %v39_v30, %v71_v60 }
   0xf   :  { %v92_v12 = vsel %vm91_vm0, %v75_v61, -inf  ;;  %v99_v17 = vsel %vm91_vm0, %v76_v63, -inf  ;;  %v106_v18 = vsel %vm91_vm0, %v77_v0, -inf  ;;  %v113_v26 = vsel %vm91_vm0, %v78_v1, -inf }
  0x10   :  { %v93_v13 = vrot.slane %v92_v12, 4  ;;  %v100_v19 = vrot.slane %v99_v17, 4  ;;  %v107_v20 = vrot.slane %v106_v18, 4  ;;  %v114_v22 = vrot.slane %v113_v26, 4 }
  0x11   :  { %v120_v23 = vsel %vm91_vm0, %v79_v4, -inf  ;;  %v127_v27 = vsel %vm91_vm0, %v80_v5, -inf  ;;  %v134_v28 = vsel %vm91_vm0, %v81_v6, -inf  ;;  %v141_v37 = vsel %vm91_vm0, %v82_v7, -inf }
  0x12   :  { %v94_v24 = vmax.f32 %v92_v12, %v93_v13  ;;  %v121_v25 = vrot.slane %v120_v23, 4  ;;  %v101_v29 = vmax.f32 %v99_v17, %v100_v19  ;;  %v108_v30 = vmax.f32 %v106_v18, %v107_v20 }
  0x13   :  { %v115_v31 = vmax.f32 %v113_v26, %v114_v22  ;;  %v128_v32 = vrot.slane %v127_v27, 4  ;;  %v135_v36 = vrot.slane %v134_v28, 4  ;;  %v142_v47 = vrot.slane %v141_v37, 4 }
  0x14   :  { %v95_v33 = vrot.slane %v94_v24, 2  ;;  %v122_v34 = vmax.f32 %v120_v23, %v121_v25  ;;  %v102_v38 = vrot.slane %v101_v29, 2  ;;  %v109_v39 = vrot.slane %v108_v30, 2 }
  0x15   :  { %v116_v40 = vrot.slane %v115_v31, 2  ;;  %v129_v41 = vmax.f32 %v127_v27, %v128_v32  ;;  %v136_v46 = vmax.f32 %v134_v28, %v135_v36  ;;  %v143_v55 = vmax.f32 %v141_v37, %v142_v47 }
  0x16   :  { %v96_v44 = vmax.f32 %v94_v24, %v95_v33  ;;  %v123_v45 = vrot.slane %v122_v34, 2  ;;  %v103_v48 = vmax.f32 %v101_v29, %v102_v38  ;;  %v110_v49 = vmax.f32 %v108_v30, %v109_v39 }
  0x17   :  { %v117_v50 = vmax.f32 %v115_v31, %v116_v40  ;;  %v130_v51 = vrot.slane %v129_v41, 2  ;;  %v137_v54 = vrot.slane %v136_v46, 2  ;;  %v88_v60 = vmax.f32 %v40_v35, %v72_v62 }
  0x18   :  { %v97_v52 = vrot.slane %v96_v44, 1  ;;  %v124_v53 = vmax.f32 %v122_v34, %v123_v45  ;;  %v104_v56 = vrot.slane %v103_v48, 1  ;;  %v111_v57 = vrot.slane %v110_v49, 1 }
  0x19   :  { %v118_v58 = vrot.slane %v117_v50, 1  ;;  %v131_v59 = vmax.f32 %v129_v41, %v130_v51  ;;  %v138_v63 = vmax.f32 %v136_v46, %v137_v54  ;;  %v144_v0 = vrot.slane %v143_v55, 2 }
  0x1a   :  { %v125_v61 = vrot.slane %v124_v53, 1  ;;  %v89_v1 = vmax.f32 %v41_v42, %v73_v2  ;;  %v90_v4 = vmax.f32 %v42_v43, %v74_v3  ;;  %v534_v5 = vmax.f32 %v96_v44, %v97_v52 }
  0x1b   :  { %v536_v6 = vmax.f32 %v103_v48, %v104_v56  ;;  %v538_v7 = vmax.f32 %v110_v49, %v111_v57  ;;  %v540_v12 = vmax.f32 %v117_v50, %v118_v58  ;;  %v145_v13 = vmax.f32 %v143_v55, %v144_v0 }
  0x1c   :  { %v148_v15 = vsel %vm91_vm0, %v83_v8, -inf  ;;  %v132_v35 = vrot.slane %v131_v59, 1  ;;  %v155_v17 = vsel %vm91_vm0, %v84_v9, -inf  ;;  %v162_v16 = vsel %vm91_vm0, %v85_v10, -inf }
  0x1d   :  { %v149_v62 = vrot.slane %v148_v15, 4  ;;  %v545_v42 = vmax.f32 %v124_v53, %v125_v61  ;;  %v139_v21 = vrot.slane %v138_v63, 1  ;;  %v156_v43 = vrot.slane %v155_v17, 4 }
  0x1e   :  { %v163_v2 = vrot.slane %v162_v16, 4  ;;  %v169_v18 = vsel %vm91_vm0, %v516_v11, -inf  ;;  %v176_v26 = vsel %vm91_vm0, %v518_v14, -inf  ;;  %v183_v8 = vsel %vm91_vm0, %v88_v60, -inf }
  0x1f   :  { %v150_v3 = vmax.f32 %v148_v15, %v149_v62  ;;  %v146_v19 = vrot.slane %v145_v13, 1  ;;  %v157_v20 = vmax.f32 %v155_v17, %v156_v43  ;;  %v170_v9 = vrot.slane %v169_v18, 4 }
  0x20   :  { %v164_v22 = vmax.f32 %v162_v16, %v163_v2  ;;  %v177_v10 = vrot.slane %v176_v26, 4  ;;  %v184_v24 = vrot.slane %v183_v8, 4  ;;  %v190_v25 = vsel %vm91_vm0, %v89_v1, -inf }
  0x21   :  { %v151_v23 = vrot.slane %v150_v3, 2  ;;  %v158_v27 = vrot.slane %v157_v20, 2  ;;  %v171_v29 = vmax.f32 %v169_v18, %v170_v9  ;;  %v191_v30 = vrot.slane %v190_v25, 4 }
  0x22   :  { %v165_v28 = vrot.slane %v164_v22, 2  ;;  %v178_v11 = vmax.f32 %v176_v26, %v177_v10  ;;  %v185_v32 = vmax.f32 %v183_v8, %v184_v24  ;;  %v197_v14 = vsel %vm91_vm0, %v90_v4, -inf }
  0x23   :  { %v152_v31 = vmax.f32 %v150_v3, %v151_v23  ;;  %v159_v33 = vmax.f32 %v157_v20, %v158_v27  ;;  %v172_v36 = vrot.slane %v171_v29, 2  ;;  %v192_v37 = vmax.f32 %v190_v25, %v191_v30 }
  0x24   :  { %v166_v34 = vmax.f32 %v164_v22, %v165_v28  ;;  %v179_v39 = vrot.slane %v178_v11, 2  ;;  %v186_v40 = vrot.slane %v185_v32, 2  ;;  %v198_v41 = vrot.slane %v197_v14, 4 }
  0x25   :  { %v153_v38 = vrot.slane %v152_v31, 1  ;;  %v160_v44 = vrot.slane %v159_v33, 1  ;;  %v173_v46 = vmax.f32 %v171_v29, %v172_v36  ;;  %v193_v47 = vrot.slane %v192_v37, 2 }
  0x26   :  { %v167_v45 = vrot.slane %v166_v34, 1  ;;  %v133_v48 = vmax.f32 %v131_v59, %v132_v35  ;;  %v180_v49 = vmax.f32 %v178_v11, %v179_v39  ;;  %v187_v50 = vmax.f32 %v185_v32, %v186_v40 }
  0x27   :  { %v199_v51 = vmax.f32 %v197_v14, %v198_v41  ;;  %v140_v52 = vmax.f32 %v138_v63, %v139_v21  ;;  %v147_v53 = vmax.f32 %v145_v13, %v146_v19  ;;  %v174_v54 = vrot.slane %v173_v46, 1 }
  0x28   :  { %v194_v55 = vmax.f32 %v192_v37, %v193_v47  ;;  %v154_v56 = vmax.f32 %v152_v31, %v153_v38  ;;  %v181_v57 = vrot.slane %v180_v49, 1  ;;  %v188_v58 = vrot.slane %v187_v50, 1 }
  0x29   :  { %v200_v60 = vrot.slane %v199_v51, 2  ;;  %v161_v61 = vmax.f32 %v159_v33, %v160_v44  ;;  %v168_v0 = vmax.f32 %v166_v34, %v167_v45  ;;  %v332_v4 = vpack.c.bf16 %v534_v5, %v534_v5 }
  0x2a   :  { %v195_v1 = vrot.slane %v194_v55, 1  ;;  %v175_v59 = vmax.f32 %v173_v46, %v174_v54  ;;  %v333_v63 = vpack.c.bf16 %v536_v6, %v536_v6  ;;  %v334_v13 = vpack.c.bf16 %v538_v7, %v538_v7 }
  0x2b   :  { %v201_v15 = vmax.f32 %v199_v51, %v200_v60  ;;  %v182_v35 = vmax.f32 %v180_v49, %v181_v57  ;;  %v189_v62 = vmax.f32 %v187_v50, %v188_v58  ;;  %v335_v16 = vpack.c.bf16 %v540_v12, %v540_v12 }
  0x2c   :  { %v196_v17 = vmax.f32 %v194_v55, %v195_v1  ;;  %v336_v43 = vpack.c.bf16 %v545_v42, %v545_v42  ;;  %v337_v2 = vpack.c.bf16 %v133_v48, %v133_v48  ;;  %v340_v5 = vpack.c.bf16 %v154_v56, %v154_v56 }
  0x2d   :  { %v202_v21 = vrot.slane %v201_v15, 1  ;;  %v338_v3 = vpack.c.bf16 %v140_v52, %v140_v52  ;;  %v339_v18 = vpack.c.bf16 %v147_v53, %v147_v53  ;;  %v341_v26 = vpack.c.bf16 %v161_v61, %v161_v61 }
  0x2e   :  { %v342_v8 = vpack.c.bf16 %v168_v0, %v168_v0  ;;  %v343_v19 = vpack.c.bf16 %v175_v59, %v175_v59  ;;  %v268_v20 = vunpack.c.l.b16 %v332_v4  ;;  %v269_v7 = vunpack.c.l.b16 %v333_v63 }
  0x2f   :  { %v203_v6 = vmax.f32 %v201_v15, %v202_v21  ;;  %v344_v22 = vpack.c.bf16 %v182_v35, %v182_v35  ;;  %v345_v9 = vpack.c.bf16 %v189_v62, %v189_v62  ;;  %v270_v23 = vunpack.c.l.b16 %v334_v13 }
  0x30   :  { %v346_v10 = vpack.c.bf16 %v196_v17, %v196_v17  ;;  %v271_v12 = vunpack.c.l.b16 %v335_v16  ;;  %v272_v24 = vunpack.c.l.b16 %v336_v43  ;;  %v276_v25 = vunpack.c.l.b16 %v340_v5 }
  0x31   :  { %v347_v27 = vpack.c.bf16 %v203_v6, %v203_v6  ;;  %v273_v42 = vunpack.c.l.b16 %v337_v2  ;;  %v277_v28 = vunpack.c.l.b16 %v341_v26  ;;  %v278_v29 = vunpack.c.l.b16 %v342_v8 }
  0x32   :  { %v274_v30 = vunpack.c.l.b16 %v338_v3  ;;  %v275_v31 = vunpack.c.l.b16 %v339_v18  ;;  %v279_v11 = vunpack.c.l.b16 %v343_v19  ;;  %v285_v32 = vsel %vm284_vm1, %v269_v7, %v268_v20 }
  0x33   :  { %v280_v14 = vunpack.c.l.b16 %v344_v22  ;;  %v287_v33 = vsel %vm286_vm2, %v270_v23, %v285_v32  ;;  %vm290_vm4 = vcmask 1044484   ;;  %vm292_vm5 = vcmask 1045509  }
  0x34   :  { %v281_v34 = vunpack.c.l.b16 %v345_v9  ;;  %v289_v36 = vsel %vm288_vm3, %v271_v12, %v287_v33  ;;  %vm294_vm6 = vcmask 1046534   ;;  %v298_v37 = vsel %vm284_vm1, %v277_v28, %v276_v25 }
  0x35   :  { %v282_v38 = vunpack.c.l.b16 %v346_v10  ;;  %v291_v39 = vsel %vm290_vm4, %v272_v24, %v289_v36  ;;  %vm296_vm7 = vcmask 1047559   ;;  %v299_v40 = vsel %vm286_vm2, %v278_v29, %v298_v37 }
  0x36   :  { %v283_v41 = vunpack.c.l.b16 %v347_v27  ;;  %v293_v44 = vsel %vm292_vm5, %v273_v42, %v291_v39  ;;  %v300_v45 = vsel %vm288_vm3, %v279_v11, %v299_v40  ;;  %vm309_vm8 = vcmask 191488  }
  0x37   :  { %v295_v46 = vsel %vm294_vm6, %v274_v30, %v293_v44  ;;  %v301_v47 = vsel %vm290_vm4, %v280_v14, %v300_v45 }
  0x38   :  { %v297_v48 = vsel %vm296_vm7, %v275_v31, %v295_v46  ;;  %v302_v49 = vsel %vm292_vm5, %v281_v34, %v301_v47 }
  0x39   :  { %v303_v50 = vsel %vm294_vm6, %v282_v38, %v302_v49  ;;  %v305_v51 = vpack.c.b16 %v297_v48, %v297_v48 }
  0x3a   :  { %v304_v52 = vsel %vm296_vm7, %v283_v41, %v303_v50 }
  0x3b   :  { %v306_v53 = vpack.c.b16 %v304_v52, %v304_v52  ;;  %310 = vst.msk [vmem:[%s580_s2] sm:$0xf] %vm309_vm8, %v305_v51 }
  0x3d   :  { %311 = vst.msk [vmem:[%s580_s2 + $0x4] sm:$0xf] %vm309_vm8, %v306_v53 }

// kernel: edsr_forward.26
= control target key start
LH: loop header
LB: loop body
LE: loop exit
PB: predicated region body
PF: predicated region fallthrough
CT: control target
= control target key end

     0   :  { %vm51_vm0 = vcmask 91136   ;;  %vm148_vm1 = vcmask 1041409   ;;  %vm150_vm2 = vcmask 1042434   ;;  %vm152_vm3 = vcmask 1043459   ;;  %s262_s0 = inlined_call_operand.vmem [shape: bf16[8,2,12], index: 0, kind: input, shape index: {}]   ;;  %s263_s1 = inlined_call_operand.vmem [shape: bf16[8,2,12], index: 1, kind: input, shape index: {}]   ;;  %s264_s2 = inlined_call_operand.vmem [shape: bf16[8,12], index: 2, kind: output, shape index: {}]  }
   0x1   :  { %v11_v0 = vld [vmem:[%s262_s0] sm:$0x1]  ;;  %v12_v1 = vld [vmem:[%s262_s0 + $0x1] sm:$0x1]  ;;  %v13_v2 = vld [vmem:[%s262_s0 + $0x2] sm:$0x1] }
   0x2   :  { %v14_v3 = vld [vmem:[%s262_s0 + $0x3] sm:$0x1]  ;;  %v15_v4 = vld [vmem:[%s262_s0 + $0x4] sm:$0x1]  ;;  %v16_v5 = vld [vmem:[%s262_s0 + $0x5] sm:$0x1]  ;;  %v19_v6 = vunpack.c.l.bf16 %v11_v0  ;;  %v20_v9 = vunpack.c.l.bf16 %v12_v1  ;;  %v21_v10 = vunpack.c.l.bf16 %v13_v2 }
   0x3   :  { %v17_v7 = vld [vmem:[%s262_s0 + $0x6] sm:$0x1]  ;;  %v18_v8 = vld [vmem:[%s262_s0 + $0x7] sm:$0x1]  ;;  %v22_v11 = vunpack.c.l.bf16 %v14_v3  ;;  %v27_v12 = vld [vmem:[%s263_s1] sm:$0x1]  ;;  %v23_v13 = vunpack.c.l.bf16 %v15_v4  ;;  %v24_v14 = vunpack.c.l.bf16 %v16_v5 }
   0x4   :  { %v25_v15 = vunpack.c.l.bf16 %v17_v7  ;;  %v28_v16 = vld [vmem:[%s263_s1 + $0x1] sm:$0x1]  ;;  %v29_v17 = vld [vmem:[%s263_s1 + $0x2] sm:$0x1]  ;;  %v30_v18 = vld [vmem:[%s263_s1 + $0x3] sm:$0x1]  ;;  %v35_v19 = vunpack.c.l.bf16 %v27_v12  ;;  %v26_v20 = vunpack.c.l.bf16 %v18_v8 }
   0x5   :  { %v31_v21 = vld [vmem:[%s263_s1 + $0x4] sm:$0x1]  ;;  %v32_v22 = vld [vmem:[%s263_s1 + $0x5] sm:$0x1]  ;;  %v33_v23 = vld [vmem:[%s263_s1 + $0x6] sm:$0x1]  ;;  %v36_v24 = vunpack.c.l.bf16 %v28_v16  ;;  %v37_v25 = vunpack.c.l.bf16 %v29_v17  ;;  %v38_v26 = vunpack.c.l.bf16 %v30_v18 }
   0x6   :  { %v34_v27 = vld [vmem:[%s263_s1 + $0x7] sm:$0x1]  ;;  %v39_v28 = vunpack.c.l.bf16 %v31_v21  ;;  %v40_v29 = vunpack.c.l.bf16 %v32_v22  ;;  %v41_v30 = vunpack.c.l.bf16 %v33_v23  ;;  %v43_v31 = vmax.f32 %v19_v6, %v35_v19 }
   0x7   :  { %v42_v32 = vunpack.c.l.bf16 %v34_v27  ;;  %v44_v33 = vmax.f32 %v20_v9, %v36_v24  ;;  %v45_v34 = vmax.f32 %v21_v10, %v37_v25  ;;  %v46_v35 = vmax.f32 %v22_v11, %v38_v26 }
   0x8   :  { %v47_v36 = vmax.f32 %v23_v13, %v39_v28  ;;  %v48_v37 = vmax.f32 %v24_v14, %v40_v29  ;;  %v49_v38 = vmax.f32 %v25_v15, %v41_v30  ;;  %v52_v39 = vsel %vm51_vm0, %v43_v31, -inf }
   0x9   :  { %v50_v40 = vmax.f32 %v26_v20, %v42_v32  ;;  %v53_v41 = vrot.slane %v52_v39, 4  ;;  %v59_v42 = vsel %vm51_vm0, %v44_v33, -inf  ;;  %v66_v43 = vsel %vm51_vm0, %v45_v34, -inf }
   0xa   :  { %v60_v44 = vrot.slane %v59_v42, 4  ;;  %v67_v45 = vrot.slane %v66_v43, 4  ;;  %v73_v46 = vsel %vm51_vm0, %v46_v35, -inf  ;;  %v80_v47 = vsel %vm51_vm0, %v47_v36, -inf }
   0xb   :  { %v54_v48 = vmax.f32 %v52_v39, %v53_v41  ;;  %v74_v49 = vrot.slane %v73_v46, 4  ;;  %v81_v50 = vrot.slane %v80_v47, 4  ;;  %v87_v51 = vsel %vm51_vm0, %v48_v37, -inf }
   0xc   :  { %v61_v52 = vmax.f32 %v59_v42, %v60_v44  ;;  %v68_v53 = vmax.f32 %v66_v43, %v67_v45  ;;  %v88_v54 = vrot.slane %v87_v51, 4  ;;  %v94_v55 = vsel %vm51_vm0, %v49_v38, -inf }
   0xd   :  { %v55_v56 = vrot.slane %v54_v48, 2  ;;  %v75_v57 = vmax.f32 %v73_v46, %v74_v49  ;;  %v82_v58 = vmax.f32 %v80_v47, %v81_v50  ;;  %v95_v59 = vrot.slane %v94_v55, 4 }
   0xe   :  { %v62_v60 = vrot.slane %v61_v52, 2  ;;  %v69_v61 = vrot.slane %v68_v53, 2  ;;  %v89_v62 = vmax.f32 %v87_v51, %v88_v54  ;;  %v101_v63 = vsel %vm51_vm0, %v50_v40, -inf }
   0xf   :  { %v56_v0 = vmax.f32 %v54_v48, %v55_v56  ;;  %v76_v1 = vrot.slane %v75_v57, 2  ;;  %v83_v2 = vrot.slane %v82_v58, 2  ;;  %v96_v3 = vmax.f32 %v94_v55, %v95_v59 }
  0x10   :  { %v63_v4 = vmax.f32 %v61_v52, %v62_v60  ;;  %v70_v5 = vmax.f32 %v68_v53, %v69_v61  ;;  %v90_v6 = vrot.slane %v89_v62, 2  ;;  %v102_v7 = vrot.slane %v101_v63, 4 }
  0x11   :  { %v57_v8 = vrot.slane %v56_v0, 1  ;;  %v77_v9 = vmax.f32 %v75_v57, %v76_v1  ;;  %v84_v10 = vmax.f32 %v82_v58, %v83_v2  ;;  %v97_v11 = vrot.slane %v96_v3, 2 }
  0x12   :  { %v64_v12 = vrot.slane %v63_v4, 1  ;;  %v71_v13 = vrot.slane %v70_v5, 1  ;;  %v91_v14 = vmax.f32 %v89_v62, %v90_v6  ;;  %v103_v15 = vmax.f32 %v101_v63, %v102_v7 }
  0x13   :  { %v58_v16 = vmax.f32 %v56_v0, %v57_v8  ;;  %v78_v17 = vrot.slane %v77_v9, 1  ;;  %v85_v18 = vrot.slane %v84_v10, 1  ;;  %v98_v19 = vmax.f32 %v96_v3, %v97_v11 }
  0x14   :  { %v65_v20 = vmax.f32 %v63_v4, %v64_v12  ;;  %v72_v21 = vmax.f32 %v70_v5, %v71_v13  ;;  %v92_v22 = vrot.slane %v91_v14, 1  ;;  %v104_v23 = vrot.slane %v103_v15, 2 }
  0x15   :  { %v79_v24 = vmax.f32 %v77_v9, %v78_v17  ;;  %v86_v25 = vmax.f32 %v84_v10, %v85_v18  ;;  %v99_v26 = vrot.slane %v98_v19, 1  ;;  %v178_v27 = vpack.c.bf16 %v58_v16, %v58_v16 }
  0x16   :  { %v93_v28 = vmax.f32 %v91_v14, %v92_v22  ;;  %v105_v29 = vmax.f32 %v103_v15, %v104_v23  ;;  %v179_v30 = vpack.c.bf16 %v65_v20, %v65_v20  ;;  %v180_v31 = vpack.c.bf16 %v72_v21, %v72_v21 }
  0x17   :  { %v100_v32 = vmax.f32 %v98_v19, %v99_v26  ;;  %v181_v33 = vpack.c.bf16 %v79_v24, %v79_v24  ;;  %v182_v34 = vpack.c.bf16 %v86_v25, %v86_v25  ;;  %v140_v35 = vunpack.c.l.b16 %v178_v27 }
  0x18   :  { %v106_v36 = vrot.slane %v105_v29, 1  ;;  %v183_v37 = vpack.c.bf16 %v93_v28, %v93_v28  ;;  %v141_v38 = vunpack.c.l.b16 %v179_v30  ;;  %v142_v39 = vunpack.c.l.b16 %v180_v31 }
  0x19   :  { %v184_v40 = vpack.c.bf16 %v100_v32, %v100_v32  ;;  %v143_v41 = vunpack.c.l.b16 %v181_v33  ;;  %v144_v42 = vunpack.c.l.b16 %v182_v34  ;;  %vm154_vm4 = vcmask 1044484  }
  0x1a   :  { %v107_v43 = vmax.f32 %v105_v29, %v106_v36  ;;  %v145_v44 = vunpack.c.l.b16 %v183_v37  ;;  %v149_v45 = vsel %vm148_vm1, %v141_v38, %v140_v35  ;;  %vm156_vm5 = vcmask 1045509  }
  0x1b   :  { %v146_v46 = vunpack.c.l.b16 %v184_v40  ;;  %v151_v47 = vsel %vm150_vm2, %v142_v39, %v149_v45  ;;  %vm158_vm6 = vcmask 1046534   ;;  %vm160_vm7 = vcmask 1047559  }
  0x1c   :  { %v185_v48 = vpack.c.bf16 %v107_v43, %v107_v43  ;;  %v153_v49 = vsel %vm152_vm3, %v143_v41, %v151_v47  ;;  %vm164_vm8 = vcmask 93184  }
  0x1d   :  { %v155_v50 = vsel %vm154_vm4, %v144_v42, %v153_v49 }
  0x1e   :  { %v147_v51 = vunpack.c.l.b16 %v185_v48  ;;  %v157_v52 = vsel %vm156_vm5, %v145_v44, %v155_v50 }
  0x1f   :  { %v159_v53 = vsel %vm158_vm6, %v146_v46, %v157_v52 }
  0x20   :  { %v161_v54 = vsel %vm160_vm7, %v147_v51, %v159_v53 }
  0x21   :  { %v162_v55 = vpack.c.b16 %v161_v54, %v161_v54 }
  0x23   :  { %165 = vst.msk [vmem:[%s264_s2] sm:$0xf] %vm164_vm8, %v162_v55 }

// kernel: tile.123
= control target key start
LH: loop header
LB: loop body
LE: loop exit
PB: predicated region body
PF: predicated region fallthrough
CT: control target
= control target key end

     0   :  { %s22_s0 = inlined_call_operand.vmem [shape: f32[12], index: 0, kind: input, shape index: {}]   ;;  %s23_s1 = inlined_call_operand.vmem [shape: f32[4,12], index: 1, kind: output, shape index: {}]  }
   0x1   :  { %v4_v0 = vld [vmem:[%s22_s0] ss:$0 sm:$0xff] }
   0x2   :  { %5 = vst [vmem:[%s23_s1] sm:$0xf] %v4_v0 }

// kernel: tile.124
= control target key start
LH: loop header
LB: loop body
LE: loop exit
PB: predicated region body
PF: predicated region fallthrough
CT: control target
= control target key end

     0   :  { %vm8_vm0 = vcmask 97280   ;;  %s40_s8 = smov 12   ;;  %s41_s9 = smov 24   ;;  %vm14_vm1 = vcmask 392480   ;;  %vm20_vm2 = vcmask 294080   ;;  %vm26_vm3 = vcmask 195680   ;;  %s58_s0 = inlined_call_operand.vmem [shape: f32[4,12], index: 0, kind: input, shape index: {}]   ;;  %s59_s1 = inlined_call_operand.vmem [shape: f32[1,48], index: 1, kind: output, shape index: {}]  }
   0x1   :  { %v5_v0 = vld [vmem:[%s58_s0] sm:$0xf]  ;;  %s39_s0 = smov 36  }
   0x2   :  { %6 = vst [vmem:[#allocation1] sm:$0xf] %v5_v0 }
   0x9   :  { %v11_v1 = vld [vmem:[#allocation1 + $0x3] sm:$0x1]   ;;  %v23_v2 = vld [vmem:[#allocation1 + $0x1] sm:$0x1]   ;;  %v7_v3 = vld [vmem:[#allocation1] sm:$0x1]  }
   0xa   :  { %12 = vrot.lane.b32.xlu0 %v11_v1, %s39_s0  ;;  %24 = vrot.lane.b32.xlu1 %v23_v2, %s40_s8  ;;  %v17_v4 = vld [vmem:[#allocation1 + $0x2] sm:$0x1]   ;;  %9 = vst.msk [vmem:[#allocation0] sm:$0x1] %vm8_vm0, %v7_v3  }
   0xe   :  { %18 = vrot.lane.b32.xlu0 %v17_v4, %s41_s9 }
  0x7c   :  { %v13_v5 = vpop.permute.xlu0 %12   ;;  %v25_v6 = vpop.permute.xlu1 %24  }
  0x7d   :  { %15 = vst.msk [vmem:[#allocation0] sm:$0x1] %vm14_vm1, %v13_v5  }
  0x80   :  { %v19_v7 = vpop.permute.xlu0 %18  }
  0x81   :  { %21 = vst.msk [vmem:[#allocation0] sm:$0x1] %vm20_vm2, %v19_v7  }
  0x82   :  { %27 = vst.msk [vmem:[#allocation0] sm:$0x1] %vm26_vm3, %v25_v6  }
  0x89   :  { %v32_v8 = vld [vmem:[#allocation0] sm:$0x1] }
  0x8a   :  { %35 = vst [vmem:[%s59_s1] sm:$0x1] %v32_v8 }

// kernel: edsr_forward.31
= control target key start
LH: loop header
LB: loop body
LE: loop exit
PB: predicated region body
PF: predicated region fallthrough
CT: control target
= control target key end

     0   :  { %s640_s15 = smov 0   ;;  %s697_s0 = inlined_call_operand.vmem [shape: bf16[2,6,48], index: 0, kind: input, shape index: {}]   ;;  %s698_s1 = inlined_call_operand.vmem [shape: bf16[3,48,12], index: 1, kind: input, shape index: {}]   ;;  %s699_s2 = inlined_call_operand.vmem [shape: f32[1,12], index: 2, kind: input, shape index: {}]   ;;  %s700_s3 = inlined_call_operand.vmem [shape: bf16[2,4,12], index: 3, kind: input, shape index: {}]   ;;  %s701_s4 = inlined_call_operand.vmem [shape: bf16[2,4,12], index: 4, kind: output, shape index: {}]  }
   0x1 LB: > { %s507_s16 = sadd.s32 4294967295, %s611_s15   ;;  %p511_p0 = scmp.ge.s32.totalorder %s611_s15, 1  ;;  %s611_s15 = sphi %s640_s15, %s14_s15  }
   0x2   : > { %p170_p1 = scmp.lt.s32.totalorder %s611_s15, 3 }
   0x4   : > { %p171_p2 = pnand %p511_p0, %p170_p1 }
   0x5   : > { %p198_p3 = scmp.lt.s32.totalorder (!%p171_p2), %s507_s16, 1 }
   0x6   : > { %174 = sbr.rel (%p171_p2) target bundleno = 238 (0xee), region = 36 }
   0xb   : > { %v595_v0 = vld [vmem:[%s698_s1 + $0x28] sm:$0xff]   ;;  %v613_v1 = vmov 0.0   ;;  %v596_v2 = vld [vmem:[%s698_s1 + $0x10] sm:$0xff]   ;;  %v597_v3 = vld [vmem:[%s698_s1 + $0x20] sm:$0xff]   ;;  %vm614_vm0 = vmmov 0   ;;  %s703_s16 = smov (!%p198_p3, %s507_s16), 1 }
   0xc   : > { %555 = vmatprep.subr.bf16.mxu0 %v613_v1  ;;  %565 = vmatprep.subr.bf16.mxu1 %v613_v1  ;;  %v598_v4 = vld [vmem:[%s698_s1 + $0x8] sm:$0xff]   ;;  %v599_v5 = vld [vmem:[%s698_s1 + $0x18] sm:$0xff]   ;;  %s512_s27 = sshll.u32 %s703_s16, 2  ;;  %v600_v6 = vld [vmem:[%s698_s1] sm:$0xff]   ;;  %vm253_vm1 = vcmask 392192   ;;  %s513_s13 = sshll.u32 %s703_s16, 1 }
   0xd   : > { %556 = vmatpush3.bf16.msra.mxu0 %v595_v0  ;;  %561 = vmatprep.mubr.msk.bf16.mxu0 %vm614_vm0, %v613_v1  ;;  %s201_s6 = scalar_lea.vmem %s697_s0, %s512_s27  ;;  %v602_v12 = vld [vmem:[%s698_s1 + $0x40] sm:$0xff]   ;;  %v603_v14 = vld [vmem:[%s698_s1 + $0x38] sm:$0xff]   ;;  %v604_v15 = vld [vmem:[%s698_s1 + $0x30] sm:$0xff]   ;;  %s205_s18 = scalar_lea.vmem %s700_s3, %s513_s13  ;;  %vm440_vm2 = vcmask 91136  }
   0xe   : > { %566 = vmatpush3.bf16.msra.mxu1 %v596_v2  ;;  %557 = vmatprep.subr.bf16.mxu0 %v613_v1  ;;  %v211_v7 = vld [vmem:[%s201_s6] sm:$0x7]  ;;  %s209_s22 = scalar_lea.vmem %s701_s4, %s513_s13 }
   0xf   : > { %567 = vmatprep.subr.bf16.mxu1 %v613_v1  ;;  %571 = vmatprep.mubr.msk.bf16.mxu1 %vm614_vm0, %v613_v1  ;;  %v521_v8 = vcombine.low %v211_v7, %v211_v7  ;;  %v436_v25 = vld [vmem:[%s205_s18] sm:$0x3] }
  0x10   : > { %v540_v28 = vld [vmem:[%s699_s2] ss:$0 sm:$0xff]  ;;  %v437_v30 = vunpack.c.l.bf16 %v436_v25 }
  0x11   : > { %558 = vmatpush3.bf16.msra.mxu0 %v597_v3  ;;  %v229_v9 = vshrl.u32 %v521_v8, 16  ;;  %v231_v10 = vshll.u32 %v521_v8, 16  ;;  %v365_v16 = vrot.slane %v521_v8, 1 }
  0x12   : > { %568 = vmatpush3.bf16.msra.mxu1 %v598_v4  ;;  %559 = vmatprep.subr.bf16.mxu0 %v613_v1 }
  0x13   : > { %569 = vmatprep.subr.bf16.mxu1 %v613_v1  ;;  %v233_v11 = vrot.slane %v231_v10, 1 }
  0x15   : > { %560 = vmatpush3.bf16.msra.mxu0 %v599_v5  ;;  %v234_v13 = vor.u32 %v233_v11, %v229_v9 }
  0x16   : > { %570 = vmatpush3.bf16.msra.mxu1 %v600_v6  ;;  %575 = vmatprep.subr.bf16.mxu0 %v613_v1 }
  0x18   : > { %562 = vmatmul.mubr.msk.bf16.vlgmr.msra.gmra.mxu0 %vm253_vm1, %v234_v13 }
  0x19   : > { %572 = vmatmul.mubr.msk.bf16.vlgmr.msra.gmra.mxu1 %vm253_vm1, %v211_v7  ;;  %576 = vmatpush3.bf16.msra.mxu0 %v602_v12 }
  0x1a   : > { %581 = vmatprep.mubr.msk.bf16.mxu0 %vm614_vm0, %v613_v1  ;;  %577 = vmatprep.subr.bf16.mxu0 %v613_v1 }
  0x1d   : > { %578 = vmatpush3.bf16.msra.mxu0 %v603_v14 }
  0x1e   : > { %579 = vmatprep.subr.bf16.mxu0 %v613_v1 }
  0x21   : > { %580 = vmatpush3.bf16.msra.mxu0 %v604_v15 }
  0x24   : > { %582 = vmatmul.mubr.msk.bf16.vlgmr.msra.gmra.mxu0 %vm253_vm1, %v365_v16 }
  0xd8   : > { %v291_v19 = vpop.f32.mrf.mxu0 }
  0xd9   : > { %v352_v17 = vpop.f32.mrf.mxu1 }
  0xda   : > { %v563_v21 = vpop.f32.mrf.mxu0  ;;  %v353_v26 = vadd.f32 %v352_v17, %v291_v19 }
  0xdb   : > { %v573_v18 = vpop.f32.mrf.mxu1 }
  0xdc   : > { %v294_v23 = vpop.f32.mrf.mxu0 }
  0xdd   : > { %v355_v20 = vpop.f32.mrf.mxu1 }
  0xde   : > { %v564_v24 = vpop.f32.mrf.mxu0 }
  0xdf   : > { %v574_v22 = vpop.f32.mrf.mxu1 }
  0xe4   : > { %v421_v27 = vpop.f32.mrf.mxu0 }
  0xe5   : > { %v427_v29 = vadd.f32 %v421_v27, %v353_v26 }
  0xe6   : > { %v583_v31 = vpop.f32.mrf.mxu0 }
  0xe7   : > { %v435_v32 = vadd.f32 %v540_v28, %v427_v29 }
  0xe8   : > { %v424_v33 = vpop.f32.mrf.mxu0 }
  0xe9   : > { %v438_v34 = vadd.f32 %v437_v30, %v435_v32 }
  0xea   : > { %v584_v35 = vpop.f32.mrf.mxu0 }
  0xeb   : > { %v439_v36 = vpack.c.bf16 %v438_v34, %v438_v34 }
  0xed   : > { %441 = vst.msk [vmem:[%s209_s22] sm:$0x3] %vm440_vm2, %v439_v36 }
  0xee PF: > { %s14_s15 = sadd.s32 1, %s611_s15  }
  0xef   : > { %p11_p4 = scmp.ge.s32.totalorder %s14_s15, 4  }
  0xf1   :  { %13 = sbr.rel (!%p11_p4) target bundleno = 1 (0x1), region = 71 }

// kernel: edsr_forward.32
= control target key start
LH: loop header
LB: loop body
LE: loop exit
PB: predicated region body
PF: predicated region fallthrough
CT: control target
= control target key end

     0   :  { %s528_s12 = smov 0   ;;  %s579_s0 = inlined_call_operand.vmem [shape: bf16[2,6,18], index: 0, kind: input, shape index: {}]   ;;  %s580_s1 = inlined_call_operand.vmem [shape: bf16[3,18,48], index: 1, kind: input, shape index: {}]   ;;  %s581_s2 = inlined_call_operand.vmem [shape: f32[1,48], index: 2, kind: input, shape index: {}]   ;;  %s582_s3 = inlined_call_operand.vmem [shape: bf16[2,4,48], index: 3, kind: output, shape index: {}]  }
   0x1 LB: > { %s422_s13 = sadd.s32 4294967295, %s504_s12   ;;  %p426_p0 = scmp.ge.s32.totalorder %s504_s12, 1  ;;  %s504_s12 = sphi %s528_s12, %s13_s12  }
   0x2   : > { %p136_p1 = scmp.lt.s32.totalorder %s504_s12, 3 }
   0x4   : > { %p137_p2 = pnand %p426_p0, %p136_p1 }
   0x5   : > { %p158_p3 = scmp.lt.s32.totalorder (!%p137_p2), %s422_s13, 1 }
   0x6   : > { %140 = sbr.rel (%p137_p2) target bundleno = 233 (0xe9), region = 32 }
   0xb   : > { %v491_v0 = vld [vmem:[%s580_s1 + $0x14] ss:$0 sps:$4 sm:$0x11]   ;;  %v506_v1 = vmov 0.0   ;;  %vm198_vm0 = vcmask 1040384   ;;  %v493_v5 = vld [vmem:[%s580_s1 + $0xc] sm:$0xff]  }
   0xc   : > { %457 = vmatprep.subr.bf16.mxu0 %v506_v1  ;;  %465 = vmatprep.subr.bf16.mxu1 %v506_v1  ;;  %v492_v2 = vld [vmem:[%s580_s1 + $0x8] ss:$0 sps:$4 sm:$0x11]   ;;  %v200_v3 = vsel %vm198_vm0, %v491_v0, 0  ;;  %v494_v6 = vld [vmem:[%s580_s1] sm:$0xff]   ;;  %vm507_vm1 = vmmov 0  }
   0xd   : > { %458 = vmatpush3.bf16.msra.mxu0 %v200_v3  ;;  %v255_v4 = vsel %vm198_vm0, %v492_v2, 0  ;;  %461 = vmatprep.mubr.msk.bf16.mxu0 %vm507_vm1, %v506_v1  ;;  %s584_s13 = smov (!%p158_p3, %s422_s13), 1  ;;  %vm194_vm2 = vcmask 146432   ;;  %v496_v11 = vld [vmem:[%s580_s1 + $0x20] ss:$0 sps:$4 sm:$0x11]  }
   0xe   : > { %466 = vmatpush3.bf16.msra.mxu1 %v255_v4  ;;  %459 = vmatprep.subr.bf16.mxu0 %v506_v1  ;;  %s427_s22 = sshll.u32 %s584_s13, 2  ;;  %v315_v14 = vsel %vm198_vm0, %v496_v11, 0  ;;  %v497_v15 = vld [vmem:[%s580_s1 + $0x18] sm:$0xff]   ;;  %v445_v27 = vld [vmem:[%s581_s2] ss:$0 sm:$0xff]  ;;  %s428_s5 = sshll.u32 %s584_s13, 1 }
   0xf   : > { %467 = vmatprep.subr.bf16.mxu1 %v506_v1  ;;  %469 = vmatprep.mubr.msk.bf16.mxu1 %vm507_vm1, %v506_v1  ;;  %s161_s25 = scalar_lea.vmem %s579_s0, %s427_s22  ;;  %s165_s8 = scalar_lea.vmem %s582_s3, %s428_s5  ;;  %vm367_vm3 = vcmask 386048  }
  0x10   : > { %v167_v7 = vld [vmem:[%s161_s25] sm:$0x7] }
  0x11   : > { %460 = vmatpush3.bf16.msra.mxu0 %v493_v5  ;;  %v432_v8 = vcombine.low %v167_v7, %v167_v7 }
  0x12   : > { %468 = vmatpush3.bf16.msra.mxu1 %v494_v6  ;;  %473 = vmatprep.subr.bf16.mxu0 %v506_v1 }
  0x13   : > { %v179_v9 = vshrl.u32 %v432_v8, 16  ;;  %v181_v10 = vshll.u32 %v432_v8, 16  ;;  %v301_v16 = vrot.slane %v432_v8, 1 }
  0x15   : > { %470 = vmatmul.mubr.msk.bf16.vlgmr.msra.gmra.mxu1 %vm194_vm2, %v167_v7  ;;  %v183_v12 = vrot.slane %v181_v10, 1 }
  0x17   : > { %v184_v13 = vor.u32 %v183_v12, %v179_v9 }
  0x19   : > { %462 = vmatmul.mubr.msk.bf16.vlgmr.msra.gmra.mxu0 %vm194_vm2, %v184_v13 }
  0x1a   : > { %474 = vmatpush3.bf16.msra.mxu0 %v315_v14  ;;  %477 = vmatprep.mubr.msk.bf16.mxu0 %vm507_vm1, %v506_v1 }
  0x1b   : > { %475 = vmatprep.subr.bf16.mxu0 %v506_v1 }
  0x1e   : > { %476 = vmatpush3.bf16.msra.mxu0 %v497_v15 }
  0x21   : > { %478 = vmatmul.mubr.msk.bf16.vlgmr.msra.gmra.mxu0 %vm194_vm2, %v301_v16 }
  0xd5   : > { %v291_v17 = vpop.f32.mrf.mxu1 }
  0xd7   : > { %v471_v18 = vpop.f32.mrf.mxu1 }
  0xd9   : > { %v294_v19 = vpop.f32.mrf.mxu1  ;;  %v236_v21 = vpop.f32.mrf.mxu0 }
  0xda   : > { %v292_v25 = vadd.f32 %v291_v17, %v236_v21 }
  0xdb   : > { %v472_v20 = vpop.f32.mrf.mxu1  ;;  %v463_v22 = vpop.f32.mrf.mxu0 }
  0xdd   : > { %v239_v23 = vpop.f32.mrf.mxu0 }
  0xdf   : > { %v464_v24 = vpop.f32.mrf.mxu0 }
  0xe1   : > { %v351_v26 = vpop.f32.mrf.mxu0 }
  0xe2   : > { %v357_v28 = vadd.f32 %v351_v26, %v292_v25 }
  0xe3   : > { %v479_v29 = vpop.f32.mrf.mxu0 }
  0xe4   : > { %v365_v30 = vadd.f32 %v445_v27, %v357_v28 }
  0xe5   : > { %v354_v31 = vpop.f32.mrf.mxu0 }
  0xe6   : > { %v366_v32 = vpack.c.bf16 %v365_v30, %v365_v30 }
  0xe7   : > { %v480_v33 = vpop.f32.mrf.mxu0 }
  0xe8   : > { %368 = vst.msk [vmem:[%s165_s8] sm:$0x3] %vm367_vm3, %v366_v32 }
  0xe9 PF: > { %s13_s12 = sadd.s32 1, %s504_s12  }
  0xea   : > { %p10_p4 = scmp.ge.s32.totalorder %s13_s12, 4  }
  0xec   :  { %12 = sbr.rel (!%p10_p4) target bundleno = 1 (0x1), region = 64 }

// kernel: tile.128
= control target key start
LH: loop header
LB: loop body
LE: loop exit
PB: predicated region body
PF: predicated region fallthrough
CT: control target
= control target key end

     0   :  { %s22_s0 = inlined_call_operand.vmem [shape: f32[3], index: 0, kind: input, shape index: {}]   ;;  %s23_s1 = inlined_call_operand.vmem [shape: f32[8,3], index: 1, kind: output, shape index: {}]  }
   0x1   :  { %v4_v0 = vld [vmem:[%s22_s0] ss:$0 sm:$0xff] }
   0x2   :  { %5 = vst [vmem:[%s23_s1] sm:$0xff] %v4_v0 }

// kernel: tile.129
= control target key start
LH: loop header
LB: loop body
LE: loop exit
PB: predicated region body
PF: predicated region fallthrough
CT: control target
= control target key end

     0   :  { %s69_s10 = smov 21   ;;  %s70_s11 = smov 15   ;;  %vm3_vm0 = vcmask 23552   ;;  %vm9_vm1 = vcmask 195752   ;;  %vm15_vm2 = vcmask 171152   ;;  %vm21_vm3 = vcmask 146552   ;;  %s113_s0 = inlined_call_operand.vmem [shape: f32[8,3], index: 0, kind: input, shape index: {}]   ;;  %s114_s1 = inlined_call_operand.vmem [shape: f32[1,24], index: 1, kind: output, shape index: {}]  }
   0x1   :  { %v55_v0 = vld [vmem:[%s113_s0 + $0x7] sm:$0x1]   ;;  %v57_v1 = vld [vmem:[%s113_s0 + $0x5] sm:$0x1]   ;;  %v56_v2 = vld [vmem:[%s113_s0 + $0x6] sm:$0x1]  }
   0x2   :  { %7 = vrot.lane.b32.xlu0 %v55_v0, %s69_s10  ;;  %19 = vrot.lane.b32.xlu1 %v57_v1, %s70_s11  ;;  %v58_v3 = vld [vmem:[%s113_s0 + $0x4] sm:$0x1]   ;;  %v2_v4 = vld [vmem:[%s113_s0] sm:$0x1]   ;;  %s71_s18 = smov 18   ;;  %s72_s19 = smov 12  }
   0x3   :  { %4 = vst.msk [vmem:[#allocation0] sm:$0x1] %vm3_vm0, %v2_v4   ;;  %v59_v5 = vld [vmem:[%s113_s0 + $0x3] sm:$0x1]   ;;  %v60_v6 = vld [vmem:[%s113_s0 + $0x2] sm:$0x1]  }
   0x4   :  { %s73_s24 = smov 9   ;;  %s74_s25 = smov 6   ;;  %v61_v7 = vld [vmem:[%s113_s0 + $0x1] sm:$0x1]   ;;  %vm27_vm4 = vcmask 121952   ;;  %vm33_vm5 = vcmask 97352  }
   0x5   :  { %s75_s0 = smov 3   ;;  %vm39_vm6 = vcmask 72752   ;;  %vm45_vm7 = vcmask 48152  }
   0x6   :  { %13 = vrot.lane.b32.xlu0 %v56_v2, %s71_s18  ;;  %25 = vrot.lane.b32.xlu1 %v58_v3, %s72_s19 }
   0xa   :  { %31 = vrot.lane.b32.xlu0 %v59_v5, %s73_s24  ;;  %37 = vrot.lane.b32.xlu1 %v60_v6, %s74_s25 }
   0xe   :  { %43 = vrot.lane.b32.xlu0 %v61_v7, %s75_s0 }
  0x74   :  { %v8_v8 = vpop.permute.xlu0 %7   ;;  %v20_v9 = vpop.permute.xlu1 %19  }
  0x75   :  { %10 = vst.msk [vmem:[#allocation0] sm:$0x1] %vm9_vm1, %v8_v8  }
  0x78   :  { %v14_v10 = vpop.permute.xlu0 %13   ;;  %v26_v11 = vpop.permute.xlu1 %25  }
  0x79   :  { %16 = vst.msk [vmem:[#allocation0] sm:$0x1] %vm15_vm2, %v14_v10  }
  0x7a   :  { %22 = vst.msk [vmem:[#allocation0] sm:$0x1] %vm21_vm3, %v20_v9  }
  0x7b   :  { %28 = vst.msk [vmem:[#allocation0] sm:$0x1] %vm27_vm4, %v26_v11  }
  0x7c   :  { %v32_v12 = vpop.permute.xlu0 %31   ;;  %v38_v13 = vpop.permute.xlu1 %37  }
  0x7d   :  { %34 = vst.msk [vmem:[#allocation0] sm:$0x1] %vm33_vm5, %v32_v12  }
  0x7e   :  { %40 = vst.msk [vmem:[#allocation0] sm:$0x1] %vm39_vm6, %v38_v13  }
  0x80   :  { %v44_v14 = vpop.permute.xlu0 %43  }
  0x81   :  { %46 = vst.msk [vmem:[#allocation0] sm:$0x1] %vm45_vm7, %v44_v14  }
  0x88   :  { %v51_v15 = vld [vmem:[#allocation0] sm:$0x1] }
  0x89   :  { %54 = vst [vmem:[%s114_s1] sm:$0x1] %v51_v15 }

// kernel: tile.133
= control target key start
LH: loop header
LB: loop body
LE: loop exit
PB: predicated region body
PF: predicated region fallthrough
CT: control target
= control target key end

     0   :  { %s22_s0 = inlined_call_operand.vmem [shape: f32[12], index: 0, kind: input, shape index: {}]   ;;  %s23_s1 = inlined_call_operand.vmem [shape: f32[8,12], index: 1, kind: output, shape index: {}]  }
   0x1   :  { %v4_v0 = vld [vmem:[%s22_s0] ss:$0 sm:$0xff] }
   0x2   :  { %5 = vst [vmem:[%s23_s1] sm:$0xff] %v4_v0 }

// kernel: tile.134
= control target key start
LH: loop header
LB: loop body
LE: loop exit
PB: predicated region body
PF: predicated region fallthrough
CT: control target
= control target key end

     0   :  { %s69_s10 = smov 84   ;;  %s70_s11 = smov 60   ;;  %vm3_vm0 = vcmask 97280   ;;  %vm9_vm1 = vcmask 786080   ;;  %vm15_vm2 = vcmask 687680   ;;  %vm21_vm3 = vcmask 589280   ;;  %s113_s0 = inlined_call_operand.vmem [shape: f32[8,12], index: 0, kind: input, shape index: {}]   ;;  %s114_s1 = inlined_call_operand.vmem [shape: f32[1,96], index: 1, kind: output, shape index: {}]  }
   0x1   :  { %v55_v0 = vld [vmem:[%s113_s0 + $0x7] sm:$0x1]   ;;  %v57_v1 = vld [vmem:[%s113_s0 + $0x5] sm:$0x1]   ;;  %v56_v2 = vld [vmem:[%s113_s0 + $0x6] sm:$0x1]  }
   0x2   :  { %7 = vrot.lane.b32.xlu0 %v55_v0, %s69_s10  ;;  %19 = vrot.lane.b32.xlu1 %v57_v1, %s70_s11  ;;  %v58_v3 = vld [vmem:[%s113_s0 + $0x4] sm:$0x1]   ;;  %v2_v4 = vld [vmem:[%s113_s0] sm:$0x1]   ;;  %s71_s18 = smov 72   ;;  %s72_s19 = smov 48  }
   0x3   :  { %4 = vst.msk [vmem:[#allocation0] sm:$0x1] %vm3_vm0, %v2_v4   ;;  %v59_v5 = vld [vmem:[%s113_s0 + $0x3] sm:$0x1]   ;;  %v60_v6 = vld [vmem:[%s113_s0 + $0x2] sm:$0x1]  }
   0x4   :  { %s73_s24 = smov 36   ;;  %s74_s25 = smov 24   ;;  %v61_v7 = vld [vmem:[%s113_s0 + $0x1] sm:$0x1]   ;;  %vm27_vm4 = vcmask 490880   ;;  %vm33_vm5 = vcmask 392480  }
   0x5   :  { %s75_s0 = smov 12   ;;  %vm39_vm6 = vcmask 294080   ;;  %vm45_vm7 = vcmask 195680  }
   0x6   :  { %13 = vrot.lane.b32.xlu0 %v56_v2, %s71_s18  ;;  %25 = vrot.lane.b32.xlu1 %v58_v3, %s72_s19 }
   0xa   :  { %31 = vrot.lane.b32.xlu0 %v59_v5, %s73_s24  ;;  %37 = vrot.lane.b32.xlu1 %v60_v6, %s74_s25 }
   0xe   :  { %43 = vrot.lane.b32.xlu0 %v61_v7, %s75_s0 }
  0x74   :  { %v8_v8 = vpop.permute.xlu0 %7   ;;  %v20_v9 = vpop.permute.xlu1 %19  }
  0x75   :  { %10 = vst.msk [vmem:[#allocation0] sm:$0x1] %vm9_vm1, %v8_v8  }
  0x78   :  { %v14_v10 = vpop.permute.xlu0 %13   ;;  %v26_v11 = vpop.permute.xlu1 %25  }
  0x79   :  { %16 = vst.msk [vmem:[#allocation0] sm:$0x1] %vm15_vm2, %v14_v10  }
  0x7a   :  { %22 = vst.msk [vmem:[#allocation0] sm:$0x1] %vm21_vm3, %v20_v9  }
  0x7b   :  { %28 = vst.msk [vmem:[#allocation0] sm:$0x1] %vm27_vm4, %v26_v11  }
  0x7c   :  { %v32_v12 = vpop.permute.xlu0 %31   ;;  %v38_v13 = vpop.permute.xlu1 %37  }
  0x7d   :  { %34 = vst.msk [vmem:[#allocation0] sm:$0x1] %vm33_vm5, %v32_v12  }
  0x7e   :  { %40 = vst.msk [vmem:[#allocation0] sm:$0x1] %vm39_vm6, %v38_v13  }
  0x80   :  { %v44_v14 = vpop.permute.xlu0 %43  }
  0x81   :  { %46 = vst.msk [vmem:[#allocation0] sm:$0x1] %vm45_vm7, %v44_v14  }
  0x88   :  { %v51_v15 = vld [vmem:[#allocation0] sm:$0x1] }
  0x89   :  { %54 = vst [vmem:[%s114_s1] sm:$0x1] %v51_v15 }

// kernel: edsr_forward.33
= control target key start
LH: loop header
LB: loop body
LE: loop exit
PB: predicated region body
PF: predicated region fallthrough
CT: control target
= control target key end

     0   :  { %s612_s15 = smov 0   ;;  %s666_s0 = inlined_call_operand.vmem [shape: bf16[2,10,30], index: 0, kind: input, shape index: {}]   ;;  %s667_s1 = inlined_call_operand.vmem [shape: bf16[3,30,24], index: 1, kind: input, shape index: {}]   ;;  %s668_s2 = inlined_call_operand.vmem [shape: f32[1,24], index: 2, kind: input, shape index: {}]   ;;  %s669_s3 = inlined_call_operand.vmem [shape: bf16[2,8,24], index: 3, kind: input, shape index: {}]   ;;  %s670_s4 = inlined_call_operand.vmem [shape: bf16[2,8,24], index: 4, kind: output, shape index: {}]  }
   0x1 LB: > { %s496_s16 = sadd.s32 4294967295, %s583_s15   ;;  %p500_p0 = scmp.ge.s32.totalorder %s583_s15, 1  ;;  %s583_s15 = sphi %s612_s15, %s14_s15  }
   0x2   : > { %p171_p1 = scmp.lt.s32.totalorder %s583_s15, 3 }
   0x4   : > { %p172_p2 = pnand %p500_p0, %p171_p1 }
   0x5   : > { %p200_p3 = scmp.lt.s32.totalorder (!%p172_p2), %s496_s16, 1 }
   0x6   : > { %175 = sbr.rel (%p172_p2) target bundleno = 234 (0xea), region = 36 }
   0xb   : > { %vm252_vm0 = vcmask 1046528   ;;  %v585_v0 = vmov 0.0   ;;  %v570_v1 = vld [vmem:[%s667_s1 + $0x18] sm:$0x7f]   ;;  %v571_v2 = vld [vmem:[%s667_s1 + $0x8] sm:$0x7f]  }
   0xc   : > { %536 = vmatprep.subr.bf16.mxu0 %v585_v0  ;;  %544 = vmatprep.subr.bf16.mxu1 %v585_v0  ;;  %v254_v3 = vsel %vm252_vm0, %v570_v1, 0  ;;  %v311_v4 = vsel %vm252_vm0, %v571_v2, 0  ;;  %v572_v5 = vld [vmem:[%s667_s1 + $0x10] sm:$0xff]   ;;  %v573_v6 = vld [vmem:[%s667_s1] sm:$0xff]   ;;  %vm586_vm1 = vmmov 0   ;;  %s672_s16 = smov (!%p200_p3, %s496_s16), 1 }
   0xd   : > { %537 = vmatpush3.bf16.msra.mxu0 %v254_v3  ;;  %545 = vmatpush3.bf16.msra.mxu1 %v311_v4  ;;  %s526_s25 = sshll.u32 %s672_s16, 3  ;;  %vm248_vm2 = vcmask 244736   ;;  %v575_v12 = vld [vmem:[%s667_s1 + $0x28] sm:$0x7f]   ;;  %v576_v16 = vld [vmem:[%s667_s1 + $0x20] sm:$0xff]   ;;  %s503_s7 = sshll.u32 %s672_s16, 2 }
   0xe   : > { %538 = vmatprep.subr.bf16.mxu0 %v585_v0  ;;  %546 = vmatprep.subr.bf16.mxu1 %v585_v0  ;;  %s204_s28 = scalar_lea.vmem %s666_s0, %s526_s25  ;;  %v374_v15 = vsel %vm252_vm0, %v575_v12, 0  ;;  %s208_s10 = scalar_lea.vmem %s669_s3, %s503_s7  ;;  %v523_v29 = vld [vmem:[%s668_s2] ss:$0 sm:$0xff]  ;;  %vm429_vm3 = vcmask 191488  }
   0xf   : > { %540 = vmatprep.mubr.msk.bf16.mxu0 %vm586_vm1, %v585_v0  ;;  %548 = vmatprep.mubr.msk.bf16.mxu1 %vm586_vm1, %v585_v0  ;;  %v214_v7 = vld [vmem:[%s204_s28] sm:$0xf]  ;;  %v215_v8 = vld [vmem:[%s204_s28 + $0x4] sm:$0x1]  ;;  %s212_s16 = scalar_lea.vmem %s670_s4, %s503_s7 }
  0x10   : > { %v509_v9 = vcombine.low %v214_v7, %v215_v8  ;;  %v425_v26 = vld [vmem:[%s208_s10] sm:$0xf] }
  0x11   : > { %539 = vmatpush3.bf16.msra.mxu0 %v572_v5  ;;  %547 = vmatpush3.bf16.msra.mxu1 %v573_v6  ;;  %v426_v31 = vunpack.c.l.bf16 %v425_v26 }
  0x12   : > { %552 = vmatprep.subr.bf16.mxu0 %v585_v0  ;;  %v231_v10 = vshrl.u32 %v509_v9, 16  ;;  %v233_v11 = vshll.u32 %v509_v9, 16  ;;  %v358_v17 = vrot.slane %v509_v9, 1 }
  0x14   : > { %549 = vmatmul.mubr.msk.bf16.vlgmr.msra.gmra.mxu1 %vm248_vm2, %v214_v7  ;;  %v235_v13 = vrot.slane %v233_v11, 1 }
  0x16   : > { %v236_v14 = vor.u32 %v235_v13, %v231_v10 }
  0x18   : > { %541 = vmatmul.mubr.msk.bf16.vlgmr.msra.gmra.mxu0 %vm248_vm2, %v236_v14 }
  0x19   : > { %553 = vmatpush3.bf16.msra.mxu0 %v374_v15  ;;  %556 = vmatprep.mubr.msk.bf16.mxu0 %vm586_vm1, %v585_v0 }
  0x1a   : > { %554 = vmatprep.subr.bf16.mxu0 %v585_v0 }
  0x1d   : > { %555 = vmatpush3.bf16.msra.mxu0 %v576_v16 }
  0x20   : > { %557 = vmatmul.mubr.msk.bf16.vlgmr.msra.gmra.mxu0 %vm248_vm2, %v358_v17 }
  0xd4   : > { %v347_v18 = vpop.f32.mrf.mxu1 }
  0xd6   : > { %v550_v19 = vpop.f32.mrf.mxu1 }
  0xd8   : > { %v350_v20 = vpop.f32.mrf.mxu1  ;;  %v290_v22 = vpop.f32.mrf.mxu0 }
  0xd9   : > { %v348_v27 = vadd.f32 %v347_v18, %v290_v22 }
  0xda   : > { %v551_v21 = vpop.f32.mrf.mxu1  ;;  %v542_v23 = vpop.f32.mrf.mxu0 }
  0xdc   : > { %v293_v24 = vpop.f32.mrf.mxu0 }
  0xde   : > { %v543_v25 = vpop.f32.mrf.mxu0 }
  0xe0   : > { %v410_v28 = vpop.f32.mrf.mxu0 }
  0xe1   : > { %v416_v30 = vadd.f32 %v410_v28, %v348_v27 }
  0xe2   : > { %v558_v32 = vpop.f32.mrf.mxu0 }
  0xe3   : > { %v424_v33 = vadd.f32 %v523_v29, %v416_v30 }
  0xe4   : > { %v413_v34 = vpop.f32.mrf.mxu0 }
  0xe5   : > { %v427_v35 = vadd.f32 %v426_v31, %v424_v33 }
  0xe6   : > { %v559_v36 = vpop.f32.mrf.mxu0 }
  0xe7   : > { %v428_v37 = vpack.c.bf16 %v427_v35, %v427_v35 }
  0xe9   : > { %430 = vst.msk [vmem:[%s212_s16] sm:$0xf] %vm429_vm3, %v428_v37 }
  0xea PF: > { %s14_s15 = sadd.s32 1, %s583_s15  }
  0xeb   : > { %p11_p4 = scmp.ge.s32.totalorder %s14_s15, 4  }
  0xed   :  { %13 = sbr.rel (!%p11_p4) target bundleno = 1 (0x1), region = 71 }

// kernel: edsr_forward.34
= control target key start
LH: loop header
LB: loop body
LE: loop exit
PB: predicated region body
PF: predicated region fallthrough
CT: control target
= control target key end

     0   :  { %s547_s12 = smov 0   ;;  %s598_s0 = inlined_call_operand.vmem [shape: bf16[2,10,30], index: 0, kind: input, shape index: {}]   ;;  %s599_s1 = inlined_call_operand.vmem [shape: bf16[3,30,96], index: 1, kind: input, shape index: {}]   ;;  %s600_s2 = inlined_call_operand.vmem [shape: f32[1,96], index: 2, kind: input, shape index: {}]   ;;  %s601_s3 = inlined_call_operand.vmem [shape: bf16[2,8,96], index: 3, kind: output, shape index: {}]  }
   0x1 LB: > { %s437_s13 = sadd.s32 4294967295, %s523_s12   ;;  %p441_p0 = scmp.ge.s32.totalorder %s523_s12, 1  ;;  %s523_s12 = sphi %s547_s12, %s13_s12  }
   0x2   : > { %p137_p1 = scmp.lt.s32.totalorder %s523_s12, 3 }
   0x4   : > { %p138_p2 = pnand %p441_p0, %p137_p1 }
   0x5   : > { %p160_p3 = scmp.lt.s32.totalorder (!%p138_p2), %s437_s13, 1 }
   0x6   : > { %141 = sbr.rel (%p138_p2) target bundleno = 232 (0xe8), region = 32 }
   0xb   : > { %vm208_vm0 = vcmask 1046528   ;;  %v525_v0 = vmov 0.0   ;;  %v510_v1 = vld [vmem:[%s599_s1 + $0x18] sm:$0x7f]   ;;  %v511_v2 = vld [vmem:[%s599_s1 + $0x8] sm:$0x7f]  }
   0xc   : > { %476 = vmatprep.subr.bf16.mxu0 %v525_v0  ;;  %484 = vmatprep.subr.bf16.mxu1 %v525_v0  ;;  %v210_v3 = vsel %vm208_vm0, %v510_v1, 0  ;;  %v267_v4 = vsel %vm208_vm0, %v511_v2, 0  ;;  %v512_v5 = vld [vmem:[%s599_s1 + $0x10] sm:$0xff]   ;;  %v513_v6 = vld [vmem:[%s599_s1] sm:$0xff]   ;;  %vm526_vm1 = vmmov 0   ;;  %s603_s13 = smov (!%p160_p3, %s437_s13), 1 }
   0xd   : > { %477 = vmatpush3.bf16.msra.mxu0 %v210_v3  ;;  %485 = vmatpush3.bf16.msra.mxu1 %v267_v4  ;;  %s466_s22 = sshll.u32 %s603_s13, 3  ;;  %vm204_vm2 = vcmask 244736   ;;  %v515_v12 = vld [vmem:[%s599_s1 + $0x28] sm:$0x7f]   ;;  %v516_v16 = vld [vmem:[%s599_s1 + $0x20] sm:$0xff]   ;;  %s444_s5 = sshll.u32 %s603_s13, 2 }
   0xe   : > { %478 = vmatprep.subr.bf16.mxu0 %v525_v0  ;;  %486 = vmatprep.subr.bf16.mxu1 %v525_v0  ;;  %s164_s25 = scalar_lea.vmem %s598_s0, %s466_s22  ;;  %v330_v15 = vsel %vm208_vm0, %v515_v12, 0  ;;  %v463_v28 = vld [vmem:[%s600_s2] ss:$0 sm:$0xff]  ;;  %s168_s8 = scalar_lea.vmem %s601_s3, %s444_s5  ;;  %vm382_vm3 = vcmask 781312  }
   0xf   : > { %480 = vmatprep.mubr.msk.bf16.mxu0 %vm526_vm1, %v525_v0  ;;  %488 = vmatprep.mubr.msk.bf16.mxu1 %vm526_vm1, %v525_v0  ;;  %v170_v7 = vld [vmem:[%s164_s25] sm:$0xf]  ;;  %v171_v8 = vld [vmem:[%s164_s25 + $0x4] sm:$0x1] }
  0x10   : > { %v449_v9 = vcombine.low %v170_v7, %v171_v8 }
  0x11   : > { %479 = vmatpush3.bf16.msra.mxu0 %v512_v5  ;;  %487 = vmatpush3.bf16.msra.mxu1 %v513_v6 }
  0x12   : > { %492 = vmatprep.subr.bf16.mxu0 %v525_v0  ;;  %v187_v10 = vshrl.u32 %v449_v9, 16  ;;  %v189_v11 = vshll.u32 %v449_v9, 16  ;;  %v314_v17 = vrot.slane %v449_v9, 1 }
  0x14   : > { %489 = vmatmul.mubr.msk.bf16.vlgmr.msra.gmra.mxu1 %vm204_vm2, %v170_v7  ;;  %v191_v13 = vrot.slane %v189_v11, 1 }
  0x16   : > { %v192_v14 = vor.u32 %v191_v13, %v187_v10 }
  0x18   : > { %481 = vmatmul.mubr.msk.bf16.vlgmr.msra.gmra.mxu0 %vm204_vm2, %v192_v14 }
  0x19   : > { %493 = vmatpush3.bf16.msra.mxu0 %v330_v15  ;;  %496 = vmatprep.mubr.msk.bf16.mxu0 %vm526_vm1, %v525_v0 }
  0x1a   : > { %494 = vmatprep.subr.bf16.mxu0 %v525_v0 }
  0x1d   : > { %495 = vmatpush3.bf16.msra.mxu0 %v516_v16 }
  0x20   : > { %497 = vmatmul.mubr.msk.bf16.vlgmr.msra.gmra.mxu0 %vm204_vm2, %v314_v17 }
  0xd4   : > { %v303_v18 = vpop.f32.mrf.mxu1 }
  0xd6   : > { %v490_v19 = vpop.f32.mrf.mxu1 }
  0xd8   : > { %v306_v20 = vpop.f32.mrf.mxu1  ;;  %v246_v22 = vpop.f32.mrf.mxu0 }
  0xd9   : > { %v304_v26 = vadd.f32 %v303_v18, %v246_v22 }
  0xda   : > { %v491_v21 = vpop.f32.mrf.mxu1  ;;  %v482_v23 = vpop.f32.mrf.mxu0 }
  0xdc   : > { %v249_v24 = vpop.f32.mrf.mxu0 }
  0xde   : > { %v483_v25 = vpop.f32.mrf.mxu0 }
  0xe0   : > { %v366_v27 = vpop.f32.mrf.mxu0 }
  0xe1   : > { %v372_v29 = vadd.f32 %v366_v27, %v304_v26 }
  0xe2   : > { %v498_v30 = vpop.f32.mrf.mxu0 }
  0xe3   : > { %v380_v31 = vadd.f32 %v463_v28, %v372_v29 }
  0xe4   : > { %v369_v32 = vpop.f32.mrf.mxu0 }
  0xe5   : > { %v381_v33 = vpack.c.bf16 %v380_v31, %v380_v31 }
  0xe6   : > { %v499_v34 = vpop.f32.mrf.mxu0 }
  0xe7   : > { %383 = vst.msk [vmem:[%s168_s8] sm:$0xf] %vm382_vm3, %v381_v33 }
  0xe8 PF: > { %s13_s12 = sadd.s32 1, %s523_s12  }
  0xe9   : > { %p10_p4 = scmp.ge.s32.totalorder %s13_s12, 4  }
  0xeb   :  { %12 = sbr.rel (!%p10_p4) target bundleno = 1 (0x1), region = 64 }

// kernel: tile.143
= control target key start
LH: loop header
LB: loop body
LE: loop exit
PB: predicated region body
PF: predicated region fallthrough
CT: control target
= control target key end

     0   :  { %s28_s0 = inlined_call_operand.vmem [shape: f32[32], index: 0, kind: input, shape index: {}]   ;;  %s29_s1 = inlined_call_operand.vmem [shape: f32[16,32], index: 1, kind: output, shape index: {}]  }
   0x1   :  { %v4_v0 = vld [vmem:[%s28_s0] ss:$0 sm:$0xff] }
   0x2   :  { %5 = vst [vmem:[%s29_s1] sm:$0xff] %v4_v0  ;;  %8 = vst [vmem:[%s29_s1 + $0x8] sm:$0xff] %v4_v0 }

// kernel: tile.144
= control target key start
LH: loop header
LB: loop body
LE: loop exit
PB: predicated region body
PF: predicated region fallthrough
CT: control target
= control target key end

     0   :  { %s62_s8 = smov 96   ;;  %vm3_vm0 = vcmask 261120   ;;  %s64_s15 = smov 64   ;;  %vm9_vm1 = vcmask 1048320   ;;  %vm15_vm2 = vcmask 785920   ;;  %vm21_vm3 = vcmask 523520   ;;  %s99_s0 = inlined_call_operand.vmem [shape: f32[16,32], index: 0, kind: input, shape index: {}]   ;;  %s100_s1 = inlined_call_operand.vmem [shape: f32[1,512], index: 1, kind: output, shape index: {}]  }
   0x1   :  { %v53_v0 = vld [vmem:[%s99_s0 + $0x3] ss:$4 sm:$0xf]   ;;  %v54_v1 = vld [vmem:[%s99_s0 + $0x2] ss:$4 sm:$0xf]  }
   0x2   :  { %7 = vrot.lane.b32.xlu0 %v53_v0, %s62_s8  ;;  %v55_v2 = vld [vmem:[%s99_s0 + $0x1] ss:$4 sm:$0xf]   ;;  %v2_v3 = vld [vmem:[%s99_s0] ss:$4 sm:$0xf]  }
   0x3   :  { %s63_s0 = smov 32   ;;  %4 = vst.msk [vmem:[#allocation0] ss:$8 sm:$0xf] %vm3_vm0, %v2_v3  }
   0x4   :  { %19 = vrot.lane.b32.xlu1 %v55_v2, %s63_s0 }
   0x6   :  { %13 = vrot.lane.b32.xlu0 %v54_v1, %s64_s15 }
  0x74   :  { %v8_v4 = vpop.permute.xlu0 %7  }
  0x75   :  { %10 = vst.msk [vmem:[#allocation0] ss:$8 sm:$0xf] %vm9_vm1, %v8_v4  }
  0x76   :  { %v20_v5 = vpop.permute.xlu1 %19  }
  0x78   :  { %v14_v6 = vpop.permute.xlu0 %13  }
  0x79   :  { %16 = vst.msk [vmem:[#allocation0] ss:$8 sm:$0xf] %vm15_vm2, %v14_v6  }
  0x7a   :  { %22 = vst.msk [vmem:[#allocation0] ss:$8 sm:$0xf] %vm21_vm3, %v20_v5  }
  0x81   :  { %v27_v7 = vld [vmem:[#allocation0] sm:$0x1]  ;;  %v32_v8 = vld [vmem:[#allocation0 + $0x8] sm:$0x1]  ;;  %v38_v9 = vld [vmem:[#allocation0 + $0x10] sm:$0x1] }
  0x82   :  { %30 = vst [vmem:[%s100_s1] sm:$0x1] %v27_v7  ;;  %56 = vst [vmem:[%s100_s1 + $0x1] sm:$0x1] %v32_v8  ;;  %v45_v10 = vld [vmem:[#allocation0 + $0x18] sm:$0x1] }
  0x83   :  { %57 = vst [vmem:[%s100_s1 + $0x2] sm:$0x1] %v38_v9  ;;  %58 = vst [vmem:[%s100_s1 + $0x3] sm:$0x1] %v45_v10 }

// kernel: edsr_forward.35
= control target key start
LH: loop header
LB: loop body
LE: loop exit
PB: predicated region body
PF: predicated region fallthrough
CT: control target
= control target key end

     0   :  { %s739_s15 = smov 0   ;;  %s811_s0 = inlined_call_operand.vmem [shape: bf16[2,18,54], index: 0, kind: input, shape index: {}]   ;;  %s812_s1 = inlined_call_operand.vmem [shape: bf16[3,54,128], index: 1, kind: input, shape index: {}]   ;;  %s813_s2 = inlined_call_operand.vmem [shape: f32[1,128], index: 2, kind: input, shape index: {}]   ;;  %s814_s3 = inlined_call_operand.vmem [shape: bf16[2,16,128], index: 3, kind: input, shape index: {}]   ;;  %s815_s4 = inlined_call_operand.vmem [shape: bf16[2,16,128], index: 4, kind: output, shape index: {}]  }
   0x1 LB: > { %s569_s16 = sadd.s32 4294967295, %s710_s15   ;;  %p573_p0 = scmp.ge.s32.totalorder %s710_s15, 1  ;;  %s710_s15 = sphi %s739_s15, %s14_s15  }
   0x2   : > { %p172_p1 = scmp.lt.s32.totalorder %s710_s15, 3 }
   0x4   : > { %p173_p2 = pnand %p573_p0, %p172_p1 }
   0x5   : > { %p203_p3 = scmp.lt.s32.totalorder (!%p173_p2), %s569_s16, 1 }
   0x6   : > { %176 = sbr.rel (%p173_p2) target bundleno = 250 (0xfa), region = 36 }
   0xb   : > { %v690_v0 = vld [vmem:[%s812_s1 + $0x34] ss:$0 sps:$4 sm:$0x77]   ;;  %v712_v1 = vmov 0.0   ;;  %vm283_vm0 = vcmask 1042432   ;;  %v692_v5 = vld [vmem:[%s812_s1 + $0x2c] sm:$0xff]  }
   0xc   : > { %643 = vmatprep.subr.bf16.mxu0 %v712_v1  ;;  %655 = vmatprep.subr.bf16.mxu1 %v712_v1  ;;  %v691_v2 = vld [vmem:[%s812_s1 + $0x18] ss:$0 sps:$4 sm:$0x77]   ;;  %v285_v3 = vsel %vm283_vm0, %v690_v0, 0  ;;  %v693_v6 = vld [vmem:[%s812_s1 + $0x10] sm:$0xff]   ;;  %vm713_vm1 = vmmov 0  }
   0xd   : > { %644 = vmatpush3.bf16.msra.mxu0 %v285_v3  ;;  %v352_v4 = vsel %vm283_vm0, %v691_v2, 0  ;;  %651 = vmatprep.mubr.msk.bf16.mxu0 %vm713_vm1, %v712_v1  ;;  %v694_v7 = vld [vmem:[%s812_s1 + $0x24] sm:$0xff]   ;;  %s817_s16 = smov (!%p203_p3, %s569_s16), 1  ;;  %v696_v9 = vld [vmem:[%s812_s1 + $0x1c] sm:$0xff]   ;;  %vm279_vm2 = vcmask 441344   ;;  %vm403_vm4 = vcmask 1046528  }
   0xe   : > { %656 = vmatpush3.bf16.msra.mxu1 %v352_v4  ;;  %645 = vmatprep.subr.bf16.mxu0 %v712_v1  ;;  %v695_v8 = vld [vmem:[%s812_s1 + $0x8] sm:$0xff]   ;;  %s679_s29 = smul.u32 12, %s817_s16  ;;  %v697_v10 = vld [vmem:[%s812_s1] sm:$0xff]   ;;  %v700_v16 = vld [vmem:[%s812_s1 + $0x50] ss:$0 sps:$4 sm:$0x77]  }
   0xf   : > { %657 = vmatprep.subr.bf16.mxu1 %v712_v1  ;;  %663 = vmatprep.mubr.msk.bf16.mxu1 %vm713_vm1, %v712_v1  ;;  %vm245_vm3 = vsmask.f32 7424  ;;  %v432_v20 = vsel %vm283_vm0, %v700_v16, 0  ;;  %v701_v22 = vld [vmem:[%s812_s1 + $0x48] sm:$0xff]   ;;  %v702_v23 = vld [vmem:[%s812_s1 + $0x40] sm:$0xff]   ;;  %v703_v24 = vld [vmem:[%s812_s1 + $0x38] sm:$0xff]  }
  0x10   : > { %s207_s10 = scalar_lea.vmem %s811_s0, %s679_s29  ;;  %s615_s21 = sshll.u32 %s817_s16, 3  ;;  %v610_v39 = vld [vmem:[%s813_s2] ss:$0 sm:$0xff] }
  0x11   : > { %646 = vmatpush3.bf16.msra.mxu0 %v692_v5  ;;  %v698_v11 = vld [vmem:[%s207_s10] sm:$0xff]   ;;  %v699_v12 = vld [vmem:[%s207_s10 + $0x8] ss:$0 sps:$4 sm:$0x11]   ;;  %s212_s24 = scalar_lea.vmem %s814_s3, %s615_s21  ;;  %s217_s28 = scalar_lea.vmem %s815_s4, %s615_s21 }
  0x12   : > { %658 = vmatpush3.bf16.msra.mxu1 %v693_v6  ;;  %647 = vmatprep.subr.bf16.mxu0 %v712_v1  ;;  %v247_v13 = vshrl.u32 %v698_v11, 16  ;;  %v249_v14 = vshll.u32 %v698_v11, 16  ;;  %v254_v15 = vshll.u32 %v699_v12, 16  ;;  %v404_v25 = vrot.slane %v698_v11, 1  ;;  %v620_v40 = vld [vmem:[%s212_s24] sm:$0xff]  }
  0x13   : > { %659 = vmatprep.subr.bf16.mxu1 %v712_v1  ;;  %v405_v26 = vrot.slane %v699_v12, 1  ;;  %v621_v45 = vunpack.c.l.bf16 %v620_v40  ;;  %v622_v47 = vunpack.c.h.bf16 %v620_v40 }
  0x14   : > { %v251_v17 = vrot.slane %v249_v14, 1  ;;  %v256_v18 = vrot.slane %v254_v15, 1 }
  0x15   : > { %648 = vmatpush3.bf16.msra.mxu0 %v694_v7  ;;  %v406_v27 = vsel %vm403_vm4, %v404_v25, %v405_v26 }
  0x16   : > { %660 = vmatpush3.bf16.msra.mxu1 %v695_v8  ;;  %649 = vmatprep.subr.bf16.mxu0 %v712_v1  ;;  %v252_v19 = vor.u32 %v251_v17, %v247_v13 }
  0x17   : > { %661 = vmatprep.subr.bf16.mxu1 %v712_v1 }
  0x18   : > { %v257_v21 = vsel %vm245_vm3, %v252_v19, %v256_v18 }
  0x19   : > { %650 = vmatpush3.bf16.msra.mxu0 %v696_v9 }
  0x1a   : > { %662 = vmatpush3.bf16.msra.mxu1 %v697_v10  ;;  %667 = vmatprep.subr.bf16.mxu0 %v712_v1 }
  0x1c   : > { %652 = vmatmul.mubr.msk.bf16.vlgmr.msra.gmra.mxu0 %vm279_vm2, %v257_v21 }
  0x1d   : > { %664 = vmatmul.mubr.msk.bf16.vlgmr.msra.gmra.mxu1 %vm279_vm2, %v698_v11  ;;  %668 = vmatpush3.bf16.msra.mxu0 %v432_v20 }
  0x1e   : > { %675 = vmatprep.mubr.msk.bf16.mxu0 %vm713_vm1, %v712_v1  ;;  %669 = vmatprep.subr.bf16.mxu0 %v712_v1 }
  0x21   : > { %670 = vmatpush3.bf16.msra.mxu0 %v701_v22 }
  0x22   : > { %671 = vmatprep.subr.bf16.mxu0 %v712_v1 }
  0x25   : > { %672 = vmatpush3.bf16.msra.mxu0 %v702_v23 }
  0x26   : > { %673 = vmatprep.subr.bf16.mxu0 %v712_v1 }
  0x29   : > { %674 = vmatpush3.bf16.msra.mxu0 %v703_v24 }
  0x2c   : > { %676 = vmatmul.mubr.msk.bf16.vlgmr.msra.gmra.mxu0 %vm279_vm2, %v406_v27 }
  0xdc   : > { %v321_v30 = vpop.f32.mrf.mxu0 }
  0xdd   : > { %v388_v28 = vpop.f32.mrf.mxu1 }
  0xde   : > { %v653_v32 = vpop.f32.mrf.mxu0  ;;  %v389_v36 = vadd.f32 %v388_v28, %v321_v30 }
  0xdf   : > { %v665_v29 = vpop.f32.mrf.mxu1 }
  0xe0   : > { %v324_v34 = vpop.f32.mrf.mxu0 }
  0xe1   : > { %v391_v31 = vpop.f32.mrf.mxu1 }
  0xe2   : > { %v654_v35 = vpop.f32.mrf.mxu0  ;;  %v392_v42 = vadd.f32 %v391_v31, %v324_v34 }
  0xe3   : > { %v666_v33 = vpop.f32.mrf.mxu1 }
  0xec   : > { %v468_v37 = vpop.f32.mrf.mxu0 }
  0xed   : > { %v475_v38 = vadd.f32 %v468_v37, %v389_v36 }
  0xee   : > { %v677_v41 = vpop.f32.mrf.mxu0 }
  0xef   : > { %v484_v44 = vadd.f32 %v610_v39, %v475_v38 }
  0xf0   : > { %v471_v43 = vpop.f32.mrf.mxu0 }
  0xf1   : > { %v476_v46 = vadd.f32 %v471_v43, %v392_v42  ;;  %v490_v50 = vadd.f32 %v621_v45, %v484_v44 }
  0xf2   : > { %v678_v48 = vpop.f32.mrf.mxu0 }
  0xf3   : > { %v485_v49 = vadd.f32 %v610_v39, %v476_v46 }
  0xf5   : > { %v491_v51 = vadd.f32 %v622_v47, %v485_v49 }
  0xf7   : > { %v626_v52 = vpack.c.bf16 %v491_v51, %v490_v50 }
  0xf9   : > { %627 = vst [vmem:[%s217_s28] sm:$0xff] %v626_v52  }
  0xfa PF: > { %s14_s15 = sadd.s32 1, %s710_s15  }
  0xfb   : > { %p11_p4 = scmp.ge.s32.totalorder %s14_s15, 4  }
  0xfd   :  { %13 = sbr.rel (!%p11_p4) target bundleno = 1 (0x1), region = 71 }

// kernel: edsr_forward.36
= control target key start
LH: loop header
LB: loop body
LE: loop exit
PB: predicated region body
PF: predicated region fallthrough
CT: control target
= control target key end

     0   :  { %s1674_s12 = smov 0   ;;  %s2058_s0 = inlined_call_operand.vmem [shape: bf16[2,18,144], index: 0, kind: input, shape index: {}]   ;;  %s2059_s1 = inlined_call_operand.vmem [shape: bf16[3,144,512], index: 1, kind: input, shape index: {}]   ;;  %s2060_s2 = inlined_call_operand.vmem [shape: f32[1,512], index: 2, kind: input, shape index: {}]   ;;  %s2061_s3 = inlined_call_operand.vmem [shape: bf16[2,16,512], index: 3, kind: output, shape index: {}]  }
   0x1 LB: > { %s1261_s13 = sadd.s32 4294967295, %s1652_s12   ;;  %p1265_p0 = scmp.ge.s32.totalorder %s1652_s12, 1  ;;  %s1652_s12 = sphi %s1674_s12, %s13_s12  }
   0x2   : > { %p137_p1 = scmp.lt.s32.totalorder %s1652_s12, 3 }
   0x4   : > { %p138_p2 = pnand %p1265_p0, %p137_p1 }
   0x5   : > { %p161_p3 = scmp.lt.s32.totalorder (!%p138_p2), %s1261_s13, 1 }
   0x6   : > { %141 = sbr.rel (%p138_p2) target bundleno = 326 (0x146), region = 32 }
   0xb   : > { %v1479_v0 = vld [vmem:[%s2059_s1 + $0x204] ss:$16 sps:$4 sm:$0xff]   ;;  %v1481_v1 = vld [vmem:[%s2059_s1 + $0x20c] ss:$16 sps:$4 sm:$0xff]   ;;  %v1483_v2 = vld [vmem:[%s2059_s1 + $0x200] ss:$16 sps:$4 sm:$0xff]  }
   0xc   : > { %471 = vmatprep.subr.bf16.mxu0 %v1479_v0  ;;  %v1484_v3 = vld [vmem:[%s2059_s1 + $0x208] ss:$16 sps:$4 sm:$0xff]   ;;  %514 = vmatprep.subr.bf16.mxu1 %v1481_v1  ;;  %v1485_v4 = vld [vmem:[%s2059_s1 + $0x1e4] ss:$16 sps:$4 sm:$0xff]   ;;  %v1487_v5 = vld [vmem:[%s2059_s1 + $0x1ec] ss:$16 sps:$4 sm:$0xff]  }
   0xd   : > { %472 = vmatpush1.bf16.msra.mxu0 %v1483_v2  ;;  %515 = vmatpush1.bf16.msra.mxu1 %v1484_v3  ;;  %v1489_v6 = vld [vmem:[%s2059_s1 + $0x1e0] ss:$16 sps:$4 sm:$0xff]   ;;  %v1490_v7 = vld [vmem:[%s2059_s1 + $0x1e8] ss:$16 sps:$4 sm:$0xff]   ;;  %v1491_v8 = vld [vmem:[%s2059_s1 + $0x1c4] ss:$16 sps:$4 sm:$0xff]  }
   0xe   : > { %473 = vmatprep.subr.bf16.mxu0 %v1485_v4  ;;  %516 = vmatprep.subr.bf16.mxu1 %v1487_v5  ;;  %v1493_v9 = vld [vmem:[%s2059_s1 + $0x1cc] ss:$16 sps:$4 sm:$0xff]   ;;  %v1495_v10 = vld [vmem:[%s2059_s1 + $0x1c0] ss:$16 sps:$4 sm:$0xff]   ;;  %v1496_v11 = vld [vmem:[%s2059_s1 + $0x1c8] ss:$16 sps:$4 sm:$0xff]  }
   0xf   : > { %v1497_v12 = vld [vmem:[%s2059_s1 + $0x1a4] ss:$16 sps:$4 sm:$0xff]   ;;  %v1499_v13 = vld [vmem:[%s2059_s1 + $0x1ac] ss:$16 sps:$4 sm:$0xff]   ;;  %v1501_v14 = vld [vmem:[%s2059_s1 + $0x1a0] ss:$16 sps:$4 sm:$0xff]  }
  0x10   : > { %v1502_v15 = vld [vmem:[%s2059_s1 + $0x1a8] ss:$16 sps:$4 sm:$0xff]   ;;  %v1503_v16 = vld [vmem:[%s2059_s1 + $0x184] ss:$16 sps:$4 sm:$0xff]   ;;  %v1505_v17 = vld [vmem:[%s2059_s1 + $0x18c] ss:$16 sps:$4 sm:$0xff]  }
  0x11   : > { %474 = vmatpush1.bf16.msra.mxu0 %v1489_v6  ;;  %517 = vmatpush1.bf16.msra.mxu1 %v1490_v7  ;;  %s2063_s13 = smov (!%p161_p3, %s1261_s13), 1  ;;  %v1507_v18 = vld [vmem:[%s2059_s1 + $0x180] ss:$16 sps:$4 sm:$0xff]   ;;  %v1508_v19 = vld [vmem:[%s2059_s1 + $0x188] ss:$16 sps:$4 sm:$0xff]   ;;  %vm467_vm1 = vcmask 130048  }
  0x12   : > { %475 = vmatprep.subr.bf16.mxu0 %v1491_v8  ;;  %518 = vmatprep.subr.bf16.mxu1 %v1493_v9  ;;  %v1509_v20 = vld [vmem:[%s2059_s1 + $0x164] ss:$16 sps:$4 sm:$0xff]   ;;  %v1511_v21 = vld [vmem:[%s2059_s1 + $0x16c] ss:$16 sps:$4 sm:$0xff]   ;;  %s1470_s6 = smul.u32 24, %s2063_s13  ;;  %vm863_vm2 = vcmask 1046528  }
  0x13   : > { %v1513_v22 = vld [vmem:[%s2059_s1 + $0x160] ss:$16 sps:$4 sm:$0xff]   ;;  %v1514_v23 = vld [vmem:[%s2059_s1 + $0x168] ss:$16 sps:$4 sm:$0xff]   ;;  %v1515_v24 = vld [vmem:[%s2059_s1 + $0x144] ss:$16 sps:$4 sm:$0xff]  }
  0x14   : > { %v1517_v25 = vld [vmem:[%s2059_s1 + $0x14c] ss:$16 sps:$4 sm:$0xff]   ;;  %s165_s19 = scalar_lea.vmem %s2058_s0, %s1470_s6  ;;  %v1519_v26 = vld [vmem:[%s2059_s1 + $0x140] ss:$16 sps:$4 sm:$0xff]   ;;  %v1520_v27 = vld [vmem:[%s2059_s1 + $0x148] ss:$16 sps:$4 sm:$0xff]  }
  0x15   : > { %476 = vmatpush1.bf16.msra.mxu0 %v1495_v10  ;;  %519 = vmatpush1.bf16.msra.mxu1 %v1496_v11  ;;  %v1521_v28 = vld [vmem:[%s2059_s1 + $0x124] ss:$16 sps:$4 sm:$0xff]   ;;  %v1523_v29 = vld [vmem:[%s2059_s1 + $0x12c] ss:$16 sps:$4 sm:$0xff]   ;;  %v1782_v31 = vld [vmem:[%s165_s19] ss:$8 sps:$4 sm:$0xff]  }
  0x16   : > { %477 = vmatprep.subr.bf16.mxu0 %v1497_v12  ;;  %520 = vmatprep.subr.bf16.mxu1 %v1499_v13  ;;  %v174_v30 = vld [vmem:[%s165_s19 + $0x10] sm:$0x11]  ;;  %v1784_v32 = vld [vmem:[%s165_s19 + $0x4] ss:$8 sps:$4 sm:$0xff]   ;;  %v1526_v36 = vld [vmem:[%s2059_s1 + $0x128] ss:$16 sps:$4 sm:$0xff]  }
  0x17   : > { %v1786_v33 = vcombine.high %v174_v30, %v174_v30  ;;  %v1307_v34 = vcombine.low %v174_v30, %v174_v30  ;;  %v1525_v35 = vld [vmem:[%s2059_s1 + $0x120] ss:$16 sps:$4 sm:$0xff]   ;;  %v275_v37 = vshrl.u32 %v1784_v32, 16  ;;  %v277_v38 = vshll.u32 %v1784_v32, 16  ;;  %v1527_v40 = vld [vmem:[%s2059_s1 + $0x224] ss:$16 sps:$4 sm:$0xff]  }
  0x18   : > { %v263_v41 = vshrl.u32 %v1782_v31, 16  ;;  %v265_v42 = vshll.u32 %v1782_v31, 16  ;;  %v1529_v44 = vld [vmem:[%s2059_s1 + $0x22c] ss:$16 sps:$4 sm:$0xff]   ;;  %vm261_vm0 = vsmask.f32 7424 }
  0x19   : > { %478 = vmatpush1.bf16.msra.mxu0 %v1501_v14  ;;  %521 = vmatpush1.bf16.msra.mxu1 %v1502_v15  ;;  %v282_v39 = vshll.u32 %v1786_v33, 16  ;;  %v270_v43 = vshll.u32 %v1307_v34, 16  ;;  %v279_v45 = vrot.slane %v277_v38, 1  ;;  %v1531_v48 = vld [vmem:[%s2059_s1 + $0x220] ss:$16 sps:$4 sm:$0xff]   ;;  %v864_v56 = vrot.slane %v1782_v31, 1 }
  0x1a   : > { %479 = vmatprep.subr.bf16.mxu0 %v1503_v16  ;;  %522 = vmatprep.subr.bf16.mxu1 %v1505_v17  ;;  %v267_v47 = vrot.slane %v265_v42, 1  ;;  %v1532_v50 = vld [vmem:[%s2059_s1 + $0x228] ss:$16 sps:$4 sm:$0xff]   ;;  %v1540_v53 = vld [vmem:[%s2059_s1 + $0xe4] ss:$16 sps:$4 sm:$0xff]   ;;  %v865_v57 = vrot.slane %v1307_v34, 1 }
  0x1b   : > { %v284_v46 = vrot.slane %v282_v39, 1  ;;  %v280_v49 = vor.u32 %v279_v45, %v275_v37  ;;  %v272_v52 = vrot.slane %v270_v43, 1  ;;  %v1543_v55 = vld [vmem:[%s2059_s1 + $0xec] ss:$16 sps:$4 sm:$0xff]   ;;  %v1538_v58 = vld [vmem:[%s2059_s1 + $0xe0] ss:$16 sps:$4 sm:$0xff]  }
  0x1c   : > { %v268_v51 = vor.u32 %v267_v47, %v263_v41  ;;  %v1825_v59 = vsel %vm863_vm2, %v864_v56, %v865_v57  ;;  %v1541_v61 = vld [vmem:[%s2059_s1 + $0xe8] ss:$16 sps:$4 sm:$0xff]   ;;  %v1546_v62 = vld [vmem:[%s2059_s1 + $0xc4] ss:$16 sps:$4 sm:$0xff]   ;;  %v1549_v63 = vld [vmem:[%s2059_s1 + $0xcc] ss:$16 sps:$4 sm:$0xff]  }
  0x1d   : > { %480 = vmatpush1.bf16.msra.mxu0 %v1507_v18  ;;  %523 = vmatpush1.bf16.msra.mxu1 %v1508_v19  ;;  %v285_v54 = vsel %vm261_vm0, %v280_v49, %v284_v46  ;;  %v1544_v0 = vld [vmem:[%s2059_s1 + $0xc0] ss:$16 sps:$4 sm:$0xff]   ;;  %v1547_v1 = vld [vmem:[%s2059_s1 + $0xc8] ss:$16 sps:$4 sm:$0xff]   ;;  %v1552_v2 = vld [vmem:[%s2059_s1 + $0xa4] ss:$16 sps:$4 sm:$0xff]  }
  0x1e   : > { %481 = vmatprep.subr.bf16.mxu0 %v1509_v20  ;;  %524 = vmatprep.subr.bf16.mxu1 %v1511_v21  ;;  %v273_v60 = vsel %vm261_vm0, %v268_v51, %v272_v52  ;;  %v1555_v3 = vld [vmem:[%s2059_s1 + $0xac] ss:$16 sps:$4 sm:$0xff]   ;;  %v1550_v4 = vld [vmem:[%s2059_s1 + $0xa0] ss:$16 sps:$4 sm:$0xff]   ;;  %v1553_v5 = vld [vmem:[%s2059_s1 + $0xa8] ss:$16 sps:$4 sm:$0xff]  }
  0x1f   : > { %1345 = vmatprep.mubr.msk.bf16.mxu0 %vm467_vm1, %v285_v54  ;;  %1346 = vmatprep.mubr.msk.bf16.mxu1 %vm467_vm1, %v285_v54  ;;  %v1558_v6 = vld [vmem:[%s2059_s1 + $0x84] ss:$16 sps:$4 sm:$0xff]   ;;  %v1561_v7 = vld [vmem:[%s2059_s1 + $0x8c] ss:$16 sps:$4 sm:$0xff]   ;;  %v1556_v8 = vld [vmem:[%s2059_s1 + $0x80] ss:$16 sps:$4 sm:$0xff]  }
  0x20   : > { %v1559_v9 = vld [vmem:[%s2059_s1 + $0x88] ss:$16 sps:$4 sm:$0xff]   ;;  %v1564_v10 = vld [vmem:[%s2059_s1 + $0x64] ss:$16 sps:$4 sm:$0xff]   ;;  %v1567_v11 = vld [vmem:[%s2059_s1 + $0x6c] ss:$16 sps:$4 sm:$0xff]  }
  0x21   : > { %482 = vmatpush1.bf16.msra.mxu0 %v1513_v22  ;;  %525 = vmatpush1.bf16.msra.mxu1 %v1514_v23  ;;  %v1562_v12 = vld [vmem:[%s2059_s1 + $0x60] ss:$16 sps:$4 sm:$0xff]   ;;  %v1565_v13 = vld [vmem:[%s2059_s1 + $0x68] ss:$16 sps:$4 sm:$0xff]   ;;  %v1570_v14 = vld [vmem:[%s2059_s1 + $0x44] ss:$16 sps:$4 sm:$0xff]  }
  0x22   : > { %483 = vmatprep.subr.bf16.mxu0 %v1515_v24  ;;  %526 = vmatprep.subr.bf16.mxu1 %v1517_v25  ;;  %v1573_v15 = vld [vmem:[%s2059_s1 + $0x4c] ss:$16 sps:$4 sm:$0xff]   ;;  %v1568_v16 = vld [vmem:[%s2059_s1 + $0x40] ss:$16 sps:$4 sm:$0xff]   ;;  %v1571_v17 = vld [vmem:[%s2059_s1 + $0x48] ss:$16 sps:$4 sm:$0xff]  }
  0x23   : > { %v1576_v18 = vld [vmem:[%s2059_s1 + $0x24] ss:$16 sps:$4 sm:$0xff]   ;;  %v1579_v19 = vld [vmem:[%s2059_s1 + $0x2c] ss:$16 sps:$4 sm:$0xff]   ;;  %v1574_v20 = vld [vmem:[%s2059_s1 + $0x20] ss:$16 sps:$4 sm:$0xff]  }
  0x24   : > { %v1577_v21 = vld [vmem:[%s2059_s1 + $0x28] ss:$16 sps:$4 sm:$0xff]   ;;  %v1582_v22 = vld [vmem:[%s2059_s1 + $0x4] ss:$16 sps:$4 sm:$0xff]   ;;  %v1585_v23 = vld [vmem:[%s2059_s1 + $0xc] ss:$16 sps:$4 sm:$0xff]  }
  0x25   : > { %484 = vmatpush1.bf16.msra.mxu0 %v1519_v26  ;;  %527 = vmatpush1.bf16.msra.mxu1 %v1520_v27  ;;  %v1580_v24 = vld [vmem:[%s2059_s1] ss:$16 sps:$4 sm:$0xff]   ;;  %v1583_v25 = vld [vmem:[%s2059_s1 + $0x8] ss:$16 sps:$4 sm:$0xff]   ;;  %v1588_v26 = vld [vmem:[%s2059_s1 + $0x104] ss:$16 sps:$4 sm:$0xff]  }
  0x26   : > { %485 = vmatprep.subr.bf16.mxu0 %v1521_v28  ;;  %528 = vmatprep.subr.bf16.mxu1 %v1523_v29  ;;  %v1591_v27 = vld [vmem:[%s2059_s1 + $0x10c] ss:$16 sps:$4 sm:$0xff]   ;;  %v1586_v28 = vld [vmem:[%s2059_s1 + $0x100] ss:$16 sps:$4 sm:$0xff]   ;;  %v1589_v29 = vld [vmem:[%s2059_s1 + $0x108] ss:$16 sps:$4 sm:$0xff]  }
  0x27   : > { %v1594_v30 = vld [vmem:[%s2059_s1 + $0x324] ss:$16 sps:$4 sm:$0xff]   ;;  %v1597_v34 = vld [vmem:[%s2059_s1 + $0x32c] ss:$16 sps:$4 sm:$0xff]   ;;  %v868_v37 = vrot.slane %v1786_v33, 1  ;;  %s1465_s9 = sshll.u32 %s2063_s13, 5 }
  0x28   : > { %v1595_v38 = vld [vmem:[%s2059_s1 + $0x328] ss:$16 sps:$4 sm:$0xff]   ;;  %v1600_v39 = vld [vmem:[%s2059_s1 + $0x304] ss:$16 sps:$4 sm:$0xff]   ;;  %v1598_v33 = vld [vmem:[%s2059_s1 + $0x300] ss:$16 sps:$4 sm:$0xff]   ;;  %s170_s14 = scalar_lea.vmem %s2061_s3, %s1465_s9 }
  0x29   : > { %486 = vmatpush1.bf16.msra.mxu0 %v1525_v35  ;;  %529 = vmatpush1.bf16.msra.mxu1 %v1526_v36  ;;  %v1592_v35 = vld [vmem:[%s2059_s1 + $0x320] ss:$16 sps:$4 sm:$0xff]   ;;  %v867_v36 = vrot.slane %v1784_v32, 1  ;;  %v1601_v41 = vld [vmem:[%s2059_s1 + $0x308] ss:$16 sps:$4 sm:$0xff]  }
  0x2a   : > { %501 = vmatprep.subr.bf16.mxu0 %v1527_v40  ;;  %544 = vmatprep.subr.bf16.mxu1 %v1529_v44  ;;  %v1603_v40 = vld [vmem:[%s2059_s1 + $0x30c] ss:$16 sps:$4 sm:$0xff]   ;;  %v1606_v42 = vld [vmem:[%s2059_s1 + $0x2e4] ss:$16 sps:$4 sm:$0xff]   ;;  %v1604_v43 = vld [vmem:[%s2059_s1 + $0x2e0] ss:$16 sps:$4 sm:$0xff]  }
  0x2b   : > { %v1607_v44 = vld [vmem:[%s2059_s1 + $0x2e8] ss:$16 sps:$4 sm:$0xff]   ;;  %v1612_v45 = vld [vmem:[%s2059_s1 + $0x2c4] ss:$16 sps:$4 sm:$0xff]   ;;  %v1615_v46 = vld [vmem:[%s2059_s1 + $0x2cc] ss:$16 sps:$4 sm:$0xff]  }
  0x2c   : > { %v1610_v47 = vld [vmem:[%s2059_s1 + $0x2c0] ss:$16 sps:$4 sm:$0xff]   ;;  %v1618_v49 = vld [vmem:[%s2059_s1 + $0x2a4] ss:$16 sps:$4 sm:$0xff]   ;;  %v1619_v52 = vld [vmem:[%s2059_s1 + $0x2a8] ss:$16 sps:$4 sm:$0xff]  }
  0x2d   : > { %502 = vmatpush2.bf16.msra.mxu0 %v1531_v48  ;;  %545 = vmatpush2.bf16.msra.mxu1 %v1532_v50  ;;  %v1613_v48 = vld [vmem:[%s2059_s1 + $0x2c8] ss:$16 sps:$4 sm:$0xff]   ;;  %v1621_v50 = vld [vmem:[%s2059_s1 + $0x2ac] ss:$16 sps:$4 sm:$0xff]   ;;  %v1616_v51 = vld [vmem:[%s2059_s1 + $0x2a0] ss:$16 sps:$4 sm:$0xff]  }
  0x2e   : > { %740 = vmatprep.subr.bf16.mxu0 %v1540_v53  ;;  %783 = vmatprep.subr.bf16.mxu1 %v1543_v55  ;;  %v1624_v53 = vld [vmem:[%s2059_s1 + $0x284] ss:$16 sps:$4 sm:$0xff]   ;;  %v1627_v54 = vld [vmem:[%s2059_s1 + $0x28c] ss:$16 sps:$4 sm:$0xff]   ;;  %v1622_v55 = vld [vmem:[%s2059_s1 + $0x280] ss:$16 sps:$4 sm:$0xff]  }
  0x2f   : > { %v1625_v56 = vld [vmem:[%s2059_s1 + $0x288] ss:$16 sps:$4 sm:$0xff]   ;;  %v1630_v57 = vld [vmem:[%s2059_s1 + $0x264] ss:$16 sps:$4 sm:$0xff]  }
  0x30   : > { %504 = vmatmul.mubr.bf16.vlgmr.msra.gmra.mxu0 %v273_v60  ;;  %547 = vmatmul.mubr.bf16.vlgmr.msra.gmra.mxu1 %v273_v60  ;;  %v1628_v60 = vld [vmem:[%s2059_s1 + $0x260] ss:$16 sps:$4 sm:$0xff]  }
  0x31   : > { %741 = vmatpush1.bf16.msra.mxu0 %v1538_v58  ;;  %784 = vmatpush1.bf16.msra.mxu1 %v1541_v61  ;;  %v1633_v58 = vld [vmem:[%s2059_s1 + $0x26c] ss:$16 sps:$4 sm:$0xff]   ;;  %v1631_v61 = vld [vmem:[%s2059_s1 + $0x268] ss:$16 sps:$4 sm:$0xff]  }
  0x32   : > { %742 = vmatprep.subr.bf16.mxu0 %v1546_v62  ;;  %785 = vmatprep.subr.bf16.mxu1 %v1549_v63  ;;  %v1636_v62 = vld [vmem:[%s2059_s1 + $0x244] ss:$16 sps:$4 sm:$0xff]   ;;  %v1639_v63 = vld [vmem:[%s2059_s1 + $0x24c] ss:$16 sps:$4 sm:$0xff]  }
  0x33   : > { %1383 = vmatprep.mubr.msk.bf16.mxu0 %vm467_vm1, %v1784_v32  ;;  %1384 = vmatprep.mubr.msk.bf16.mxu1 %vm467_vm1, %v1784_v32  ;;  %v869_v32 = vsel %vm863_vm2, %v867_v36, %v868_v37 }
  0x35   : > { %743 = vmatpush1.bf16.msra.mxu0 %v1544_v0  ;;  %786 = vmatpush1.bf16.msra.mxu1 %v1547_v1  ;;  %v1634_v0 = vld [vmem:[%s2059_s1 + $0x240] ss:$16 sps:$4 sm:$0xff]   ;;  %v1637_v1 = vld [vmem:[%s2059_s1 + $0x248] ss:$16 sps:$4 sm:$0xff]  }
  0x36   : > { %744 = vmatprep.subr.bf16.mxu0 %v1552_v2  ;;  %787 = vmatprep.subr.bf16.mxu1 %v1555_v3  ;;  %v1642_v2 = vld [vmem:[%s2059_s1 + $0x344] ss:$16 sps:$4 sm:$0xff]   ;;  %v1645_v3 = vld [vmem:[%s2059_s1 + $0x34c] ss:$16 sps:$4 sm:$0xff]  }
  0x39   : > { %745 = vmatpush1.bf16.msra.mxu0 %v1550_v4  ;;  %788 = vmatpush1.bf16.msra.mxu1 %v1553_v5  ;;  %v1640_v4 = vld [vmem:[%s2059_s1 + $0x340] ss:$16 sps:$4 sm:$0xff]   ;;  %v1643_v5 = vld [vmem:[%s2059_s1 + $0x348] ss:$16 sps:$4 sm:$0xff]  }
  0x3a   : > { %746 = vmatprep.subr.bf16.mxu0 %v1558_v6  ;;  %789 = vmatprep.subr.bf16.mxu1 %v1561_v7 }
  0x3d   : > { %747 = vmatpush1.bf16.msra.mxu0 %v1556_v8  ;;  %790 = vmatpush1.bf16.msra.mxu1 %v1559_v9 }
  0x3e   : > { %748 = vmatprep.subr.bf16.mxu0 %v1564_v10  ;;  %791 = vmatprep.subr.bf16.mxu1 %v1567_v11 }
  0x41   : > { %749 = vmatpush1.bf16.msra.mxu0 %v1562_v12  ;;  %792 = vmatpush1.bf16.msra.mxu1 %v1565_v13 }
  0x42   : > { %750 = vmatprep.subr.bf16.mxu0 %v1570_v14  ;;  %793 = vmatprep.subr.bf16.mxu1 %v1573_v15 }
  0x45   : > { %751 = vmatpush1.bf16.msra.mxu0 %v1568_v16  ;;  %794 = vmatpush1.bf16.msra.mxu1 %v1571_v17  ;;  %v1150_v16 = vlaneseq }
  0x46   : > { %752 = vmatprep.subr.bf16.mxu0 %v1576_v18  ;;  %795 = vmatprep.subr.bf16.mxu1 %v1579_v19 }
  0x47   : > { %v1151_v19 = vshrl.u32 %v1150_v16, 7 }
  0x49   : > { %753 = vmatpush1.bf16.msra.mxu0 %v1574_v20  ;;  %796 = vmatpush1.bf16.msra.mxu1 %v1577_v21 }
  0x4a   : > { %754 = vmatprep.subr.bf16.mxu0 %v1582_v22  ;;  %797 = vmatprep.subr.bf16.mxu1 %v1585_v23  ;;  %v1152_v22 = vsub.s32 0, %v1151_v19  ;;  %v1160_v23 = vsub.s32 2, %v1151_v19 }
  0x4d   : > { %755 = vmatpush1.bf16.msra.mxu0 %v1580_v24  ;;  %798 = vmatpush1.bf16.msra.mxu1 %v1583_v25  ;;  %v1156_v24 = vsub.s32 1, %v1151_v19  ;;  %v1148_v25 = vld [vmem:[%s2060_s2] sm:$0xf] }
  0x4e   : > { %770 = vmatprep.subr.bf16.mxu0 %v1588_v26  ;;  %813 = vmatprep.subr.bf16.mxu1 %v1591_v27  ;;  %v1161_v36 = vrot.slane %v1148_v25, %v1160_v23 }
  0x4f   : > { %v1157_v37 = vrot.slane %v1148_v25, %v1156_v24 }
  0x51   : > { %771 = vmatpush2.bf16.msra.mxu0 %v1586_v28  ;;  %814 = vmatpush2.bf16.msra.mxu1 %v1589_v29 }
  0x52   : > { %1054 = vmatprep.subr.bf16.mxu0 %v1594_v30  ;;  %1097 = vmatprep.subr.bf16.mxu1 %v1597_v34  ;;  %v1153_v34 = vrot.slane %v1148_v25, %v1152_v22 }
  0x54   : > { %773 = vmatmul.mubr.bf16.vlgmr.msra.gmra.mxu0 %v1782_v31  ;;  %816 = vmatmul.mubr.bf16.vlgmr.msra.gmra.mxu1 %v1782_v31  ;;  %v1609_v31 = vld [vmem:[%s2059_s1 + $0x2ec] ss:$16 sps:$4 sm:$0xff]  }
  0x55   : > { %1055 = vmatpush1.bf16.msra.mxu0 %v1592_v35  ;;  %1098 = vmatpush1.bf16.msra.mxu1 %v1595_v38 }
  0x56   : > { %1056 = vmatprep.subr.bf16.mxu0 %v1600_v39  ;;  %1099 = vmatprep.subr.bf16.mxu1 %v1603_v40 }
  0x57   : > { %1457 = vmatprep.mubr.msk.bf16.mxu0 %vm467_vm1, %v869_v32  ;;  %1458 = vmatprep.mubr.msk.bf16.mxu1 %vm467_vm1, %v869_v32 }
  0x59   : > { %1057 = vmatpush1.bf16.msra.mxu0 %v1598_v33  ;;  %1100 = vmatpush1.bf16.msra.mxu1 %v1601_v41 }
  0x5a   : > { %1058 = vmatprep.subr.bf16.mxu0 %v1606_v42  ;;  %1101 = vmatprep.subr.bf16.mxu1 %v1609_v31 }
  0x5d   : > { %1059 = vmatpush1.bf16.msra.mxu0 %v1604_v43  ;;  %1102 = vmatpush1.bf16.msra.mxu1 %v1607_v44 }
  0x5e   : > { %1060 = vmatprep.subr.bf16.mxu0 %v1612_v45  ;;  %1103 = vmatprep.subr.bf16.mxu1 %v1615_v46 }
  0x61   : > { %1061 = vmatpush1.bf16.msra.mxu0 %v1610_v47  ;;  %1104 = vmatpush1.bf16.msra.mxu1 %v1613_v48 }
  0x62   : > { %1062 = vmatprep.subr.bf16.mxu0 %v1618_v49  ;;  %1105 = vmatprep.subr.bf16.mxu1 %v1621_v50 }
  0x65   : > { %1063 = vmatpush1.bf16.msra.mxu0 %v1616_v51  ;;  %1106 = vmatpush1.bf16.msra.mxu1 %v1619_v52 }
  0x66   : > { %1064 = vmatprep.subr.bf16.mxu0 %v1624_v53  ;;  %1107 = vmatprep.subr.bf16.mxu1 %v1627_v54 }
  0x69   : > { %1065 = vmatpush1.bf16.msra.mxu0 %v1622_v55  ;;  %1108 = vmatpush1.bf16.msra.mxu1 %v1625_v56 }
  0x6a   : > { %1066 = vmatprep.subr.bf16.mxu0 %v1630_v57  ;;  %1109 = vmatprep.subr.bf16.mxu1 %v1633_v58 }
  0x6d   : > { %1067 = vmatpush1.bf16.msra.mxu0 %v1628_v60  ;;  %1110 = vmatpush1.bf16.msra.mxu1 %v1631_v61 }
  0x6e   : > { %1068 = vmatprep.subr.bf16.mxu0 %v1636_v62  ;;  %1111 = vmatprep.subr.bf16.mxu1 %v1639_v63 }
  0x71   : > { %1069 = vmatpush1.bf16.msra.mxu0 %v1634_v0  ;;  %1112 = vmatpush1.bf16.msra.mxu1 %v1637_v1 }
  0x72   : > { %1084 = vmatprep.subr.bf16.mxu0 %v1642_v2  ;;  %1127 = vmatprep.subr.bf16.mxu1 %v1645_v3 }
  0x75   : > { %1085 = vmatpush2.bf16.msra.mxu0 %v1640_v4  ;;  %1128 = vmatpush2.bf16.msra.mxu1 %v1643_v5 }
  0x78   : > { %1087 = vmatmul.mubr.bf16.vlgmr.msra.gmra.mxu0 %v1825_v59  ;;  %1130 = vmatmul.mubr.bf16.vlgmr.msra.gmra.mxu1 %v1825_v59  ;;  %v1164_v59 = vsub.s32 3, %v1151_v19 }
  0x7a   : > { %v1165_v38 = vrot.slane %v1148_v25, %v1164_v59 }
  0xf0   : > { %v505_v6 = vpop.f32.mrf.mxu0  ;;  %v548_v7 = vpop.f32.mrf.mxu1 }
  0xf2   : > { %v507_v8 = vpop.f32.mrf.mxu0  ;;  %v550_v9 = vpop.f32.mrf.mxu1 }
  0xf4   : > { %v509_v10 = vpop.f32.mrf.mxu0  ;;  %v552_v11 = vpop.f32.mrf.mxu1 }
  0xf6   : > { %v511_v12 = vpop.f32.mrf.mxu0  ;;  %v554_v13 = vpop.f32.mrf.mxu1 }
 0x114   : > { %v774_v14 = vpop.f32.mrf.mxu0  ;;  %v817_v15 = vpop.f32.mrf.mxu1 }
 0x115   : > { %v775_v28 = vadd.f32 %v774_v14, %v505_v6  ;;  %v818_v29 = vadd.f32 %v817_v15, %v548_v7 }
 0x116   : > { %v776_v17 = vpop.f32.mrf.mxu0  ;;  %v819_v18 = vpop.f32.mrf.mxu1 }
 0x117   : > { %v777_v39 = vadd.f32 %v776_v17, %v507_v8  ;;  %v820_v40 = vadd.f32 %v819_v18, %v550_v9 }
 0x118   : > { %v778_v20 = vpop.f32.mrf.mxu0  ;;  %v821_v21 = vpop.f32.mrf.mxu1 }
 0x119   : > { %v779_v44 = vadd.f32 %v778_v20, %v509_v10  ;;  %v822_v45 = vadd.f32 %v821_v21, %v552_v11 }
 0x11a   : > { %v780_v26 = vpop.f32.mrf.mxu0  ;;  %v823_v27 = vpop.f32.mrf.mxu1 }
 0x11b   : > { %v781_v52 = vadd.f32 %v780_v26, %v511_v12  ;;  %v824_v53 = vadd.f32 %v823_v27, %v554_v13 }
 0x138   : > { %v1088_v30 = vpop.f32.mrf.mxu0  ;;  %v1131_v35 = vpop.f32.mrf.mxu1 }
 0x139   : > { %v1140_v32 = vadd.f32 %v1088_v30, %v775_v28  ;;  %v1142_v33 = vadd.f32 %v1131_v35, %v818_v29 }
 0x13a   : > { %v1090_v41 = vpop.f32.mrf.mxu0  ;;  %v1133_v42 = vpop.f32.mrf.mxu1 }
 0x13b   : > { %v1141_v31 = vadd.f32 %v1090_v41, %v777_v39  ;;  %v1143_v43 = vadd.f32 %v1133_v42, %v820_v40  ;;  %v1170_v48 = vadd.f32 %v1153_v34, %v1140_v32  ;;  %v1172_v49 = vadd.f32 %v1161_v36, %v1142_v33 }
 0x13c   : > { %v1092_v46 = vpop.f32.mrf.mxu0  ;;  %v1135_v47 = vpop.f32.mrf.mxu1 }
 0x13d   : > { %v1171_v50 = vadd.f32 %v1157_v37, %v1141_v31  ;;  %v1173_v51 = vadd.f32 %v1165_v38, %v1143_v43  ;;  %v1144_v54 = vadd.f32 %v1092_v46, %v779_v44  ;;  %v1146_v55 = vadd.f32 %v1135_v47, %v822_v45 }
 0x13e   : > { %v1094_v56 = vpop.f32.mrf.mxu0  ;;  %v1137_v57 = vpop.f32.mrf.mxu1 }
 0x13f   : > { %v1466_v58 = vpack.c.bf16 %v1171_v50, %v1170_v48  ;;  %v1467_v60 = vpack.c.bf16 %v1173_v51, %v1172_v49  ;;  %v1145_v61 = vadd.f32 %v1094_v56, %v781_v52  ;;  %v1147_v62 = vadd.f32 %v1137_v57, %v824_v53 }
 0x140   : > { %v1174_v63 = vadd.f32 %v1153_v34, %v1144_v54  ;;  %v1176_v0 = vadd.f32 %v1161_v36, %v1146_v55 }
 0x141   : > { %1202 = vst [vmem:[%s170_s14] sm:$0xff] %v1466_v58  ;;  %1203 = vst [vmem:[%s170_s14 + $0x8] sm:$0xff] %v1467_v60  ;;  %v1175_v1 = vadd.f32 %v1157_v37, %v1145_v61  ;;  %v1177_v2 = vadd.f32 %v1165_v38, %v1147_v62 }
 0x143   : > { %v1468_v3 = vpack.c.bf16 %v1175_v1, %v1174_v63  ;;  %v1469_v4 = vpack.c.bf16 %v1177_v2, %v1176_v0 }
 0x145   : > { %1204 = vst [vmem:[%s170_s14 + $0x10] sm:$0xff] %v1468_v3  ;;  %1205 = vst [vmem:[%s170_s14 + $0x18] sm:$0xff] %v1469_v4 }
 0x146 PF: > { %s13_s12 = sadd.s32 1, %s1652_s12  }
 0x147   : > { %p10_p4 = scmp.ge.s32.totalorder %s13_s12, 4  }
 0x149   :  { %12 = sbr.rel (!%p10_p4) target bundleno = 1 (0x1), region = 64 }

// kernel: tile.148
= control target key start
LH: loop header
LB: loop body
LE: loop exit
PB: predicated region body
PF: predicated region fallthrough
CT: control target
= control target key end

     0   :  { %s40_s0 = inlined_call_operand.vmem [shape: f32[3], index: 0, kind: input, shape index: {}]   ;;  %s41_s1 = inlined_call_operand.vmem [shape: f32[32,3], index: 1, kind: output, shape index: {}]  }
   0x1   :  { %v4_v0 = vld [vmem:[%s40_s0] ss:$0 sm:$0xff] }
   0x2   :  { %5 = vst [vmem:[%s41_s1] sm:$0xff] %v4_v0  ;;  %12 = vst [vmem:[%s41_s1 + $0x8] sm:$0xff] %v4_v0 }
   0x3   :  { %13 = vst [vmem:[%s41_s1 + $0x10] sm:$0xff] %v4_v0  ;;  %14 = vst [vmem:[%s41_s1 + $0x18] sm:$0xff] %v4_v0 }

// kernel: tile.149
= control target key start
LH: loop header
LB: loop body
LE: loop exit
PB: predicated region body
PF: predicated region fallthrough
CT: control target
= control target key end

     0   :  { %s261_s10 = smov 93   ;;  %s262_s11 = smov 87   ;;  %vm3_vm0 = vcmask 23552   ;;  %vm9_vm1 = vcmask 786152   ;;  %vm15_vm2 = vcmask 761552   ;;  %vm21_vm3 = vcmask 736952   ;;  %s401_s0 = inlined_call_operand.vmem [shape: f32[32,3], index: 0, kind: input, shape index: {}]   ;;  %s402_s1 = inlined_call_operand.vmem [shape: f32[1,96], index: 1, kind: output, shape index: {}]  }
   0x1   :  { %v199_v0 = vld [vmem:[%s401_s0 + $0x1f] sm:$0x1]   ;;  %v201_v1 = vld [vmem:[%s401_s0 + $0x1d] sm:$0x1]   ;;  %v200_v2 = vld [vmem:[%s401_s0 + $0x1e] sm:$0x1]  }
   0x2   :  { %7 = vrot.lane.b32.xlu0 %v199_v0, %s261_s10  ;;  %19 = vrot.lane.b32.xlu1 %v201_v1, %s262_s11  ;;  %v202_v3 = vld [vmem:[%s401_s0 + $0x1c] sm:$0x1]   ;;  %s263_s16 = smov 90   ;;  %s264_s17 = smov 84   ;;  %v203_v4 = vld [vmem:[%s401_s0 + $0x1b] sm:$0x1]  }
   0x3   :  { %v204_v5 = vld [vmem:[%s401_s0 + $0x1a] sm:$0x1]   ;;  %s265_s22 = smov 81   ;;  %s266_s23 = smov 78   ;;  %v205_v6 = vld [vmem:[%s401_s0 + $0x19] sm:$0x1]  }
   0x4   :  { %v206_v7 = vld [vmem:[%s401_s0 + $0x18] sm:$0x1]   ;;  %s267_s28 = smov 75   ;;  %s268_s29 = smov 72   ;;  %v207_v8 = vld [vmem:[%s401_s0 + $0x17] sm:$0x1]  }
   0x5   :  { %v208_v9 = vld [vmem:[%s401_s0 + $0x16] sm:$0x1]   ;;  %v2_v10 = vld [vmem:[%s401_s0] sm:$0x1]   ;;  %s269_s7 = smov 69   ;;  %s270_s8 = smov 66  }
   0x6   :  { %13 = vrot.lane.b32.xlu0 %v200_v2, %s263_s16  ;;  %25 = vrot.lane.b32.xlu1 %v202_v3, %s264_s17  ;;  %4 = vst.msk [vmem:[#allocation0] sm:$0x1] %vm3_vm0, %v2_v10   ;;  %v209_v11 = vld [vmem:[%s401_s0 + $0x15] sm:$0x1]   ;;  %v210_v12 = vld [vmem:[%s401_s0 + $0x14] sm:$0x1]  }
   0x7   :  { %s271_s13 = smov 63   ;;  %s272_s14 = smov 60   ;;  %v211_v13 = vld [vmem:[%s401_s0 + $0x13] sm:$0x1]   ;;  %v212_v14 = vld [vmem:[%s401_s0 + $0x12] sm:$0x1]  }
   0x8   :  { %s273_s19 = smov 57   ;;  %s274_s20 = smov 54   ;;  %v213_v15 = vld [vmem:[%s401_s0 + $0x11] sm:$0x1]   ;;  %v214_v16 = vld [vmem:[%s401_s0 + $0x10] sm:$0x1]  }
   0x9   :  { %s275_s25 = smov 51   ;;  %s276_s26 = smov 48   ;;  %v215_v17 = vld [vmem:[%s401_s0 + $0xf] sm:$0x1]   ;;  %v216_v18 = vld [vmem:[%s401_s0 + $0xe] sm:$0x1]  }
   0xa   :  { %31 = vrot.lane.b32.xlu0 %v203_v4, %s265_s22  ;;  %37 = vrot.lane.b32.xlu1 %v204_v5, %s266_s23  ;;  %s277_s2 = smov 45   ;;  %s278_s3 = smov 42   ;;  %v217_v19 = vld [vmem:[%s401_s0 + $0xd] sm:$0x1]   ;;  %v218_v20 = vld [vmem:[%s401_s0 + $0xc] sm:$0x1]  }
   0xb   :  { %s280_s9 = smov 36   ;;  %v219_v21 = vld [vmem:[%s401_s0 + $0xb] sm:$0x1]   ;;  %v220_v22 = vld [vmem:[%s401_s0 + $0xa] sm:$0x1]   ;;  %s282_s15 = smov 30  }
   0xc   :  { %v221_v23 = vld [vmem:[%s401_s0 + $0x9] sm:$0x1]   ;;  %v222_v24 = vld [vmem:[%s401_s0 + $0x8] sm:$0x1]   ;;  %s284_s21 = smov 24   ;;  %s286_s27 = smov 18  }
   0xd   :  { %v223_v25 = vld [vmem:[%s401_s0 + $0x7] sm:$0x1]   ;;  %v224_v26 = vld [vmem:[%s401_s0 + $0x6] sm:$0x1]   ;;  %v225_v27 = vld [vmem:[%s401_s0 + $0x5] sm:$0x1]  }
   0xe   :  { %43 = vrot.lane.b32.xlu0 %v205_v6, %s267_s28  ;;  %49 = vrot.lane.b32.xlu1 %v206_v7, %s268_s29  ;;  %v226_v28 = vld [vmem:[%s401_s0 + $0x4] sm:$0x1]   ;;  %s288_s4 = smov 12   ;;  %v227_v29 = vld [vmem:[%s401_s0 + $0x3] sm:$0x1]   ;;  %s290_s10 = smov 6  }
   0xf   :  { %v228_v30 = vld [vmem:[%s401_s0 + $0x2] sm:$0x1]   ;;  %v229_v31 = vld [vmem:[%s401_s0 + $0x1] sm:$0x1]   ;;  %s291_s0 = smov 3   ;;  %vm27_vm4 = vcmask 712352  }
  0x10   :  { %vm33_vm5 = vcmask 687752   ;;  %vm39_vm6 = vcmask 663152   ;;  %vm45_vm7 = vcmask 638552   ;;  %vm51_vm8 = vcmask 613952  }
  0x11   :  { %vm57_vm9 = vcmask 589352   ;;  %vm63_vm10 = vcmask 564752   ;;  %vm69_vm11 = vcmask 540152   ;;  %vm75_vm12 = vcmask 515552  }
  0x12   :  { %55 = vrot.lane.b32.xlu0 %v207_v8, %s269_s7  ;;  %61 = vrot.lane.b32.xlu1 %v208_v9, %s270_s8  ;;  %s279_s8 = smov 39   ;;  %vm81_vm13 = vcmask 490952   ;;  %vm87_vm14 = vcmask 466352   ;;  %vm93_vm15 = vcmask 441752   ;;  %vm99_vm0 = vcmask 417152  }
  0x16   :  { %67 = vrot.lane.b32.xlu0 %v209_v11, %s271_s13  ;;  %73 = vrot.lane.b32.xlu1 %v210_v12, %s272_s14  ;;  %s281_s14 = smov 33  }
  0x1a   :  { %79 = vrot.lane.b32.xlu0 %v211_v13, %s273_s19  ;;  %85 = vrot.lane.b32.xlu1 %v212_v14, %s274_s20  ;;  %s283_s20 = smov 27  }
  0x1e   :  { %91 = vrot.lane.b32.xlu0 %v213_v15, %s275_s25  ;;  %97 = vrot.lane.b32.xlu1 %v214_v16, %s276_s26  ;;  %s285_s26 = smov 21  }
  0x22   :  { %103 = vrot.lane.b32.xlu0 %v215_v17, %s277_s2  ;;  %109 = vrot.lane.b32.xlu1 %v216_v18, %s278_s3  ;;  %s287_s3 = smov 15  }
  0x26   :  { %115 = vrot.lane.b32.xlu0 %v217_v19, %s279_s8  ;;  %121 = vrot.lane.b32.xlu1 %v218_v20, %s280_s9  ;;  %s289_s9 = smov 9  }
  0x2a   :  { %127 = vrot.lane.b32.xlu0 %v219_v21, %s281_s14  ;;  %133 = vrot.lane.b32.xlu1 %v220_v22, %s282_s15 }
  0x2e   :  { %139 = vrot.lane.b32.xlu0 %v221_v23, %s283_s20  ;;  %145 = vrot.lane.b32.xlu1 %v222_v24, %s284_s21 }
  0x32   :  { %151 = vrot.lane.b32.xlu0 %v223_v25, %s285_s26  ;;  %157 = vrot.lane.b32.xlu1 %v224_v26, %s286_s27 }
  0x36   :  { %163 = vrot.lane.b32.xlu0 %v225_v27, %s287_s3  ;;  %169 = vrot.lane.b32.xlu1 %v226_v28, %s288_s4 }
  0x3a   :  { %175 = vrot.lane.b32.xlu0 %v227_v29, %s289_s9  ;;  %181 = vrot.lane.b32.xlu1 %v228_v30, %s290_s10 }
  0x3e   :  { %187 = vrot.lane.b32.xlu0 %v229_v31, %s291_s0 }
  0x74   :  { %v8_v32 = vpop.permute.xlu0 %7   ;;  %v20_v33 = vpop.permute.xlu1 %19  }
  0x75   :  { %10 = vst.msk [vmem:[#allocation0] sm:$0x1] %vm9_vm1, %v8_v32   ;;  %vm105_vm1 = vcmask 392552  }
  0x78   :  { %v14_v34 = vpop.permute.xlu0 %13   ;;  %v26_v35 = vpop.permute.xlu1 %25  }
  0x79   :  { %16 = vst.msk [vmem:[#allocation0] sm:$0x1] %vm15_vm2, %v14_v34   ;;  %vm111_vm2 = vcmask 367952  }
  0x7a   :  { %22 = vst.msk [vmem:[#allocation0] sm:$0x1] %vm21_vm3, %v20_v33   ;;  %vm117_vm3 = vcmask 343352  }
  0x7b   :  { %28 = vst.msk [vmem:[#allocation0] sm:$0x1] %vm27_vm4, %v26_v35   ;;  %vm123_vm4 = vcmask 318752  }
  0x7c   :  { %v32_v36 = vpop.permute.xlu0 %31   ;;  %v38_v37 = vpop.permute.xlu1 %37  }
  0x7d   :  { %34 = vst.msk [vmem:[#allocation0] sm:$0x1] %vm33_vm5, %v32_v36   ;;  %vm129_vm5 = vcmask 294152  }
  0x7e   :  { %40 = vst.msk [vmem:[#allocation0] sm:$0x1] %vm39_vm6, %v38_v37   ;;  %vm135_vm6 = vcmask 269552  }
  0x80   :  { %v44_v38 = vpop.permute.xlu0 %43   ;;  %v50_v39 = vpop.permute.xlu1 %49  }
  0x81   :  { %46 = vst.msk [vmem:[#allocation0] sm:$0x1] %vm45_vm7, %v44_v38   ;;  %vm141_vm7 = vcmask 244952  }
  0x82   :  { %52 = vst.msk [vmem:[#allocation0] sm:$0x1] %vm51_vm8, %v50_v39   ;;  %vm147_vm8 = vcmask 220352  }
  0x84   :  { %v56_v40 = vpop.permute.xlu0 %55   ;;  %v62_v41 = vpop.permute.xlu1 %61  }
  0x85   :  { %58 = vst.msk [vmem:[#allocation0] sm:$0x1] %vm57_vm9, %v56_v40   ;;  %vm153_vm9 = vcmask 195752  }
  0x86   :  { %64 = vst.msk [vmem:[#allocation0] sm:$0x1] %vm63_vm10, %v62_v41   ;;  %vm159_vm10 = vcmask 171152  }
  0x88   :  { %v68_v42 = vpop.permute.xlu0 %67   ;;  %v74_v43 = vpop.permute.xlu1 %73  }
  0x89   :  { %70 = vst.msk [vmem:[#allocation0] sm:$0x1] %vm69_vm11, %v68_v42   ;;  %vm165_vm11 = vcmask 146552  }
  0x8a   :  { %76 = vst.msk [vmem:[#allocation0] sm:$0x1] %vm75_vm12, %v74_v43   ;;  %vm171_vm12 = vcmask 121952  }
  0x8c   :  { %v80_v44 = vpop.permute.xlu0 %79   ;;  %v86_v45 = vpop.permute.xlu1 %85  }
  0x8d   :  { %82 = vst.msk [vmem:[#allocation0] sm:$0x1] %vm81_vm13, %v80_v44   ;;  %vm177_vm13 = vcmask 97352  }
  0x8e   :  { %88 = vst.msk [vmem:[#allocation0] sm:$0x1] %vm87_vm14, %v86_v45   ;;  %vm183_vm14 = vcmask 72752  }
  0x90   :  { %v92_v46 = vpop.permute.xlu0 %91   ;;  %v98_v47 = vpop.permute.xlu1 %97  }
  0x91   :  { %94 = vst.msk [vmem:[#allocation0] sm:$0x1] %vm93_vm15, %v92_v46   ;;  %vm189_vm15 = vcmask 48152  }
  0x92   :  { %100 = vst.msk [vmem:[#allocation0] sm:$0x1] %vm99_vm0, %v98_v47  }
  0x94   :  { %v104_v48 = vpop.permute.xlu0 %103   ;;  %v110_v49 = vpop.permute.xlu1 %109  }
  0x95   :  { %106 = vst.msk [vmem:[#allocation0] sm:$0x1] %vm105_vm1, %v104_v48  }
  0x96   :  { %112 = vst.msk [vmem:[#allocation0] sm:$0x1] %vm111_vm2, %v110_v49  }
  0x98   :  { %v116_v50 = vpop.permute.xlu0 %115   ;;  %v122_v51 = vpop.permute.xlu1 %121  }
  0x99   :  { %118 = vst.msk [vmem:[#allocation0] sm:$0x1] %vm117_vm3, %v116_v50  }
  0x9a   :  { %124 = vst.msk [vmem:[#allocation0] sm:$0x1] %vm123_vm4, %v122_v51  }
  0x9c   :  { %v128_v52 = vpop.permute.xlu0 %127   ;;  %v134_v53 = vpop.permute.xlu1 %133  }
  0x9d   :  { %130 = vst.msk [vmem:[#allocation0] sm:$0x1] %vm129_vm5, %v128_v52  }
  0x9e   :  { %136 = vst.msk [vmem:[#allocation0] sm:$0x1] %vm135_vm6, %v134_v53  }
  0xa0   :  { %v140_v54 = vpop.permute.xlu0 %139   ;;  %v146_v55 = vpop.permute.xlu1 %145  }
  0xa1   :  { %142 = vst.msk [vmem:[#allocation0] sm:$0x1] %vm141_vm7, %v140_v54  }
  0xa2   :  { %148 = vst.msk [vmem:[#allocation0] sm:$0x1] %vm147_vm8, %v146_v55  }
  0xa4   :  { %v152_v56 = vpop.permute.xlu0 %151   ;;  %v158_v57 = vpop.permute.xlu1 %157  }
  0xa5   :  { %154 = vst.msk [vmem:[#allocation0] sm:$0x1] %vm153_vm9, %v152_v56  }
  0xa6   :  { %160 = vst.msk [vmem:[#allocation0] sm:$0x1] %vm159_vm10, %v158_v57  }
  0xa8   :  { %v164_v58 = vpop.permute.xlu0 %163   ;;  %v170_v59 = vpop.permute.xlu1 %169  }
  0xa9   :  { %166 = vst.msk [vmem:[#allocation0] sm:$0x1] %vm165_vm11, %v164_v58  }
  0xaa   :  { %172 = vst.msk [vmem:[#allocation0] sm:$0x1] %vm171_vm12, %v170_v59  }
  0xac   :  { %v176_v60 = vpop.permute.xlu0 %175   ;;  %v182_v61 = vpop.permute.xlu1 %181  }
  0xad   :  { %178 = vst.msk [vmem:[#allocation0] sm:$0x1] %vm177_vm13, %v176_v60  }
  0xae   :  { %184 = vst.msk [vmem:[#allocation0] sm:$0x1] %vm183_vm14, %v182_v61  }
  0xb0   :  { %v188_v62 = vpop.permute.xlu0 %187  }
  0xb1   :  { %190 = vst.msk [vmem:[#allocation0] sm:$0x1] %vm189_vm15, %v188_v62  }
  0xb8   :  { %v195_v63 = vld [vmem:[#allocation0] sm:$0x1] }
  0xb9   :  { %198 = vst [vmem:[%s402_s1] sm:$0x1] %v195_v63 }

// kernel: edsr_forward.37
= control target key start
LH: loop header
LB: loop body
LE: loop exit
PB: predicated region body
PF: predicated region fallthrough
CT: control target
= control target key end

     0   :  { %s1532_s15 = smov 0   ;;  %s1790_s0 = inlined_call_operand.vmem [shape: bf16[2,34,272], index: 0, kind: input, shape index: {}]   ;;  %s1791_s1 = inlined_call_operand.vmem [shape: bf16[3,272,96], index: 1, kind: input, shape index: {}]   ;;  %s1792_s2 = inlined_call_operand.vmem [shape: f32[1,96], index: 2, kind: input, shape index: {}]   ;;  %s1793_s3 = inlined_call_operand.vmem [shape: f32[2,32,96], index: 3, kind: input, shape index: {}]   ;;  %s1794_s4 = inlined_call_operand.vmem [shape: f32[2,32,96], index: 4, kind: output, shape index: {}]  }
   0x1 LB: > { %s1168_s16 = sadd.s32 4294967295, %s1505_s15   ;;  %p1172_p0 = scmp.ge.s32.totalorder %s1505_s15, 1  ;;  %s1505_s15 = sphi %s1532_s15, %s14_s15  }
   0x2   : > { %p172_p1 = scmp.lt.s32.totalorder %s1505_s15, 3 }
   0x4   : > { %p173_p2 = pnand %p1172_p0, %p172_p1 }
   0x5   : > { %p203_p3 = scmp.lt.s32.totalorder (!%p173_p2), %s1168_s16, 1 }
   0x6   : > { %176 = sbr.rel (%p173_p2) target bundleno = 294 (0x126), region = 36 }
   0xb   : > { %v1437_v0 = vld [vmem:[%s1791_s1 + $0x100] sm:$0xff]   ;;  %v1438_v1 = vld [vmem:[%s1791_s1 + $0x78] sm:$0xff]   ;;  %v1442_v5 = vld [vmem:[%s1791_s1 + $0x70] sm:$0xff]   ;;  %s1796_s16 = smov (!%p203_p3, %s1168_s16), 1  ;;  %vm332_vm0 = vsmask.f32 7424 }
   0xc   : > { %1317 = vmatprep.subr.bf16.mxu0 %v1437_v0  ;;  %v1439_v2 = vld [vmem:[%s1791_s1 + $0xc0] sm:$0xff]   ;;  %1348 = vmatprep.subr.bf16.mxu1 %v1438_v1  ;;  %v1440_v3 = vld [vmem:[%s1791_s1 + $0x38] sm:$0xff]   ;;  %v1444_v7 = vld [vmem:[%s1791_s1 + $0x30] sm:$0xff]   ;;  %s1428_s23 = smul.u32 60, %s1796_s16  ;;  %vm499_vm1 = vcmask 130048   ;;  %vm847_vm2 = vcmask 1046528  }
   0xd   : > { %1318 = vmatpush3.bf16.msra.mxu0 %v1439_v2  ;;  %v1441_v4 = vld [vmem:[%s1791_s1 + $0xf8] sm:$0xff]   ;;  %1349 = vmatpush3.bf16.msra.mxu1 %v1440_v3  ;;  %v1445_v8 = vld [vmem:[%s1791_s1 + $0xf0] sm:$0xff]   ;;  %v1446_v9 = vld [vmem:[%s1791_s1 + $0x68] sm:$0xff]   ;;  %s1315_s27 = sshll.u32 %s1796_s16, 5  ;;  %vm1096_vm3 = vcmask 785408  }
   0xe   : > { %1319 = vmatprep.subr.bf16.mxu0 %v1441_v4  ;;  %v1443_v6 = vld [vmem:[%s1791_s1 + $0xb8] sm:$0xff]   ;;  %1350 = vmatprep.subr.bf16.mxu1 %v1442_v5  ;;  %v1447_v10 = vld [vmem:[%s1791_s1 + $0xb0] sm:$0xff]   ;;  %v1448_v11 = vld [vmem:[%s1791_s1 + $0x28] sm:$0xff]   ;;  %s1643_s8 = scalar_lea.vmem %s1790_s0, %s1428_s23  ;;  %s1769_s30 = scalar_lea.vmem %s1793_s3, %s1315_s27 }
   0xf   : > { %v1449_v12 = vld [vmem:[%s1791_s1 + $0xe8] sm:$0xff]   ;;  %v1450_v13 = vld [vmem:[%s1791_s1 + $0x60] sm:$0xff]   ;;  %v1454_v17 = vld [vmem:[%s1791_s1 + $0x58] sm:$0xff]   ;;  %s217_s10 = scalar_lea.vmem %s1794_s4, %s1315_s27 }
  0x10   : > { %v1451_v14 = vld [vmem:[%s1791_s1 + $0xa8] sm:$0xff]   ;;  %v1452_v15 = vld [vmem:[%s1791_s1 + $0x20] sm:$0xff]   ;;  %v1456_v19 = vld [vmem:[%s1791_s1 + $0x18] sm:$0xff]  }
  0x11   : > { %1320 = vmatpush3.bf16.msra.mxu0 %v1443_v6  ;;  %1351 = vmatpush3.bf16.msra.mxu1 %v1444_v7  ;;  %v1453_v16 = vld [vmem:[%s1791_s1 + $0xe0] sm:$0xff]   ;;  %v1457_v20 = vld [vmem:[%s1791_s1 + $0xd8] sm:$0xff]   ;;  %v1458_v21 = vld [vmem:[%s1791_s1 + $0x50] sm:$0xff]  }
  0x12   : > { %1321 = vmatprep.subr.bf16.mxu0 %v1445_v8  ;;  %1352 = vmatprep.subr.bf16.mxu1 %v1446_v9  ;;  %v1455_v18 = vld [vmem:[%s1791_s1 + $0xa0] sm:$0xff]   ;;  %v1459_v22 = vld [vmem:[%s1791_s1 + $0x98] sm:$0xff]   ;;  %v1460_v23 = vld [vmem:[%s1791_s1 + $0x10] sm:$0xff]  }
  0x13   : > { %v1461_v24 = vld [vmem:[%s1791_s1 + $0xd0] sm:$0xff]   ;;  %v1462_v25 = vld [vmem:[%s1791_s1 + $0x48] sm:$0xff]   ;;  %v1466_v29 = vld [vmem:[%s1791_s1 + $0x40] sm:$0xff]  }
  0x14   : > { %v1463_v26 = vld [vmem:[%s1791_s1 + $0x90] sm:$0xff]   ;;  %v1464_v27 = vld [vmem:[%s1791_s1 + $0x8] sm:$0xff]   ;;  %v1468_v31 = vld [vmem:[%s1791_s1] sm:$0xff]  }
  0x15   : > { %1322 = vmatpush3.bf16.msra.mxu0 %v1447_v10  ;;  %1353 = vmatpush3.bf16.msra.mxu1 %v1448_v11  ;;  %v1465_v28 = vld [vmem:[%s1791_s1 + $0xc8] sm:$0xff]   ;;  %v1649_v32 = vld [vmem:[%s1643_s8 + $0x4] ss:$12 sps:$4 sm:$0xff]   ;;  %v1481_v56 = vld [vmem:[%s1791_s1 + $0x178] sm:$0xff]  }
  0x16   : > { %1323 = vmatprep.subr.bf16.mxu0 %v1449_v12  ;;  %1354 = vmatprep.subr.bf16.mxu1 %v1450_v13  ;;  %v1467_v30 = vld [vmem:[%s1791_s1 + $0x88] sm:$0xff]   ;;  %v1658_v35 = vld [vmem:[%s1643_s8 + $0x18] ss:$12 sps:$4 sm:$0xff]   ;;  %v346_v36 = vshrl.u32 %v1649_v32, 16  ;;  %v348_v37 = vshll.u32 %v1649_v32, 16  ;;  %v1484_v4 = vld [vmem:[%s1791_s1 + $0x170] sm:$0xff]  }
  0x17   : > { %v1652_v33 = vld [vmem:[%s1643_s8 + $0x1c] ss:$12 sps:$4 sm:$0xff]   ;;  %v1655_v34 = vld [vmem:[%s1643_s8] ss:$12 sps:$4 sm:$0xff]   ;;  %746 = vmatprep.mubr.bf16.mxu1 %v1649_v32  ;;  %v341_v42 = vshll.u32 %v1658_v35, 16  ;;  %v369_v58 = vshrl.u32 %v1658_v35, 16 }
  0x18   : > { %v353_v38 = vshll.u32 %v1652_v33, 16  ;;  %v1475_v39 = vld [vmem:[%s1791_s1 + $0x188] sm:$0xff]   ;;  %v334_v40 = vshrl.u32 %v1655_v34, 16  ;;  %v336_v41 = vshll.u32 %v1655_v34, 16  ;;  %v350_v44 = vrot.slane %v348_v37, 1  ;;  %v1477_v48 = vld [vmem:[%s1791_s1 + $0x180] sm:$0xff]  }
  0x19   : > { %1324 = vmatpush3.bf16.msra.mxu0 %v1451_v14  ;;  %1355 = vmatpush3.bf16.msra.mxu1 %v1452_v15  ;;  %v1476_v43 = vld [vmem:[%s1791_s1 + $0x148] sm:$0xff]   ;;  %v343_v47 = vrot.slane %v341_v42, 1  ;;  %v1478_v49 = vld [vmem:[%s1791_s1 + $0x140] sm:$0xff]   ;;  %v227_v51 = vld [vmem:[%s1643_s8 + $0x30] sm:$0x11]  ;;  %v377_v54 = vshrl.u32 %v1652_v33, 16 }
  0x1a   : > { %1325 = vmatprep.subr.bf16.mxu0 %v1453_v16  ;;  %1356 = vmatprep.subr.bf16.mxu1 %v1454_v17  ;;  %v355_v45 = vrot.slane %v353_v38, 1  ;;  %v338_v46 = vrot.slane %v336_v41, 1  ;;  %v351_v50 = vor.u32 %v350_v44, %v346_v36  ;;  %v1682_v53 = vcombine.high %v227_v51, %v227_v51  ;;  %v1482_v59 = vld [vmem:[%s1791_s1 + $0x108] sm:$0xff]   ;;  %v1483_v0 = vld [vmem:[%s1791_s1 + $0x138] sm:$0xff]   ;;  %v1485_v5 = vld [vmem:[%s1791_s1 + $0x130] sm:$0xff]  }
  0x1b   : > { %v1685_v55 = vcombine.low %v227_v51, %v227_v51  ;;  %v371_v2 = vor.u32 %v369_v58, %v343_v47  ;;  %v1486_v7 = vld [vmem:[%s1643_s8 + $0x8] ss:$12 sps:$4 sm:$0xff]   ;;  %v1487_v8 = vld [vmem:[%s1643_s8 + $0x20] ss:$12 sps:$4 sm:$0xff]   ;;  %v849_v41 = vrot.slane %v1658_v35, 1 }
  0x1c   : > { %v339_v52 = vor.u32 %v338_v46, %v334_v40  ;;  %v356_v57 = vsel %vm332_vm0, %v351_v50, %v355_v45  ;;  %v379_v61 = vor.u32 %v377_v54, %v355_v45  ;;  %v381_v62 = vshll.u32 %v1682_v53, 16  ;;  %v1488_v12 = vld [vmem:[%s1643_s8 + $0x38] ss:$0 sps:$4 sm:$0x11]   ;;  %v1489_v13 = vld [vmem:[%s1791_s1 + $0x168] sm:$0xff]   ;;  %v1496_v36 = vld [vmem:[%s1791_s1 + $0x150] sm:$0xff]  }
  0x1d   : > { %1326 = vmatpush3.bf16.msra.mxu0 %v1455_v18  ;;  %1357 = vmatpush3.bf16.msra.mxu1 %v1456_v19  ;;  %v373_v63 = vshll.u32 %v1685_v55, 16  ;;  %v358_v10 = vshrl.u32 %v1486_v7, 16  ;;  %v360_v11 = vshll.u32 %v1486_v7, 16  ;;  %v365_v14 = vshll.u32 %v1487_v8, 16  ;;  %v1490_v18 = vld [vmem:[%s1791_s1 + $0x128] sm:$0xff]   ;;  %v1491_v19 = vld [vmem:[%s1791_s1 + $0x80] sm:$0xff]  }
  0x1e   : > { %1327 = vmatprep.subr.bf16.mxu0 %v1457_v20  ;;  %1358 = vmatprep.subr.bf16.mxu1 %v1458_v21  ;;  %v344_v60 = vsel %vm332_vm0, %v339_v52, %v343_v47  ;;  %v383_v1 = vrot.slane %v381_v62, 1  ;;  %v385_v15 = vshrl.u32 %v1487_v8, 16  ;;  %v389_v17 = vshll.u32 %v1488_v12, 16  ;;  %v1492_v21 = vld [vmem:[%s1791_s1 + $0x160] sm:$0xff]  }
  0x1f   : > { %538 = vmatprep.mubr.bf16.mxu0 %v356_v57  ;;  %v375_v3 = vrot.slane %v373_v63, 1  ;;  %v362_v16 = vrot.slane %v360_v11, 1  ;;  %v367_v20 = vrot.slane %v365_v14, 1  ;;  %v854_v37 = vrot.slane %v1486_v7, 1 }
  0x20   : > { %v384_v6 = vsel %vm332_vm0, %v379_v61, %v383_v1  ;;  %v855_v38 = vrot.slane %v1487_v8, 1  ;;  %v848_v40 = vrot.slane %v1655_v34, 1  ;;  %v859_v42 = vrot.slane %v1682_v53, 1 }
  0x21   : > { %1328 = vmatpush3.bf16.msra.mxu0 %v1459_v22  ;;  %1359 = vmatpush3.bf16.msra.mxu1 %v1460_v23  ;;  %v376_v9 = vsel %vm332_vm0, %v371_v2, %v375_v3  ;;  %v363_v22 = vor.u32 %v362_v16, %v358_v10  ;;  %v391_v23 = vrot.slane %v389_v17, 1  ;;  %v861_v46 = vrot.slane %v1488_v12, 1 }
  0x22   : > { %1329 = vmatprep.subr.bf16.mxu0 %v1461_v24  ;;  %1360 = vmatprep.subr.bf16.mxu1 %v1462_v25  ;;  %v851_v24 = vrot.slane %v1649_v32, 1  ;;  %v387_v25 = vor.u32 %v385_v15, %v367_v20  ;;  %v1495_v32 = vld [vmem:[%s1791_s1 + $0x118] sm:$0xff]   ;;  %v850_v44 = vsel %vm847_vm2, %v848_v40, %v849_v41 }
  0x25   : > { %1330 = vmatpush3.bf16.msra.mxu0 %v1463_v26  ;;  %1361 = vmatpush3.bf16.msra.mxu1 %v1464_v27  ;;  %v368_v26 = vsel %vm332_vm0, %v363_v22, %v367_v20  ;;  %v1493_v27 = vld [vmem:[%s1791_s1 + $0x120] sm:$0xff]  }
  0x26   : > { %1331 = vmatprep.subr.bf16.mxu0 %v1465_v28  ;;  %1362 = vmatprep.subr.bf16.mxu1 %v1466_v29  ;;  %v852_v28 = vrot.slane %v1652_v33, 1  ;;  %v1494_v29 = vld [vmem:[%s1791_s1 + $0x158] sm:$0xff]  }
  0x28   : > { %v860_v45 = vsel %vm847_vm2, %v852_v28, %v859_v42  ;;  %v1088_v42 = vld [vmem:[%s1769_s30] sm:$0xff] }
  0x29   : > { %1332 = vmatpush3.bf16.msra.mxu0 %v1467_v30  ;;  %1363 = vmatpush3.bf16.msra.mxu1 %v1468_v31  ;;  %v392_v30 = vsel %vm332_vm0, %v387_v25, %v391_v23  ;;  %v853_v31 = vsel %vm847_vm2, %v851_v24, %v852_v28 }
  0x2a   : > { %1379 = vmatprep.subr.bf16.mxu1 %v1475_v39  ;;  %1410 = vmatprep.subr.bf16.mxu0 %v1482_v59  ;;  %v1497_v39 = vld [vmem:[%s1791_s1 + $0x110] sm:$0xff]  }
  0x2c   : > { %747 = vmatmul.mubr.bf16.vlgmr.msra.gmra.mxu1 %v1655_v34  ;;  %539 = vmatmul.mubr.bf16.vlgmr.msra.gmra.mxu0 %v344_v60  ;;  %v857_v34 = vrot.slane %v1685_v55, 1 }
  0x2d   : > { %754 = vmatprep.mubr.bf16.mxu1 %v1652_v33  ;;  %1380 = vmatpush3.bf16.msra.mxu1 %v1476_v43  ;;  %v1498_v33 = vld [vmem:[%s1791_s1 + $0x190] sm:$0xff]   ;;  %v856_v43 = vsel %vm847_vm2, %v854_v37, %v855_v38 }
  0x2e   : > { %1381 = vmatprep.subr.bf16.mxu1 %v1477_v48  ;;  %1411 = vmatpush3.bf16.msra.mxu0 %v1482_v59  ;;  %v858_v47 = vsel %vm847_vm2, %v849_v41, %v857_v34 }
  0x2f   : > { %546 = vmatprep.mubr.bf16.mxu0 %v384_v6  ;;  %1416 = vmatprep.subr.bf16.mxu0 %v1491_v19 }
  0x31   : > { %1382 = vmatpush3.bf16.msra.mxu1 %v1478_v49 }
  0x32   : > { %1383 = vmatprep.subr.bf16.mxu1 %v1481_v56 }
  0x34   : > { %755 = vmatmul.mubr.bf16.gmra.mxu1 %v1658_v35  ;;  %547 = vmatmul.mubr.bf16.gmra.mxu0 %v376_v9  ;;  %v862_v35 = vsel %vm847_vm2, %v855_v38, %v861_v46 }
  0x35   : > { %1384 = vmatpush3.bf16.msra.mxu1 %v1483_v0  ;;  %1412 = vmatprep.mubr.msk.bf16.mxu0 %vm499_vm1, %v368_v26 }
  0x36   : > { %1385 = vmatprep.subr.bf16.mxu1 %v1484_v4  ;;  %1007 = vmatprep.mubr.bf16.mxu1 %v853_v31 }
  0x39   : > { %1386 = vmatpush3.bf16.msra.mxu1 %v1485_v5 }
  0x3a   : > { %1387 = vmatprep.subr.bf16.mxu1 %v1489_v13 }
  0x3c   : > { %1413 = vmatmul.mubr.msk.bf16.vlgmr.msra.gmra.mxu0 %vm499_vm1, %v392_v30 }
  0x3d   : > { %1388 = vmatpush3.bf16.msra.mxu1 %v1490_v18  ;;  %1417 = vmatpush3.bf16.msra.mxu0 %v1491_v19 }
  0x3e   : > { %1389 = vmatprep.subr.bf16.mxu1 %v1492_v21  ;;  %1418 = vmatprep.mubr.msk.bf16.mxu0 %vm499_vm1, %v1486_v7 }
  0x3f   : > { %1422 = vmatprep.subr.bf16.mxu0 %v1498_v33 }
  0x41   : > { %1390 = vmatpush3.bf16.msra.mxu1 %v1493_v27 }
  0x42   : > { %1391 = vmatprep.subr.bf16.mxu1 %v1494_v29 }
  0x44   : > { %1419 = vmatmul.mubr.msk.bf16.vlgmr.msra.gmra.mxu0 %vm499_vm1, %v1487_v8 }
  0x45   : > { %1392 = vmatpush3.bf16.msra.mxu1 %v1495_v32  ;;  %1423 = vmatpush3.bf16.msra.mxu0 %v1498_v33  ;;  %v1312_v33 = vld [vmem:[%s1792_s2] ss:$0 sm:$0xff] }
  0x46   : > { %1393 = vmatprep.subr.bf16.mxu1 %v1496_v36  ;;  %1424 = vmatprep.mubr.msk.bf16.mxu0 %vm499_vm1, %v856_v43 }
  0x49   : > { %1394 = vmatpush3.bf16.msra.mxu1 %v1497_v39 }
  0x4c   : > { %1008 = vmatmul.mubr.bf16.vlgmr.msra.gmra.mxu1 %v850_v44  ;;  %1425 = vmatmul.mubr.msk.bf16.vlgmr.msra.gmra.mxu0 %vm499_vm1, %v862_v35 }
  0x4d   : > { %1015 = vmatprep.mubr.bf16.mxu1 %v860_v45 }
  0x54   : > { %1016 = vmatmul.mubr.bf16.gmra.mxu1 %v858_v47 }
  0xec   : > { %v1364_v48 = vpop.f32.mrf.mxu1  ;;  %v1333_v49 = vpop.f32.mrf.mxu0 }
  0xee   : > { %v1334_v50 = vpop.f32.mrf.mxu0  ;;  %v1365_v51 = vpop.f32.mrf.mxu1 }
  0xef   : > { %v1335_v8 = vadd.f32 %v1334_v50, %v1333_v49  ;;  %v1366_v16 = vadd.f32 %v1365_v51, %v1364_v48 }
  0xf0   : > { %v1336_v52 = vpop.f32.mrf.mxu0  ;;  %v1367_v53 = vpop.f32.mrf.mxu1 }
  0xf2   : > { %v1337_v54 = vpop.f32.mrf.mxu0  ;;  %v1368_v57 = vpop.f32.mrf.mxu1 }
  0xf3   : > { %v1338_v17 = vadd.f32 %v1337_v54, %v1336_v52  ;;  %v1369_v27 = vadd.f32 %v1368_v57, %v1367_v53  ;;  %v1089_v53 = vld [vmem:[%s1769_s30 + $0x8] sm:$0xff]  ;;  %v1090_v54 = vld [vmem:[%s1769_s30 + $0x10] sm:$0xff] }
  0xf4   : > { %v1339_v56 = vpop.f32.mrf.mxu0  ;;  %v1370_v60 = vpop.f32.mrf.mxu1 }
  0xf6   : > { %v1340_v58 = vpop.f32.mrf.mxu0  ;;  %v1371_v62 = vpop.f32.mrf.mxu1 }
  0xf7   : > { %v1341_v5 = vadd.f32 %v1340_v58, %v1339_v56  ;;  %v1372_v13 = vadd.f32 %v1371_v62, %v1370_v60  ;;  %v1091_v62 = vld [vmem:[%s1769_s30 + $0x18] sm:$0xff] }
  0xf8   : > { %v1342_v59 = vpop.f32.mrf.mxu0  ;;  %v1373_v0 = vpop.f32.mrf.mxu1 }
  0xfa   : > { %v1343_v55 = vpop.f32.mrf.mxu0  ;;  %v1374_v3 = vpop.f32.mrf.mxu1 }
  0xfb   : > { %v1344_v19 = vadd.f32 %v1343_v55, %v1342_v59  ;;  %v1375_v32 = vadd.f32 %v1374_v3, %v1373_v0 }
  0xfc   : > { %v1414_v61 = vpop.f32.mrf.mxu0 }
  0xfd   : > { %v598_v12 = vadd.f32 %v1414_v61, %v1341_v5 }
  0xfe   : > { %v589_v63 = vpop.f32.mrf.mxu0 }
  0xff   : > { %v590_v11 = vadd.f32 %v1335_v8, %v589_v63  ;;  %v757_v24 = vadd.f32 %v1372_v13, %v598_v12 }
 0x100   : > { %v1415_v1 = vpop.f32.mrf.mxu0 }
 0x101   : > { %v749_v23 = vadd.f32 %v1366_v16, %v590_v11  ;;  %v601_v31 = vadd.f32 %v1415_v1, %v1344_v19 }
 0x102   : > { %v592_v2 = vpop.f32.mrf.mxu0 }
 0x103   : > { %v593_v22 = vadd.f32 %v1338_v17, %v592_v2  ;;  %v760_v47 = vadd.f32 %v1375_v32, %v601_v31 }
 0x104   : > { %v1420_v4 = vpop.f32.mrf.mxu0 }
 0x105   : > { %v752_v38 = vadd.f32 %v1369_v27, %v593_v22  ;;  %v806_v41 = vadd.f32 %v1420_v4, %v757_v24 }
 0x106   : > { %v797_v6 = vpop.f32.mrf.mxu0 }
 0x107   : > { %v798_v28 = vadd.f32 %v797_v6, %v749_v23 }
 0x108   : > { %v1421_v9 = vpop.f32.mrf.mxu0 }
 0x109   : > { %v809_v56 = vadd.f32 %v1421_v9, %v760_v47 }
 0x10a   : > { %v800_v14 = vpop.f32.mrf.mxu0 }
 0x10b   : > { %v801_v45 = vadd.f32 %v800_v14, %v752_v38 }
 0x10c   : > { %v1395_v7 = vpop.f32.mrf.mxu1  ;;  %v1426_v20 = vpop.f32.mrf.mxu0 }
 0x10e   : > { %v1396_v10 = vpop.f32.mrf.mxu1  ;;  %v1058_v25 = vpop.f32.mrf.mxu0 }
 0x10f   : > { %v1397_v18 = vadd.f32 %v1396_v10, %v1395_v7 }
 0x110   : > { %v1398_v15 = vpop.f32.mrf.mxu1  ;;  %v1427_v36 = vpop.f32.mrf.mxu0 }
 0x111   : > { %v1059_v29 = vadd.f32 %v1397_v18, %v1058_v25 }
 0x112   : > { %v1399_v21 = vpop.f32.mrf.mxu1  ;;  %v1061_v43 = vpop.f32.mrf.mxu0 }
 0x113   : > { %v1400_v30 = vadd.f32 %v1399_v21, %v1398_v15  ;;  %v1073_v39 = vadd.f32 %v1059_v29, %v798_v28 }
 0x114   : > { %v1401_v26 = vpop.f32.mrf.mxu1 }
 0x115   : > { %v1084_v46 = vadd.f32 %v1312_v33, %v1073_v39  ;;  %v1062_v34 = vadd.f32 %v1400_v30, %v1061_v43 }
 0x116   : > { %v1402_v37 = vpop.f32.mrf.mxu1 }
 0x117   : > { %v1403_v40 = vadd.f32 %v1402_v37, %v1401_v26  ;;  %v1092_v49 = vadd.f32 %v1088_v42, %v1084_v46  ;;  %v1074_v50 = vadd.f32 %v1062_v34, %v801_v45 }
 0x118   : > { %v1404_v44 = vpop.f32.mrf.mxu1 }
 0x119   : > { %v1067_v35 = vadd.f32 %v1426_v20, %v1403_v40  ;;  %1097 = vst.msk [vmem:[%s217_s10] sm:$0xff] %vm1096_vm3, %v1092_v49  ;;  %v1085_v57 = vadd.f32 %v1312_v33, %v1074_v50 }
 0x11a   : > { %v1405_v48 = vpop.f32.mrf.mxu1 }
 0x11b   : > { %v1075_v51 = vadd.f32 %v1067_v35, %v806_v41  ;;  %v1406_v52 = vadd.f32 %v1405_v48, %v1404_v44  ;;  %v1093_v60 = vadd.f32 %v1089_v53, %v1085_v57 }
 0x11d   : > { %v1086_v58 = vadd.f32 %v1312_v33, %v1075_v51  ;;  %v1070_v59 = vadd.f32 %v1427_v36, %v1406_v52  ;;  %1098 = vst.msk [vmem:[%s217_s10 + $0x8] sm:$0xff] %vm1096_vm3, %v1093_v60 }
 0x11f   : > { %v1094_v55 = vadd.f32 %v1090_v54, %v1086_v58  ;;  %v1076_v61 = vadd.f32 %v1070_v59, %v809_v56 }
 0x121   : > { %1099 = vst.msk [vmem:[%s217_s10 + $0x10] sm:$0xff] %vm1096_vm3, %v1094_v55  ;;  %v1087_v63 = vadd.f32 %v1312_v33, %v1076_v61 }
 0x123   : > { %v1095_v0 = vadd.f32 %v1091_v62, %v1087_v63 }
 0x125   : > { %1100 = vst.msk [vmem:[%s217_s10 + $0x18] sm:$0xff] %vm1096_vm3, %v1095_v0 }
 0x126 PF: > { %s14_s15 = sadd.s32 1, %s1505_s15  }
 0x127   : > { %p11_p4 = scmp.ge.s32.totalorder %s14_s15, 4  }
 0x129   :  { %13 = sbr.rel (!%p11_p4) target bundleno = 1 (0x1), region = 71 }

</bundles_post_ra>
